<compile_context>
chip_gen: v5e
topology: v5e:2x2
jax: 0.10.0
libtpu: 0.0.40
codegen_flags: <defaults>
</compile_context>

<pallas_src>
import functools
from math import sqrt

import jax
import jax.numpy as jnp
from jax import lax
from jax.experimental import pallas as pl
from jax.experimental.pallas import tpu as pltpu

EPS = 1e-5                      # nn.InstanceNorm2d default eps
_PREC = lax.Precision.HIGHEST   # f32-exact MXU results (see header note)


# ----------------------------------------------------------------------------
# In-kernel helpers
# ----------------------------------------------------------------------------
def _instance_norm(y):
    """nn.InstanceNorm2d (affine=False, biased var, eps=1e-5) over the lane
    (HW) axis of a (C, HW) tile, one-pass statistics."""
    inv_n = 1.0 / y.shape[1]
    s1 = jnp.sum(y, axis=1, keepdims=True)          # (C, 1) lane reduction
    s2 = jnp.sum(y * y, axis=1, keepdims=True)
    mean = s1 * inv_n
    var = jnp.maximum(s2 * inv_n - mean * mean, 0.0)
    return (y - mean) * lax.rsqrt(var + EPS)


def _shifted_patch(a, k, m_ref, W):
    """Shifted, zero-padded conv patch for kernel position k = ky*3 + kx.

    a: (rows, HW) activation with HW flattened on the lane axis.
    The spatial shift (dy, dx) becomes a lane rotation by -(dy*W + dx); the
    out-of-image (and row-wrap) positions are zeroed by the precomputed
    boundary mask m_ref[k] of shape (1, HW)."""
    HW = a.shape[-1]
    dy, dx = k // 3 - 1, k % 3 - 1
    delta = dy * W + dx
    p = a if delta == 0 else pltpu.roll(a, (-delta) % HW, axis=1)
    if k != 4:                                       # center tap needs no mask
        p = p * m_ref[k:k + 1, :]
    return p


# ----------------------------------------------------------------------------
# Fused kernel: whole Net forward for one image per grid step
# ----------------------------------------------------------------------------
def _net_kernel(x_ref, m_ref, w_in_ref, w3_ref, w1_ref, w_out_ref,
                o_ref, yr_ref, *, W):
    C, HW = yr_ref.shape
    x_row = x_ref[0]                                 # (1, HW) lane-dense input

    # ---- input_Y: 3x3 conv (1 -> C) as 9 outer-product MACs + IN + ReLU ----
    y = jnp.zeros((C, HW), jnp.float32)
    for k in range(9):
        p = _shifted_patch(x_row, k, m_ref, W)       # (1, HW)
        y = y + w_in_ref[:, k:k + 1] * p             # (C,1)*(1,HW) -> (C,HW)
    y = jnp.maximum(_instance_norm(y), 0.0)
    yr_ref[...] = y                                  # block residual (yr)

    # ---- 6 block steps: 3x3 conv -> IN -> 1x1 conv -> IN -> ReLU ------------
    def block_step(i, y):
        acc = jnp.zeros((C, HW), jnp.float32)
        for k in range(9):                           # static k: static roll amounts
            p = _shifted_patch(y, k, m_ref, W)       # (C, HW)
            acc = acc + jnp.dot(w3_ref[i * 9 + k], p,
                                preferred_element_type=jnp.float32,
                                precision=_PREC)     # (C,C)@(C,HW) on MXU
        y = _instance_norm(acc)
        y = jnp.dot(w1_ref[i], y,
                    preferred_element_type=jnp.float32, precision=_PREC)
        return jnp.maximum(_instance_norm(y), 0.0)

    y = lax.fori_loop(0, 6, block_step, y)

    # ---- + yr, output_Y: 3x3 conv (C -> 1), + residual_Y ---------------------
    y = y + yr_ref[...]
    z = jnp.zeros((C, HW), jnp.float32)
    for k in range(9):
        p = _shifted_patch(y, k, m_ref, W)           # (C, HW)
        z = z + w_out_ref[:, k:k + 1] * p            # per-channel scale
    out = jnp.sum(z, axis=0, keepdims=True) + x_row  # channel reduce + residual
    o_ref[...] = out.reshape(1, 1, HW)               # lane-dense (256-wide) store


# ----------------------------------------------------------------------------
# pallas_call wrapper (single fused call, grid over batch)
# ----------------------------------------------------------------------------
def _build_masks(H, W):
    """(9, H*W) 0/1 masks: mask[k, p] = 1 iff pixel p shifted by kernel tap k
    stays inside the image (zero padding of the 3x3 convs)."""
    hh = jnp.arange(H).reshape(H, 1)
    ww = jnp.arange(W).reshape(1, W)
    rows = []
    for ky in range(3):
        for kx in range(3):
            dy, dx = ky - 1, kx - 1
            ok = ((hh + dy >= 0) & (hh + dy < H) &
                  (ww + dx >= 0) & (ww + dx < W))
            rows.append(ok.reshape(-1))
    return jnp.stack(rows).astype(jnp.float32)


def net_forward_pallas(x_nchw, kp):
    """x_nchw: (N, Cin, H, W) float32. Returns (N, 1, H, W) float32."""
    N, _, H, W = x_nchw.shape
    C = kp["w_in"].shape[0]
    HW = H * W

    x_rows = x_nchw[:, 0, :, :].reshape(N, 1, HW)    # lane-dense input rows
    masks = _build_masks(H, W)                       # (9, HW)

    kernel = functools.partial(_net_kernel, W=W)

    out = pl.pallas_call(
        kernel,
        out_shape=jax.ShapeDtypeStruct((N, 1, HW), jnp.float32),
        grid=(N,),
        in_specs=[
            pl.BlockSpec((1, 1, HW), lambda b: (b, 0, 0)),   # Y image row
            pl.BlockSpec((9, HW), lambda b: (0, 0)),         # boundary masks
            pl.BlockSpec((C, 9), lambda b: (0, 0)),          # input_Y  (C, 9)
            pl.BlockSpec((54, C, C), lambda b: (0, 0, 0)),   # 3x3 convs (6*9, C, C)
            pl.BlockSpec((6, C, C), lambda b: (0, 0, 0)),    # 1x1 convs (6, C, C)
            pl.BlockSpec((C, 9), lambda b: (0, 0)),          # output_Y (C, 9)
        ],
        out_specs=pl.BlockSpec((1, 1, HW), lambda b: (b, 0, 0)),
        scratch_shapes=[
            pltpu.VMEM((C, HW), jnp.float32),                # block residual (yr)
        ],
        compiler_params=pltpu.CompilerParams(
            dimension_semantics=("parallel",)),              # 2 images -> 2 TCs on v7x
    )(x_rows, masks, kp["w_in"], kp["w3"], kp["w1"], kp["w_out"])

    return out.reshape(N, 1, H, W)


# ----------------------------------------------------------------------------
# Parameter init (deterministic, matches PyTorch shapes & init scale)
# ----------------------------------------------------------------------------
def init_params_pt(key, C, groups):
    """PyTorch-layout (OIHW) weights, normal(0, sqrt(2 / (k*k*out)))."""
    keys = jax.random.split(key, 14)

    def normal(k, shape, std):
        return std * jax.random.normal(k, shape, dtype=jnp.float32)

    p = {}
    p["input_Y"] = normal(keys[0], (C, 1, 3, 3), sqrt(2.0 / (9 * C)))
    p["b1_conv_1"] = normal(keys[1], (C, C, 3, 3), sqrt(2.0 / (9 * C)))
    p["b1_conv_2"] = normal(keys[2], (C, C, 3, 3), sqrt(2.0 / (9 * C)))
    p["b1_conv_3"] = normal(keys[3], (C, C, 3, 3), sqrt(2.0 / (9 * C)))
    p["b1_conv_4"] = normal(keys[4], (C, C // groups, 3, 3), sqrt(2.0 / (9 * C)))
    p["b1_conv_5"] = normal(keys[5], (C, C // groups, 3, 3), sqrt(2.0 / (9 * C)))
    p["b1_conv_6"] = normal(keys[6], (C, C // groups, 3, 3), sqrt(2.0 / (9 * C)))
    for i in range(6):
        p[f"p_conv_{i + 1}"] = normal(keys[7 + i], (C, C, 1, 1), sqrt(2.0 / C))
    p["output_Y"] = normal(keys[13], (1, C, 3, 3), sqrt(2.0 / 9.0))
    return p


def _expand_grouped(w, groups):
    """(Co, Ci//g, 3, 3) grouped weight -> block-diagonal full (Co, Co, 3, 3).

    Kept dense on purpose: per-group (4-channel) matmuls would be far too small
    for the MXU; the block-diagonal expansion is the right TPU trade-off."""
    Co, cin_g, kh, kw = w.shape
    cpg_out = Co // groups
    full = jnp.zeros((Co, Co, kh, kw), w.dtype)
    for g in range(groups):
        full = full.at[g * cpg_out:(g + 1) * cpg_out,
                       g * cin_g:(g + 1) * cin_g].set(
            w[g * cpg_out:(g + 1) * cpg_out])
    return full


def to_kernel_params(p, groups):
    """Repack PyTorch-layout weights for the transposed (C, HW) kernel layout."""
    C = p["input_Y"].shape[0]
    kp = {}
    # input conv (C,1,3,3) -> (C, 9): w_in[c, ky*3+kx] = W[c, 0, ky, kx]
    kp["w_in"] = p["input_Y"][:, 0, :, :].reshape(C, 9)
    # 3x3 convs -> (6*9, C, C): w3[l*9+k, o, i] = W_l[o, i, ky, kx]
    w3_list = [p["b1_conv_1"], p["b1_conv_2"], p["b1_conv_3"],
               _expand_grouped(p["b1_conv_4"], groups),
               _expand_grouped(p["b1_conv_5"], groups),
               _expand_grouped(p["b1_conv_6"], groups)]
    w3 = jnp.stack([jnp.transpose(w, (2, 3, 0, 1)).reshape(9, C, C)
                    for w in w3_list])                       # (6, 9, C, C)
    kp["w3"] = w3.reshape(54, C, C)
    # 1x1 convs -> (6, C, C): w1[l, o, i] = W_l[o, i, 0, 0]
    kp["w1"] = jnp.stack([p[f"p_conv_{i + 1}"][:, :, 0, 0] for i in range(6)])
    # output conv (1,C,3,3) -> (C, 9): w_out[c, ky*3+kx] = W[0, c, ky, kx]
    kp["w_out"] = p["output_Y"][0].reshape(C, 9)
    return kp


# ----------------------------------------------------------------------------
# Pure-JAX reference (for correctness check only)
# ----------------------------------------------------------------------------
def _conv_ref(x, w, groups=1):
    return lax.conv_general_dilated(
        x, w, window_strides=(1, 1), padding="SAME",
        dimension_numbers=("NCHW", "OIHW", "NCHW"),
        feature_group_count=groups, precision=lax.Precision.HIGHEST)


def _inorm_ref(x):
    m = jnp.mean(x, axis=(2, 3), keepdims=True)
    v = jnp.mean((x - m) ** 2, axis=(2, 3), keepdims=True)
    return (x - m) * lax.rsqrt(v + EPS)


def net_forward_ref(x_nchw, p, groups):
    relu = lambda z: jnp.maximum(z, 0.0)
    y = x_nchw[:, 0:1, :, :]
    residual = y
    y = relu(_inorm_ref(_conv_ref(y, p["input_Y"])))
    yr = y
    steps = [("b1_conv_1", 1), ("b1_conv_2", 1), ("b1_conv_3", 1),
             ("b1_conv_4", groups), ("b1_conv_5", groups), ("b1_conv_6", groups)]
    for i, (name, g) in enumerate(steps):
        y = _inorm_ref(_conv_ref(y, p[name], groups=g))
        y = _inorm_ref(_conv_ref(y, p[f"p_conv_{i + 1}"]))
        y = relu(y)
    y = y + yr
    y = _conv_ref(y, p["output_Y"])
    return y + residual


# ----------------------------------------------------------------------------
if __name__ == "__main__":
    key = jax.random.PRNGKey(0)
    kx, kp_key = jax.random.split(key)

    # small, module-consistent shapes
    N, Cin, H, W = 2, 3, 16, 16     # forward only uses channel 0
    C = 32                          # opt.ch
    conv_g = 4                      # opt.conv_g
    groups = C // conv_g            # = 8

    x = jax.random.normal(kx, (N, Cin, H, W), dtype=jnp.float32)
    params_pt = init_params_pt(kp_key, C, groups)
    params_kernel = to_kernel_params(params_pt, groups)

    out = jax.jit(net_forward_pallas)(x, params_kernel)
    out = jax.block_until_ready(out)

    ref = net_forward_ref(x, params_pt, groups)
    ref = jax.block_until_ready(ref)

    assert out.shape == (N, 1, H, W), out.shape
    err = float(jnp.max(jnp.abs(out - ref)))
    assert err < 1e-2, f"max abs err vs reference = {err}"

    print("KERNEL_OK")
</pallas_src>

<mosaic_0001>
module attributes {stable_mosaic.version = 11 : i64} {
  func.func @_net_kernel(%arg0: i32, %arg1: memref<1x1x256xf32, #tpu.memory_space<vmem>>, %arg2: memref<9x256xf32, #tpu.memory_space<vmem>>, %arg3: memref<32x9xf32, #tpu.memory_space<vmem>>, %arg4: memref<54x32x32xf32, #tpu.memory_space<vmem>>, %arg5: memref<6x32x32xf32, #tpu.memory_space<vmem>>, %arg6: memref<32x9xf32, #tpu.memory_space<vmem>>, %arg7: memref<1x1x256xf32, #tpu.memory_space<vmem>>, %arg8: memref<32x256xf32, #tpu.memory_space<vmem>>) attributes {dimension_semantics = [#tpu.dimension_semantics<parallel>], iteration_bounds = array<i64: 2>, scalar_prefetch = 0 : i64, scratch_operands = 1 : i64, tpu.core_type = #tpu.core_type<tc>, window_params = [{transform_indices = @transform_0, window_bounds = array<i64: 1, 1, 256>}, {pipeline_mode = #tpu.pipeline_mode<synchronous>, transform_indices = @transform_1, window_bounds = array<i64: 9, 256>}, {pipeline_mode = #tpu.pipeline_mode<synchronous>, transform_indices = @transform_2, window_bounds = array<i64: 32, 9>}, {pipeline_mode = #tpu.pipeline_mode<synchronous>, transform_indices = @transform_3, window_bounds = array<i64: 54, 32, 32>}, {pipeline_mode = #tpu.pipeline_mode<synchronous>, transform_indices = @transform_4, window_bounds = array<i64: 6, 32, 32>}, {pipeline_mode = #tpu.pipeline_mode<synchronous>, transform_indices = @transform_5, window_bounds = array<i64: 32, 9>}, {transform_indices = @transform_6, window_bounds = array<i64: 1, 1, 256>}]} {
    %c0 = arith.constant 0 : index
    %c0_0 = arith.constant 0 : index
    %c0_1 = arith.constant 0 : index
    %0 = vector.load %arg1[%c0, %c0_0, %c0_1] : memref<1x1x256xf32, #tpu.memory_space<vmem>>, vector<1x1x256xf32>
    %1 = vector.shape_cast %0 : vector<1x1x256xf32> to vector<1x256xf32>
    %cst = arith.constant 0.000000e+00 : f32
    %2 = vector.broadcast %cst : f32 to vector<32x256xf32>
    %c17_i32 = arith.constant 17 : i32
    %3 = tpu.dynamic_rotate %1 by %c17_i32 dim 1 : vector<1x256xf32>, i32 -> vector<1x256xf32>
    %c0_2 = arith.constant 0 : index
    %c0_3 = arith.constant 0 : index
    %4 = vector.load %arg2[%c0_2, %c0_3] : memref<9x256xf32, #tpu.memory_space<vmem>>, vector<1x256xf32>
    %5 = arith.mulf %3, %4 : vector<1x256xf32>
    %c0_4 = arith.constant 0 : index
    %c0_5 = arith.constant 0 : index
    %6 = vector.load %arg3[%c0_4, %c0_5] : memref<32x9xf32, #tpu.memory_space<vmem>>, vector<32x1xf32>
    %7 = vector.broadcast %6 : vector<32x1xf32> to vector<32x256xf32>
    %8 = vector.broadcast %5 : vector<1x256xf32> to vector<32x256xf32>
    %9 = arith.mulf %7, %8 : vector<32x256xf32>
    %10 = arith.addf %2, %9 : vector<32x256xf32>
    %c16_i32 = arith.constant 16 : i32
    %11 = tpu.dynamic_rotate %1 by %c16_i32 dim 1 : vector<1x256xf32>, i32 -> vector<1x256xf32>
    %c1 = arith.constant 1 : index
    %c0_6 = arith.constant 0 : index
    %12 = vector.load %arg2[%c1, %c0_6] : memref<9x256xf32, #tpu.memory_space<vmem>>, vector<1x256xf32>
    %13 = arith.mulf %11, %12 : vector<1x256xf32>
    %c0_7 = arith.constant 0 : index
    %c1_8 = arith.constant 1 : index
    %14 = vector.load %arg3[%c0_7, %c1_8] : memref<32x9xf32, #tpu.memory_space<vmem>>, vector<32x1xf32>
    %15 = vector.broadcast %14 : vector<32x1xf32> to vector<32x256xf32>
    %16 = vector.broadcast %13 : vector<1x256xf32> to vector<32x256xf32>
    %17 = arith.mulf %15, %16 : vector<32x256xf32>
    %18 = arith.addf %10, %17 : vector<32x256xf32>
    %c15_i32 = arith.constant 15 : i32
    %19 = tpu.dynamic_rotate %1 by %c15_i32 dim 1 : vector<1x256xf32>, i32 -> vector<1x256xf32>
    %c2 = arith.constant 2 : index
    %c0_9 = arith.constant 0 : index
    %20 = vector.load %arg2[%c2, %c0_9] : memref<9x256xf32, #tpu.memory_space<vmem>>, vector<1x256xf32>
    %21 = arith.mulf %19, %20 : vector<1x256xf32>
    %c0_10 = arith.constant 0 : index
    %c2_11 = arith.constant 2 : index
    %22 = vector.load %arg3[%c0_10, %c2_11] : memref<32x9xf32, #tpu.memory_space<vmem>>, vector<32x1xf32>
    %23 = vector.broadcast %22 : vector<32x1xf32> to vector<32x256xf32>
    %24 = vector.broadcast %21 : vector<1x256xf32> to vector<32x256xf32>
    %25 = arith.mulf %23, %24 : vector<32x256xf32>
    %26 = arith.addf %18, %25 : vector<32x256xf32>
    %c1_i32 = arith.constant 1 : i32
    %27 = tpu.dynamic_rotate %1 by %c1_i32 dim 1 : vector<1x256xf32>, i32 -> vector<1x256xf32>
    %c3 = arith.constant 3 : index
    %c0_12 = arith.constant 0 : index
    %28 = vector.load %arg2[%c3, %c0_12] : memref<9x256xf32, #tpu.memory_space<vmem>>, vector<1x256xf32>
    %29 = arith.mulf %27, %28 : vector<1x256xf32>
    %c0_13 = arith.constant 0 : index
    %c3_14 = arith.constant 3 : index
    %30 = vector.load %arg3[%c0_13, %c3_14] : memref<32x9xf32, #tpu.memory_space<vmem>>, vector<32x1xf32>
    %31 = vector.broadcast %30 : vector<32x1xf32> to vector<32x256xf32>
    %32 = vector.broadcast %29 : vector<1x256xf32> to vector<32x256xf32>
    %33 = arith.mulf %31, %32 : vector<32x256xf32>
    %34 = arith.addf %26, %33 : vector<32x256xf32>
    %c0_15 = arith.constant 0 : index
    %c4 = arith.constant 4 : index
    %35 = vector.load %arg3[%c0_15, %c4] : memref<32x9xf32, #tpu.memory_space<vmem>>, vector<32x1xf32>
    %36 = vector.broadcast %35 : vector<32x1xf32> to vector<32x256xf32>
    %37 = vector.broadcast %1 : vector<1x256xf32> to vector<32x256xf32>
    %38 = arith.mulf %36, %37 : vector<32x256xf32>
    %39 = arith.addf %34, %38 : vector<32x256xf32>
    %c255_i32 = arith.constant 255 : i32
    %40 = tpu.dynamic_rotate %1 by %c255_i32 dim 1 : vector<1x256xf32>, i32 -> vector<1x256xf32>
    %c5 = arith.constant 5 : index
    %c0_16 = arith.constant 0 : index
    %41 = vector.load %arg2[%c5, %c0_16] : memref<9x256xf32, #tpu.memory_space<vmem>>, vector<1x256xf32>
    %42 = arith.mulf %40, %41 : vector<1x256xf32>
    %c0_17 = arith.constant 0 : index
    %c5_18 = arith.constant 5 : index
    %43 = vector.load %arg3[%c0_17, %c5_18] : memref<32x9xf32, #tpu.memory_space<vmem>>, vector<32x1xf32>
    %44 = vector.broadcast %43 : vector<32x1xf32> to vector<32x256xf32>
    %45 = vector.broadcast %42 : vector<1x256xf32> to vector<32x256xf32>
    %46 = arith.mulf %44, %45 : vector<32x256xf32>
    %47 = arith.addf %39, %46 : vector<32x256xf32>
    %c241_i32 = arith.constant 241 : i32
    %48 = tpu.dynamic_rotate %1 by %c241_i32 dim 1 : vector<1x256xf32>, i32 -> vector<1x256xf32>
    %c6 = arith.constant 6 : index
    %c0_19 = arith.constant 0 : index
    %49 = vector.load %arg2[%c6, %c0_19] : memref<9x256xf32, #tpu.memory_space<vmem>>, vector<1x256xf32>
    %50 = arith.mulf %48, %49 : vector<1x256xf32>
    %c0_20 = arith.constant 0 : index
    %c6_21 = arith.constant 6 : index
    %51 = vector.load %arg3[%c0_20, %c6_21] : memref<32x9xf32, #tpu.memory_space<vmem>>, vector<32x1xf32>
    %52 = vector.broadcast %51 : vector<32x1xf32> to vector<32x256xf32>
    %53 = vector.broadcast %50 : vector<1x256xf32> to vector<32x256xf32>
    %54 = arith.mulf %52, %53 : vector<32x256xf32>
    %55 = arith.addf %47, %54 : vector<32x256xf32>
    %c240_i32 = arith.constant 240 : i32
    %56 = tpu.dynamic_rotate %1 by %c240_i32 dim 1 : vector<1x256xf32>, i32 -> vector<1x256xf32>
    %c7 = arith.constant 7 : index
    %c0_22 = arith.constant 0 : index
    %57 = vector.load %arg2[%c7, %c0_22] : memref<9x256xf32, #tpu.memory_space<vmem>>, vector<1x256xf32>
    %58 = arith.mulf %56, %57 : vector<1x256xf32>
    %c0_23 = arith.constant 0 : index
    %c7_24 = arith.constant 7 : index
    %59 = vector.load %arg3[%c0_23, %c7_24] : memref<32x9xf32, #tpu.memory_space<vmem>>, vector<32x1xf32>
    %60 = vector.broadcast %59 : vector<32x1xf32> to vector<32x256xf32>
    %61 = vector.broadcast %58 : vector<1x256xf32> to vector<32x256xf32>
    %62 = arith.mulf %60, %61 : vector<32x256xf32>
    %63 = arith.addf %55, %62 : vector<32x256xf32>
    %c239_i32 = arith.constant 239 : i32
    %64 = tpu.dynamic_rotate %1 by %c239_i32 dim 1 : vector<1x256xf32>, i32 -> vector<1x256xf32>
    %c8 = arith.constant 8 : index
    %c0_25 = arith.constant 0 : index
    %65 = vector.load %arg2[%c8, %c0_25] : memref<9x256xf32, #tpu.memory_space<vmem>>, vector<1x256xf32>
    %66 = arith.mulf %64, %65 : vector<1x256xf32>
    %c0_26 = arith.constant 0 : index
    %c8_27 = arith.constant 8 : index
    %67 = vector.load %arg3[%c0_26, %c8_27] : memref<32x9xf32, #tpu.memory_space<vmem>>, vector<32x1xf32>
    %68 = vector.broadcast %67 : vector<32x1xf32> to vector<32x256xf32>
    %69 = vector.broadcast %66 : vector<1x256xf32> to vector<32x256xf32>
    %70 = arith.mulf %68, %69 : vector<32x256xf32>
    %71 = arith.addf %63, %70 : vector<32x256xf32>
    %cst_28 = arith.constant dense<0.000000e+00> : vector<32xf32>
    %72 = vector.multi_reduction <add>, %71, %cst_28 [1] : vector<32x256xf32> to vector<32xf32>
    %73 = vector.shape_cast %72 : vector<32xf32> to vector<32x1xf32>
    %74 = arith.mulf %71, %71 : vector<32x256xf32>
    %cst_29 = arith.constant dense<0.000000e+00> : vector<32xf32>
    %75 = vector.multi_reduction <add>, %74, %cst_29 [1] : vector<32x256xf32> to vector<32xf32>
    %76 = vector.shape_cast %75 : vector<32xf32> to vector<32x1xf32>
    %cst_30 = arith.constant 3.906250e-03 : f32
    %77 = vector.broadcast %cst_30 : f32 to vector<32x1xf32>
    %78 = arith.mulf %73, %77 : vector<32x1xf32>
    %cst_31 = arith.constant 3.906250e-03 : f32
    %79 = vector.broadcast %cst_31 : f32 to vector<32x1xf32>
    %80 = arith.mulf %76, %79 : vector<32x1xf32>
    %81 = arith.mulf %78, %78 : vector<32x1xf32>
    %82 = arith.subf %80, %81 : vector<32x1xf32>
    %cst_32 = arith.constant 0.000000e+00 : f32
    %83 = vector.broadcast %cst_32 : f32 to vector<32x1xf32>
    %84 = arith.maximumf %82, %83 : vector<32x1xf32>
    %85 = vector.broadcast %78 : vector<32x1xf32> to vector<32x256xf32>
    %86 = arith.subf %71, %85 : vector<32x256xf32>
    %cst_33 = arith.constant 9.99999974E-6 : f32
    %87 = vector.broadcast %cst_33 : f32 to vector<32x1xf32>
    %88 = arith.addf %84, %87 : vector<32x1xf32>
    %89 = math.rsqrt %88 : vector<32x1xf32>
    %90 = vector.broadcast %89 : vector<32x1xf32> to vector<32x256xf32>
    %91 = arith.mulf %86, %90 : vector<32x256xf32>
    %cst_34 = arith.constant 0.000000e+00 : f32
    %92 = vector.broadcast %cst_34 : f32 to vector<32x256xf32>
    %93 = arith.maximumf %91, %92 : vector<32x256xf32>
    %c0_35 = arith.constant 0 : index
    %c0_36 = arith.constant 0 : index
    %94 = vector.load %arg8[%c0_35, %c0_36] : memref<32x256xf32, #tpu.memory_space<vmem>>, vector<32x256xf32>
    tpu.vector_store %arg8[%c0_35, %c0_36], %93 {strides = array<i32>} : memref<32x256xf32, #tpu.memory_space<vmem>>, vector<32x256xf32>,
    %c0_i32 = arith.constant 0 : i32
    %c6_i32 = arith.constant 6 : i32
    %95 = arith.addi %c0_i32, %c6_i32 : i32
    %c1_i32_37 = arith.constant 1 : i32
    %96 = scf.for %arg9 = %c0_i32 to %95 step %c1_i32_37 iter_args(%arg10 = %93) -> (vector<32x256xf32>)  : i32 {
      %cst_88 = arith.constant 0.000000e+00 : f32
      %173 = vector.broadcast %cst_88 : f32 to vector<32x256xf32>
      %c17_i32_89 = arith.constant 17 : i32
      %174 = tpu.dynamic_rotate %arg10 by %c17_i32_89 dim 1 : vector<32x256xf32>, i32 -> vector<32x256xf32>
      %c0_90 = arith.constant 0 : index
      %c0_91 = arith.constant 0 : index
      %175 = vector.load %arg2[%c0_90, %c0_91] : memref<9x256xf32, #tpu.memory_space<vmem>>, vector<1x256xf32>
      %176 = vector.broadcast %175 : vector<1x256xf32> to vector<32x256xf32>
      %177 = arith.mulf %174, %176 : vector<32x256xf32>
      %c9_i32 = arith.constant 9 : i32
      %178 = arith.muli %arg9, %c9_i32 : i32
      %c0_i32_92 = arith.constant 0 : i32
      %179 = arith.addi %178, %c0_i32_92 : i32
      %180 = arith.index_cast %179 : i32 to index
      %c0_93 = arith.constant 0 : index
      %c0_94 = arith.constant 0 : index
      %181 = vector.load %arg4[%180, %c0_93, %c0_94] : memref<54x32x32xf32, #tpu.memory_space<vmem>>, vector<1x32x32xf32>
      %182 = vector.shape_cast %181 : vector<1x32x32xf32> to vector<32x32xf32>
      %cst_95 = arith.constant dense<0.000000e+00> : vector<32x256xf32>
      %183 = tpu.matmul %182, %177, %cst_95 {dimension_numbers = #tpu.dot_dimension_numbers<[1], [0], [0], [1], [0, 0, 1, 1], [], []>, precision = #tpu.contract_precision<fp32>} : vector<32x32xf32>, vector<32x256xf32>, vector<32x256xf32> -> vector<32x256xf32>
      %184 = arith.addf %173, %183 : vector<32x256xf32>
      %c16_i32_96 = arith.constant 16 : i32
      %185 = tpu.dynamic_rotate %arg10 by %c16_i32_96 dim 1 : vector<32x256xf32>, i32 -> vector<32x256xf32>
      %c1_97 = arith.constant 1 : index
      %c0_98 = arith.constant 0 : index
      %186 = vector.load %arg2[%c1_97, %c0_98] : memref<9x256xf32, #tpu.memory_space<vmem>>, vector<1x256xf32>
      %187 = vector.broadcast %186 : vector<1x256xf32> to vector<32x256xf32>
      %188 = arith.mulf %185, %187 : vector<32x256xf32>
      %c9_i32_99 = arith.constant 9 : i32
      %189 = arith.muli %arg9, %c9_i32_99 : i32
      %c1_i32_100 = arith.constant 1 : i32
      %190 = arith.addi %189, %c1_i32_100 : i32
      %191 = arith.index_cast %190 : i32 to index
      %c0_101 = arith.constant 0 : index
      %c0_102 = arith.constant 0 : index
      %192 = vector.load %arg4[%191, %c0_101, %c0_102] : memref<54x32x32xf32, #tpu.memory_space<vmem>>, vector<1x32x32xf32>
      %193 = vector.shape_cast %192 : vector<1x32x32xf32> to vector<32x32xf32>
      %cst_103 = arith.constant dense<0.000000e+00> : vector<32x256xf32>
      %194 = tpu.matmul %193, %188, %cst_103 {dimension_numbers = #tpu.dot_dimension_numbers<[1], [0], [0], [1], [0, 0, 1, 1], [], []>, precision = #tpu.contract_precision<fp32>} : vector<32x32xf32>, vector<32x256xf32>, vector<32x256xf32> -> vector<32x256xf32>
      %195 = arith.addf %184, %194 : vector<32x256xf32>
      %c15_i32_104 = arith.constant 15 : i32
      %196 = tpu.dynamic_rotate %arg10 by %c15_i32_104 dim 1 : vector<32x256xf32>, i32 -> vector<32x256xf32>
      %c2_105 = arith.constant 2 : index
      %c0_106 = arith.constant 0 : index
      %197 = vector.load %arg2[%c2_105, %c0_106] : memref<9x256xf32, #tpu.memory_space<vmem>>, vector<1x256xf32>
      %198 = vector.broadcast %197 : vector<1x256xf32> to vector<32x256xf32>
      %199 = arith.mulf %196, %198 : vector<32x256xf32>
      %c9_i32_107 = arith.constant 9 : i32
      %200 = arith.muli %arg9, %c9_i32_107 : i32
      %c2_i32 = arith.constant 2 : i32
      %201 = arith.addi %200, %c2_i32 : i32
      %202 = arith.index_cast %201 : i32 to index
      %c0_108 = arith.constant 0 : index
      %c0_109 = arith.constant 0 : index
      %203 = vector.load %arg4[%202, %c0_108, %c0_109] : memref<54x32x32xf32, #tpu.memory_space<vmem>>, vector<1x32x32xf32>
      %204 = vector.shape_cast %203 : vector<1x32x32xf32> to vector<32x32xf32>
      %cst_110 = arith.constant dense<0.000000e+00> : vector<32x256xf32>
      %205 = tpu.matmul %204, %199, %cst_110 {dimension_numbers = #tpu.dot_dimension_numbers<[1], [0], [0], [1], [0, 0, 1, 1], [], []>, precision = #tpu.contract_precision<fp32>} : vector<32x32xf32>, vector<32x256xf32>, vector<32x256xf32> -> vector<32x256xf32>
      %206 = arith.addf %195, %205 : vector<32x256xf32>
      %c1_i32_111 = arith.constant 1 : i32
      %207 = tpu.dynamic_rotate %arg10 by %c1_i32_111 dim 1 : vector<32x256xf32>, i32 -> vector<32x256xf32>
      %c3_112 = arith.constant 3 : index
      %c0_113 = arith.constant 0 : index
      %208 = vector.load %arg2[%c3_112, %c0_113] : memref<9x256xf32, #tpu.memory_space<vmem>>, vector<1x256xf32>
      %209 = vector.broadcast %208 : vector<1x256xf32> to vector<32x256xf32>
      %210 = arith.mulf %207, %209 : vector<32x256xf32>
      %c9_i32_114 = arith.constant 9 : i32
      %211 = arith.muli %arg9, %c9_i32_114 : i32
      %c3_i32 = arith.constant 3 : i32
      %212 = arith.addi %211, %c3_i32 : i32
      %213 = arith.index_cast %212 : i32 to index
      %c0_115 = arith.constant 0 : index
      %c0_116 = arith.constant 0 : index
      %214 = vector.load %arg4[%213, %c0_115, %c0_116] : memref<54x32x32xf32, #tpu.memory_space<vmem>>, vector<1x32x32xf32>
      %215 = vector.shape_cast %214 : vector<1x32x32xf32> to vector<32x32xf32>
      %cst_117 = arith.constant dense<0.000000e+00> : vector<32x256xf32>
      %216 = tpu.matmul %215, %210, %cst_117 {dimension_numbers = #tpu.dot_dimension_numbers<[1], [0], [0], [1], [0, 0, 1, 1], [], []>, precision = #tpu.contract_precision<fp32>} : vector<32x32xf32>, vector<32x256xf32>, vector<32x256xf32> -> vector<32x256xf32>
      %217 = arith.addf %206, %216 : vector<32x256xf32>
      %c9_i32_118 = arith.constant 9 : i32
      %218 = arith.muli %arg9, %c9_i32_118 : i32
      %c4_i32 = arith.constant 4 : i32
      %219 = arith.addi %218, %c4_i32 : i32
      %220 = arith.index_cast %219 : i32 to index
      %c0_119 = arith.constant 0 : index
      %c0_120 = arith.constant 0 : index
      %221 = vector.load %arg4[%220, %c0_119, %c0_120] : memref<54x32x32xf32, #tpu.memory_space<vmem>>, vector<1x32x32xf32>
      %222 = vector.shape_cast %221 : vector<1x32x32xf32> to vector<32x32xf32>
      %cst_121 = arith.constant dense<0.000000e+00> : vector<32x256xf32>
      %223 = tpu.matmul %222, %arg10, %cst_121 {dimension_numbers = #tpu.dot_dimension_numbers<[1], [0], [0], [1], [0, 0, 1, 1], [], []>, precision = #tpu.contract_precision<fp32>} : vector<32x32xf32>, vector<32x256xf32>, vector<32x256xf32> -> vector<32x256xf32>
      %224 = arith.addf %217, %223 : vector<32x256xf32>
      %c255_i32_122 = arith.constant 255 : i32
      %225 = tpu.dynamic_rotate %arg10 by %c255_i32_122 dim 1 : vector<32x256xf32>, i32 -> vector<32x256xf32>
      %c5_123 = arith.constant 5 : index
      %c0_124 = arith.constant 0 : index
      %226 = vector.load %arg2[%c5_123, %c0_124] : memref<9x256xf32, #tpu.memory_space<vmem>>, vector<1x256xf32>
      %227 = vector.broadcast %226 : vector<1x256xf32> to vector<32x256xf32>
      %228 = arith.mulf %225, %227 : vector<32x256xf32>
      %c9_i32_125 = arith.constant 9 : i32
      %229 = arith.muli %arg9, %c9_i32_125 : i32
      %c5_i32 = arith.constant 5 : i32
      %230 = arith.addi %229, %c5_i32 : i32
      %231 = arith.index_cast %230 : i32 to index
      %c0_126 = arith.constant 0 : index
      %c0_127 = arith.constant 0 : index
      %232 = vector.load %arg4[%231, %c0_126, %c0_127] : memref<54x32x32xf32, #tpu.memory_space<vmem>>, vector<1x32x32xf32>
      %233 = vector.shape_cast %232 : vector<1x32x32xf32> to vector<32x32xf32>
      %cst_128 = arith.constant dense<0.000000e+00> : vector<32x256xf32>
      %234 = tpu.matmul %233, %228, %cst_128 {dimension_numbers = #tpu.dot_dimension_numbers<[1], [0], [0], [1], [0, 0, 1, 1], [], []>, precision = #tpu.contract_precision<fp32>} : vector<32x32xf32>, vector<32x256xf32>, vector<32x256xf32> -> vector<32x256xf32>
      %235 = arith.addf %224, %234 : vector<32x256xf32>
      %c241_i32_129 = arith.constant 241 : i32
      %236 = tpu.dynamic_rotate %arg10 by %c241_i32_129 dim 1 : vector<32x256xf32>, i32 -> vector<32x256xf32>
      %c6_130 = arith.constant 6 : index
      %c0_131 = arith.constant 0 : index
      %237 = vector.load %arg2[%c6_130, %c0_131] : memref<9x256xf32, #tpu.memory_space<vmem>>, vector<1x256xf32>
      %238 = vector.broadcast %237 : vector<1x256xf32> to vector<32x256xf32>
      %239 = arith.mulf %236, %238 : vector<32x256xf32>
      %c9_i32_132 = arith.constant 9 : i32
      %240 = arith.muli %arg9, %c9_i32_132 : i32
      %c6_i32_133 = arith.constant 6 : i32
      %241 = arith.addi %240, %c6_i32_133 : i32
      %242 = arith.index_cast %241 : i32 to index
      %c0_134 = arith.constant 0 : index
      %c0_135 = arith.constant 0 : index
      %243 = vector.load %arg4[%242, %c0_134, %c0_135] : memref<54x32x32xf32, #tpu.memory_space<vmem>>, vector<1x32x32xf32>
      %244 = vector.shape_cast %243 : vector<1x32x32xf32> to vector<32x32xf32>
      %cst_136 = arith.constant dense<0.000000e+00> : vector<32x256xf32>
      %245 = tpu.matmul %244, %239, %cst_136 {dimension_numbers = #tpu.dot_dimension_numbers<[1], [0], [0], [1], [0, 0, 1, 1], [], []>, precision = #tpu.contract_precision<fp32>} : vector<32x32xf32>, vector<32x256xf32>, vector<32x256xf32> -> vector<32x256xf32>
      %246 = arith.addf %235, %245 : vector<32x256xf32>
      %c240_i32_137 = arith.constant 240 : i32
      %247 = tpu.dynamic_rotate %arg10 by %c240_i32_137 dim 1 : vector<32x256xf32>, i32 -> vector<32x256xf32>
      %c7_138 = arith.constant 7 : index
      %c0_139 = arith.constant 0 : index
      %248 = vector.load %arg2[%c7_138, %c0_139] : memref<9x256xf32, #tpu.memory_space<vmem>>, vector<1x256xf32>
      %249 = vector.broadcast %248 : vector<1x256xf32> to vector<32x256xf32>
      %250 = arith.mulf %247, %249 : vector<32x256xf32>
      %c9_i32_140 = arith.constant 9 : i32
      %251 = arith.muli %arg9, %c9_i32_140 : i32
      %c7_i32 = arith.constant 7 : i32
      %252 = arith.addi %251, %c7_i32 : i32
      %253 = arith.index_cast %252 : i32 to index
      %c0_141 = arith.constant 0 : index
      %c0_142 = arith.constant 0 : index
      %254 = vector.load %arg4[%253, %c0_141, %c0_142] : memref<54x32x32xf32, #tpu.memory_space<vmem>>, vector<1x32x32xf32>
      %255 = vector.shape_cast %254 : vector<1x32x32xf32> to vector<32x32xf32>
      %cst_143 = arith.constant dense<0.000000e+00> : vector<32x256xf32>
      %256 = tpu.matmul %255, %250, %cst_143 {dimension_numbers = #tpu.dot_dimension_numbers<[1], [0], [0], [1], [0, 0, 1, 1], [], []>, precision = #tpu.contract_precision<fp32>} : vector<32x32xf32>, vector<32x256xf32>, vector<32x256xf32> -> vector<32x256xf32>
      %257 = arith.addf %246, %256 : vector<32x256xf32>
      %c239_i32_144 = arith.constant 239 : i32
      %258 = tpu.dynamic_rotate %arg10 by %c239_i32_144 dim 1 : vector<32x256xf32>, i32 -> vector<32x256xf32>
      %c8_145 = arith.constant 8 : index
      %c0_146 = arith.constant 0 : index
      %259 = vector.load %arg2[%c8_145, %c0_146] : memref<9x256xf32, #tpu.memory_space<vmem>>, vector<1x256xf32>
      %260 = vector.broadcast %259 : vector<1x256xf32> to vector<32x256xf32>
      %261 = arith.mulf %258, %260 : vector<32x256xf32>
      %c9_i32_147 = arith.constant 9 : i32
      %262 = arith.muli %arg9, %c9_i32_147 : i32
      %c8_i32 = arith.constant 8 : i32
      %263 = arith.addi %262, %c8_i32 : i32
      %264 = arith.index_cast %263 : i32 to index
      %c0_148 = arith.constant 0 : index
      %c0_149 = arith.constant 0 : index
      %265 = vector.load %arg4[%264, %c0_148, %c0_149] : memref<54x32x32xf32, #tpu.memory_space<vmem>>, vector<1x32x32xf32>
      %266 = vector.shape_cast %265 : vector<1x32x32xf32> to vector<32x32xf32>
      %cst_150 = arith.constant dense<0.000000e+00> : vector<32x256xf32>
      %267 = tpu.matmul %266, %261, %cst_150 {dimension_numbers = #tpu.dot_dimension_numbers<[1], [0], [0], [1], [0, 0, 1, 1], [], []>, precision = #tpu.contract_precision<fp32>} : vector<32x32xf32>, vector<32x256xf32>, vector<32x256xf32> -> vector<32x256xf32>
      %268 = arith.addf %257, %267 : vector<32x256xf32>
      %cst_151 = arith.constant dense<0.000000e+00> : vector<32xf32>
      %269 = vector.multi_reduction <add>, %268, %cst_151 [1] : vector<32x256xf32> to vector<32xf32>
      %270 = vector.shape_cast %269 : vector<32xf32> to vector<32x1xf32>
      %271 = arith.mulf %268, %268 : vector<32x256xf32>
      %cst_152 = arith.constant dense<0.000000e+00> : vector<32xf32>
      %272 = vector.multi_reduction <add>, %271, %cst_152 [1] : vector<32x256xf32> to vector<32xf32>
      %273 = vector.shape_cast %272 : vector<32xf32> to vector<32x1xf32>
      %cst_153 = arith.constant 3.906250e-03 : f32
      %274 = vector.broadcast %cst_153 : f32 to vector<32x1xf32>
      %275 = arith.mulf %270, %274 : vector<32x1xf32>
      %cst_154 = arith.constant 3.906250e-03 : f32
      %276 = vector.broadcast %cst_154 : f32 to vector<32x1xf32>
      %277 = arith.mulf %273, %276 : vector<32x1xf32>
      %278 = arith.mulf %275, %275 : vector<32x1xf32>
      %279 = arith.subf %277, %278 : vector<32x1xf32>
      %cst_155 = arith.constant 0.000000e+00 : f32
      %280 = vector.broadcast %cst_155 : f32 to vector<32x1xf32>
      %281 = arith.maximumf %279, %280 : vector<32x1xf32>
      %282 = vector.broadcast %275 : vector<32x1xf32> to vector<32x256xf32>
      %283 = arith.subf %268, %282 : vector<32x256xf32>
      %cst_156 = arith.constant 9.99999974E-6 : f32
      %284 = vector.broadcast %cst_156 : f32 to vector<32x1xf32>
      %285 = arith.addf %281, %284 : vector<32x1xf32>
      %286 = math.rsqrt %285 : vector<32x1xf32>
      %287 = vector.broadcast %286 : vector<32x1xf32> to vector<32x256xf32>
      %288 = arith.mulf %283, %287 : vector<32x256xf32>
      %289 = arith.index_cast %arg9 : i32 to index
      %c0_157 = arith.constant 0 : index
      %c0_158 = arith.constant 0 : index
      %290 = vector.load %arg5[%289, %c0_157, %c0_158] : memref<6x32x32xf32, #tpu.memory_space<vmem>>, vector<1x32x32xf32>
      %291 = vector.shape_cast %290 : vector<1x32x32xf32> to vector<32x32xf32>
      %cst_159 = arith.constant dense<0.000000e+00> : vector<32x256xf32>
      %292 = tpu.matmul %291, %288, %cst_159 {dimension_numbers = #tpu.dot_dimension_numbers<[1], [0], [0], [1], [0, 0, 1, 1], [], []>, precision = #tpu.contract_precision<fp32>} : vector<32x32xf32>, vector<32x256xf32>, vector<32x256xf32> -> vector<32x256xf32>
      %cst_160 = arith.constant dense<0.000000e+00> : vector<32xf32>
      %293 = vector.multi_reduction <add>, %292, %cst_160 [1] : vector<32x256xf32> to vector<32xf32>
      %294 = vector.shape_cast %293 : vector<32xf32> to vector<32x1xf32>
      %295 = arith.mulf %292, %292 : vector<32x256xf32>
      %cst_161 = arith.constant dense<0.000000e+00> : vector<32xf32>
      %296 = vector.multi_reduction <add>, %295, %cst_161 [1] : vector<32x256xf32> to vector<32xf32>
      %297 = vector.shape_cast %296 : vector<32xf32> to vector<32x1xf32>
      %cst_162 = arith.constant 3.906250e-03 : f32
      %298 = vector.broadcast %cst_162 : f32 to vector<32x1xf32>
      %299 = arith.mulf %294, %298 : vector<32x1xf32>
      %cst_163 = arith.constant 3.906250e-03 : f32
      %300 = vector.broadcast %cst_163 : f32 to vector<32x1xf32>
      %301 = arith.mulf %297, %300 : vector<32x1xf32>
      %302 = arith.mulf %299, %299 : vector<32x1xf32>
      %303 = arith.subf %301, %302 : vector<32x1xf32>
      %cst_164 = arith.constant 0.000000e+00 : f32
      %304 = vector.broadcast %cst_164 : f32 to vector<32x1xf32>
      %305 = arith.maximumf %303, %304 : vector<32x1xf32>
      %306 = vector.broadcast %299 : vector<32x1xf32> to vector<32x256xf32>
      %307 = arith.subf %292, %306 : vector<32x256xf32>
      %cst_165 = arith.constant 9.99999974E-6 : f32
      %308 = vector.broadcast %cst_165 : f32 to vector<32x1xf32>
      %309 = arith.addf %305, %308 : vector<32x1xf32>
      %310 = math.rsqrt %309 : vector<32x1xf32>
      %311 = vector.broadcast %310 : vector<32x1xf32> to vector<32x256xf32>
      %312 = arith.mulf %307, %311 : vector<32x256xf32>
      %cst_166 = arith.constant 0.000000e+00 : f32
      %313 = vector.broadcast %cst_166 : f32 to vector<32x256xf32>
      %314 = arith.maximumf %312, %313 : vector<32x256xf32>
      scf.yield %314 : vector<32x256xf32>
    }
    %c6_i32_38 = arith.constant 6 : i32
    %c0_39 = arith.constant 0 : index
    %c0_40 = arith.constant 0 : index
    %97 = vector.load %arg8[%c0_39, %c0_40] : memref<32x256xf32, #tpu.memory_space<vmem>>, vector<32x256xf32>
    %98 = arith.addf %96, %97 : vector<32x256xf32>
    %cst_41 = arith.constant 0.000000e+00 : f32
    %99 = vector.broadcast %cst_41 : f32 to vector<32x256xf32>
    %c17_i32_42 = arith.constant 17 : i32
    %100 = tpu.dynamic_rotate %98 by %c17_i32_42 dim 1 : vector<32x256xf32>, i32 -> vector<32x256xf32>
    %c0_43 = arith.constant 0 : index
    %c0_44 = arith.constant 0 : index
    %101 = vector.load %arg2[%c0_43, %c0_44] : memref<9x256xf32, #tpu.memory_space<vmem>>, vector<1x256xf32>
    %102 = vector.broadcast %101 : vector<1x256xf32> to vector<32x256xf32>
    %103 = arith.mulf %100, %102 : vector<32x256xf32>
    %c0_45 = arith.constant 0 : index
    %c0_46 = arith.constant 0 : index
    %104 = vector.load %arg6[%c0_45, %c0_46] : memref<32x9xf32, #tpu.memory_space<vmem>>, vector<32x1xf32>
    %105 = vector.broadcast %104 : vector<32x1xf32> to vector<32x256xf32>
    %106 = arith.mulf %105, %103 : vector<32x256xf32>
    %107 = arith.addf %99, %106 : vector<32x256xf32>
    %c16_i32_47 = arith.constant 16 : i32
    %108 = tpu.dynamic_rotate %98 by %c16_i32_47 dim 1 : vector<32x256xf32>, i32 -> vector<32x256xf32>
    %c1_48 = arith.constant 1 : index
    %c0_49 = arith.constant 0 : index
    %109 = vector.load %arg2[%c1_48, %c0_49] : memref<9x256xf32, #tpu.memory_space<vmem>>, vector<1x256xf32>
    %110 = vector.broadcast %109 : vector<1x256xf32> to vector<32x256xf32>
    %111 = arith.mulf %108, %110 : vector<32x256xf32>
    %c0_50 = arith.constant 0 : index
    %c1_51 = arith.constant 1 : index
    %112 = vector.load %arg6[%c0_50, %c1_51] : memref<32x9xf32, #tpu.memory_space<vmem>>, vector<32x1xf32>
    %113 = vector.broadcast %112 : vector<32x1xf32> to vector<32x256xf32>
    %114 = arith.mulf %113, %111 : vector<32x256xf32>
    %115 = arith.addf %107, %114 : vector<32x256xf32>
    %c15_i32_52 = arith.constant 15 : i32
    %116 = tpu.dynamic_rotate %98 by %c15_i32_52 dim 1 : vector<32x256xf32>, i32 -> vector<32x256xf32>
    %c2_53 = arith.constant 2 : index
    %c0_54 = arith.constant 0 : index
    %117 = vector.load %arg2[%c2_53, %c0_54] : memref<9x256xf32, #tpu.memory_space<vmem>>, vector<1x256xf32>
    %118 = vector.broadcast %117 : vector<1x256xf32> to vector<32x256xf32>
    %119 = arith.mulf %116, %118 : vector<32x256xf32>
    %c0_55 = arith.constant 0 : index
    %c2_56 = arith.constant 2 : index
    %120 = vector.load %arg6[%c0_55, %c2_56] : memref<32x9xf32, #tpu.memory_space<vmem>>, vector<32x1xf32>
    %121 = vector.broadcast %120 : vector<32x1xf32> to vector<32x256xf32>
    %122 = arith.mulf %121, %119 : vector<32x256xf32>
    %123 = arith.addf %115, %122 : vector<32x256xf32>
    %c1_i32_57 = arith.constant 1 : i32
    %124 = tpu.dynamic_rotate %98 by %c1_i32_57 dim 1 : vector<32x256xf32>, i32 -> vector<32x256xf32>
    %c3_58 = arith.constant 3 : index
    %c0_59 = arith.constant 0 : index
    %125 = vector.load %arg2[%c3_58, %c0_59] : memref<9x256xf32, #tpu.memory_space<vmem>>, vector<1x256xf32>
    %126 = vector.broadcast %125 : vector<1x256xf32> to vector<32x256xf32>
    %127 = arith.mulf %124, %126 : vector<32x256xf32>
    %c0_60 = arith.constant 0 : index
    %c3_61 = arith.constant 3 : index
    %128 = vector.load %arg6[%c0_60, %c3_61] : memref<32x9xf32, #tpu.memory_space<vmem>>, vector<32x1xf32>
    %129 = vector.broadcast %128 : vector<32x1xf32> to vector<32x256xf32>
    %130 = arith.mulf %129, %127 : vector<32x256xf32>
    %131 = arith.addf %123, %130 : vector<32x256xf32>
    %c0_62 = arith.constant 0 : index
    %c4_63 = arith.constant 4 : index
    %132 = vector.load %arg6[%c0_62, %c4_63] : memref<32x9xf32, #tpu.memory_space<vmem>>, vector<32x1xf32>
    %133 = vector.broadcast %132 : vector<32x1xf32> to vector<32x256xf32>
    %134 = arith.mulf %133, %98 : vector<32x256xf32>
    %135 = arith.addf %131, %134 : vector<32x256xf32>
    %c255_i32_64 = arith.constant 255 : i32
    %136 = tpu.dynamic_rotate %98 by %c255_i32_64 dim 1 : vector<32x256xf32>, i32 -> vector<32x256xf32>
    %c5_65 = arith.constant 5 : index
    %c0_66 = arith.constant 0 : index
    %137 = vector.load %arg2[%c5_65, %c0_66] : memref<9x256xf32, #tpu.memory_space<vmem>>, vector<1x256xf32>
    %138 = vector.broadcast %137 : vector<1x256xf32> to vector<32x256xf32>
    %139 = arith.mulf %136, %138 : vector<32x256xf32>
    %c0_67 = arith.constant 0 : index
    %c5_68 = arith.constant 5 : index
    %140 = vector.load %arg6[%c0_67, %c5_68] : memref<32x9xf32, #tpu.memory_space<vmem>>, vector<32x1xf32>
    %141 = vector.broadcast %140 : vector<32x1xf32> to vector<32x256xf32>
    %142 = arith.mulf %141, %139 : vector<32x256xf32>
    %143 = arith.addf %135, %142 : vector<32x256xf32>
    %c241_i32_69 = arith.constant 241 : i32
    %144 = tpu.dynamic_rotate %98 by %c241_i32_69 dim 1 : vector<32x256xf32>, i32 -> vector<32x256xf32>
    %c6_70 = arith.constant 6 : index
    %c0_71 = arith.constant 0 : index
    %145 = vector.load %arg2[%c6_70, %c0_71] : memref<9x256xf32, #tpu.memory_space<vmem>>, vector<1x256xf32>
    %146 = vector.broadcast %145 : vector<1x256xf32> to vector<32x256xf32>
    %147 = arith.mulf %144, %146 : vector<32x256xf32>
    %c0_72 = arith.constant 0 : index
    %c6_73 = arith.constant 6 : index
    %148 = vector.load %arg6[%c0_72, %c6_73] : memref<32x9xf32, #tpu.memory_space<vmem>>, vector<32x1xf32>
    %149 = vector.broadcast %148 : vector<32x1xf32> to vector<32x256xf32>
    %150 = arith.mulf %149, %147 : vector<32x256xf32>
    %151 = arith.addf %143, %150 : vector<32x256xf32>
    %c240_i32_74 = arith.constant 240 : i32
    %152 = tpu.dynamic_rotate %98 by %c240_i32_74 dim 1 : vector<32x256xf32>, i32 -> vector<32x256xf32>
    %c7_75 = arith.constant 7 : index
    %c0_76 = arith.constant 0 : index
    %153 = vector.load %arg2[%c7_75, %c0_76] : memref<9x256xf32, #tpu.memory_space<vmem>>, vector<1x256xf32>
    %154 = vector.broadcast %153 : vector<1x256xf32> to vector<32x256xf32>
    %155 = arith.mulf %152, %154 : vector<32x256xf32>
    %c0_77 = arith.constant 0 : index
    %c7_78 = arith.constant 7 : index
    %156 = vector.load %arg6[%c0_77, %c7_78] : memref<32x9xf32, #tpu.memory_space<vmem>>, vector<32x1xf32>
    %157 = vector.broadcast %156 : vector<32x1xf32> to vector<32x256xf32>
    %158 = arith.mulf %157, %155 : vector<32x256xf32>
    %159 = arith.addf %151, %158 : vector<32x256xf32>
    %c239_i32_79 = arith.constant 239 : i32
    %160 = tpu.dynamic_rotate %98 by %c239_i32_79 dim 1 : vector<32x256xf32>, i32 -> vector<32x256xf32>
    %c8_80 = arith.constant 8 : index
    %c0_81 = arith.constant 0 : index
    %161 = vector.load %arg2[%c8_80, %c0_81] : memref<9x256xf32, #tpu.memory_space<vmem>>, vector<1x256xf32>
    %162 = vector.broadcast %161 : vector<1x256xf32> to vector<32x256xf32>
    %163 = arith.mulf %160, %162 : vector<32x256xf32>
    %c0_82 = arith.constant 0 : index
    %c8_83 = arith.constant 8 : index
    %164 = vector.load %arg6[%c0_82, %c8_83] : memref<32x9xf32, #tpu.memory_space<vmem>>, vector<32x1xf32>
    %165 = vector.broadcast %164 : vector<32x1xf32> to vector<32x256xf32>
    %166 = arith.mulf %165, %163 : vector<32x256xf32>
    %167 = arith.addf %159, %166 : vector<32x256xf32>
    %cst_84 = arith.constant dense<0.000000e+00> : vector<256xf32>
    %168 = vector.multi_reduction <add>, %167, %cst_84 [0] : vector<32x256xf32> to vector<256xf32>
    %169 = vector.shape_cast %168 : vector<256xf32> to vector<1x256xf32>
    %170 = arith.addf %169, %1 : vector<1x256xf32>
    %171 = vector.shape_cast %170 : vector<1x256xf32> to vector<1x1x256xf32>
    %c0_85 = arith.constant 0 : index
    %c0_86 = arith.constant 0 : index
    %c0_87 = arith.constant 0 : index
    %172 = vector.load %arg7[%c0_85, %c0_86, %c0_87] : memref<1x1x256xf32, #tpu.memory_space<vmem>>, vector<1x1x256xf32>
    tpu.vector_store %arg7[%c0_85, %c0_86, %c0_87], %171 {strides = array<i32>} : memref<1x1x256xf32, #tpu.memory_space<vmem>>, vector<1x1x256xf32>,
    return
  }
  func.func @transform_0(%arg0: i32) -> (i32, i32, i32) {
    %c0_i32 = arith.constant 0 : i32
    %c0_i32_0 = arith.constant 0 : i32
    %c0_i32_1 = arith.constant 0 : i32
    return %arg0, %c0_i32, %c0_i32_0 : i32, i32, i32
  }
  func.func @transform_1(%arg0: i32) -> (i32, i32) {
    %c0_i32 = arith.constant 0 : i32
    %c0_i32_0 = arith.constant 0 : i32
    %c0_i32_1 = arith.constant 0 : i32
    return %c0_i32, %c0_i32_0 : i32, i32
  }
  func.func @transform_2(%arg0: i32) -> (i32, i32) {
    %c0_i32 = arith.constant 0 : i32
    %c0_i32_0 = arith.constant 0 : i32
    %c0_i32_1 = arith.constant 0 : i32
    return %c0_i32, %c0_i32_0 : i32, i32
  }
  func.func @transform_3(%arg0: i32) -> (i32, i32, i32) {
    %c0_i32 = arith.constant 0 : i32
    %c0_i32_0 = arith.constant 0 : i32
    %c0_i32_1 = arith.constant 0 : i32
    %c0_i32_2 = arith.constant 0 : i32
    return %c0_i32, %c0_i32_0, %c0_i32_1 : i32, i32, i32
  }
  func.func @transform_4(%arg0: i32) -> (i32, i32, i32) {
    %c0_i32 = arith.constant 0 : i32
    %c0_i32_0 = arith.constant 0 : i32
    %c0_i32_1 = arith.constant 0 : i32
    %c0_i32_2 = arith.constant 0 : i32
    return %c0_i32, %c0_i32_0, %c0_i32_1 : i32, i32, i32
  }
  func.func @transform_5(%arg0: i32) -> (i32, i32) {
    %c0_i32 = arith.constant 0 : i32
    %c0_i32_0 = arith.constant 0 : i32
    %c0_i32_1 = arith.constant 0 : i32
    return %c0_i32, %c0_i32_0 : i32, i32
  }
  func.func @transform_6(%arg0: i32) -> (i32, i32, i32) {
    %c0_i32 = arith.constant 0 : i32
    %c0_i32_0 = arith.constant 0 : i32
    %c0_i32_1 = arith.constant 0 : i32
    return %arg0, %c0_i32, %c0_i32_0 : i32, i32, i32
  }
}

</mosaic_0001>

<bundles_post_ra>
// kernel: squeeze.1
= control target key start
LH: loop header
LB: loop body
LE: loop exit
PB: predicated region body
PF: predicated region fallthrough
CT: control target
= control target key end

     0   :  { %s88_s8 = smov 112   ;;  %s89_s11 = smov 80   ;;  %vm3_vm0 = vcmask 130048   ;;  %vm9_vm1 = vcmask 1048448   ;;  %vm15_vm2 = vcmask 917248   ;;  %vm21_vm3 = vcmask 786048   ;;  %s141_s0 = inlined_call_operand.vmem [shape: f32[2,1,16,16], index: 0, kind: input, shape index: {}]   ;;  %s142_s1 = inlined_call_operand.vmem [shape: f32[2,1,256], index: 1, kind: output, shape index: {}]  }
   0x1   :  { %v71_v0 = vld [vmem:[%s141_s0 + $0x7] ss:$8 sm:$0xf]   ;;  %v73_v1 = vld [vmem:[%s141_s0 + $0x5] ss:$8 sm:$0xf]  }
   0x2   :  { %7 = vrot.lane.b32.xlu0 %v71_v0, %s88_s8  ;;  %19 = vrot.lane.b32.xlu1 %v73_v1, %s89_s11  ;;  %v75_v2 = vld [vmem:[%s141_s0 + $0x3] ss:$8 sm:$0xf]   ;;  %s90_s14 = smov 48   ;;  %s91_s19 = smov 96   ;;  %vm27_vm4 = vcmask 654848  }
   0x3   :  { %31 = vrot.lane.b32.xlu2 %v75_v2, %s90_s14  ;;  %v72_v3 = vld [vmem:[%s141_s0 + $0x6] ss:$8 sm:$0xf]   ;;  %v74_v4 = vld [vmem:[%s141_s0 + $0x4] ss:$8 sm:$0xf]  }
   0x4   :  { %s92_s20 = smov 64   ;;  %v76_v5 = vld [vmem:[%s141_s0 + $0x2] ss:$8 sm:$0xf]   ;;  %s93_s23 = smov 32   ;;  %vm33_vm5 = vcmask 523648  }
   0x5   :  { %v77_v6 = vld [vmem:[%s141_s0 + $0x1] ss:$8 sm:$0xf]   ;;  %s94_s26 = smov 16   ;;  %vm39_vm6 = vcmask 392448   ;;  %vm45_vm7 = vcmask 261248  }
   0x6   :  { %v2_v7 = vld [vmem:[%s141_s0] ss:$8 sm:$0xf]  }
   0x7   :  { %4 = vst.msk [vmem:[#allocation0] ss:$8 sm:$0xf] %vm3_vm0, %v2_v7  }
   0xa   :  { %13 = vrot.lane.b32.xlu0 %v72_v3, %s91_s19  ;;  %25 = vrot.lane.b32.xlu1 %v74_v4, %s92_s20 }
   0xb   :  { %37 = vrot.lane.b32.xlu2 %v76_v5, %s93_s23 }
  0x12   :  { %43 = vrot.lane.b32.xlu0 %v77_v6, %s94_s26 }
  0x5d   :  { %v32_v8 = vpop.permute.xlu2 %31  }
  0x65   :  { %v38_v9 = vpop.permute.xlu2 %37  }
  0x74   :  { %v8_v10 = vpop.permute.xlu0 %7   ;;  %v20_v11 = vpop.permute.xlu1 %19  }
  0x75   :  { %10 = vst.msk [vmem:[#allocation0] ss:$8 sm:$0xf] %vm9_vm1, %v8_v10  }
  0x7c   :  { %v14_v12 = vpop.permute.xlu0 %13   ;;  %v26_v13 = vpop.permute.xlu1 %25  }
  0x7d   :  { %16 = vst.msk [vmem:[#allocation0] ss:$8 sm:$0xf] %vm15_vm2, %v14_v12  }
  0x7e   :  { %22 = vst.msk [vmem:[#allocation0] ss:$8 sm:$0xf] %vm21_vm3, %v20_v11  }
  0x7f   :  { %28 = vst.msk [vmem:[#allocation0] ss:$8 sm:$0xf] %vm27_vm4, %v26_v13  }
  0x80   :  { %34 = vst.msk [vmem:[#allocation0] ss:$8 sm:$0xf] %vm33_vm5, %v32_v8  }
  0x81   :  { %40 = vst.msk [vmem:[#allocation0] ss:$8 sm:$0xf] %vm39_vm6, %v38_v9  }
  0x84   :  { %v44_v14 = vpop.permute.xlu0 %43  }
  0x85   :  { %46 = vst.msk [vmem:[#allocation0] ss:$8 sm:$0xf] %vm45_vm7, %v44_v14  }
  0x8c   :  { %v49_v15 = vld [vmem:[#allocation0] sm:$0x1]  ;;  %v54_v16 = vld [vmem:[#allocation0 + $0x8] sm:$0x1]  ;;  %v60_v17 = vld [vmem:[#allocation0 + $0x10] sm:$0x1] }
  0x8d   :  { %52 = vst [vmem:[%s142_s1] sm:$0x1] %v49_v15  ;;  %v66_v18 = vld [vmem:[#allocation0 + $0x18] sm:$0x1] }
  0x8e   :  { %78 = vst [vmem:[%s142_s1 + $0x1] sm:$0x1] %v54_v16 }
  0x8f   :  { %79 = vst [vmem:[%s142_s1 + $0x2] sm:$0x1] %v60_v17 }
  0x90   :  { %80 = vst [vmem:[%s142_s1 + $0x3] sm:$0x1] %v66_v18 }

// kernel: net_forward_pallas.1
= control target key start
LH: loop header
LB: loop body
LE: loop exit
PB: predicated region body
PF: predicated region fallthrough
CT: control target
= control target key end

     0   :  { %s8335_s21 = smov 0   ;;  %s12438_s0 = inlined_call_operand.vmem [shape: f32[2,1,256], index: 0, kind: input, shape index: {}]   ;;  %s12439_s1 = inlined_call_operand.vmem [shape: f32[9,256], index: 1, kind: input, shape index: {}]   ;;  %s12440_s2 = inlined_call_operand.vmem [shape: f32[32,9], index: 2, kind: input, shape index: {}]   ;;  %s12441_s3 = inlined_call_operand.vmem [shape: f32[54,32,32], index: 3, kind: input, shape index: {}]   ;;  %s12442_s4 = inlined_call_operand.vmem [shape: f32[6,32,32], index: 4, kind: input, shape index: {}]   ;;  %s12443_s5 = inlined_call_operand.vmem [shape: f32[32,9], index: 5, kind: input, shape index: {}]   ;;  %s12444_s6 = inlined_call_operand.vmem [shape: f32[2,1,256], index: 6, kind: output, shape index: {}]  }
   0x1 LB: > { %s7943_s22 = sadd.s32 4294967295, %s8237_s21   ;;  %p7947_p0 = scmp.ge.s32.totalorder %s8237_s21, 1  ;;  %s8237_s21 = sphi %s8335_s21, %s16_s21  }
   0x2   : > { %p211_p1 = scmp.lt.s32.totalorder %s8237_s21, 3 }
   0x4   : > { %p212_p2 = pnand %p7947_p0, %p211_p1 }
   0x6   : > { %215 = sbr.rel (%p212_p2) target bundleno = 2574 (0xa0e), region = 44 }
   0xb   : > { %v8346_v0 = vld [vmem:[%s12440_s2 + $0x10] sm:$0xff]  ;;  %v8351_v1 = vld [vmem:[%s12440_s2] sm:$0xff]  ;;  %p239_p3 = scmp.lt.s32.totalorder %s7943_s22, 1  ;;  %v12462_v2 = vmov 0   ;;  %v12460_v3 = vmov 1   ;;  %v8371_v6 = vld [vmem:[%s12440_s2 + $0x18] sm:$0xff]  ;;  %v12445_v21 = vlaneseq }
   0xc   : > { %8121 = vset.pattern.permute.xlu2 %v12462_v2  ;;  %8120 = vset.pattern.permute.xlu1 %v12462_v2  ;;  %v8376_v7 = vld [vmem:[%s12440_s2 + $0x8] sm:$0xff]  ;;  %s8277_s14 = smov 17   ;;  %s8278_s15 = smov 16   ;;  %v12458_v9 = vmov 2   ;;  %v12456_v10 = vmov 3   ;;  %v12454_v11 = vmov 4  }
   0xd   : > { %286 = vperm.xlu2 %8121, %v8346_v0   ;;  %276 = vperm.xlu1 %8120, %v8351_v1   ;;  %s12565_s22 = smov (!%p239_p3, %s7943_s22), 1  ;;  %s8279_s16 = smov 15   ;;  %v12452_v12 = vmov 5   ;;  %v12450_v13 = vmov 6   ;;  %v12448_v16 = vmov 7   ;;  %v12446_v18 = vmov 8  }
   0xe   : > { %8123 = vset.pattern.permute.xlu0 %v12460_v3  ;;  %s7948_s27 = sshll.u32 %s12565_s22, 1  ;;  %s8281_s17 = smov 1   ;;  %v8461_v25 = vand.u32 127, %v12445_v21  ;;  %v262_v26 = vld [vmem:[%s12439_s1] ss:$8 sm:$0x3] }
   0xf   : > { %s242_s30 = scalar_lea.vmem %s12438_s0, %s7948_s27  ;;  %s8364_s9 = scalar_lea.vmem %s12444_s6, %s7948_s27  ;;  %v264_v27 = vperm.slane %v262_v26, 0  ;;  %v265_v28 = vperm.slane %v262_v26, 1  ;;  %v7950_v36 = vld [vmem:[%s12439_s1 + $0x1] ss:$8 sm:$0x3] }
  0x10   : > { %v247_v4 = vld [vmem:[%s242_s30] sm:$0x3]  ;;  %s8285_s18 = smov 127   ;;  %s8286_s19 = smov 112   ;;  %12481 = vst [vmem:[#allocation5_spill] sm:$0xff] %v8461_v25  ;;  %vm259_vm0 = vcmp.lt.s32.totalorder %v8461_v25, 17 }
  0x11   : > { %v8366_v5 = vperm.slane %v247_v4, 0  ;;  %v8382_v8 = vperm.slane %v247_v4, 1  ;;  %s8288_s20 = smov 113   ;;  %s8291_s22 = smov 111   ;;  %vm316_vm1 = vcmp.lt.s32.totalorder %v8461_v25, 16  ;;  %v322_v39 = vperm.slane %v7950_v36, 0 }
  0x12   : > { %v323_v40 = vperm.slane %v7950_v36, 1  ;;  %v7951_v58 = vld [vmem:[%s12439_s1 + $0x2] ss:$8 sm:$0x3]  ;;  %vm366_vm2 = vcmp.lt.s32.totalorder %v8461_v25, 15  ;;  %vm416_vm3 = vcmp.lt.s32.totalorder %v8461_v25, 1 }
  0x13   : > { %12479 = vst [vmem:[#allocation3_spill] sm:$0xff] %v8366_v5  ;;  %253 = vrot.lane.b32.xlu0 %v8366_v5, %s8277_s14  ;;  %v372_v63 = vperm.slane %v7951_v58, 0  ;;  %v373_v4 = vperm.slane %v7951_v58, 1  ;;  %vm498_vm4 = vcmp.lt.s32.totalorder %v8461_v25, 127  ;;  %vm598_vm5 = vcmp.lt.s32.totalorder %v8461_v25, 112  ;;  %s8730_s25 = smov 0  }
  0x14   : > { %12480 = vst [vmem:[#allocation4_spill] sm:$0xff] %v8382_v8  ;;  %vm548_vm6 = vcmp.lt.s32.totalorder %v8461_v25, 113  ;;  %vm648_vm7 = vcmp.lt.s32.totalorder %v8461_v25, 111 }
  0x15   : > { %291 = vperm.xlu2 %8121, %v8371_v6   ;;  %281 = vperm.xlu1 %8120, %v8376_v7  }
  0x1b   : > { %255 = vrot.lane.b32.xlu0 %v8382_v8, %s8277_s14 }
  0x1d   : > { %8122 = vset.pattern.permute.xlu2 %v12460_v3  ;;  %314 = vrot.lane.b32.xlu1 %v8382_v8, %s8278_s15 }
  0x1e   : > { %329 = vperm.xlu2 %8122, %v8351_v1   ;;  %8124 = vset.pattern.permute.xlu1 %v12460_v3 }
  0x23   : > { %312 = vrot.lane.b32.xlu0 %v8366_v5, %s8278_s15 }
  0x25   : > { %337 = vperm.xlu1 %8124, %v8346_v0  }
  0x26   : > { %341 = vperm.xlu2 %8122, %v8371_v6  }
  0x2b   : > { %333 = vperm.xlu0 %8123, %v8376_v7  }
  0x2d   : > { %362 = vrot.lane.b32.xlu1 %v8366_v5, %s8279_s16 }
  0x2e   : > { %364 = vrot.lane.b32.xlu2 %v8382_v8, %s8279_s16  ;;  %8126 = vset.pattern.permute.xlu1 %v12458_v9 }
  0x2f   : > { %8127 = vset.pattern.permute.xlu2 %v12458_v9 }
  0x33   : > { %8125 = vset.pattern.permute.xlu0 %v12458_v9 }
  0x34   : > { %379 = vperm.xlu0 %8125, %v8351_v1  }
  0x35   : > { %383 = vperm.xlu1 %8126, %v8376_v7  }
  0x36   : > { %387 = vperm.xlu2 %8127, %v8346_v0  }
  0x3c   : > { %414 = vrot.lane.b32.xlu0 %v8382_v8, %s8281_s17 }
  0x3d   : > { %391 = vperm.xlu1 %8126, %v8371_v6   ;;  %8130 = vset.pattern.permute.xlu0 %v12456_v10 }
  0x3e   : > { %412 = vrot.lane.b32.xlu2 %v8366_v5, %s8281_s17 }
  0x3f   : > { %8129 = vset.pattern.permute.xlu2 %v12456_v10 }
  0x44   : > { %437 = vperm.xlu0 %8130, %v8346_v0  }
  0x45   : > { %8128 = vset.pattern.permute.xlu1 %v12456_v10 }
  0x46   : > { %433 = vperm.xlu2 %8129, %v8376_v7   ;;  %429 = vperm.xlu1 %8128, %v8351_v1  }
  0x4c   : > { %8133 = vset.pattern.permute.xlu0 %v12454_v11 }
  0x4d   : > { %475 = vperm.xlu0 %8133, %v8371_v6  }
  0x4e   : > { %8131 = vset.pattern.permute.xlu2 %v12454_v11  ;;  %441 = vperm.xlu1 %8128, %v8371_v6  }
  0x4f   : > { %463 = vperm.xlu2 %8131, %v8351_v1  }
  0x55   : > { %8136 = vset.pattern.permute.xlu0 %v12452_v12 }
  0x56   : > { %8132 = vset.pattern.permute.xlu1 %v12454_v11  ;;  %519 = vperm.xlu0 %8136, %v8346_v0  }
  0x57   : > { %471 = vperm.xlu2 %8131, %v8346_v0   ;;  %467 = vperm.xlu1 %8132, %v8376_v7  }
  0x5e   : > { %596 = vrot.lane.b32.xlu0 %v8382_v8, %s8286_s19 }
  0x5f   : > { %496 = vrot.lane.b32.xlu2 %v8382_v8, %s8285_s18  ;;  %494 = vrot.lane.b32.xlu1 %v8366_v5, %s8285_s18 }
  0x60   : > { %8135 = vset.pattern.permute.xlu2 %v12452_v12  ;;  %8134 = vset.pattern.permute.xlu1 %v12452_v12 }
  0x61   : > { %8137 = vset.pattern.permute.xlu0 %v12450_v13 }
  0x66   : > { %561 = vperm.xlu0 %8137, %v8351_v1  }
  0x67   : > { %515 = vperm.xlu2 %8135, %v8376_v7   ;;  %511 = vperm.xlu1 %8134, %v8351_v1   ;;  %v287_v14 = vpop.permute.xlu2 %286 }
  0x6e   : > { %8141 = vset.pattern.permute.xlu0 %v12448_v16 }
  0x6f   : > { %544 = vrot.lane.b32.xlu2 %v8366_v5, %s8288_s20  ;;  %523 = vperm.xlu1 %8134, %v8371_v6   ;;  %v292_v15 = vpop.permute.xlu2 %291 }
  0x70   : > { %8139 = vset.pattern.permute.xlu2 %v12450_v13  ;;  %615 = vperm.xlu0 %8141, %v8376_v7  }
  0x77   : > { %594 = vrot.lane.b32.xlu2 %v8366_v5, %s8286_s19  ;;  %546 = vrot.lane.b32.xlu1 %v8382_v8, %s8288_s20 }
  0x78   : > { %v330_v17 = vpop.permute.xlu2 %329  ;;  %8138 = vset.pattern.permute.xlu1 %v12450_v13  ;;  %8145 = vset.pattern.permute.xlu0 %v12446_v18 }
  0x79   : > { %669 = vperm.xlu0 %8145, %v8346_v0  }
  0x7f   : > { %v277_v19 = vpop.permute.xlu1 %276  ;;  %646 = vrot.lane.b32.xlu2 %v8382_v8, %s8291_s22  ;;  %644 = vrot.lane.b32.xlu1 %v8366_v5, %s8291_s22 }
  0x80   : > { %v342_v20 = vpop.permute.xlu2 %341 }
  0x85   : > { %v254_v22 = vpop.permute.xlu0 %253 }
  0x87   : > { %v282_v23 = vpop.permute.xlu1 %281  ;;  %569 = vperm.xlu2 %8139, %v8346_v0   ;;  %565 = vperm.xlu1 %8138, %v8376_v7  }
  0x88   : > { %v8458_v24 = vpop.permute.xlu2 %364 }
  0x8d   : > { %v256_v29 = vpop.permute.xlu0 %255 }
  0x8e   : > { %v260_v30 = vsel %vm259_vm0, %v254_v22, %v256_v29  ;;  %v261_v31 = vsel %vm259_vm0, %v256_v29, %v254_v22 }
  0x8f   : > { %v315_v32 = vpop.permute.xlu1 %314  ;;  %8140 = vset.pattern.permute.xlu2 %v12448_v16  ;;  %573 = vperm.xlu1 %8138, %v8371_v6   ;;  %v268_v33 = vmul.f32 %v264_v27, %v261_v31  ;;  %v269_v34 = vmul.f32 %v265_v28, %v260_v30 }
  0x90   : > { %611 = vperm.xlu2 %8140, %v8351_v1   ;;  %v388_v35 = vpop.permute.xlu2 %387 }
  0x91   : > { %v294_v37 = vperm.slane %v268_v33, 0  ;;  %v295_v38 = vperm.slane %v269_v34, 0 }
  0x93   : > { %v300_v41 = vmul.f32 %v294_v37, %v287_v14  ;;  %v301_v42 = vmul.f32 %v295_v38, %v287_v14  ;;  %v298_v43 = vmul.f32 %v294_v37, %v282_v23  ;;  %v299_v44 = vmul.f32 %v295_v38, %v282_v23 }
  0x94   : > { %v296_v45 = vmul.f32 %v294_v37, %v277_v19  ;;  %v297_v46 = vmul.f32 %v295_v38, %v277_v19  ;;  %v302_v47 = vmul.f32 %v294_v37, %v292_v15  ;;  %v303_v48 = vmul.f32 %v295_v38, %v292_v15 }
  0x95   : > { %v313_v49 = vpop.permute.xlu0 %312 }
  0x96   : > { %v317_v50 = vsel %vm316_vm1, %v313_v49, %v315_v32  ;;  %v318_v51 = vsel %vm316_vm1, %v315_v32, %v313_v49 }
  0x97   : > { %v338_v52 = vpop.permute.xlu1 %337  ;;  %8142 = vset.pattern.permute.xlu1 %v12448_v16  ;;  %v326_v53 = vmul.f32 %v322_v39, %v318_v51  ;;  %v327_v54 = vmul.f32 %v323_v40, %v317_v50 }
  0x98   : > { %623 = vperm.xlu2 %8140, %v8371_v6   ;;  %619 = vperm.xlu1 %8142, %v8346_v0   ;;  %v413_v55 = vpop.permute.xlu2 %412 }
  0x99   : > { %v344_v56 = vperm.slane %v326_v53, 0  ;;  %v345_v57 = vperm.slane %v327_v54, 0 }
  0x9b   : > { %v350_v59 = vmul.f32 %v344_v56, %v338_v52  ;;  %v351_v60 = vmul.f32 %v345_v57, %v338_v52  ;;  %v346_v61 = vmul.f32 %v344_v56, %v330_v17  ;;  %v347_v62 = vmul.f32 %v345_v57, %v330_v17 }
  0x9c   : > { %v352_v14 = vmul.f32 %v344_v56, %v342_v20  ;;  %v353_v15 = vmul.f32 %v345_v57, %v342_v20 }
  0x9d   : > { %v358_v19 = vadd.f32 %v350_v59, %v300_v41  ;;  %v359_v22 = vadd.f32 %v351_v60, %v301_v42  ;;  %v334_v0 = vpop.permute.xlu0 %333  ;;  %v354_v23 = vadd.f32 %v346_v61, %v296_v45  ;;  %v355_v26 = vadd.f32 %v347_v62, %v297_v46 }
  0x9e   : > { %v348_v27 = vmul.f32 %v344_v56, %v334_v0  ;;  %v349_v28 = vmul.f32 %v345_v57, %v334_v0  ;;  %v360_v30 = vadd.f32 %v352_v14, %v302_v47  ;;  %v361_v31 = vadd.f32 %v353_v15, %v303_v48 }
  0x9f   : > { %v363_v29 = vpop.permute.xlu1 %362 }
  0xa0   : > { %v367_v32 = vsel %vm366_vm2, %v363_v29, %v8458_v24  ;;  %v368_v17 = vsel %vm366_vm2, %v8458_v24, %v363_v29  ;;  %8144 = vset.pattern.permute.xlu2 %v12446_v18  ;;  %8143 = vset.pattern.permute.xlu1 %v12446_v18  ;;  %v434_v20 = vpop.permute.xlu2 %433  ;;  %v356_v33 = vadd.f32 %v348_v27, %v298_v43 }
  0xa1   : > { %v357_v34 = vadd.f32 %v349_v28, %v299_v44  ;;  %v376_v36 = vmul.f32 %v372_v63, %v368_v17  ;;  %v377_v37 = vmul.f32 %v373_v4, %v367_v32  ;;  %665 = vperm.xlu2 %8144, %v8376_v7   ;;  %661 = vperm.xlu1 %8143, %v8351_v1   ;;  %v7952_v1 = vld [vmem:[%s12439_s1 + $0x3] ss:$8 sm:$0x3] }
  0xa2   : > { %v422_v7 = vperm.slane %v7952_v1, 0 }
  0xa3   : > { %v394_v38 = vperm.slane %v376_v36, 0  ;;  %v395_v39 = vperm.slane %v377_v37, 0 }
  0xa5   : > { %v400_v40 = vmul.f32 %v394_v38, %v388_v35  ;;  %v401_v41 = vmul.f32 %v395_v39, %v388_v35  ;;  %v423_v35 = vperm.slane %v7952_v1, 1 }
  0xa6   : > { %v380_v45 = vpop.permute.xlu0 %379 }
  0xa7   : > { %v384_v42 = vpop.permute.xlu1 %383  ;;  %v408_v24 = vadd.f32 %v400_v40, %v358_v19  ;;  %v409_v46 = vadd.f32 %v401_v41, %v359_v22  ;;  %v396_v49 = vmul.f32 %v394_v38, %v380_v45  ;;  %v397_v50 = vmul.f32 %v395_v39, %v380_v45 }
  0xa8   : > { %v398_v47 = vmul.f32 %v394_v38, %v384_v42  ;;  %v399_v48 = vmul.f32 %v395_v39, %v384_v42 }
  0xa9   : > { %v464_v43 = vpop.permute.xlu2 %463  ;;  %v404_v52 = vadd.f32 %v396_v49, %v354_v23  ;;  %v405_v53 = vadd.f32 %v397_v50, %v355_v26  ;;  %673 = vperm.xlu1 %8143, %v8371_v6  }
  0xaa   : > { %v406_v44 = vadd.f32 %v398_v47, %v356_v33  ;;  %v407_v51 = vadd.f32 %v399_v48, %v357_v34  ;;  %v478_v17 = vmul.f32 %v464_v43, %v8366_v5 }
  0xae   : > { %v415_v56 = vpop.permute.xlu0 %414 }
  0xaf   : > { %v392_v54 = vpop.permute.xlu1 %391  ;;  %v417_v59 = vsel %vm416_vm3, %v413_v55, %v415_v56  ;;  %v418_v60 = vsel %vm416_vm3, %v415_v56, %v413_v55 }
  0xb0   : > { %v402_v57 = vmul.f32 %v394_v38, %v392_v54  ;;  %v403_v58 = vmul.f32 %v395_v39, %v392_v54  ;;  %v426_v61 = vmul.f32 %v422_v7, %v418_v60  ;;  %v427_v6 = vmul.f32 %v423_v35, %v417_v59 }
  0xb1   : > { %v472_v62 = vpop.permute.xlu2 %471 }
  0xb2   : > { %v410_v63 = vadd.f32 %v402_v57, %v360_v30  ;;  %v411_v4 = vadd.f32 %v403_v58, %v361_v31  ;;  %v444_v14 = vperm.slane %v426_v61, 0  ;;  %v445_v15 = vperm.slane %v427_v6, 0  ;;  %v7953_v57 = vld [vmem:[%s12439_s1 + $0x5] ss:$8 sm:$0x3] }
  0xb3   : > { %v482_v27 = vmul.f32 %v472_v62, %v8366_v5  ;;  %v483_v28 = vmul.f32 %v472_v62, %v8382_v8  ;;  %v479_v30 = vmul.f32 %v464_v43, %v8382_v8  ;;  %v504_v58 = vperm.slane %v7953_v57, 0 }
  0xb4   : > { %v448_v19 = vmul.f32 %v444_v14, %v434_v20  ;;  %v449_v22 = vmul.f32 %v445_v15, %v434_v20  ;;  %v505_v59 = vperm.slane %v7953_v57, 1 }
  0xb6   : > { %v438_v0 = vpop.permute.xlu0 %437  ;;  %v8508_v23 = vadd.f32 %v448_v19, %v406_v44  ;;  %v8510_v26 = vadd.f32 %v449_v22, %v407_v51 }
  0xb7   : > { %v450_v29 = vmul.f32 %v444_v14, %v438_v0  ;;  %v451_v55 = vmul.f32 %v445_v15, %v438_v0 }
  0xb8   : > { %v430_v32 = vpop.permute.xlu1 %429 }
  0xb9   : > { %v446_v31 = vmul.f32 %v444_v14, %v430_v32  ;;  %v447_v33 = vmul.f32 %v445_v15, %v430_v32  ;;  %v497_v34 = vpop.permute.xlu2 %496  ;;  %v458_v20 = vadd.f32 %v450_v29, %v408_v24  ;;  %v459_v36 = vadd.f32 %v451_v55, %v409_v46 }
  0xbb   : > { %v454_v37 = vadd.f32 %v446_v31, %v404_v52  ;;  %v455_v38 = vadd.f32 %v447_v33, %v405_v53  ;;  %v8516_v39 = vadd.f32 %v482_v27, %v458_v20  ;;  %v8518_v40 = vadd.f32 %v483_v28, %v459_v36  ;;  %v7956_v33 = vld [vmem:[%s12439_s1 + $0x10] ss:$8 sm:$0x3] }
  0xbd   : > { %v8520_v41 = vadd.f32 %v478_v17, %v454_v37  ;;  %v8522_v42 = vadd.f32 %v479_v30, %v455_v38 }
  0xbf   : > { %v8528_v52 = vpop.permute.xlu0 %475 }
  0xc0   : > { %v442_v45 = vpop.permute.xlu1 %441 }
  0xc1   : > { %v452_v47 = vmul.f32 %v444_v14, %v442_v45  ;;  %v453_v48 = vmul.f32 %v445_v15, %v442_v45  ;;  %v516_v49 = vpop.permute.xlu2 %515  ;;  %v7954_v15 = vld [vmem:[%s12439_s1 + $0x6] ss:$8 sm:$0x3] }
  0xc2   : > { %v554_v29 = vperm.slane %v7954_v15, 0  ;;  %v555_v55 = vperm.slane %v7954_v15, 1 }
  0xc3   : > { %v8524_v50 = vadd.f32 %v452_v47, %v410_v63  ;;  %v8526_v43 = vadd.f32 %v453_v48, %v411_v4  ;;  %v7955_v63 = vld [vmem:[%s12439_s1 + $0x7] ss:$8 sm:$0x3] }
  0xc4   : > { %v604_v19 = vperm.slane %v7955_v63, 0  ;;  %v605_v22 = vperm.slane %v7955_v63, 1 }
  0xc8   : > { %v8532_v7 = vpop.permute.xlu0 %519 }
  0xc9   : > { %v468_v24 = vpop.permute.xlu1 %467  ;;  %v545_v46 = vpop.permute.xlu2 %544 }
  0xca   : > { %v480_v36 = vmul.f32 %v468_v24, %v8366_v5  ;;  %v481_v37 = vmul.f32 %v468_v24, %v8382_v8 }
  0xcc   : > { %v489_v24 = vadd.f32 %v481_v37, %v8510_v26 }
  0xd0   : > { %v597_v56 = vpop.permute.xlu0 %596 }
  0xd1   : > { %v495_v44 = vpop.permute.xlu1 %494  ;;  %v595_v51 = vpop.permute.xlu2 %594 }
  0xd2   : > { %v499_v61 = vsel %vm498_vm4, %v495_v44, %v497_v34  ;;  %v500_v6 = vsel %vm498_vm4, %v497_v34, %v495_v44  ;;  %v599_v27 = vsel %vm598_vm5, %v595_v51, %v597_v56  ;;  %v600_v28 = vsel %vm598_vm5, %v597_v56, %v595_v51 }
  0xd3   : > { %v508_v4 = vmul.f32 %v504_v58, %v499_v61  ;;  %v509_v14 = vmul.f32 %v505_v59, %v500_v6  ;;  %v608_v38 = vmul.f32 %v604_v19, %v599_v27  ;;  %v609_v45 = vmul.f32 %v605_v22, %v600_v28 }
  0xd4   : > { %v654_v44 = vperm.slane %v7956_v33, 0  ;;  %v655_v51 = vperm.slane %v7956_v33, 1  ;;  %v488_v59 = vadd.f32 %v480_v36, %v8508_v23 }
  0xd5   : > { %v8562_v32 = vperm.slane %v508_v4, 0  ;;  %v8564_v17 = vperm.slane %v509_v14, 0  ;;  %v8588_v61 = vperm.slane %v609_v45, 0 }
  0xd7   : > { %v530_v57 = vmul.f32 %v8562_v32, %v516_v49  ;;  %v531_v58 = vmul.f32 %v8564_v17, %v516_v49 }
  0xd8   : > { %v8556_v0 = vpop.permute.xlu0 %561 }
  0xd9   : > { %v8530_v53 = vpop.permute.xlu1 %511  ;;  %v647_v1 = vpop.permute.xlu2 %646  ;;  %v538_v19 = vadd.f32 %v530_v57, %v488_v59  ;;  %v539_v22 = vadd.f32 %v531_v58, %v489_v24 }
  0xe1   : > { %v8534_v35 = vpop.permute.xlu1 %523  ;;  %v8536_v54 = vpop.permute.xlu2 %569 }
  0xe2   : > { %v616_v15 = vpop.permute.xlu0 %615 }
  0xe3   : > { %v631_v23 = vmul.f32 %v8588_v61, %v616_v15 }
  0xe9   : > { %v547_v60 = vpop.permute.xlu1 %546 }
  0xea   : > { %v8546_v62 = vpop.permute.xlu2 %611  ;;  %v549_v30 = vsel %vm548_vm6, %v545_v46, %v547_v60  ;;  %v550_v31 = vsel %vm548_vm6, %v547_v60, %v545_v46  ;;  %v8586_v60 = vperm.slane %v608_v38, 0 }
  0xeb   : > { %v558_v47 = vmul.f32 %v554_v29, %v549_v30  ;;  %v559_v48 = vmul.f32 %v555_v55, %v550_v31 }
  0xec   : > { %v630_v49 = vmul.f32 %v8586_v60, %v616_v15 }
  0xed   : > { %v8590_v6 = vperm.slane %v558_v47, 0  ;;  %v8592_v63 = vperm.slane %v559_v48, 0 }
  0xef   : > { %v582_v57 = vmul.f32 %v8590_v6, %v8536_v54  ;;  %v583_v58 = vmul.f32 %v8592_v63, %v8536_v54 }
  0xf1   : > { %v645_v34 = vpop.permute.xlu1 %644 }
  0xf2   : > { %v8574_v20 = vpop.permute.xlu2 %623  ;;  %v649_v46 = vsel %vm648_vm7, %v645_v34, %v647_v1  ;;  %v650_v56 = vsel %vm648_vm7, %v647_v1, %v645_v34 }
  0xf3   : > { %v658_v4 = vmul.f32 %v654_v44, %v649_v46  ;;  %v659_v14 = vmul.f32 %v655_v51, %v650_v56  ;;  %v532_v44 = vmul.f32 %v8562_v32, %v8532_v7  ;;  %v533_v51 = vmul.f32 %v8564_v17, %v8532_v7 }
  0xf4   : > { %v529_v7 = vmul.f32 %v8564_v17, %v8530_v53 }
  0xf5   : > { %v8598_v29 = vperm.slane %v658_v4, 0  ;;  %v8600_v55 = vperm.slane %v659_v14, 0  ;;  %v540_v59 = vadd.f32 %v532_v44, %v8516_v39  ;;  %v541_v24 = vadd.f32 %v533_v51, %v8518_v40  ;;  %v670_v14 = vpop.permute.xlu0 %669 }
  0xf6   : > { %v528_v4 = vmul.f32 %v8562_v32, %v8530_v53  ;;  %v578_v39 = vmul.f32 %v8590_v6, %v8556_v0  ;;  %v579_v40 = vmul.f32 %v8592_v63, %v8556_v0  ;;  %v534_v44 = vmul.f32 %v8562_v32, %v8534_v35 }
  0xf7   : > { %v682_v54 = vmul.f32 %v8598_v29, %v670_v14  ;;  %v683_v53 = vmul.f32 %v8600_v55, %v670_v14 }
  0xf9   : > { %v566_v1 = vpop.permute.xlu1 %565 }
  0xfa   : > { %v580_v26 = vmul.f32 %v8590_v6, %v566_v1  ;;  %v581_v27 = vmul.f32 %v8592_v63, %v566_v1 }
  0xfb   : > { %v666_v28 = vpop.permute.xlu2 %665 }
  0xfc   : > { %v588_v30 = vadd.f32 %v580_v26, %v538_v19  ;;  %v589_v31 = vadd.f32 %v581_v27, %v539_v22  ;;  %v680_v36 = vmul.f32 %v8598_v29, %v666_v28  ;;  %v681_v37 = vmul.f32 %v8600_v55, %v666_v28 }
  0xfd   : > { %v590_v19 = vadd.f32 %v582_v57, %v540_v59  ;;  %v591_v22 = vadd.f32 %v583_v58, %v541_v24  ;;  %v536_v28 = vadd.f32 %v528_v4, %v8520_v41  ;;  %v629_v41 = vmul.f32 %v8588_v61, %v8546_v62 }
  0xfe   : > { %v638_v33 = vadd.f32 %v630_v49, %v588_v30  ;;  %v639_v34 = vadd.f32 %v631_v23, %v589_v31  ;;  %v537_v30 = vadd.f32 %v529_v7, %v8522_v42  ;;  %v484_v31 = vmul.f32 %v8528_v52, %v8366_v5 }
 0x100   : > { %v8604_v38 = vadd.f32 %v680_v36, %v638_v33  ;;  %v8606_v45 = vadd.f32 %v681_v37, %v639_v34  ;;  %v485_v33 = vmul.f32 %v8528_v52, %v8382_v8  ;;  %v586_v36 = vadd.f32 %v578_v39, %v536_v28 }
 0x101   : > { %v574_v47 = vpop.permute.xlu1 %573  ;;  %v587_v37 = vadd.f32 %v579_v40, %v537_v30  ;;  %v535_v52 = vmul.f32 %v8564_v17, %v8534_v35  ;;  %v492_v51 = vadd.f32 %v484_v31, %v8524_v50 }
 0x102   : > { %v697_v48 = vadd.f32 %v8606_v45, %v8604_v38  ;;  %v708_v46 = vmul.f32 %v8604_v38, %v8604_v38  ;;  %v709_v56 = vmul.f32 %v8606_v45, %v8606_v45  ;;  %v584_v59 = vmul.f32 %v8590_v6, %v574_v47 }
 0x103   : > { %v637_v57 = vadd.f32 %v629_v41, %v587_v37  ;;  %v542_v32 = vadd.f32 %v534_v44, %v492_v51  ;;  %v634_v6 = vmul.f32 %v8586_v60, %v8574_v20 }
 0x104   : > { %698 = vadd.xlane.f32.xlu1 %v697_v48  ;;  %v717_v1 = vadd.f32 %v709_v56, %v708_v46  ;;  %v628_v48 = vmul.f32 %v8586_v60, %v8546_v62  ;;  %v493_v46 = vadd.f32 %v485_v33, %v8526_v43  ;;  %v585_v62 = vmul.f32 %v8592_v63, %v574_v47 }
 0x105   : > { %v592_v50 = vadd.f32 %v584_v59, %v542_v32  ;;  %v635_v63 = vmul.f32 %v8588_v61, %v8574_v20 }
 0x106   : > { %v636_v56 = vadd.f32 %v628_v48, %v586_v36  ;;  %v543_v7 = vadd.f32 %v535_v52, %v493_v46 }
 0x108   : > { %v593_v17 = vadd.f32 %v585_v62, %v543_v7 }
 0x10a   : > { %v620_v15 = vpop.permute.xlu1 %619 }
 0x10b   : > { %v632_v49 = vmul.f32 %v8586_v60, %v620_v15  ;;  %v633_v23 = vmul.f32 %v8588_v61, %v620_v15  ;;  %v642_v15 = vadd.f32 %v634_v6, %v592_v50 }
 0x10c   : > { %718 = vadd.xlane.f32.xlu1 %v717_v1  ;;  %v643_v1 = vadd.f32 %v635_v63, %v593_v17 }
 0x10d   : > { %v640_v26 = vadd.f32 %v632_v49, %v590_v19  ;;  %v641_v27 = vadd.f32 %v633_v23, %v591_v22 }
 0x10f   : > { %v8642_v34 = vadd.f32 %v682_v54, %v640_v26  ;;  %v8644_v0 = vadd.f32 %v683_v53, %v641_v27 }
 0x111   : > { %v700_v42 = vadd.f32 %v8644_v0, %v8642_v34  ;;  %v710_v54 = vmul.f32 %v8642_v34, %v8642_v34  ;;  %v711_v53 = vmul.f32 %v8644_v0, %v8644_v0 }
 0x113   : > { %701 = vadd.xlane.f32.xlu0 %v700_v42  ;;  %v662_v58 = vpop.permute.xlu1 %661  ;;  %v720_v26 = vadd.f32 %v711_v53, %v710_v54 }
 0x114   : > { %v678_v24 = vmul.f32 %v8598_v29, %v662_v58  ;;  %v679_v4 = vmul.f32 %v8600_v55, %v662_v58 }
 0x116   : > { %v8662_v14 = vadd.f32 %v678_v24, %v636_v56  ;;  %v8664_v35 = vadd.f32 %v679_v4, %v637_v57 }
 0x118   : > { %v694_v43 = vadd.f32 %v8664_v35, %v8662_v14 }
 0x11a   : > { %695 = vadd.xlane.f32.xlu2 %v694_v43 }
 0x11b   : > { %v674_v47 = vpop.permute.xlu1 %673 }
 0x11c   : > { %v684_v19 = vmul.f32 %v8598_v29, %v674_v47  ;;  %v685_v22 = vmul.f32 %v8600_v55, %v674_v47  ;;  %v706_v29 = vmul.f32 %v8662_v14, %v8662_v14  ;;  %v707_v55 = vmul.f32 %v8664_v35, %v8664_v35 }
 0x11e   : > { %v8674_v49 = vadd.f32 %v684_v19, %v642_v15  ;;  %v8676_v23 = vadd.f32 %v685_v22, %v643_v1  ;;  %v714_v40 = vadd.f32 %v707_v55, %v706_v29 }
 0x120   : > { %v703_v39 = vadd.f32 %v8676_v23, %v8674_v49  ;;  %v712_v60 = vmul.f32 %v8674_v49, %v8674_v49  ;;  %v713_v20 = vmul.f32 %v8676_v23, %v8676_v23 }
 0x122   : > { %704 = vadd.xlane.f32.xlu2 %v703_v39  ;;  %v723_v61 = vadd.f32 %v713_v20, %v712_v60 }
 0x124   : > { %724 = vadd.xlane.f32.xlu0 %v723_v61 }
 0x12a   : > { %715 = vadd.xlane.f32.xlu2 %v714_v40 }
 0x132   : > { %721 = vadd.xlane.f32.xlu2 %v720_v26 }
 0x177   : > { %v699_v27 = vpop.xlane.xlu1 %698 }
 0x178   : > { %v727_v28 = vmul.f32 0.00390625, %v699_v27 }
 0x17a   : > { %v735_v31 = vmul.f32 %v727_v28, %v727_v28  ;;  %v748_v62 = vsub.f32 %v8604_v38, %v727_v28  ;;  %v749_v24 = vsub.f32 %v8606_v45, %v727_v28 }
 0x17f   : > { %v719_v30 = vpop.xlane.xlu1 %718 }
 0x180   : > { %v731_v33 = vmul.f32 0.00390625, %v719_v30 }
 0x182   : > { %v739_v36 = vsub.f32 %v731_v33, %v735_v31 }
 0x184   : > { %v743_v37 = vmax.f32 %v739_v36, 0.0 }
 0x186   : > { %v755_v48 = vadd.f32 1e-05, %v743_v37  ;;  %v702_v52 = vpop.xlane.xlu0 %701 }
 0x187   : > { %v728_v60 = vmul.f32 0.00390625, %v702_v52 }
 0x188   : > { %8146 = vrsqrt.f32 %v755_v48  ;;  %vm774_vm9 = vweird.f32 %v755_v48 }
 0x189   : > { %v736_v40 = vmul.f32 %v728_v60, %v728_v60 }
 0x18d   : > { %v696_v42 = vpop.xlane.xlu2 %695 }
 0x18e   : > { %v8147_v41 = vpop.eup %8146  ;;  %v726_v6 = vmul.f32 0.00390625, %v696_v42 }
 0x18f   : > { %v769_v44 = vmul.f32 %v8147_v41, %v755_v48  ;;  %vm775_vm8 = vweird.f32 %v8147_v41 }
 0x190   : > { %vm776_vm10 = vmor %vm774_vm9, %vm775_vm8  ;;  %v734_v1 = vmul.f32 %v726_v6, %v726_v6 }
 0x191   : > { %v770_v51 = vmul.f32 %v8147_v41, %v769_v44 }
 0x193   : > { %v771_v46 = vmul.f32 0.5, %v770_v51 }
 0x195   : > { %v772_v56 = vsub.f32 1.5, %v771_v46  ;;  %v705_v57 = vpop.xlane.xlu2 %704 }
 0x196   : > { %v729_v59 = vmul.f32 0.00390625, %v705_v57 }
 0x197   : > { %v773_v58 = vmul.f32 %v8147_v41, %v772_v56  ;;  %v725_v4 = vpop.xlane.xlu0 %724 }
 0x198   : > { %v737_v7 = vmul.f32 %v729_v59, %v729_v59  ;;  %v733_v43 = vmul.f32 0.00390625, %v725_v4  ;;  %v752_v42 = vsub.f32 %v8674_v49, %v729_v59  ;;  %v753_v44 = vsub.f32 %v8676_v23, %v729_v59 }
 0x199   : > { %v777_v32 = vsel %vm776_vm10, %v8147_v41, %v773_v58 }
 0x19a   : > { %v8694_v50 = vmul.f32 %v777_v32, %v748_v62  ;;  %v8696_v17 = vmul.f32 %v777_v32, %v749_v24  ;;  %v741_v15 = vsub.f32 %v733_v43, %v737_v7  ;;  %v746_v7 = vsub.f32 %v8662_v14, %v726_v6 }
 0x19b   : > { %v747_v43 = vsub.f32 %v8664_v35, %v726_v6  ;;  %v750_v14 = vsub.f32 %v8642_v34, %v728_v60  ;;  %v751_v35 = vsub.f32 %v8644_v0, %v728_v60 }
 0x19c   : > { %v808_v63 = vmax.f32 %v8694_v50, 0.0   ;;  %v809_v47 = vmax.f32 %v8696_v17, 0.0   ;;  %v745_v38 = vmax.f32 %v741_v15, 0.0 }
 0x19d   : > { %v716_v45 = vpop.xlane.xlu2 %715 }
 0x19e   : > { %816 = vst [vmem:[#allocation2 + $0x18] sm:$0xff] %v808_v63  ;;  %v730_v19 = vmul.f32 0.00390625, %v716_v45  ;;  %v757_v22 = vadd.f32 1e-05, %v745_v38 }
 0x19f   : > { %817 = vst [vmem:[#allocation2 + $0x10] sm:$0xff] %v809_v47 }
 0x1a0   : > { %v738_v39 = vsub.f32 %v730_v19, %v734_v1  ;;  %8148 = vrsqrt.f32 %v757_v22  ;;  %vm794_vm12 = vweird.f32 %v757_v22 }
 0x1a2   : > { %v742_v20 = vmax.f32 %v738_v39, 0.0 }
 0x1a4   : > { %v754_v61 = vadd.f32 1e-05, %v742_v20 }
 0x1a5   : > { %v722_v29 = vpop.xlane.xlu2 %721 }
 0x1a6   : > { %8150 = vrsqrt.f32 %v754_v61  ;;  %v732_v55 = vmul.f32 0.00390625, %v722_v29  ;;  %v8149_v54 = vpop.eup %8148  ;;  %vm764_vm15 = vweird.f32 %v754_v61 }
 0x1a7   : > { %v789_v53 = vmul.f32 %v8149_v54, %v757_v22  ;;  %vm795_vm11 = vweird.f32 %v8149_v54 }
 0x1a8   : > { %v740_v26 = vsub.f32 %v732_v55, %v736_v40  ;;  %vm796_vm13 = vmor %vm794_vm12, %vm795_vm11 }
 0x1a9   : > { %v790_v27 = vmul.f32 %v8149_v54, %v789_v53 }
 0x1aa   : > { %v744_v28 = vmax.f32 %v740_v26, 0.0 }
 0x1ab   : > { %v791_v31 = vmul.f32 0.5, %v790_v27 }
 0x1ac   : > { %v8151_v30 = vpop.eup %8150  ;;  %v756_v33 = vadd.f32 1e-05, %v744_v28 }
 0x1ad   : > { %v759_v36 = vmul.f32 %v8151_v30, %v754_v61  ;;  %v792_v37 = vsub.f32 1.5, %v791_v31  ;;  %vm765_vm14 = vweird.f32 %v8151_v30 }
 0x1ae   : > { %8152 = vrsqrt.f32 %v756_v33  ;;  %vm766_vm8 = vmor %vm764_vm15, %vm765_vm14  ;;  %vm784_vm10 = vweird.f32 %v756_v33 }
 0x1af   : > { %v760_v48 = vmul.f32 %v8151_v30, %v759_v36  ;;  %v793_v41 = vmul.f32 %v8149_v54, %v792_v37 }
 0x1b1   : > { %v761_v52 = vmul.f32 0.5, %v760_v48  ;;  %v797_v51 = vsel %vm796_vm13, %v8149_v54, %v793_v41 }
 0x1b2   : > { %v804_v46 = vmul.f32 %v797_v51, %v752_v42  ;;  %v805_v56 = vmul.f32 %v797_v51, %v753_v44 }
 0x1b3   : > { %v762_v57 = vsub.f32 1.5, %v761_v52 }
 0x1b4   : > { %v8153_v58 = vpop.eup %8152  ;;  %v812_v62 = vmax.f32 %v804_v46, 0.0   ;;  %v813_v24 = vmax.f32 %v805_v56, 0.0  }
 0x1b5   : > { %v763_v4 = vmul.f32 %v8151_v30, %v762_v57  ;;  %v779_v32 = vmul.f32 %v8153_v58, %v756_v33  ;;  %vm785_vm9 = vweird.f32 %v8153_v58 }
 0x1b6   : > { %820 = vst [vmem:[#allocation2 + $0x28] sm:$0xff] %v812_v62  ;;  %vm786_vm11 = vmor %vm784_vm10, %vm785_vm9 }
 0x1b7   : > { %v767_v49 = vsel %vm766_vm8, %v8151_v30, %v763_v4  ;;  %v780_v23 = vmul.f32 %v8153_v58, %v779_v32  ;;  %821 = vst [vmem:[#allocation2 + $0x38] sm:$0xff] %v813_v24 }
 0x1b8   : > { %v798_v59 = vmul.f32 %v767_v49, %v746_v7  ;;  %v799_v15 = vmul.f32 %v767_v49, %v747_v43 }
 0x1b9   : > { %v781_v38 = vmul.f32 0.5, %v780_v23 }
 0x1ba   : > { %v806_v45 = vmax.f32 %v798_v59, 0.0   ;;  %v807_v1 = vmax.f32 %v799_v15, 0.0  }
 0x1bb   : > { %v782_v19 = vsub.f32 1.5, %v781_v38 }
 0x1bc   : > { %814 = vst [vmem:[#allocation2 + $0x30] sm:$0xff] %v806_v45 }
 0x1bd   : > { %815 = vst [vmem:[#allocation2] sm:$0xff] %v807_v1  ;;  %v783_v22 = vmul.f32 %v8153_v58, %v782_v19 }
 0x1bf   : > { %v787_v6 = vsel %vm786_vm11, %v8153_v58, %v783_v22 }
 0x1c0   : > { %v802_v39 = vmul.f32 %v787_v6, %v750_v14  ;;  %v803_v20 = vmul.f32 %v787_v6, %v751_v35 }
 0x1c2   : > { %v810_v61 = vmax.f32 %v802_v39, 0.0   ;;  %v811_v29 = vmax.f32 %v803_v20, 0.0  }
 0x1c4   : > { %818 = vst [vmem:[#allocation2 + $0x8] sm:$0xff] %v810_v61 }
 0x1c5   : > { %819 = vst [vmem:[#allocation2 + $0x20] sm:$0xff] %v811_v29 }
 0x1c6 LB: >> { %12483 = vst [vmem:[#allocation6_spill] sm:$0xff] %v8265_v1  ;;  %s8292_s26 = smov 16   ;;  %s8293_s27 = smov 17   ;;  %v7958_v0 = vld [vmem:[%s12439_s1 + $0x1] ss:$8 sm:$0x3]  ;;  %v8241_v24 = vphi %v813_v24, %v12543_v24   ;;  %s8273_s25 = sphi %s8730_s25, %s827_s25   ;;  %v8269_v45 = vphi %v806_v45, %v12550_v45   ;;  %v8265_v1 = vphi %v807_v1, %v12549_v1   ;;  %v8261_v63 = vphi %v808_v63, %v12548_v63   ;;  %v8257_v47 = vphi %v809_v47, %v12547_v47   ;;  %v8253_v61 = vphi %v810_v61, %v12546_v61   ;;  %v8249_v29 = vphi %v811_v29, %v12545_v29   ;;  %v8245_v62 = vphi %v812_v62, %v12544_v62  }
 0x1c7   : >> { %885 = vrot.lane.b32.xlu1 %v8253_v61, %s8292_s26  ;;  %887 = vrot.lane.b32.xlu0 %v8245_v62, %s8292_s26  ;;  %s8294_s28 = smov 15   ;;  %s7957_s29 = smul.u32 288, %s8273_s25  ;;  %vm926_vm12 = vcmask 261120   ;;  %v907_v40 = vperm.slane %v7958_v0, 0  ;;  %v908_v26 = vperm.slane %v7958_v0, 1 }
 0x1c8   : >> { %883 = vrot.lane.b32.xlu2 %v8261_v63, %s8292_s26  ;;  %s8295_s23 = smov 1   ;;  %s8297_s30 = smov 113  }
 0x1c9   : >> { %s8787_s8 = scalar_lea.vmem %s12441_s3, %s7957_s29  ;;  %s8298_s7 = smov 112  }
 0x1ca   : >> { %v7960_v50 = vld [vmem:[%s8787_s8 + $0x20] sm:$0xff]  ;;  %v7961_v31 = vld [vmem:[%s8787_s8 + $0x28] sm:$0xff]  ;;  %s8299_s12 = smov 111  }
 0x1cb   : >> { %v928_v54 = vsel %vm926_vm12, %v7960_v50, 0  ;;  %v931_v42 = vsel %vm926_vm12, %v7961_v31, 0 }
 0x1cc   : >> { %v8796_v27 = vand.u32 4294901760, %v928_v54  ;;  %v8820_v43 = vand.u32 4294901760, %v931_v42 }
 0x1ce   : >> { %v8802_v36 = vsub.f32 %v928_v54, %v8796_v27 }
 0x1cf   : >> { %893 = vrot.lane.b32.xlu1 %v8249_v29, %s8292_s26  ;;  %895 = vrot.lane.b32.xlu0 %v8241_v24, %s8292_s26 }
 0x1d0   : >> { %891 = vrot.lane.b32.xlu2 %v8257_v47, %s8292_s26  ;;  %v8818_v7 = vand.u32 4294901760, %v8802_v36 }
 0x1d2   : >> { %v962_v39 = vsub.f32 %v8802_v36, %v8818_v7 }
 0x1d7   : >> { %889 = vrot.lane.b32.xlu1 %v8265_v1, %s8292_s26  ;;  %881 = vrot.lane.b32.xlu0 %v8269_v45, %s8292_s26 }
 0x1d8   : >> { %842 = vrot.lane.b32.xlu2 %v8245_v62, %s8293_s27 }
 0x1df   : >> { %850 = vrot.lane.b32.xlu0 %v8241_v24, %s8293_s27  ;;  %840 = vrot.lane.b32.xlu1 %v8253_v61, %s8293_s27 }
 0x1e0   : >> { %848 = vrot.lane.b32.xlu2 %v8249_v29, %s8293_s27 }
 0x1e7   : >> { %838 = vrot.lane.b32.xlu0 %v8261_v63, %s8293_s27  ;;  %846 = vrot.lane.b32.xlu1 %v8257_v47, %s8293_s27 }
 0x1e8   : >> { %836 = vrot.lane.b32.xlu2 %v8269_v45, %s8293_s27 }
 0x1ef   : >> { %844 = vrot.lane.b32.xlu0 %v8265_v1, %s8293_s27  ;;  %2069 = vrot.lane.b32.xlu1 %v8245_v62, %s8294_s28  ;;  %s8296_s27 = smov 127  }
 0x1f0   : >> { %2077 = vrot.lane.b32.xlu2 %v8241_v24, %s8294_s28 }
 0x1f7   : >> { %2067 = vrot.lane.b32.xlu0 %v8253_v61, %s8294_s28  ;;  %2075 = vrot.lane.b32.xlu1 %v8249_v29, %s8294_s28 }
 0x1f8   : >> { %2065 = vrot.lane.b32.xlu2 %v8261_v63, %s8294_s28 }
 0x1ff   : >> { %2073 = vrot.lane.b32.xlu0 %v8257_v47, %s8294_s28  ;;  %2063 = vrot.lane.b32.xlu1 %v8269_v45, %s8294_s28 }
 0x200   : >> { %2071 = vrot.lane.b32.xlu2 %v8265_v1, %s8294_s28 }
 0x207   : >> { %2698 = vrot.lane.b32.xlu1 %v8241_v24, %s8295_s23  ;;  %2690 = vrot.lane.b32.xlu0 %v8245_v62, %s8295_s23 }
 0x208   : >> { %2688 = vrot.lane.b32.xlu2 %v8253_v61, %s8295_s23 }
 0x20f   : >> { %2686 = vrot.lane.b32.xlu1 %v8261_v63, %s8295_s23  ;;  %2696 = vrot.lane.b32.xlu0 %v8249_v29, %s8295_s23 }
 0x210   : >> { %2694 = vrot.lane.b32.xlu2 %v8257_v47, %s8295_s23 }
 0x217   : >> { %2692 = vrot.lane.b32.xlu1 %v8265_v1, %s8295_s23  ;;  %2684 = vrot.lane.b32.xlu0 %v8269_v45, %s8295_s23 }
 0x218   : >> { %3894 = vrot.lane.b32.xlu2 %v8245_v62, %s8296_s27 }
 0x21f   : >> { %3902 = vrot.lane.b32.xlu0 %v8241_v24, %s8296_s27  ;;  %3892 = vrot.lane.b32.xlu1 %v8253_v61, %s8296_s27 }
 0x220   : >> { %3900 = vrot.lane.b32.xlu2 %v8249_v29, %s8296_s27 }
 0x222   : >> { %v884_v34 = vpop.permute.xlu2 %883 }
 0x227   : >> { %3890 = vrot.lane.b32.xlu0 %v8261_v63, %s8296_s27  ;;  %3898 = vrot.lane.b32.xlu1 %v8257_v47, %s8296_s27 }
 0x228   : >> { %3888 = vrot.lane.b32.xlu2 %v8269_v45, %s8296_s27 }
 0x22a   : >> { %v892_v17 = vpop.permute.xlu2 %891 }
 0x22b   : >> { %v902_v53 = vsel %vm316_vm1, %v892_v17, %v884_v34  ;;  %v898_v28 = vsel %vm316_vm1, %v884_v34, %v892_v17  ;;  %v8851_v17 = vsub.f32 %v931_v42, %v8820_v43 }
 0x22c   : >> { %v913_v30 = vmul.f32 %v907_v40, %v902_v53  ;;  %v914_v33 = vmul.f32 %v908_v26, %v898_v28  ;;  %v7962_v28 = vld [vmem:[%s8787_s8 + $0x30] sm:$0xff] }
 0x22e   : >> { %v8804_v37 = vand.u32 4294901760, %v913_v30  ;;  %v8815_v32 = vand.u32 4294901760, %v914_v33 }
 0x22f   : >> { %3896 = vrot.lane.b32.xlu0 %v8265_v1, %s8296_s27  ;;  %4515 = vrot.lane.b32.xlu1 %v8245_v62, %s8297_s30 }
 0x230   : >> { %v8831_v38 = vsub.f32 %v913_v30, %v8804_v37  ;;  %v8843_v35 = vsub.f32 %v914_v33, %v8815_v32  ;;  %4523 = vrot.lane.b32.xlu2 %v8241_v24, %s8297_s30 }
 0x237   : >> { %4513 = vrot.lane.b32.xlu0 %v8253_v61, %s8297_s30  ;;  %4521 = vrot.lane.b32.xlu1 %v8249_v29, %s8297_s30 }
 0x238   : >> { %4511 = vrot.lane.b32.xlu2 %v8261_v63, %s8297_s30 }
 0x239   : >> { %v886_v60 = vpop.permute.xlu1 %885  ;;  %v888_v55 = vpop.permute.xlu0 %887 }
 0x23f   : >> { %4519 = vrot.lane.b32.xlu0 %v8257_v47, %s8297_s30  ;;  %4509 = vrot.lane.b32.xlu1 %v8269_v45, %s8297_s30 }
 0x241   : >> { %v894_v48 = vpop.permute.xlu1 %893  ;;  %v896_v41 = vpop.permute.xlu0 %895 }
 0x242   : >> { %v899_v44 = vsel %vm316_vm1, %v886_v60, %v894_v48  ;;  %v903_v52 = vsel %vm316_vm1, %v894_v48, %v886_v60  ;;  %v900_v51 = vsel %vm316_vm1, %v888_v55, %v896_v41  ;;  %v904_v46 = vsel %vm316_vm1, %v896_v41, %v888_v55 }
 0x243   : >> { %v915_v56 = vmul.f32 %v907_v40, %v903_v52  ;;  %v916_v57 = vmul.f32 %v908_v26, %v899_v44  ;;  %v917_v58 = vmul.f32 %v907_v40, %v904_v46  ;;  %v918_v4 = vmul.f32 %v908_v26, %v900_v51 }
 0x244   : >> { %v1018_v48 = vand.u32 4294901760, %v8831_v38  ;;  %v8863_v41 = vand.u32 4294901760, %v962_v39  ;;  %v1296_v52 = vand.u32 4294901760, %v8843_v35  ;;  %v934_v46 = vsel %vm926_vm12, %v7962_v28, 0 }
 0x245   : >> { %v8822_v49 = vand.u32 4294901760, %v915_v56  ;;  %v8824_v23 = vand.u32 4294901760, %v916_v57  ;;  %v8826_v59 = vand.u32 4294901760, %v917_v58  ;;  %v8828_v15 = vand.u32 4294901760, %v918_v4 }
 0x247   : >> { %v8834_v19 = vsub.f32 %v916_v57, %v8824_v23  ;;  %v8837_v22 = vsub.f32 %v918_v4, %v8828_v15  ;;  %952 = vmatpush.msra.mxu0 %v8826_v59  ;;  %1103 = vmatpush.msra.mxu3 %v8826_v59  ;;  %v1005_v14 = vsub.f32 %v917_v58, %v8826_v59  ;;  %v8879_v58 = vand.u32 4294901760, %v8851_v17 }
 0x248   : >> { %v1011_v6 = vsub.f32 %v915_v56, %v8822_v49  ;;  %5144 = vrot.lane.b32.xlu1 %v8241_v24, %s8298_s7  ;;  %5136 = vrot.lane.b32.xlu0 %v8245_v62, %s8298_s7 }
 0x249   : >> { %v890_v20 = vpop.permute.xlu1 %889  ;;  %954 = vmatpush.msra.mxu0 %v8822_v49  ;;  %1059 = vmatpush.msra.mxu2 %v1005_v14  ;;  %v882_v34 = vpop.permute.xlu0 %881  ;;  %v1006_v0 = vand.u32 4294901760, %v1005_v14  ;;  %v1284_v50 = vand.u32 4294901760, %v8837_v22  ;;  %v1290_v53 = vand.u32 4294901760, %v8834_v19  ;;  %v970_v28 = vsub.f32 %v8851_v17, %v8879_v58 }
 0x24a   : >> { %1105 = vmatpush.msra.mxu3 %v8822_v49  ;;  %v897_v60 = vsel %vm316_vm1, %v882_v34, %v890_v20  ;;  %v901_v55 = vsel %vm316_vm1, %v890_v20, %v882_v34  ;;  %v1012_v54 = vand.u32 4294901760, %v1011_v6  ;;  %v1297_v20 = vsub.f32 %v8843_v35, %v1296_v52 }
 0x24b   : >> { %v911_v30 = vmul.f32 %v907_v40, %v901_v55  ;;  %v912_v31 = vmul.f32 %v908_v26, %v897_v60  ;;  %956 = vmatpush.msra.mxu0 %v8804_v37  ;;  %1062 = vmatpush.msra.mxu2 %v1011_v6  ;;  %v1007_v33 = vsub.f32 %v1005_v14, %v1006_v0  ;;  %v8892_v34 = vand.u32 4294901760, %v934_v46 }
 0x24c   : >> { %1107 = vmatpush.msra.mxu3 %v8804_v37  ;;  %v1285_v42 = vsub.f32 %v8837_v22, %v1284_v50  ;;  %v1013_v44 = vsub.f32 %v1011_v6, %v1012_v54  ;;  %v1291_v57 = vsub.f32 %v8834_v19, %v1290_v53  ;;  %v1019_v6 = vsub.f32 %v8831_v38, %v1018_v48 }
 0x24d   : >> { %v8869_v51 = vand.u32 4294901760, %v911_v30  ;;  %v8871_v40 = vand.u32 4294901760, %v912_v31  ;;  %1065 = vmatpush.msra.mxu2 %v8831_v38  ;;  %v1008_v26 = vand.u32 4294901760, %v1007_v33 }
 0x24e   : >> { %v1286_v56 = vand.u32 4294901760, %v1285_v42  ;;  %v1014_v39 = vand.u32 4294901760, %v1013_v44  ;;  %v1292_v38 = vand.u32 4294901760, %v1291_v57  ;;  %v8902_v44 = vsub.f32 %v934_v46, %v8892_v34 }
 0x24f   : >> { %v8882_v4 = vsub.f32 %v912_v31, %v8871_v40  ;;  %958 = vmatpush.msra.mxu0 %v8869_v51  ;;  %1009 = vmatpush.msra.mxu1 %v1008_v26  ;;  %v1023_v14 = vsub.f32 %v911_v30, %v8869_v51  ;;  %v7963_v30 = vld [vmem:[%s8787_s8 + $0x38] sm:$0xff]  ;;  %v1020_v31 = vand.u32 4294901760, %v1019_v6 }
 0x250   : >> { %1109 = vmatpush.msra.mxu3 %v8869_v51  ;;  %964 = vmatmul.f32.vlgmr.msra.gmra.mxu0 %v8863_v41  ;;  %v937_v57 = vsel %vm926_vm12, %v7963_v30, 0 }
 0x251   : >> { %1113 = vmatmul.f32.vlgmr.msra.gmra.mxu3 %v8818_v7  ;;  %1150 = vmatpush.msrb.mxu0 %v1006_v0  ;;  %v1024_v60 = vand.u32 4294901760, %v1023_v14  ;;  %v1302_v55 = vand.u32 4294901760, %v8882_v4  ;;  %v1298_v0 = vand.u32 4294901760, %v1297_v20  ;;  %v8912_v46 = vand.u32 4294901760, %v937_v57 }
 0x252   : >> { %1287 = vmatpush.msrb.mxu3 %v1286_v56  ;;  %1015 = vmatpush.msra.mxu1 %v1014_v39 }
 0x253   : >> { %1068 = vmatpush.msra.mxu2 %v1023_v14  ;;  %1154 = vmatpush.msrb.mxu0 %v1012_v54  ;;  %v1025_v33 = vsub.f32 %v1023_v14, %v1024_v60  ;;  %v1303_v42 = vsub.f32 %v8882_v4, %v1302_v55  ;;  %v8906_v54 = vand.u32 4294901760, %v970_v28  ;;  %v8910_v14 = vand.u32 4294901760, %v8902_v44 }
 0x254   : >> { %1071 = vmatmul.f32.vlgmr.msra.gmra.mxu2 %v8802_v36  ;;  %1293 = vmatpush.msrb.mxu3 %v1292_v38  ;;  %v8925_v6 = vsub.f32 %v937_v57, %v8912_v46 }
 0x255   : >> { %1230 = vmatpush.msrb.mxu2 %v8828_v15  ;;  %1021 = vmatpush.msra.mxu1 %v1020_v31  ;;  %v1026_v26 = vand.u32 4294901760, %v1025_v33  ;;  %v1304_v56 = vand.u32 4294901760, %v1303_v42 }
 0x256   : >> { %1158 = vmatpush.msrb.mxu0 %v1018_v48  ;;  %1299 = vmatpush.msrb.mxu3 %v1298_v0  ;;  %v978_v48 = vsub.f32 %v8902_v44, %v8910_v14 }
 0x257   : >> { %1232 = vmatpush.msrb.mxu2 %v8824_v23  ;;  %1027 = vmatpush.msra.mxu1 %v1026_v26 }
 0x258   : >> { %1162 = vmatpush.msrb.mxu0 %v1024_v60  ;;  %1305 = vmatpush.msrb.mxu3 %v1304_v56  ;;  %v8939_v39 = vand.u32 4294901760, %v978_v48 }
 0x259   : >> { %1234 = vmatpush.msrb.mxu2 %v8815_v32  ;;  %972 = vmatmul.f32.gmra.mxu0 %v8906_v54 }
 0x25a   : >> { %1337 = vmatpush.msra.mxu0 %v8837_v22  ;;  %1029 = vmatmul.f32.vlgmr.msra.gmra.mxu1 %v8796_v27  ;;  %v8942_v22 = vand.u32 4294901760, %v8925_v6 }
 0x25b   : >> { %1119 = vmatmul.f32.gmra.mxu3 %v8879_v58  ;;  %1193 = vmatpush.msrb.mxu1 %v8826_v59  ;;  %v8934_v59 = vpop.permute.xlu2 %842 }
 0x25c   : >> { %1236 = vmatpush.msrb.mxu2 %v8871_v40  ;;  %1471 = vmatpush.msra.mxu3 %v8828_v15 }
 0x25d   : >> { %1340 = vmatpush.msra.mxu0 %v8834_v19  ;;  %1076 = vmatmul.f32.gmra.mxu2 %v8851_v17  ;;  %v8959_v19 = vpop.permute.xlu0 %850 }
 0x25e   : >> { %1428 = vmatpush.msra.mxu2 %v1284_v50  ;;  %1195 = vmatpush.msrb.mxu1 %v8822_v49  ;;  %v860_v49 = vld [vmem:[%s12439_s1] ss:$8 sm:$0x3]  ;;  %v8967_v50 = vpop.permute.xlu1 %840 }
 0x25f   : >> { %1473 = vmatpush.msra.mxu3 %v8824_v23  ;;  %1343 = vmatpush.msra.mxu0 %v8843_v35  ;;  %v859_v35 = vsel %vm259_vm0, %v8959_v19, %v8934_v59 }
 0x260   : >> { %1432 = vmatpush.msra.mxu2 %v1290_v53  ;;  %1197 = vmatpush.msrb.mxu1 %v8804_v37  ;;  %v986_v37 = vsub.f32 %v8925_v6, %v8942_v22 }
 0x261   : >> { %1475 = vmatpush.msra.mxu3 %v8815_v32  ;;  %1346 = vmatpush.msra.mxu0 %v8882_v4 }
 0x262   : >> { %1436 = vmatpush.msra.mxu2 %v1296_v52  ;;  %1199 = vmatpush.msrb.mxu1 %v8869_v51 }
 0x263   : >> { %1477 = vmatpush.msra.mxu3 %v8871_v40  ;;  %980 = vmatmul.f32.gmra.mxu0 %v8939_v39  ;;  %v849_v52 = vpop.permute.xlu2 %848 }
 0x264   : >> { %1381 = vmatpush.msra.mxu1 %v8828_v15  ;;  %1440 = vmatpush.msra.mxu2 %v1302_v55  ;;  %v862_v15 = vperm.slane %v860_v49, 0  ;;  %v858_v51 = vsel %vm259_vm0, %v849_v52, %v8967_v50 }
 0x265   : >> { %1033 = vmatmul.f32.gmra.mxu1 %v8820_v43  ;;  %1125 = vmatmul.f32.gmra.mxu3 %v8910_v14  ;;  %v839_v20 = vpop.permute.xlu0 %838 }
 0x266   : >> { %1383 = vmatpush.msra.mxu1 %v8824_v23  ;;  %1081 = vmatmul.f32.gmra.mxu2 %v8902_v44  ;;  %v8974_v23 = vand.u32 4294901760, %v986_v37  ;;  %v872_v53 = vmul.f32 %v862_v15, %v859_v35  ;;  %v870_v4 = vmul.f32 %v862_v15, %v858_v51  ;;  %v847_v60 = vpop.permute.xlu1 %846 }
 0x267   : >> { %5132 = vrot.lane.b32.xlu1 %v8261_v63, %s8298_s7  ;;  %5142 = vrot.lane.b32.xlu0 %v8249_v29, %s8298_s7 }
 0x268   : >> { %1385 = vmatpush.msra.mxu1 %v8815_v32  ;;  %v8985_v32 = vand.u32 4294901760, %v872_v53  ;;  %v8997_v28 = vand.u32 4294901760, %v870_v4 }
 0x26a   : >> { %1387 = vmatpush.msra.mxu1 %v8871_v40  ;;  %v857_v40 = vsel %vm259_vm0, %v847_v60, %v839_v20  ;;  %v8995_v38 = vsub.f32 %v872_v53, %v8985_v32  ;;  %v9008_v42 = vsub.f32 %v870_v4, %v8997_v28  ;;  %v855_v4 = vsel %vm259_vm0, %v8934_v59, %v8959_v19 }
 0x26b   : >> { %988 = vmatmul.f32.gmra.mxu0 %v8974_v23  ;;  %v868_v55 = vmul.f32 %v862_v15, %v857_v40  ;;  %v837_v30 = vpop.permute.xlu2 %836  ;;  %v853_v19 = vsel %vm259_vm0, %v839_v20, %v847_v60 }
 0x26c   : >> { %v1574_v33 = vand.u32 4294901760, %v8995_v38  ;;  %v1580_v37 = vand.u32 4294901760, %v9008_v42 }
 0x26d   : >> { %1037 = vmatmul.f32.gmra.mxu1 %v8892_v34  ;;  %1131 = vmatmul.f32.gmra.mxu3 %v8942_v22  ;;  %v9002_v31 = vand.u32 4294901760, %v868_v55  ;;  %v845_v0 = vpop.permute.xlu0 %844 }
 0x26e   : >> { %1086 = vmatmul.f32.gmra.mxu2 %v8925_v6  ;;  %v856_v26 = vsel %vm259_vm0, %v845_v0, %v837_v30  ;;  %v1581_v51 = vsub.f32 %v9008_v42, %v1580_v37  ;;  %v852_v20 = vsel %vm259_vm0, %v837_v30, %v845_v0 }
 0x26f   : >> { %v866_v56 = vmul.f32 %v862_v15, %v856_v26  ;;  %v9017_v57 = vsub.f32 %v868_v55, %v9002_v31  ;;  %v863_v15 = vperm.slane %v860_v49, 1  ;;  %v854_v26 = vsel %vm259_vm0, %v8967_v50, %v849_v52  ;;  %5130 = vrot.lane.b32.xlu0 %v8269_v45, %s8298_s7 }
 0x270   : >> { %v1582_v40 = vand.u32 4294901760, %v1581_v51 }
 0x271   : >> { %v9022_v48 = vand.u32 4294901760, %v866_v56  ;;  %v1586_v49 = vand.u32 4294901760, %v9017_v57  ;;  %v871_v50 = vmul.f32 %v863_v15, %v854_v26 }
 0x273   : >> { %1164 = vmatmul.f32.vlgmr.msrb.gmra.mxu0 %v8796_v27  ;;  %v9034_v35 = vsub.f32 %v866_v56, %v9022_v48  ;;  %v1587_v56 = vsub.f32 %v9017_v57, %v1586_v49  ;;  %v9068_v51 = vand.u32 4294901760, %v871_v50 }
 0x274   : >> { %1520 = vmatpush.msrb.mxu0 %v8985_v32 }
 0x275   : >> { %1041 = vmatmul.f32.gmra.mxu1 %v8912_v46  ;;  %1307 = vmatmul.f32.vlgmr.msrb.gmra.mxu3 %v8796_v27  ;;  %v1592_v55 = vand.u32 4294901760, %v9034_v35  ;;  %v9079_v26 = vsub.f32 %v871_v50, %v9068_v51 }
 0x276   : >> { %1242 = vmatmul.f32.vlgmr.msrb.gmra.mxu2 %v8863_v41  ;;  %1671 = vmatpush.msrb.mxu3 %v8985_v32  ;;  %v1575_v41 = vsub.f32 %v8995_v38, %v1574_v33 }
 0x277   : >> { %1627 = vmatpush.msrb.mxu2 %v8995_v38  ;;  %1522 = vmatpush.msrb.mxu0 %v8997_v28  ;;  %v1593_v59 = vsub.f32 %v9034_v35, %v1592_v55 }
 0x278   : >> { %1673 = vmatpush.msrb.mxu3 %v8997_v28  ;;  %v1576_v53 = vand.u32 4294901760, %v1575_v41  ;;  %v873_v41 = vmul.f32 %v863_v15, %v855_v4  ;;  %5765 = vrot.lane.b32.xlu0 %v8241_v24, %s8299_s12 }
 0x279   : >> { %1630 = vmatpush.msrb.mxu2 %v9008_v42  ;;  %1524 = vmatpush.msrb.mxu0 %v9002_v31  ;;  %v1594_v52 = vand.u32 4294901760, %v1593_v59 }
 0x27a   : >> { %1675 = vmatpush.msrb.mxu3 %v9002_v31 }
 0x27b   : >> { %1633 = vmatpush.msrb.mxu2 %v9017_v57  ;;  %1168 = vmatmul.f32.gmra.mxu0 %v8820_v43  ;;  %v9063_v57 = vand.u32 4294901760, %v873_v41 }
 0x27c   : >> { %1526 = vmatpush.msrb.mxu0 %v9022_v48  ;;  %1677 = vmatpush.msrb.mxu3 %v9022_v48 }
 0x27d   : >> { %1201 = vmatmul.f32.vlgmr.msrb.gmra.mxu1 %v8796_v27  ;;  %1311 = vmatmul.f32.gmra.mxu3 %v8820_v43  ;;  %v9074_v60 = vsub.f32 %v873_v41, %v9063_v57 }
 0x27e   : >> { %1250 = vmatmul.f32.gmra.mxu2 %v8906_v54  ;;  %1577 = vmatpush.msrb.mxu1 %v1576_v53  ;;  %v1588_v54 = vand.u32 4294901760, %v1587_v56  ;;  %v869_v53 = vmul.f32 %v863_v15, %v853_v19 }
 0x27f   : >> { %1636 = vmatpush.msrb.mxu2 %v9034_v35  ;;  %v1852_v56 = vand.u32 4294901760, %v9074_v60 }
 0x280   : >> { %1583 = vmatpush.msrb.mxu1 %v1582_v40  ;;  %v9076_v4 = vand.u32 4294901760, %v869_v53  ;;  %v867_v40 = vmul.f32 %v863_v15, %v852_v20  ;;  %v877_v20 = vld [vmem:[%s8787_s8] sm:$0xff]  ;;  %5753 = vrot.lane.b32.xlu0 %v8261_v63, %s8299_s12 }
 0x281   : >> { %v1853_v30 = vsub.f32 %v9074_v60, %v1852_v56  ;;  %v1496_v38 = vsel %vm926_vm12, %v877_v20, 0 }
 0x282   : >> { %1589 = vmatpush.msrb.mxu1 %v1588_v54  ;;  %v9083_v59 = vsub.f32 %v869_v53, %v9076_v4  ;;  %v9086_v19 = vand.u32 4294901760, %v867_v40 }
 0x283   : >> { %1172 = vmatmul.f32.gmra.mxu0 %v8892_v34  ;;  %v1854_v54 = vand.u32 4294901760, %v1853_v30 }
 0x284   : >> { %1595 = vmatpush.msrb.mxu1 %v1594_v52  ;;  %v1864_v0 = vand.u32 4294901760, %v9083_v59  ;;  %v9097_v15 = vsub.f32 %v867_v40, %v9086_v19 }
 0x285   : >> { %1205 = vmatmul.f32.gmra.mxu1 %v8820_v43  ;;  %1315 = vmatmul.f32.gmra.mxu3 %v8892_v34 }
 0x286   : >> { %1258 = vmatmul.f32.gmra.mxu2 %v8939_v39  ;;  %v1858_v39 = vand.u32 4294901760, %v9079_v26  ;;  %v1865_v50 = vsub.f32 %v9083_v59, %v1864_v0 }
 0x288   : >> { %v1859_v41 = vsub.f32 %v9079_v26, %v1858_v39  ;;  %v1866_v53 = vand.u32 4294901760, %v1865_v50 }
 0x28a   : >> { %v1860_v52 = vand.u32 4294901760, %v1859_v41  ;;  %v2068_v41 = vpop.permute.xlu0 %2067 }
 0x28b   : >> { %1176 = vmatmul.f32.gmra.mxu0 %v8912_v46 }
 0x28d   : >> { %1209 = vmatmul.f32.gmra.mxu1 %v8892_v34  ;;  %1319 = vmatmul.f32.gmra.mxu3 %v8912_v46 }
 0x28e   : >> { %1266 = vmatmul.f32.gmra.mxu2 %v8974_v23  ;;  %v1870_v23 = vand.u32 4294901760, %v9097_v15 }
 0x293   : >> { %1349 = vmatmul.f32.vlgmr.msra.gmra.mxu0 %v8802_v36  ;;  %v1871_v36 = vsub.f32 %v9097_v15, %v1870_v23 }
 0x294   : >> { %1718 = vmatpush.msra.mxu0 %v1574_v33 }
 0x295   : >> { %1213 = vmatmul.f32.gmra.mxu1 %v8912_v46  ;;  %1479 = vmatmul.f32.vlgmr.msra.gmra.mxu3 %v8796_v27 }
 0x296   : >> { %1442 = vmatmul.f32.vlgmr.msra.gmra.mxu2 %v8796_v27  ;;  %1855 = vmatpush.msra.mxu3 %v1854_v54  ;;  %v1872_v27 = vand.u32 4294901760, %v1871_v36 }
 0x297   : >> { %1798 = vmatpush.msra.mxu2 %v9063_v57  ;;  %1722 = vmatpush.msra.mxu0 %v1580_v37  ;;  %v880_v37 = vld [vmem:[%s8787_s8 + $0x18] sm:$0xff] }
 0x298   : >> { %1861 = vmatpush.msra.mxu3 %v1860_v52  ;;  %v1505_v35 = vsel %vm926_vm12, %v880_v37, 0 }
 0x299   : >> { %1800 = vmatpush.msra.mxu2 %v9068_v51  ;;  %1726 = vmatpush.msra.mxu0 %v1586_v49 }
 0x29a   : >> { %1867 = vmatpush.msra.mxu3 %v1866_v53 }
 0x29b   : >> { %1802 = vmatpush.msra.mxu2 %v9076_v4  ;;  %1354 = vmatmul.f32.gmra.mxu0 %v8851_v17  ;;  %v9131_v17 = vand.u32 4294901760, %v1496_v38 }
 0x29c   : >> { %1730 = vmatpush.msra.mxu0 %v1592_v55  ;;  %1873 = vmatpush.msra.mxu3 %v1872_v27  ;;  %v9189_v55 = vand.u32 4294901760, %v1505_v35 }
 0x29d   : >> { %1391 = vmatmul.f32.vlgmr.msra.gmra.mxu1 %v8818_v7  ;;  %1483 = vmatmul.f32.gmra.mxu3 %v8820_v43  ;;  %v878_v7 = vld [vmem:[%s8787_s8 + $0x8] sm:$0xff] }
 0x29e   : >> { %1446 = vmatmul.f32.gmra.mxu2 %v8820_v43  ;;  %1761 = vmatpush.msra.mxu1 %v8985_v32  ;;  %v9138_v43 = vsub.f32 %v1496_v38, %v9131_v17  ;;  %v1499_v32 = vsel %vm926_vm12, %v878_v7, 0  ;;  %v9203_v40 = vsub.f32 %v1505_v35, %v9189_v55  ;;  %v2074_v38 = vpop.permute.xlu0 %2073 }
 0x29f   : >> { %1804 = vmatpush.msra.mxu2 %v9086_v19 }
 0x2a0   : >> { %1763 = vmatpush.msra.mxu1 %v8997_v28  ;;  %v9145_v28 = vand.u32 4294901760, %v9138_v43 }
 0x2a2   : >> { %1765 = vmatpush.msra.mxu1 %v9002_v31  ;;  %v9147_v31 = vand.u32 4294901760, %v1499_v32  ;;  %v1530_v33 = vsub.f32 %v9138_v43, %v9145_v28 }
 0x2a3   : >> { %1359 = vmatmul.f32.gmra.mxu0 %v8902_v44  ;;  %v879_v44 = vld [vmem:[%s8787_s8 + $0x10] sm:$0xff] }
 0x2a4   : >> { %1767 = vmatpush.msra.mxu1 %v9022_v48  ;;  %v9160_v42 = vand.u32 4294901760, %v1530_v33 }
 0x2a5   : >> { %1397 = vmatmul.f32.gmra.mxu1 %v8879_v58  ;;  %1487 = vmatmul.f32.gmra.mxu3 %v8892_v34  ;;  %v9156_v58 = vsub.f32 %v1499_v32, %v9147_v31 }
 0x2a6   : >> { %1450 = vmatmul.f32.gmra.mxu2 %v8892_v34  ;;  %v1502_v34 = vsel %vm926_vm12, %v879_v44, 0 }
 0x2a7   : >> { %v9163_v48 = vand.u32 4294901760, %v9156_v58 }
 0x2ab   : >> { %1364 = vmatmul.f32.gmra.mxu0 %v8925_v6  ;;  %v9165_v6 = vand.u32 4294901760, %v1502_v34 }
 0x2ad   : >> { %1403 = vmatmul.f32.gmra.mxu1 %v8910_v14  ;;  %1491 = vmatmul.f32.gmra.mxu3 %v8912_v46  ;;  %v1538_v14 = vsub.f32 %v9156_v58, %v9163_v48 }
 0x2ae   : >> { %1454 = vmatmul.f32.gmra.mxu2 %v8912_v46  ;;  %v9174_v46 = vsub.f32 %v1502_v34, %v9165_v6 }
 0x2b0   : >> { %v9187_v49 = vand.u32 4294901760, %v9174_v46 }
 0x2b3   : >> { %1532 = vmatmul.f32.vlgmr.msrb.gmra.mxu0 %v9160_v42 }
 0x2b4   : >> { %1905 = vmatpush.msrb.mxu0 %v9074_v60  ;;  %v1546_v60 = vsub.f32 %v9174_v46, %v9187_v49 }
 0x2b5   : >> { %1409 = vmatmul.f32.gmra.mxu1 %v8942_v22  ;;  %1681 = vmatmul.f32.vlgmr.msrb.gmra.mxu3 %v9145_v28  ;;  %v9184_v22 = vand.u32 4294901760, %v1538_v14 }
 0x2b6   : >> { %2039 = vmatpush.msrb.mxu3 %v9063_v57  ;;  %1639 = vmatmul.f32.vlgmr.msrb.gmra.mxu2 %v9138_v43 }
 0x2b7   : >> { %1908 = vmatpush.msrb.mxu0 %v9079_v26  ;;  %1996 = vmatpush.msrb.mxu2 %v1852_v56  ;;  %v9212_v26 = vand.u32 4294901760, %v1546_v60  ;;  %v9215_v56 = vand.u32 4294901760, %v9203_v40 }
 0x2b8   : >> { %2041 = vmatpush.msrb.mxu3 %v9068_v51 }
 0x2b9   : >> { %1911 = vmatpush.msrb.mxu0 %v9083_v59  ;;  %2000 = vmatpush.msrb.mxu2 %v1858_v39  ;;  %v2070_v59 = vpop.permute.xlu1 %2069  ;;  %v2078_v39 = vpop.permute.xlu2 %2077 }
 0x2ba   : >> { %2043 = vmatpush.msrb.mxu3 %v9076_v4 }
 0x2bb   : >> { %1914 = vmatpush.msrb.mxu0 %v9097_v15  ;;  %2004 = vmatpush.msrb.mxu2 %v1864_v0 }
 0x2bc   : >> { %2045 = vmatpush.msrb.mxu3 %v9086_v19  ;;  %1540 = vmatmul.f32.gmra.mxu0 %v9184_v22 }
 0x2bd   : >> { %1597 = vmatmul.f32.vlgmr.msrb.gmra.mxu1 %v9131_v17  ;;  %1687 = vmatmul.f32.gmra.mxu3 %v9163_v48 }
 0x2be   : >> { %1949 = vmatpush.msrb.mxu1 %v9063_v57  ;;  %2008 = vmatpush.msrb.mxu2 %v1870_v23  ;;  %v1554_v57 = vsub.f32 %v9203_v40, %v9215_v56 }
 0x2bf   : >> { %1644 = vmatmul.f32.gmra.mxu2 %v9156_v58 }
 0x2c0   : >> { %1951 = vmatpush.msrb.mxu1 %v9068_v51  ;;  %v7964_v51 = vld [vmem:[%s12439_s1 + $0x2] ss:$8 sm:$0x3]  ;;  %v9228_v30 = vand.u32 4294901760, %v1554_v57 }
 0x2c1   : >> { %v2076_v54 = vpop.permute.xlu1 %2075  ;;  %v2066_v50 = vpop.permute.xlu2 %2065 }
 0x2c2   : >> { %1953 = vmatpush.msrb.mxu1 %v9076_v4  ;;  %v2089_v4 = vperm.slane %v7964_v51, 0  ;;  %v2085_v52 = vsel %vm366_vm2, %v2076_v54, %v2068_v41  ;;  %v2084_v7 = vsel %vm366_vm2, %v2074_v38, %v2066_v50 }
 0x2c4   : >> { %1955 = vmatpush.msrb.mxu1 %v9086_v19  ;;  %1548 = vmatmul.f32.gmra.mxu0 %v9212_v26  ;;  %v2086_v19 = vsel %vm366_vm2, %v2078_v39, %v2070_v59  ;;  %v2097_v53 = vmul.f32 %v2089_v4, %v2085_v52  ;;  %v2095_v33 = vmul.f32 %v2089_v4, %v2084_v7  ;;  %v2090_v52 = vperm.slane %v7964_v51, 1 }
 0x2c5   : >> { %1601 = vmatmul.f32.gmra.mxu1 %v9147_v31  ;;  %1693 = vmatmul.f32.gmra.mxu3 %v9187_v49  ;;  %v2099_v0 = vmul.f32 %v2089_v4, %v2086_v19 }
 0x2c6   : >> { %v9243_v27 = vand.u32 4294901760, %v2097_v53  ;;  %v9257_v57 = vand.u32 4294901760, %v2095_v33 }
 0x2c7   : >> { %1649 = vmatmul.f32.gmra.mxu2 %v9174_v46  ;;  %v9236_v23 = vand.u32 4294901760, %v2099_v0 }
 0x2c8   : >> { %v9255_v35 = vsub.f32 %v2097_v53, %v9243_v27  ;;  %v9267_v53 = vsub.f32 %v2095_v33, %v9257_v57 }
 0x2c9   : >> { %v9241_v20 = vsub.f32 %v2099_v0, %v9236_v23  ;;  %v2064_v60 = vpop.permute.xlu1 %2063  ;;  %v2072_v19 = vpop.permute.xlu2 %2071 }
 0x2cb   : >> { %v2187_v14 = vand.u32 4294901760, %v9241_v20 }
 0x2cc   : >> { %1556 = vmatmul.f32.gmra.mxu0 %v9228_v30 }
 0x2cd   : >> { %v965_v15 = vpop.f32.mrf.mxu0  ;;  %1605 = vmatmul.f32.gmra.mxu1 %v9165_v6  ;;  %1699 = vmatmul.f32.gmra.mxu3 %v9215_v56  ;;  %v2188_v51 = vsub.f32 %v9241_v20, %v2187_v14 }
 0x2cf   : >> { %1654 = vmatmul.f32.gmra.mxu2 %v9203_v40  ;;  %v2189_v33 = vand.u32 4294901760, %v2188_v51 }
 0x2d4   : >> { %v1114_v36 = vpop.f32.mrf.mxu3  ;;  %1732 = vmatmul.f32.vlgmr.msra.gmra.mxu0 %v9131_v17 }
 0x2d5   : >> { %1609 = vmatmul.f32.gmra.mxu1 %v9189_v55  ;;  %1875 = vmatmul.f32.vlgmr.msra.gmra.mxu3 %v9131_v17 }
 0x2d6   : >> { %v973_v32 = vpop.f32.mrf.mxu0  ;;  %2133 = vmatpush.msra.mxu0 %v9236_v23  ;;  %2284 = vmatpush.msra.mxu3 %v9236_v23 }
 0x2d7   : >> { %v1030_v44 = vpop.f32.mrf.mxu1  ;;  %1810 = vmatmul.f32.vlgmr.msra.gmra.mxu2 %v9160_v42  ;;  %v1072_v37 = vpop.f32.mrf.mxu2  ;;  %v2083_v42 = vsel %vm366_vm2, %v2072_v19, %v2064_v60 }
 0x2d8   : >> { %v1031_v34 = vadd.f32 %v1030_v44, %v965_v15  ;;  %2240 = vmatpush.msra.mxu2 %v9241_v20  ;;  %2135 = vmatpush.msra.mxu0 %v9243_v27  ;;  %v2082_v15 = vsel %vm366_vm2, %v2070_v59, %v2078_v39  ;;  %v2093_v7 = vmul.f32 %v2089_v4, %v2083_v42  ;;  %v2199_v39 = vand.u32 4294901760, %v9267_v53 }
 0x2d9   : >> { %2286 = vmatpush.msra.mxu3 %v9243_v27 }
 0x2da   : >> { %v1073_v0 = vadd.f32 %v1072_v37, %v1031_v34  ;;  %2243 = vmatpush.msra.mxu2 %v9255_v35  ;;  %v2193_v34 = vand.u32 4294901760, %v9255_v35  ;;  %2137 = vmatpush.msra.mxu0 %v9257_v57  ;;  %v9279_v59 = vand.u32 4294901760, %v2093_v7  ;;  %v2200_v21 = vsub.f32 %v9267_v53, %v2199_v39 }
 0x2db   : >> { %2288 = vmatpush.msra.mxu3 %v9257_v57 }
 0x2dc   : >> { %v9270_v44 = vadd.f32 %v1114_v36, %v1073_v0  ;;  %1736 = vmatmul.f32.gmra.mxu0 %v9147_v31  ;;  %2246 = vmatpush.msra.mxu2 %v9267_v53  ;;  %v2100_v36 = vmul.f32 %v2090_v52, %v2082_v15  ;;  %v2194_v37 = vsub.f32 %v9255_v35, %v2193_v34 }
 0x2dd   : >> { %1769 = vmatmul.f32.vlgmr.msra.gmra.mxu1 %v9131_v17  ;;  %1879 = vmatmul.f32.gmra.mxu3 %v9147_v31  ;;  %v2081_v0 = vsel %vm366_vm2, %v2068_v41, %v2076_v54  ;;  %v9291_v42 = vsub.f32 %v2093_v7, %v9279_v59  ;;  %v2080_v41 = vsel %vm366_vm2, %v2066_v50, %v2074_v38  ;;  %v2201_v54 = vand.u32 4294901760, %v2200_v21 }
 0x2de   : >> { %v1120_v4 = vpop.f32.mrf.mxu3  ;;  %2139 = vmatpush.msra.mxu0 %v9279_v59  ;;  %2290 = vmatpush.msra.mxu3 %v9279_v59  ;;  %v2195_v15 = vand.u32 4294901760, %v2194_v37  ;;  %v2098_v13 = vmul.f32 %v2090_v52, %v2081_v0  ;;  %v9303_v11 = vand.u32 4294901760, %v2100_v36  ;;  %v2079_v21 = vsel %vm366_vm2, %v2064_v60, %v2072_v19 }
 0x2df   : >> { %1818 = vmatmul.f32.gmra.mxu2 %v9184_v22  ;;  %2190 = vmatpush.msra.mxu1 %v2189_v33  ;;  %v2205_v7 = vand.u32 4294901760, %v9291_v42  ;;  %v2096_v33 = vmul.f32 %v2090_v52, %v2080_v41  ;;  %v2094_v0 = vmul.f32 %v2090_v52, %v2079_v21 }
 0x2e0   : >> { %v981_v51 = vpop.f32.mrf.mxu0  ;;  %v1077_v18 = vpop.f32.mrf.mxu2  ;;  %2249 = vmatpush.msra.mxu2 %v9291_v42 }
 0x2e1   : >> { %2196 = vmatpush.msra.mxu1 %v2195_v15  ;;  %v2206_v22 = vsub.f32 %v9291_v42, %v2205_v7 }
 0x2e2   : >> { %v1034_v16 = vpop.f32.mrf.mxu1 }
 0x2e3   : >> { %v1035_v12 = vadd.f32 %v1034_v16, %v973_v32  ;;  %2202 = vmatpush.msra.mxu1 %v2201_v54  ;;  %v2207_v50 = vand.u32 4294901760, %v2206_v22  ;;  %v9313_v16 = vand.u32 4294901760, %v2098_v13  ;;  %v9318_v32 = vsub.f32 %v2100_v36, %v9303_v11 }
 0x2e4   : >> { %1740 = vmatmul.f32.gmra.mxu0 %v9165_v6  ;;  %v9330_v36 = vand.u32 4294901760, %v2094_v0 }
 0x2e5   : >> { %v1078_v37 = vadd.f32 %v1077_v18, %v1035_v12  ;;  %1773 = vmatmul.f32.gmra.mxu1 %v9147_v31  ;;  %1883 = vmatmul.f32.gmra.mxu3 %v9165_v6  ;;  %v9321_v18 = vand.u32 4294901760, %v2096_v33  ;;  %v9324_v41 = vsub.f32 %v2098_v13, %v9313_v16  ;;  %v2465_v54 = vand.u32 4294901760, %v9318_v32 }
 0x2e6   : >> { %2208 = vmatpush.msra.mxu1 %v2207_v50 }
 0x2e7   : >> { %v9315_v38 = vadd.f32 %v1120_v4, %v1078_v37  ;;  %1826 = vmatmul.f32.gmra.mxu2 %v9212_v26  ;;  %v9328_v22 = vsub.f32 %v2096_v33, %v9321_v18  ;;  %v2471_v26 = vand.u32 4294901760, %v9324_v41  ;;  %v2466_v13 = vsub.f32 %v9318_v32, %v2465_v54 }
 0x2e8   : >> { %v1126_v12 = vpop.f32.mrf.mxu3  ;;  %v989_v60 = vpop.f32.mrf.mxu0  ;;  %v9343_v33 = vsub.f32 %v2094_v0, %v9330_v36 }
 0x2e9   : >> { %v1082_v19 = vpop.f32.mrf.mxu2  ;;  %v2477_v21 = vand.u32 4294901760, %v9328_v22 }
 0x2ea   : >> { %v1038_v15 = vpop.f32.mrf.mxu1  ;;  %v2483_v10 = vand.u32 4294901760, %v9343_v33 }
 0x2eb   : >> { %v1039_v4 = vadd.f32 %v1038_v15, %v981_v51 }
 0x2ec   : >> { %1744 = vmatmul.f32.gmra.mxu0 %v9189_v55 }
 0x2ed   : >> { %v1083_v37 = vadd.f32 %v1082_v19, %v1039_v4  ;;  %1777 = vmatmul.f32.gmra.mxu1 %v9165_v6  ;;  %1887 = vmatmul.f32.gmra.mxu3 %v9189_v55 }
 0x2ef   : >> { %v9336_v52 = vadd.f32 %v1126_v12, %v1083_v37  ;;  %1834 = vmatmul.f32.gmra.mxu2 %v9228_v30  ;;  %v2472_v12 = vsub.f32 %v9324_v41, %v2471_v26  ;;  %v2467_v37 = vand.u32 4294901760, %v2466_v13  ;;  %v2478_v30 = vsub.f32 %v9328_v22, %v2477_v21 }
 0x2f0   : >> { %v1132_v51 = vpop.f32.mrf.mxu3  ;;  %v9346_v19 = vpop.f32.mrf.mxu0 }
 0x2f1   : >> { %v1087_v50 = vpop.f32.mrf.mxu2  ;;  %v2473_v9 = vand.u32 4294901760, %v2472_v12  ;;  %v2479_v13 = vand.u32 4294901760, %v2478_v30 }
 0x2f2   : >> { %v1042_v15 = vpop.f32.mrf.mxu1 }
 0x2f3   : >> { %v1043_v4 = vadd.f32 %v1042_v15, %v989_v60 }
 0x2f4   : >> { %1917 = vmatmul.f32.vlgmr.msrb.gmra.mxu0 %v9138_v43  ;;  %v2484_v43 = vsub.f32 %v9343_v33, %v2483_v10 }
 0x2f5   : >> { %v1088_v0 = vadd.f32 %v1087_v50, %v1043_v4  ;;  %1781 = vmatmul.f32.gmra.mxu1 %v9189_v55  ;;  %2047 = vmatmul.f32.vlgmr.msrb.gmra.mxu3 %v9131_v17 }
 0x2f6   : >> { %2331 = vmatpush.msrb.mxu0 %v2187_v14  ;;  %2468 = vmatpush.msrb.mxu3 %v2467_v37 }
 0x2f7   : >> { %v9358_v3 = vadd.f32 %v1132_v51, %v1088_v0  ;;  %2010 = vmatmul.f32.vlgmr.msrb.gmra.mxu2 %v9131_v17  ;;  %v7966_v17 = vld [vmem:[%s8787_s8 + $0x40] sm:$0xff]  ;;  %v2485_v51 = vand.u32 4294901760, %v2484_v43 }
 0x2f8   : >> { %v1308_v60 = vpop.f32.mrf.mxu3  ;;  %v9366_v50 = vpop.f32.mrf.mxu0  ;;  %2411 = vmatpush.msrb.mxu2 %v9303_v11  ;;  %2335 = vmatpush.msrb.mxu0 %v2193_v34  ;;  %v2109_v35 = vsel %vm926_vm12, %v7966_v17, 0 }
 0x2f9   : >> { %v1243_v15 = vpop.f32.mrf.mxu2  ;;  %2474 = vmatpush.msrb.mxu3 %v2473_v9 }
 0x2fa   : >> { %v9371_v20 = vpop.f32.mrf.mxu1  ;;  %v9373_v14 = vadd.f32 %v1308_v60, %v1243_v15  ;;  %2413 = vmatpush.msrb.mxu2 %v9313_v16  ;;  %2339 = vmatpush.msrb.mxu0 %v2199_v39 }
 0x2fb   : >> { %2480 = vmatpush.msrb.mxu3 %v2479_v13 }
 0x2fc   : >> { %1922 = vmatmul.f32.gmra.mxu0 %v9156_v58  ;;  %2415 = vmatpush.msrb.mxu2 %v9321_v18 }
 0x2fd   : >> { %1959 = vmatmul.f32.vlgmr.msrb.gmra.mxu1 %v9145_v28  ;;  %2051 = vmatmul.f32.gmra.mxu3 %v9147_v31  ;;  %v9392_v28 = vand.u32 4294901760, %v2109_v35 }
 0x2fe   : >> { %2374 = vmatpush.msrb.mxu1 %v9236_v23  ;;  %2343 = vmatpush.msrb.mxu0 %v2205_v7  ;;  %v7967_v23 = vld [vmem:[%s8787_s8 + $0x48] sm:$0xff] }
 0x2ff   : >> { %2014 = vmatmul.f32.gmra.mxu2 %v9147_v31  ;;  %2486 = vmatpush.msrb.mxu3 %v2485_v51  ;;  %v9403_v31 = vsub.f32 %v2109_v35, %v9392_v28  ;;  %v7969_v51 = vld [vmem:[%s8787_s8 + $0x58] sm:$0xff] }
 0x300   : >> { %v1312_v9 = vpop.f32.mrf.mxu3  ;;  %v9388_v53 = vpop.f32.mrf.mxu0  ;;  %2376 = vmatpush.msrb.mxu1 %v9243_v27  ;;  %2417 = vmatpush.msrb.mxu2 %v9330_v36  ;;  %v2112_v27 = vsel %vm926_vm12, %v7967_v23, 0 }
 0x301   : >> { %v1251_v58 = vpop.f32.mrf.mxu2  ;;  %v9412_v12 = vand.u32 4294901760, %v9403_v31  ;;  %v9418_v4 = vand.u32 4294901760, %v2112_v27 }
 0x302   : >> { %v9394_v34 = vpop.f32.mrf.mxu1  ;;  %v9396_v39 = vadd.f32 %v1312_v9, %v1251_v58  ;;  %2378 = vmatpush.msrb.mxu1 %v9257_v57  ;;  %v2118_v9 = vsel %vm926_vm12, %v7969_v51, 0 }
 0x303   : >> { %v9427_v37 = vsub.f32 %v2112_v27, %v9418_v4 }
 0x304   : >> { %1927 = vmatmul.f32.gmra.mxu0 %v9174_v46  ;;  %2380 = vmatpush.msrb.mxu1 %v9279_v59 }
 0x305   : >> { %1965 = vmatmul.f32.gmra.mxu1 %v9163_v48  ;;  %2055 = vmatmul.f32.gmra.mxu3 %v9165_v6  ;;  %v7968_v48 = vld [vmem:[%s8787_s8 + $0x50] sm:$0xff] }
 0x306   : >> { %v2115_v30 = vsel %vm926_vm12, %v7968_v48, 0 }
 0x307   : >> { %2018 = vmatmul.f32.gmra.mxu2 %v9165_v6  ;;  %v2143_v6 = vsub.f32 %v9403_v31, %v9412_v12  ;;  %v9440_v17 = vand.u32 4294901760, %v2115_v30 }
 0x308   : >> { %v1316_v42 = vpop.f32.mrf.mxu3  ;;  %v9409_v7 = vpop.f32.mrf.mxu0 }
 0x309   : >> { %v1259_v57 = vpop.f32.mrf.mxu2  ;;  %v9431_v43 = vand.u32 4294901760, %v2143_v6  ;;  %v9451_v35 = vsub.f32 %v2115_v30, %v9440_v17  ;;  %v9469_v6 = vand.u32 4294901760, %v2118_v9 }
 0x30a   : >> { %v9414_v46 = vpop.f32.mrf.mxu1  ;;  %v9416_v59 = vadd.f32 %v1316_v42, %v1259_v57 }
 0x30b   : >> { %v9467_v48 = vand.u32 4294901760, %v9451_v35  ;;  %v9485_v30 = vsub.f32 %v2118_v9, %v9469_v6 }
 0x30c   : >> { %1932 = vmatmul.f32.gmra.mxu0 %v9203_v40 }
 0x30d   : >> { %1971 = vmatmul.f32.gmra.mxu1 %v9187_v49  ;;  %2059 = vmatmul.f32.gmra.mxu3 %v9189_v55  ;;  %v9438_v49 = vand.u32 4294901760, %v9427_v37 }
 0x30f   : >> { %2022 = vmatmul.f32.gmra.mxu2 %v9189_v55  ;;  %v2151_v55 = vsub.f32 %v9427_v37, %v9438_v49 }
 0x310   : >> { %v1320_v0 = vpop.f32.mrf.mxu3  ;;  %v1350_v13 = vpop.f32.mrf.mxu0 }
 0x311   : >> { %v1267_v60 = vpop.f32.mrf.mxu2  ;;  %v9464_v57 = vand.u32 4294901760, %v2151_v55  ;;  %v9517_v55 = vpop.permute.xlu1 %2698 }
 0x312   : >> { %v9433_v40 = vpop.f32.mrf.mxu1  ;;  %v9435_v15 = vadd.f32 %v1320_v0, %v1267_v60 }
 0x314   : >> { %2145 = vmatmul.f32.vlgmr.msra.gmra.mxu0 %v9431_v43 }
 0x315   : >> { %1977 = vmatmul.f32.gmra.mxu1 %v9215_v56  ;;  %2294 = vmatmul.f32.vlgmr.msra.gmra.mxu3 %v9412_v12  ;;  %v1351_v56 = vadd.f32 %v1350_v13, %v9373_v14  ;;  %v2159_v14 = vsub.f32 %v9451_v35, %v9467_v48 }
 0x316   : >> { %2518 = vmatpush.msra.mxu0 %v9318_v32  ;;  %2652 = vmatpush.msra.mxu3 %v9303_v11 }
 0x317   : >> { %2252 = vmatmul.f32.vlgmr.msra.gmra.mxu2 %v9403_v31  ;;  %v9499_v13 = vand.u32 4294901760, %v2159_v14 }
 0x318   : >> { %v1480_v58 = vpop.f32.mrf.mxu3  ;;  %2521 = vmatpush.msra.mxu0 %v9324_v41  ;;  %2609 = vmatpush.msra.mxu2 %v2465_v54  ;;  %v1355_v23 = vpop.f32.mrf.mxu0 }
 0x319   : >> { %v1443_v27 = vpop.f32.mrf.mxu2  ;;  %2654 = vmatpush.msra.mxu3 %v9313_v16 }
 0x31a   : >> { %v1392_v42 = vpop.f32.mrf.mxu1  ;;  %2524 = vmatpush.msra.mxu0 %v9328_v22  ;;  %2613 = vmatpush.msra.mxu2 %v2471_v26  ;;  %v1356_v26 = vadd.f32 %v1355_v23, %v9396_v39 }
 0x31b   : >> { %v1393_v32 = vadd.f32 %v1392_v42, %v1351_v56  ;;  %2656 = vmatpush.msra.mxu3 %v9321_v18  ;;  %v2691_v42 = vpop.permute.xlu0 %2690 }
 0x31c   : >> { %2527 = vmatpush.msra.mxu0 %v9343_v33  ;;  %2617 = vmatpush.msra.mxu2 %v2477_v21 }
 0x31d   : >> { %v1444_v54 = vadd.f32 %v1443_v27, %v1393_v32  ;;  %2658 = vmatpush.msra.mxu3 %v9330_v36  ;;  %2153 = vmatmul.f32.gmra.mxu0 %v9464_v57 }
 0x31e   : >> { %2210 = vmatmul.f32.vlgmr.msra.gmra.mxu1 %v9392_v28  ;;  %2300 = vmatmul.f32.gmra.mxu3 %v9438_v49 }
 0x31f   : >> { %v9487_v41 = vadd.f32 %v1480_v58, %v1444_v54  ;;  %2562 = vmatpush.msra.mxu1 %v9303_v11  ;;  %2621 = vmatpush.msra.mxu2 %v2483_v10  ;;  %v9502_v11 = vand.u32 4294901760, %v9485_v30  ;;  %v2707_v54 = vsel %vm416_vm3, %v9517_v55, %v2691_v42 }
 0x320   : >> { %v1484_v22 = vpop.f32.mrf.mxu3  ;;  %2257 = vmatmul.f32.gmra.mxu2 %v9427_v37  ;;  %v1360_v21 = vpop.f32.mrf.mxu0 }
 0x321   : >> { %v1447_v0 = vpop.f32.mrf.mxu2  ;;  %2564 = vmatpush.msra.mxu1 %v9313_v16  ;;  %v2167_v16 = vsub.f32 %v9485_v30, %v9502_v11 }
 0x322   : >> { %v1398_v60 = vpop.f32.mrf.mxu1 }
 0x323   : >> { %v1399_v10 = vadd.f32 %v1398_v60, %v1356_v26  ;;  %2566 = vmatpush.msra.mxu1 %v9321_v18  ;;  %v7970_v18 = vld [vmem:[%s12439_s1 + $0x3] ss:$8 sm:$0x3]  ;;  %v9528_v27 = vand.u32 4294901760, %v2167_v16 }
 0x324   : >> { %v9524_v56 = vperm.slane %v7970_v18, 0 }
 0x325   : >> { %v1448_v33 = vadd.f32 %v1447_v0, %v1399_v10  ;;  %2568 = vmatpush.msra.mxu1 %v9330_v36  ;;  %2161 = vmatmul.f32.gmra.mxu0 %v9499_v13  ;;  %v1361_v36 = vadd.f32 %v1360_v21, %v9416_v59  ;;  %v9543_v0 = vpop.permute.xlu1 %2686 }
 0x326   : >> { %2214 = vmatmul.f32.gmra.mxu1 %v9418_v4  ;;  %2306 = vmatmul.f32.gmra.mxu3 %v9467_v48  ;;  %v2720_v14 = vmul.f32 %v9524_v56, %v2707_v54 }
 0x327   : >> { %v9513_v39 = vadd.f32 %v1484_v22, %v1448_v33  ;;  %v9537_v22 = vpop.permute.xlu2 %2688 }
 0x328   : >> { %v1488_v51 = vpop.f32.mrf.mxu3  ;;  %2262 = vmatmul.f32.gmra.mxu2 %v9451_v35  ;;  %v1365_v9 = vpop.f32.mrf.mxu0  ;;  %v9547_v16 = vand.u32 4294901760, %v2720_v14 }
 0x329   : >> { %v1451_v58 = vpop.f32.mrf.mxu2  ;;  %v1366_v60 = vadd.f32 %v1365_v9, %v9435_v15  ;;  %v1166_v15 = vadd.f32 %v9346_v19, %v9270_v44 }
 0x32a   : >> { %v1404_v23 = vpop.f32.mrf.mxu1 }
 0x32b   : >> { %v1405_v32 = vadd.f32 %v1404_v23, %v1361_v36 }
 0x32d   : >> { %v1452_v59 = vadd.f32 %v1451_v58, %v1405_v32  ;;  %2169 = vmatmul.f32.gmra.mxu0 %v9528_v27  ;;  %v2697_v58 = vpop.permute.xlu0 %2696 }
 0x32e   : >> { %2218 = vmatmul.f32.gmra.mxu1 %v9440_v17  ;;  %2312 = vmatmul.f32.gmra.mxu3 %v9502_v11 }
 0x32f   : >> { %v9539_v26 = vadd.f32 %v1488_v51, %v1452_v59  ;;  %v2706_v51 = vsel %vm416_vm3, %v2697_v58, %v9537_v22  ;;  %v9554_v59 = vsub.f32 %v2720_v14, %v9547_v16  ;;  %v2695_v2 = vpop.permute.xlu2 %2694  ;;  %v1203_v14 = vadd.f32 %v9371_v20, %v1166_v15 }
 0x330   : >> { %v1492_v21 = vpop.f32.mrf.mxu3  ;;  %2267 = vmatmul.f32.gmra.mxu2 %v9485_v30  ;;  %v1533_v33 = vpop.f32.mrf.mxu0  ;;  %v2718_v32 = vmul.f32 %v9524_v56, %v2706_v51  ;;  %v9581_v15 = vperm.slane %v7970_v18, 1 }
 0x331   : >> { %v1455_v10 = vpop.f32.mrf.mxu2  ;;  %v12468_v19 = vand.u32 4294901760, %v9554_v59 }
 0x332   : >> { %v1410_v36 = vpop.f32.mrf.mxu1  ;;  %v9559_v9 = vand.u32 4294901760, %v2718_v32 }
 0x333   : >> { %v1411_v23 = vadd.f32 %v1410_v36, %v1366_v60  ;;  %v2705_v60 = vsel %vm416_vm3, %v2695_v2, %v9543_v0  ;;  %v2693_v36 = vpop.permute.xlu1 %2692  ;;  %v2809_v1 = vsub.f32 %v9554_v59, %v12468_v19 }
 0x334   : >> { %v2716_v44 = vmul.f32 %v9524_v56, %v2705_v60  ;;  %v2703_v60 = vsel %vm416_vm3, %v2691_v42, %v9517_v55 }
 0x335   : >> { %v1456_v54 = vadd.f32 %v1455_v10, %v1411_v23  ;;  %2345 = vmatmul.f32.vlgmr.msrb.gmra.mxu0 %v9392_v28  ;;  %v1534_v23 = vadd.f32 %v1533_v33, %v1203_v14  ;;  %v1170_v14 = vadd.f32 %v9366_v50, %v9315_v38 }
 0x336   : >> { %2222 = vmatmul.f32.gmra.mxu1 %v9469_v6  ;;  %2488 = vmatmul.f32.vlgmr.msrb.gmra.mxu3 %v9392_v28  ;;  %v9577_v8 = vand.u32 4294901760, %v2716_v44 }
 0x337   : >> { %v9561_v5 = vadd.f32 %v1492_v21, %v1456_v54  ;;  %2754 = vmatpush.msrb.mxu0 %v9547_v16  ;;  %v9574_v21 = vsub.f32 %v2718_v32, %v9559_v9  ;;  %2905 = vmatpush.msrb.mxu3 %v9547_v16  ;;  %v1207_v50 = vadd.f32 %v9394_v34, %v1170_v14 }
 0x338   : >> { %v1682_v10 = vpop.f32.mrf.mxu3  ;;  %2423 = vmatmul.f32.vlgmr.msrb.gmra.mxu2 %v9431_v43  ;;  %v2685_v43 = vpop.permute.xlu0 %2684  ;;  %v9588_v33 = vsub.f32 %v2716_v44, %v9577_v8  ;;  %v2721_v44 = vmul.f32 %v9581_v15, %v2703_v60 }
 0x339   : >> { %v1541_v51 = vpop.f32.mrf.mxu0  ;;  %v1640_v54 = vpop.f32.mrf.mxu2  ;;  %2861 = vmatpush.msrb.mxu2 %v9554_v59  ;;  %2756 = vmatpush.msrb.mxu0 %v9559_v9  ;;  %v2704_v18 = vsel %vm416_vm3, %v2693_v36, %v2685_v43 }
 0x33a   : >> { %v1598_v20 = vpop.f32.mrf.mxu1  ;;  %2907 = vmatpush.msrb.mxu3 %v9559_v9  ;;  %v2714_v42 = vmul.f32 %v9524_v56, %v2704_v18  ;;  %v12469_v38 = vand.u32 4294901760, %v9588_v33  ;;  %v2702_v56 = vsel %vm416_vm3, %v9537_v22, %v2697_v58  ;;  %v1542_v14 = vadd.f32 %v1541_v51, %v1207_v50 }
 0x33b   : >> { %v1599_v32 = vadd.f32 %v1598_v20, %v1534_v23  ;;  %2864 = vmatpush.msrb.mxu2 %v9574_v21  ;;  %v2814_v23 = vand.u32 4294901760, %v9574_v21  ;;  %2758 = vmatpush.msrb.mxu0 %v9577_v8  ;;  %v2810_v20 = vand.u32 4294901760, %v2809_v1  ;;  %v9632_v51 = vand.u32 4294901760, %v2721_v44 }
 0x33c   : >> { %2909 = vmatpush.msrb.mxu3 %v9577_v8  ;;  %v9617_v18 = vand.u32 4294901760, %v2714_v42  ;;  %v2821_v34 = vsub.f32 %v9588_v33, %v12469_v38 }
 0x33d   : >> { %v1641_v55 = vadd.f32 %v1640_v54, %v1599_v32  ;;  %2349 = vmatmul.f32.gmra.mxu0 %v9418_v4  ;;  %2867 = vmatpush.msrb.mxu2 %v9588_v33  ;;  %v2815_v54 = vsub.f32 %v9574_v21, %v2814_v23 }
 0x33e   : >> { %2382 = vmatmul.f32.vlgmr.msrb.gmra.mxu1 %v9392_v28  ;;  %2492 = vmatmul.f32.gmra.mxu3 %v9418_v4  ;;  %v2822_v22 = vand.u32 4294901760, %v2821_v34 }
 0x33f   : >> { %v9612_v32 = vadd.f32 %v1682_v10, %v1641_v55  ;;  %2811 = vmatpush.msrb.mxu1 %v2810_v20  ;;  %v2816_v1 = vand.u32 4294901760, %v2815_v54  ;;  %v2701_v10 = vsel %vm416_vm3, %v9543_v0, %v2695_v2  ;;  %v9627_v55 = vsub.f32 %v2714_v42, %v9617_v18  ;;  %2760 = vmatpush.msrb.mxu0 %v9617_v18 }
 0x340   : >> { %2431 = vmatmul.f32.gmra.mxu2 %v9464_v57  ;;  %v1688_v60 = vpop.f32.mrf.mxu3  ;;  %2911 = vmatpush.msrb.mxu3 %v9617_v18  ;;  %v2719_v57 = vmul.f32 %v9581_v15, %v2702_v56  ;;  %v2717_v2 = vmul.f32 %v9581_v15, %v2701_v10  ;;  %v1174_v0 = vadd.f32 %v9388_v53, %v9336_v52 }
 0x341   : >> { %v1549_v19 = vpop.f32.mrf.mxu0  ;;  %2817 = vmatpush.msrb.mxu1 %v2816_v1  ;;  %v2826_v50 = vand.u32 4294901760, %v9627_v55  ;;  %2870 = vmatpush.msrb.mxu2 %v9627_v55  ;;  %v2700_v54 = vsel %vm416_vm3, %v2685_v43, %v2693_v36  ;;  %v9653_v52 = vsub.f32 %v2721_v44, %v9632_v51 }
 0x342   : >> { %v1602_v58 = vpop.f32.mrf.mxu1  ;;  %v1645_v38 = vpop.f32.mrf.mxu2  ;;  %v9647_v34 = vand.u32 4294901760, %v2719_v57  ;;  %v1211_v1 = vadd.f32 %v9414_v46, %v1174_v0  ;;  %v9656_v43 = vand.u32 4294901760, %v2717_v2 }
 0x343   : >> { %v1603_v20 = vadd.f32 %v1602_v58, %v1542_v14  ;;  %2823 = vmatpush.msrb.mxu1 %v2822_v22  ;;  %v2827_v56 = vsub.f32 %v9627_v55, %v2826_v50  ;;  %v7973_v55 = vld [vmem:[%s8787_s8 + $0x68] sm:$0xff] }
 0x344   : >> { %v1550_v10 = vadd.f32 %v1549_v19, %v1211_v1  ;;  %v9660_v46 = vsub.f32 %v2719_v57, %v9647_v34  ;;  %v9664_v0 = vsub.f32 %v2717_v2, %v9656_v43 }
 0x345   : >> { %v1646_v42 = vadd.f32 %v1645_v38, %v1603_v20  ;;  %2353 = vmatmul.f32.gmra.mxu0 %v9440_v17  ;;  %v2828_v53 = vand.u32 4294901760, %v2827_v56  ;;  %v2715_v38 = vmul.f32 %v9581_v15, %v2700_v54 }
 0x346   : >> { %2386 = vmatmul.f32.gmra.mxu1 %v9418_v4  ;;  %2496 = vmatmul.f32.gmra.mxu3 %v9440_v17  ;;  %v3092_v19 = vand.u32 4294901760, %v9660_v46  ;;  %v3098_v56 = vand.u32 4294901760, %v9664_v0 }
 0x347   : >> { %v9650_v14 = vadd.f32 %v1688_v60, %v1646_v42  ;;  %2829 = vmatpush.msrb.mxu1 %v2828_v53  ;;  %v3086_v60 = vand.u32 4294901760, %v9653_v52  ;;  %v1178_v42 = vadd.f32 %v9409_v7, %v9358_v3 }
 0x348   : >> { %2439 = vmatmul.f32.gmra.mxu2 %v9499_v13  ;;  %v1694_v36 = vpop.f32.mrf.mxu3  ;;  %v9666_v13 = vand.u32 4294901760, %v2715_v38 }
 0x349   : >> { %v1557_v22 = vpop.f32.mrf.mxu0  ;;  %v1215_v57 = vadd.f32 %v9433_v40, %v1178_v42  ;;  %v3087_v2 = vsub.f32 %v9653_v52, %v3086_v60  ;;  %v3093_v40 = vsub.f32 %v9660_v46, %v3092_v19 }
 0x34a   : >> { %v1606_v58 = vpop.f32.mrf.mxu1  ;;  %v1650_v20 = vpop.f32.mrf.mxu2  ;;  %v9682_v7 = vsub.f32 %v2715_v38, %v9666_v13 }
 0x34b   : >> { %v1607_v44 = vadd.f32 %v1606_v58, %v1550_v10  ;;  %v1558_v1 = vadd.f32 %v1557_v22, %v1215_v57  ;;  %v3094_v22 = vand.u32 4294901760, %v3093_v40 }
 0x34c   : >> { %v3104_v38 = vand.u32 4294901760, %v9682_v7 }
 0x34d   : >> { %v1651_v15 = vadd.f32 %v1650_v20, %v1607_v44  ;;  %2357 = vmatmul.f32.gmra.mxu0 %v9469_v6  ;;  %v3088_v20 = vand.u32 4294901760, %v3087_v2 }
 0x34e   : >> { %2390 = vmatmul.f32.gmra.mxu1 %v9440_v17  ;;  %2500 = vmatmul.f32.gmra.mxu3 %v9469_v6 }
 0x34f   : >> { %v9675_v54 = vadd.f32 %v1694_v36, %v1651_v15  ;;  %v12484_v15 = vand.u32 4294901760, %v9554_v59 }
 0x350   : >> { %2447 = vmatmul.f32.gmra.mxu2 %v9528_v27  ;;  %v1700_v3 = vpop.f32.mrf.mxu3  ;;  %v3099_v27 = vsub.f32 %v9664_v0, %v3098_v56 }
 0x351   : >> { %v9685_v53 = vpop.f32.mrf.mxu0 }
 0x352   : >> { %v1610_v10 = vpop.f32.mrf.mxu1  ;;  %v1655_v58 = vpop.f32.mrf.mxu2  ;;  %v3100_v2 = vand.u32 4294901760, %v3099_v27 }
 0x353   : >> { %v1611_v36 = vadd.f32 %v1610_v10, %v1558_v1 }
 0x355   : >> { %v1656_v44 = vadd.f32 %v1655_v58, %v1611_v36  ;;  %2530 = vmatmul.f32.vlgmr.msra.gmra.mxu0 %v9403_v31  ;;  %v3105_v31 = vsub.f32 %v9682_v7, %v3104_v38  ;;  %v7972_v58 = vld [vmem:[%s8787_s8 + $0x60] sm:$0xff] }
 0x356   : >> { %2394 = vmatmul.f32.gmra.mxu1 %v9469_v6  ;;  %2660 = vmatmul.f32.vlgmr.msra.gmra.mxu3 %v9392_v28 }
 0x357   : >> { %v9697_v42 = vadd.f32 %v1700_v3, %v1656_v44  ;;  %2952 = vmatpush.msra.mxu0 %v12484_v15  ;;  %3089 = vmatpush.msra.mxu3 %v3088_v20  ;;  %v3106_v40 = vand.u32 4294901760, %v3105_v31 }
 0x358   : >> { %2623 = vmatmul.f32.vlgmr.msra.gmra.mxu2 %v9392_v28  ;;  %v1876_v57 = vpop.f32.mrf.mxu3  ;;  %v12485_v28 = vand.u32 4294901760, %v9588_v33 }
 0x359   : >> { %v9705_v1 = vpop.f32.mrf.mxu0  ;;  %3032 = vmatpush.msra.mxu2 %v9632_v51  ;;  %2956 = vmatpush.msra.mxu0 %v2814_v23 }
 0x35a   : >> { %v9710_v3 = vpop.f32.mrf.mxu1  ;;  %v1811_v59 = vpop.f32.mrf.mxu2  ;;  %3095 = vmatpush.msra.mxu3 %v3094_v22 }
 0x35b   : >> { %v1812_v10 = vadd.f32 %v1811_v59, %v9487_v41  ;;  %3034 = vmatpush.msra.mxu2 %v9647_v34  ;;  %2960 = vmatpush.msra.mxu0 %v12485_v28  ;;  %v2730_v41 = vsel %vm926_vm12, %v7972_v58, 0  ;;  %v7975_v58 = vld [vmem:[%s8787_s8 + $0x78] sm:$0xff] }
 0x35c   : >> { %3101 = vmatpush.msra.mxu3 %v3100_v2 }
 0x35d   : >> { %v9717_v36 = vadd.f32 %v1876_v57, %v1812_v10  ;;  %2535 = vmatmul.f32.gmra.mxu0 %v9427_v37  ;;  %3036 = vmatpush.msra.mxu2 %v9656_v43 }
 0x35e   : >> { %2572 = vmatmul.f32.vlgmr.msra.gmra.mxu1 %v9412_v12  ;;  %2664 = vmatmul.f32.gmra.mxu3 %v9418_v4  ;;  %v9732_v12 = vand.u32 4294901760, %v2730_v41 }
 0x35f   : >> { %2995 = vmatpush.msra.mxu1 %v9547_v16  ;;  %2964 = vmatpush.msra.mxu0 %v2826_v50  ;;  %v2733_v50 = vsel %vm926_vm12, %v7973_v55, 0 }
 0x360   : >> { %2627 = vmatmul.f32.gmra.mxu2 %v9418_v4  ;;  %v1880_v21 = vpop.f32.mrf.mxu3  ;;  %3107 = vmatpush.msra.mxu3 %v3106_v40  ;;  %v9757_v27 = vand.u32 4294901760, %v2733_v50 }
 0x361   : >> { %v9728_v33 = vpop.f32.mrf.mxu0  ;;  %2997 = vmatpush.msra.mxu1 %v9559_v9  ;;  %3038 = vmatpush.msra.mxu2 %v9666_v13  ;;  %v9744_v9 = vsub.f32 %v2730_v41, %v9732_v12 }
 0x362   : >> { %v9734_v37 = vpop.f32.mrf.mxu1  ;;  %v1819_v23 = vpop.f32.mrf.mxu2  ;;  %v9769_v15 = vsub.f32 %v2733_v50, %v9757_v27 }
 0x363   : >> { %v1820_v16 = vadd.f32 %v1819_v23, %v9513_v39  ;;  %2999 = vmatpush.msra.mxu1 %v9577_v8  ;;  %v9753_v20 = vand.u32 4294901760, %v9744_v9 }
 0x364   : >> { %v9778_v10 = vand.u32 4294901760, %v9769_v15 }
 0x365   : >> { %v9739_v4 = vadd.f32 %v1880_v21, %v1820_v16  ;;  %2540 = vmatmul.f32.gmra.mxu0 %v9451_v35  ;;  %3001 = vmatpush.msra.mxu1 %v9617_v18 }
 0x366   : >> { %2578 = vmatmul.f32.gmra.mxu1 %v9438_v49  ;;  %2668 = vmatmul.f32.gmra.mxu3 %v9440_v17  ;;  %v7974_v49 = vld [vmem:[%s8787_s8 + $0x70] sm:$0xff] }
 0x367   : >> { %v2736_v57 = vsel %vm926_vm12, %v7974_v49, 0 }
 0x368   : >> { %2631 = vmatmul.f32.gmra.mxu2 %v9440_v17  ;;  %v1884_v8 = vpop.f32.mrf.mxu3  ;;  %v2764_v17 = vsub.f32 %v9744_v9, %v9753_v20 }
 0x369   : >> { %v9750_v39 = vpop.f32.mrf.mxu0 }
 0x36a   : >> { %v9755_v35 = vpop.f32.mrf.mxu1  ;;  %v1827_v18 = vpop.f32.mrf.mxu2  ;;  %v9773_v31 = vand.u32 4294901760, %v2764_v17 }
 0x36b   : >> { %v1828_v44 = vadd.f32 %v1827_v18, %v9539_v26 }
 0x36d   : >> { %v9761_v22 = vadd.f32 %v1884_v8, %v1828_v44  ;;  %2545 = vmatmul.f32.gmra.mxu0 %v9485_v30 }
 0x36e   : >> { %2584 = vmatmul.f32.gmra.mxu1 %v9467_v48  ;;  %2672 = vmatmul.f32.gmra.mxu3 %v9469_v6  ;;  %v9780_v48 = vand.u32 4294901760, %v2736_v57 }
 0x370   : >> { %2635 = vmatmul.f32.gmra.mxu2 %v9469_v6  ;;  %v1888_v26 = vpop.f32.mrf.mxu3  ;;  %v2772_v6 = vsub.f32 %v9769_v15, %v9778_v10  ;;  %v9794_v41 = vsub.f32 %v2736_v57, %v9780_v48 }
 0x371   : >> { %v1918_v2 = vpop.f32.mrf.mxu0 }
 0x372   : >> { %v9775_v59 = vpop.f32.mrf.mxu1  ;;  %v1835_v30 = vpop.f32.mrf.mxu2  ;;  %v9807_v50 = vand.u32 4294901760, %v2772_v6  ;;  %v9810_v8 = vand.u32 4294901760, %v9794_v41  ;;  %v12486_v6 = vld [vmem:[#allocation6_spill] sm:$0xff] }
 0x373   : >> { %v1836_v28 = vadd.f32 %v1835_v30, %v9561_v5  ;;  %v2739_v5 = vsel %vm926_vm12, %v7975_v58, 0  ;;  %4517 = vrot.lane.b32.xlu2 %v12486_v6, %s8297_s30  ;;  %5138 = vrot.lane.b32.xlu1 %v12486_v6, %s8298_s7 }
 0x374   : >> { %v9812_v18 = vand.u32 4294901760, %v2739_v5  ;;  %5759 = vrot.lane.b32.xlu0 %v12486_v6, %s8299_s12 }
 0x375   : >> { %v9784_v40 = vadd.f32 %v1888_v26, %v1836_v28  ;;  %2766 = vmatmul.f32.vlgmr.msrb.gmra.mxu0 %v9773_v31 }
 0x376   : >> { %2590 = vmatmul.f32.gmra.mxu1 %v9502_v11  ;;  %2915 = vmatmul.f32.vlgmr.msrb.gmra.mxu3 %v9753_v20  ;;  %v1919_v11 = vadd.f32 %v1918_v2, %v9717_v36  ;;  %v2780_v36 = vsub.f32 %v9794_v41, %v9810_v8  ;;  %v9828_v44 = vsub.f32 %v2739_v5, %v9812_v18 }
 0x377   : >> { %3139 = vmatpush.msrb.mxu0 %v9653_v52  ;;  %3273 = vmatpush.msrb.mxu3 %v9632_v51 }
 0x378   : >> { %2873 = vmatmul.f32.vlgmr.msrb.gmra.mxu2 %v9744_v9  ;;  %v2048_v21 = vpop.f32.mrf.mxu3  ;;  %v2781_v57 = vand.u32 4294901760, %v2780_v36  ;;  %v9843_v26 = vand.u32 4294901760, %v9828_v44 }
 0x379   : >> { %3142 = vmatpush.msrb.mxu0 %v9660_v46  ;;  %3230 = vmatpush.msrb.mxu2 %v3086_v60  ;;  %v1923_v23 = vpop.f32.mrf.mxu0 }
 0x37a   : >> { %3275 = vmatpush.msrb.mxu3 %v9647_v34  ;;  %v1960_v16 = vpop.f32.mrf.mxu1  ;;  %v2011_v55 = vpop.f32.mrf.mxu2 }
 0x37b   : >> { %3145 = vmatpush.msrb.mxu0 %v9664_v0  ;;  %3234 = vmatpush.msrb.mxu2 %v3092_v19  ;;  %v1961_v52 = vadd.f32 %v1960_v16, %v1919_v11  ;;  %v1924_v19 = vadd.f32 %v1923_v23, %v9739_v4 }
 0x37c   : >> { %3277 = vmatpush.msrb.mxu3 %v9656_v43  ;;  %5134 = vrot.lane.b32.xlu2 %v8253_v61, %s8298_s7 }
 0x37d   : >> { %3148 = vmatpush.msrb.mxu0 %v9682_v7  ;;  %3238 = vmatpush.msrb.mxu2 %v3098_v56  ;;  %v2012_v60 = vadd.f32 %v2011_v55, %v1961_v52 }
 0x37e   : >> { %3279 = vmatpush.msrb.mxu3 %v9666_v13  ;;  %2774 = vmatmul.f32.gmra.mxu0 %v9807_v50 }
 0x37f   : >> { %v9830_v46 = vadd.f32 %v2048_v21, %v2012_v60  ;;  %2831 = vmatmul.f32.vlgmr.msrb.gmra.mxu1 %v9732_v12  ;;  %2921 = vmatmul.f32.gmra.mxu3 %v9778_v10 }
 0x380   : >> { %3183 = vmatpush.msrb.mxu1 %v9632_v51  ;;  %3242 = vmatpush.msrb.mxu2 %v3104_v38  ;;  %v2052_v0 = vpop.f32.mrf.mxu3 }
 0x381   : >> { %2878 = vmatmul.f32.gmra.mxu2 %v9769_v15  ;;  %v1928_v56 = vpop.f32.mrf.mxu0  ;;  %5755 = vrot.lane.b32.xlu1 %v8253_v61, %s8299_s12 }
 0x382   : >> { %3185 = vmatpush.msrb.mxu1 %v9647_v34  ;;  %v1966_v49 = vpop.f32.mrf.mxu1  ;;  %v2015_v17 = vpop.f32.mrf.mxu2  ;;  %v2788_v34 = vsub.f32 %v9828_v44, %v9843_v26  ;;  %v1929_v2 = vadd.f32 %v1928_v56, %v9761_v22 }
 0x383   : >> { %v1967_v51 = vadd.f32 %v1966_v49, %v1924_v19 }
 0x384   : >> { %3187 = vmatpush.msrb.mxu1 %v9656_v43  ;;  %v2789_v28 = vand.u32 4294901760, %v2788_v34  ;;  %5140 = vrot.lane.b32.xlu2 %v8257_v47, %s8298_s7 }
 0x385   : >> { %v2016_v7 = vadd.f32 %v2015_v17, %v1967_v51 }
 0x386   : >> { %3189 = vmatpush.msrb.mxu1 %v9666_v13  ;;  %2782 = vmatmul.f32.gmra.mxu0 %v2781_v57 }
 0x387   : >> { %v9853_v38 = vadd.f32 %v2052_v0, %v2016_v7  ;;  %2835 = vmatmul.f32.gmra.mxu1 %v9757_v27  ;;  %2927 = vmatmul.f32.gmra.mxu3 %v9810_v8 }
 0x388   : >> { %v2056_v4 = vpop.f32.mrf.mxu3 }
 0x389   : >> { %2883 = vmatmul.f32.gmra.mxu2 %v9794_v41  ;;  %v1933_v30 = vpop.f32.mrf.mxu0  ;;  %5761 = vrot.lane.b32.xlu1 %v8257_v47, %s8299_s12 }
 0x38a   : >> { %v1972_v43 = vpop.f32.mrf.mxu1  ;;  %v2019_v13 = vpop.f32.mrf.mxu2  ;;  %v1934_v11 = vadd.f32 %v1933_v30, %v9784_v40 }
 0x38b   : >> { %v1973_v58 = vadd.f32 %v1972_v43, %v1929_v2 }
 0x38c   : >> { %5757 = vrot.lane.b32.xlu2 %v8245_v62, %s8299_s12 }
 0x38d   : >> { %v2020_v5 = vadd.f32 %v2019_v13, %v1973_v58 }
 0x38e   : >> { %2790 = vmatmul.f32.gmra.mxu0 %v2789_v28 }
 0x38f   : >> { %v9863_v21 = vadd.f32 %v2056_v4, %v2020_v5  ;;  %2839 = vmatmul.f32.gmra.mxu1 %v9780_v48  ;;  %2933 = vmatmul.f32.gmra.mxu3 %v9843_v26 }
 0x390   : >> { %v2060_v22 = vpop.f32.mrf.mxu3 }
 0x391   : >> { %2888 = vmatmul.f32.gmra.mxu2 %v9828_v44  ;;  %v2146_v23 = vpop.f32.mrf.mxu0 }
 0x392   : >> { %v1978_v16 = vpop.f32.mrf.mxu1  ;;  %v2023_v55 = vpop.f32.mrf.mxu2 }
 0x393   : >> { %v1979_v52 = vadd.f32 %v1978_v16, %v1934_v11 }
 0x394   : >> { %5763 = vrot.lane.b32.xlu2 %v8249_v29, %s8299_s12 }
 0x395   : >> { %v2024_v60 = vadd.f32 %v2023_v55, %v1979_v52 }
 0x396   : >> { %2966 = vmatmul.f32.vlgmr.msra.gmra.mxu0 %v9732_v12 }
 0x397   : >> { %v9870_v36 = vadd.f32 %v2060_v22, %v2024_v60  ;;  %2843 = vmatmul.f32.gmra.mxu1 %v9812_v18  ;;  %3109 = vmatmul.f32.vlgmr.msra.gmra.mxu3 %v9732_v12 }
 0x398   : >> { %v2295_v0 = vpop.f32.mrf.mxu3 }
 0x399   : >> { %3044 = vmatmul.f32.vlgmr.msra.gmra.mxu2 %v9773_v31 }
 0x39a   : >> { %v2154_v19 = vpop.f32.mrf.mxu0  ;;  %v2253_v40 = vpop.f32.mrf.mxu2 }
 0x39b   : >> { %v2211_v56 = vpop.f32.mrf.mxu1 }
 0x39c   : >> { %v2212_v49 = vadd.f32 %v2211_v56, %v2146_v23  ;;  %v9890_v23 = vand.u32 4294901760, %v8245_v62  ;;  %5751 = vrot.lane.b32.xlu2 %v8269_v45, %s8299_s12 }
 0x39e   : >> { %v2254_v17 = vadd.f32 %v2253_v40, %v2212_v49  ;;  %2970 = vmatmul.f32.gmra.mxu0 %v9757_v27  ;;  %v3390_v52 = vsub.f32 %v8245_v62, %v9890_v23  ;;  %3488 = vmatpush.msra.mxu3 %v9890_v23  ;;  %v9903_v40 = vand.u32 4294901760, %v8261_v63 }
 0x39f   : >> { %3003 = vmatmul.f32.vlgmr.msra.gmra.mxu1 %v9732_v12  ;;  %3113 = vmatmul.f32.gmra.mxu3 %v9757_v27 }
 0x3a0   : >> { %v9878_v51 = vadd.f32 %v2295_v0, %v2254_v17  ;;  %3337 = vmatpush.msra.mxu0 %v9890_v23  ;;  %3444 = vmatpush.msra.mxu2 %v3390_v52  ;;  %v3391_v56 = vand.u32 4294901760, %v3390_v52  ;;  %v9910_v17 = vand.u32 4294901760, %v8269_v45 }
 0x3a1   : >> { %3052 = vmatmul.f32.gmra.mxu2 %v9807_v50  ;;  %v2301_v7 = vpop.f32.mrf.mxu3 }
 0x3a2   : >> { %v2162_v34 = vpop.f32.mrf.mxu0 }
 0x3a3   : >> { %v2215_v4 = vpop.f32.mrf.mxu1  ;;  %v2258_v2 = vpop.f32.mrf.mxu2 }
 0x3a4   : >> { %v2216_v31 = vadd.f32 %v2215_v4, %v2154_v19 }
 0x3a6   : >> { %v2259_v30 = vadd.f32 %v2258_v2, %v2216_v31  ;;  %2974 = vmatmul.f32.gmra.mxu0 %v9780_v48 }
 0x3a7   : >> { %3007 = vmatmul.f32.gmra.mxu1 %v9757_v27  ;;  %3117 = vmatmul.f32.gmra.mxu3 %v9780_v48 }
 0x3a8   : >> { %v9884_v43 = vadd.f32 %v2301_v7, %v2259_v30  ;;  %v3392_v7 = vsub.f32 %v3390_v52, %v3391_v56  ;;  %v3408_v30 = vsub.f32 %v8269_v45, %v9910_v17  ;;  %v1734_v52 = vadd.f32 %v9685_v53, %v9612_v32 }
 0x3a9   : >> { %3060 = vmatmul.f32.gmra.mxu2 %v2781_v57  ;;  %v2307_v13 = vpop.f32.mrf.mxu3  ;;  %v9896_v57 = vand.u32 4294901760, %v8253_v61 }
 0x3aa   : >> { %v2170_v58 = vpop.f32.mrf.mxu0  ;;  %v3393_v31 = vand.u32 4294901760, %v3392_v7  ;;  %v1771_v7 = vadd.f32 %v9710_v3, %v1734_v52  ;;  %v7979_v52 = vld [vmem:[%s8787_s8 + $0x90] sm:$0xff] }
 0x3ab   : >> { %v2219_v5 = vpop.f32.mrf.mxu1  ;;  %v2263_v22 = vpop.f32.mrf.mxu2  ;;  %3339 = vmatpush.msra.mxu0 %v9896_v57  ;;  %3490 = vmatpush.msra.mxu3 %v9896_v57 }
 0x3ac   : >> { %v2220_v50 = vadd.f32 %v2219_v5, %v2162_v34  ;;  %v3402_v34 = vsub.f32 %v8261_v63, %v9903_v40  ;;  %3394 = vmatpush.msra.mxu1 %v3393_v31  ;;  %v7977_v31 = vld [vmem:[%s8787_s8 + $0x80] sm:$0xff] }
 0x3ad   : >> { %3341 = vmatpush.msra.mxu0 %v9903_v40  ;;  %3492 = vmatpush.msra.mxu3 %v9903_v40 }
 0x3ae   : >> { %v2264_v11 = vadd.f32 %v2263_v22, %v2220_v50  ;;  %2978 = vmatmul.f32.gmra.mxu0 %v9812_v18 }
 0x3af   : >> { %3011 = vmatmul.f32.gmra.mxu1 %v9780_v48  ;;  %3121 = vmatmul.f32.gmra.mxu3 %v9812_v18 }
 0x3b0   : >> { %v9892_v16 = vadd.f32 %v2307_v13, %v2264_v11  ;;  %3343 = vmatpush.msra.mxu0 %v9910_v17  ;;  %v3409_v11 = vand.u32 4294901760, %v3408_v30  ;;  %3494 = vmatpush.msra.mxu3 %v9910_v17 }
 0x3b1   : >> { %3068 = vmatmul.f32.gmra.mxu2 %v2789_v28  ;;  %v2313_v55 = vpop.f32.mrf.mxu3  ;;  %v3396_v28 = vsub.f32 %v8253_v61, %v9896_v57 }
 0x3b2   : >> { %v2346_v60 = vpop.f32.mrf.mxu0 }
 0x3b3   : >> { %v2223_v0 = vpop.f32.mrf.mxu1  ;;  %v2268_v19 = vpop.f32.mrf.mxu2  ;;  %3447 = vmatpush.msra.mxu2 %v3396_v28  ;;  %v3397_v4 = vand.u32 4294901760, %v3396_v28 }
 0x3b4   : >> { %v2224_v49 = vadd.f32 %v2223_v0, %v2170_v58  ;;  %v3403_v58 = vand.u32 4294901760, %v3402_v34  ;;  %v2347_v0 = vadd.f32 %v2346_v60, %v9878_v51  ;;  %v3313_v51 = vsel %vm926_vm12, %v7977_v31, 0 }
 0x3b5   : >> { %v3398_v13 = vsub.f32 %v3396_v28, %v3397_v4  ;;  %3450 = vmatpush.msra.mxu2 %v3402_v34  ;;  %v1738_v60 = vadd.f32 %v9705_v1, %v9650_v14 }
 0x3b6   : >> { %v2269_v2 = vadd.f32 %v2268_v19, %v2224_v49  ;;  %3151 = vmatmul.f32.vlgmr.msrb.gmra.mxu0 %v9744_v9  ;;  %v3404_v50 = vsub.f32 %v3402_v34, %v3403_v58 }
 0x3b7   : >> { %3015 = vmatmul.f32.gmra.mxu1 %v9812_v18  ;;  %3281 = vmatmul.f32.vlgmr.msrb.gmra.mxu3 %v9732_v12  ;;  %v3399_v22 = vand.u32 4294901760, %v3398_v13  ;;  %v1775_v13 = vadd.f32 %v9734_v37, %v1738_v60  ;;  %v9961_v37 = vand.u32 4294901760, %v8241_v24 }
 0x3b8   : >> { %v9920_v5 = vadd.f32 %v2313_v55, %v2269_v2  ;;  %3453 = vmatpush.msra.mxu2 %v3408_v30  ;;  %v3405_v49 = vand.u32 4294901760, %v3404_v50  ;;  %3535 = vmatpush.msrb.mxu0 %v3391_v56 }
 0x3b9   : >> { %3244 = vmatmul.f32.vlgmr.msrb.gmra.mxu2 %v9732_v12  ;;  %v2489_v9 = vpop.f32.mrf.mxu3  ;;  %3400 = vmatpush.msra.mxu1 %v3399_v22  ;;  %v3410_v12 = vsub.f32 %v3408_v30, %v3409_v11 }
 0x3ba   : >> { %v2350_v19 = vpop.f32.mrf.mxu0  ;;  %3539 = vmatpush.msrb.mxu0 %v3397_v4  ;;  %v9943_v4 = vand.u32 4294901760, %v3313_v51  ;;  %3615 = vmatpush.msrb.mxu2 %v9961_v37 }
 0x3bb   : >> { %v2383_v55 = vpop.f32.mrf.mxu1  ;;  %v2424_v28 = vpop.f32.mrf.mxu2  ;;  %3406 = vmatpush.msra.mxu1 %v3405_v49  ;;  %v3411_v32 = vand.u32 4294901760, %v3410_v12  ;;  %v2351_v56 = vadd.f32 %v2350_v19, %v9884_v43 }
 0x3bc   : >> { %v2384_v34 = vadd.f32 %v2383_v55, %v2347_v0  ;;  %v9929_v2 = vadd.f32 %v2489_v9, %v2424_v28  ;;  %3543 = vmatpush.msrb.mxu0 %v3403_v58  ;;  %v7978_v9 = vld [vmem:[%s8787_s8 + $0x88] sm:$0xff]  ;;  %v9955_v14 = vsub.f32 %v3313_v51, %v9943_v4 }
 0x3bd   : >> { %3412 = vmatpush.msra.mxu1 %v3411_v32  ;;  %v3316_v1 = vsel %vm926_vm12, %v7978_v9, 0  ;;  %v3319_v32 = vsel %vm926_vm12, %v7979_v52, 0 }
 0x3be   : >> { %v9932_v53 = vadd.f32 %v2384_v34, %v1771_v7  ;;  %3156 = vmatmul.f32.gmra.mxu0 %v9769_v15  ;;  %v9976_v50 = vand.u32 4294901760, %v9955_v14  ;;  %v10003_v7 = vand.u32 4294901760, %v12486_v6 }
 0x3bf   : >> { %3193 = vmatmul.f32.vlgmr.msrb.gmra.mxu1 %v9753_v20  ;;  %3285 = vmatmul.f32.gmra.mxu3 %v9757_v27 }
 0x3c0   : >> { %3578 = vmatpush.msrb.mxu1 %v9890_v23  ;;  %3547 = vmatpush.msrb.mxu0 %v3409_v11  ;;  %v10023_v60 = vsub.f32 %v12486_v6, %v10003_v7 }
 0x3c1   : >> { %3248 = vmatmul.f32.gmra.mxu2 %v9757_v27  ;;  %v2493_v3 = vpop.f32.mrf.mxu3 }
 0x3c2   : >> { %v2354_v15 = vpop.f32.mrf.mxu0  ;;  %3580 = vmatpush.msrb.mxu1 %v9896_v57  ;;  %v9970_v57 = vand.u32 4294901760, %v8249_v29 }
 0x3c3   : >> { %v2387_v20 = vpop.f32.mrf.mxu1  ;;  %v2432_v30 = vpop.f32.mrf.mxu2 }
 0x3c4   : >> { %v2388_v58 = vadd.f32 %v2387_v20, %v2351_v56  ;;  %v9947_v27 = vadd.f32 %v2493_v3, %v2432_v30  ;;  %3582 = vmatpush.msrb.mxu1 %v9903_v40  ;;  %v2355_v40 = vadd.f32 %v2354_v15, %v9892_v16  ;;  %v9985_v19 = vsub.f32 %v8249_v29, %v9970_v57  ;;  %v10447_v29 = vld [vmem:[%s12439_s1 + $0x6] ss:$8 sm:$0x3] }
 0x3c5   : >> { %3617 = vmatpush.msrb.mxu2 %v9970_v57  ;;  %v1746_v56 = vadd.f32 %v9750_v39, %v9697_v42  ;;  %v3687_v30 = vand.u32 4294901760, %v10023_v60 }
 0x3c6   : >> { %v9951_v23 = vadd.f32 %v2388_v58, %v1775_v13  ;;  %3161 = vmatmul.f32.gmra.mxu0 %v9794_v41  ;;  %3584 = vmatpush.msrb.mxu1 %v9910_v17  ;;  %v9967_v41 = vsub.f32 %v8241_v24, %v9961_v37  ;;  %v9978_v17 = vand.u32 4294901760, %v3316_v1  ;;  %v3675_v49 = vand.u32 4294901760, %v9985_v19 }
 0x3c7   : >> { %3199 = vmatmul.f32.gmra.mxu1 %v9778_v10  ;;  %3289 = vmatmul.f32.gmra.mxu3 %v9780_v48  ;;  %v1742_v10 = vadd.f32 %v9728_v33, %v9675_v54  ;;  %v9988_v54 = vand.u32 4294901760, %v8257_v47 }
 0x3c8   : >> { %v3669_v0 = vand.u32 4294901760, %v9967_v41  ;;  %v10011_v31 = vsub.f32 %v3316_v1, %v9978_v17  ;;  %v3676_v3 = vsub.f32 %v9985_v19, %v3675_v49 }
 0x3c9   : >> { %3252 = vmatmul.f32.gmra.mxu2 %v9780_v48  ;;  %v2497_v43 = vpop.f32.mrf.mxu3  ;;  %v1779_v33 = vadd.f32 %v9755_v35, %v1742_v10  ;;  %v10000_v12 = vsub.f32 %v8257_v47, %v9988_v54  ;;  %v3347_v35 = vsub.f32 %v9955_v14, %v9976_v50  ;;  %v3688_v10 = vsub.f32 %v10023_v60, %v3687_v30 }
 0x3ca   : >> { %v2358_v22 = vpop.f32.mrf.mxu0  ;;  %v3670_v28 = vsub.f32 %v9967_v41, %v3669_v0  ;;  %3619 = vmatpush.msrb.mxu2 %v9988_v54  ;;  %v3677_v15 = vand.u32 4294901760, %v3676_v3  ;;  %v10035_v1 = vand.u32 4294901760, %v10011_v31 }
 0x3cb   : >> { %v2391_v48 = vpop.f32.mrf.mxu1  ;;  %v2440_v11 = vpop.f32.mrf.mxu2  ;;  %v2359_v13 = vadd.f32 %v2358_v22, %v9920_v5  ;;  %v10032_v9 = vand.u32 4294901760, %v3347_v35  ;;  %v7980_v22 = vld [vmem:[%s8787_s8 + $0x98] sm:$0xff] }
 0x3cc   : >> { %v2392_v16 = vadd.f32 %v2391_v48, %v2355_v40  ;;  %v9991_v55 = vadd.f32 %v2497_v43, %v2440_v11  ;;  %v3671_v51 = vand.u32 4294901760, %v3670_v28  ;;  %3621 = vmatpush.msrb.mxu2 %v10003_v7  ;;  %v10037_v43 = vand.u32 4294901760, %v3319_v32 }
 0x3cd   : >> { %v1783_v40 = vadd.f32 %v9775_v59, %v1746_v56  ;;  %v3689_v11 = vand.u32 4294901760, %v3688_v10  ;;  %v3322_v59 = vsel %vm926_vm12, %v7980_v22, 0 }
 0x3ce   : >> { %v10005_v34 = vadd.f32 %v2392_v16, %v1779_v33  ;;  %3166 = vmatmul.f32.gmra.mxu0 %v9828_v44  ;;  %v3681_v44 = vand.u32 4294901760, %v10000_v12  ;;  %3672 = vmatpush.msrb.mxu3 %v3671_v51  ;;  %v3355_v33 = vsub.f32 %v10011_v31, %v10035_v1  ;;  %v10052_v16 = vsub.f32 %v3319_v32, %v10037_v43 }
 0x3cf   : >> { %3205 = vmatmul.f32.gmra.mxu1 %v9810_v8  ;;  %3293 = vmatmul.f32.gmra.mxu3 %v9812_v18 }
 0x3d0   : >> { %v3682_v20 = vsub.f32 %v10000_v12, %v3681_v44  ;;  %3678 = vmatpush.msrb.mxu3 %v3677_v15  ;;  %v10063_v51 = vand.u32 4294901760, %v3355_v33  ;;  %v10066_v3 = vand.u32 4294901760, %v10052_v16 }
 0x3d1   : >> { %3256 = vmatmul.f32.gmra.mxu2 %v9812_v18  ;;  %v2501_v8 = vpop.f32.mrf.mxu3 }
 0x3d2   : >> { %v2531_v58 = vpop.f32.mrf.mxu0  ;;  %v3683_v18 = vand.u32 4294901760, %v3682_v20 }
 0x3d3   : >> { %v2395_v42 = vpop.f32.mrf.mxu1  ;;  %v2448_v39 = vpop.f32.mrf.mxu2  ;;  %v2532_v35 = vadd.f32 %v2531_v58, %v9929_v2 }
 0x3d4   : >> { %v2396_v48 = vadd.f32 %v2395_v42, %v2359_v13  ;;  %v10043_v5 = vadd.f32 %v2501_v8, %v2448_v39  ;;  %3684 = vmatpush.msrb.mxu3 %v3683_v18  ;;  %v10121_v39 = vpop.permute.xlu0 %3902  ;;  %v7981_v18 = vld [vmem:[%s12439_s1 + $0x5] ss:$8 sm:$0x3] }
 0x3d6   : >> { %v10046_v52 = vadd.f32 %v2396_v48, %v1783_v40  ;;  %3349 = vmatmul.f32.vlgmr.msra.gmra.mxu0 %v10032_v9  ;;  %3690 = vmatpush.msrb.mxu3 %v3689_v11  ;;  %v3914_v11 = vperm.slane %v7981_v18, 0 }
 0x3d7   : >> { %3211 = vmatmul.f32.gmra.mxu1 %v9843_v26  ;;  %3498 = vmatmul.f32.vlgmr.msra.gmra.mxu3 %v9976_v50  ;;  %v10068_v26 = vand.u32 4294901760, %v3322_v59 }
 0x3d8   : >> { %3722 = vmatpush.msra.mxu0 %v9967_v41  ;;  %3856 = vmatpush.msra.mxu3 %v9961_v37 }
 0x3d9   : >> { %3456 = vmatmul.f32.vlgmr.msra.gmra.mxu2 %v9955_v14  ;;  %v2661_v28 = vpop.f32.mrf.mxu3  ;;  %v10086_v15 = vsub.f32 %v3322_v59, %v10068_v26 }
 0x3da   : >> { %v2536_v32 = vpop.f32.mrf.mxu0  ;;  %3725 = vmatpush.msra.mxu0 %v9985_v19  ;;  %3813 = vmatpush.msra.mxu2 %v3669_v0  ;;  %v3363_v0 = vsub.f32 %v10052_v16, %v10066_v3 }
 0x3db   : >> { %v2573_v56 = vpop.f32.mrf.mxu1  ;;  %v2624_v8 = vpop.f32.mrf.mxu2  ;;  %3858 = vmatpush.msra.mxu3 %v9970_v57  ;;  %v10101_v58 = vand.u32 4294901760, %v10086_v15 }
 0x3dc   : >> { %v2574_v2 = vadd.f32 %v2573_v56, %v2532_v35  ;;  %3728 = vmatpush.msra.mxu0 %v10000_v12  ;;  %3817 = vmatpush.msra.mxu2 %v3675_v49  ;;  %v2537_v12 = vadd.f32 %v2536_v32, %v9947_v27  ;;  %v10098_v13 = vand.u32 4294901760, %v3363_v0  ;;  %v10141_v32 = vpop.permute.xlu1 %3892 }
 0x3dd   : >> { %3860 = vmatpush.msra.mxu3 %v9988_v54 }
 0x3de   : >> { %v2625_v41 = vadd.f32 %v2624_v8, %v2574_v2  ;;  %3357 = vmatmul.f32.gmra.mxu0 %v10063_v51  ;;  %3821 = vmatpush.msra.mxu2 %v3681_v44  ;;  %v10148_v2 = vpop.permute.xlu0 %3890 }
 0x3df   : >> { %3414 = vmatmul.f32.vlgmr.msra.gmra.mxu1 %v9943_v4  ;;  %3504 = vmatmul.f32.gmra.mxu3 %v10035_v1 }
 0x3e0   : >> { %v2662_v19 = vadd.f32 %v2661_v28, %v2625_v41  ;;  %3731 = vmatpush.msra.mxu0 %v10023_v60  ;;  %3766 = vmatpush.msra.mxu1 %v9961_v37 }
 0x3e1   : >> { %3461 = vmatmul.f32.gmra.mxu2 %v10011_v31  ;;  %v2665_v49 = vpop.f32.mrf.mxu3  ;;  %3862 = vmatpush.msra.mxu3 %v10003_v7 }
 0x3e2   : >> { %v10096_v20 = vadd.f32 %v2662_v19, %v9830_v46  ;;  %v2541_v44 = vpop.f32.mrf.mxu0  ;;  %3825 = vmatpush.msra.mxu2 %v3687_v30  ;;  %3768 = vmatpush.msra.mxu1 %v9970_v57  ;;  %v3371_v57 = vsub.f32 %v10086_v15, %v10101_v58  ;;  %v10119_v30 = vpop.permute.xlu2 %3894 }
 0x3e3   : >> { %v2579_v37 = vpop.f32.mrf.mxu1  ;;  %v2628_v42 = vpop.f32.mrf.mxu2  ;;  %v2542_v10 = vadd.f32 %v2541_v44, %v9991_v55 }
 0x3e4   : >> { %v2580_v46 = vadd.f32 %v2579_v37, %v2537_v12  ;;  %3770 = vmatpush.msra.mxu1 %v9988_v54  ;;  %v10135_v22 = vand.u32 4294901760, %v3371_v57 }
 0x3e6   : >> { %v2629_v27 = vadd.f32 %v2628_v42, %v2580_v46  ;;  %3365 = vmatmul.f32.gmra.mxu0 %v10098_v13  ;;  %3772 = vmatpush.msra.mxu1 %v10003_v7  ;;  %v3907_v7 = vsel %vm498_vm4, %v10119_v30, %v10121_v39 }
 0x3e7   : >> { %3418 = vmatmul.f32.gmra.mxu1 %v9978_v17  ;;  %3510 = vmatmul.f32.gmra.mxu3 %v10066_v3  ;;  %v3924_v35 = vmul.f32 %v3914_v11, %v3907_v7 }
 0x3e8   : >> { %v2666_v60 = vadd.f32 %v2665_v49, %v2629_v27 }
 0x3e9   : >> { %3466 = vmatmul.f32.gmra.mxu2 %v10052_v16  ;;  %v2669_v54 = vpop.f32.mrf.mxu3  ;;  %v10146_v56 = vand.u32 4294901760, %v3924_v35 }
 0x3ea   : >> { %v10133_v40 = vadd.f32 %v2666_v60, %v9853_v38  ;;  %v2546_v48 = vpop.f32.mrf.mxu0  ;;  %v3901_v8 = vpop.permute.xlu2 %3900 }
 0x3eb   : >> { %v2585_v33 = vpop.f32.mrf.mxu1  ;;  %v2632_v59 = vpop.f32.mrf.mxu2  ;;  %v3906_v0 = vsel %vm498_vm4, %v10141_v32, %v3901_v8  ;;  %v2547_v19 = vadd.f32 %v2546_v48, %v10043_v5  ;;  %v10159_v27 = vsub.f32 %v3924_v35, %v10146_v56 }
 0x3ec   : >> { %v2586_v28 = vadd.f32 %v2585_v33, %v2542_v10  ;;  %v3922_v44 = vmul.f32 %v3914_v11, %v3906_v0  ;;  %v3899_v60 = vpop.permute.xlu1 %3898 }
 0x3ed   : >> { %v3905_v5 = vsel %vm498_vm4, %v10148_v2, %v3899_v60  ;;  %v12473_v10 = vand.u32 4294901760, %v10159_v27 }
 0x3ee   : >> { %v2633_v55 = vadd.f32 %v2632_v59, %v2586_v28  ;;  %3373 = vmatmul.f32.gmra.mxu0 %v10135_v22  ;;  %v10161_v57 = vand.u32 4294901760, %v3922_v44  ;;  %v3897_v59 = vpop.permute.xlu0 %3896 }
 0x3ef   : >> { %3422 = vmatmul.f32.gmra.mxu1 %v10037_v43  ;;  %3516 = vmatmul.f32.gmra.mxu3 %v10101_v58 }
 0x3f0   : >> { %v2670_v38 = vadd.f32 %v2669_v54, %v2633_v55  ;;  %v10171_v48 = vsub.f32 %v3922_v44, %v10161_v57 }
 0x3f1   : >> { %3471 = vmatmul.f32.gmra.mxu2 %v10086_v15  ;;  %v2673_v41 = vpop.f32.mrf.mxu3 }
 0x3f2   : >> { %v10156_v49 = vadd.f32 %v2670_v38, %v9863_v21  ;;  %v2767_v12 = vpop.f32.mrf.mxu0  ;;  %v3920_v21 = vmul.f32 %v3914_v11, %v3905_v5  ;;  %v3889_v33 = vpop.permute.xlu2 %3888 }
 0x3f3   : >> { %v2591_v37 = vpop.f32.mrf.mxu1  ;;  %v2636_v42 = vpop.f32.mrf.mxu2  ;;  %v3904_v55 = vsel %vm498_vm4, %v3889_v33, %v3897_v59 }
 0x3f4   : >> { %v2592_v46 = vadd.f32 %v2591_v37, %v2547_v19  ;;  %v10176_v35 = vand.u32 4294901760, %v3920_v21  ;;  %v3915_v37 = vperm.slane %v7981_v18, 1 }
 0x3f6   : >> { %v2637_v54 = vadd.f32 %v2636_v42, %v2592_v46  ;;  %3549 = vmatmul.f32.vlgmr.msrb.gmra.mxu0 %v9943_v4  ;;  %v10186_v44 = vsub.f32 %v3920_v21, %v10176_v35 }
 0x3f7   : >> { %3426 = vmatmul.f32.gmra.mxu1 %v10068_v26  ;;  %3692 = vmatmul.f32.vlgmr.msrb.gmra.mxu3 %v9943_v4 }
 0x3f8   : >> { %v2674_v7 = vadd.f32 %v2673_v41, %v2637_v54  ;;  %3958 = vmatpush.msrb.mxu0 %v10146_v56  ;;  %4109 = vmatpush.msrb.mxu3 %v10146_v56  ;;  %v3918_v41 = vmul.f32 %v3914_v11, %v3904_v55  ;;  %v12471_v11 = vand.u32 4294901760, %v10171_v48  ;;  %v3911_v54 = vsel %vm498_vm4, %v10121_v39, %v10119_v30 }
 0x3f9   : >> { %3627 = vmatmul.f32.vlgmr.msrb.gmra.mxu2 %v10032_v9  ;;  %v2916_v28 = vpop.f32.mrf.mxu3  ;;  %v12470_v30 = vand.u32 4294901760, %v10186_v44  ;;  %v3925_v39 = vmul.f32 %v3915_v37, %v3911_v54 }
 0x3fa   : >> { %v10181_v38 = vadd.f32 %v2674_v7, %v9870_v36  ;;  %4065 = vmatpush.msrb.mxu2 %v10159_v27  ;;  %3960 = vmatpush.msrb.mxu0 %v10161_v57  ;;  %v10189_v42 = vand.u32 4294901760, %v3918_v41  ;;  %v4013_v36 = vsub.f32 %v10159_v27, %v12473_v10  ;;  %v4019_v21 = vsub.f32 %v10171_v48, %v12471_v11 }
 0x3fb   : >> { %v2775_v0 = vpop.f32.mrf.mxu0  ;;  %v2874_v19 = vpop.f32.mrf.mxu2  ;;  %4111 = vmatpush.msrb.mxu3 %v10161_v57  ;;  %v3910_v7 = vsel %vm498_vm4, %v3901_v8, %v10141_v32  ;;  %v3909_v32 = vsel %vm498_vm4, %v3899_v60, %v10148_v2  ;;  %v3908_v2 = vsel %vm498_vm4, %v3897_v59, %v3889_v33 }
 0x3fc   : >> { %v2832_v9 = vpop.f32.mrf.mxu1  ;;  %4068 = vmatpush.msrb.mxu2 %v10171_v48  ;;  %3962 = vmatpush.msrb.mxu0 %v10176_v35  ;;  %v10204_v18 = vsub.f32 %v3918_v41, %v10189_v42  ;;  %v4014_v5 = vand.u32 4294901760, %v4013_v36  ;;  %v4020_v55 = vand.u32 4294901760, %v4019_v21  ;;  %v10232_v21 = vand.u32 4294901760, %v3925_v39 }
 0x3fd   : >> { %v2833_v46 = vadd.f32 %v2832_v9, %v2767_v12  ;;  %4113 = vmatpush.msrb.mxu3 %v10176_v35  ;;  %v3921_v11 = vmul.f32 %v3915_v37, %v3909_v32  ;;  %v3919_v32 = vmul.f32 %v3915_v37, %v3908_v2 }
 0x3fe   : >> { %3553 = vmatmul.f32.gmra.mxu0 %v9978_v17  ;;  %4071 = vmatpush.msrb.mxu2 %v10186_v44  ;;  %v12472_v41 = vand.u32 4294901760, %v10204_v18 }
 0x3ff   : >> { %v2875_v12 = vadd.f32 %v2874_v19, %v2833_v46  ;;  %3586 = vmatmul.f32.vlgmr.msrb.gmra.mxu1 %v9943_v4  ;;  %3696 = vmatmul.f32.gmra.mxu3 %v9978_v17  ;;  %v4025_v19 = vsub.f32 %v10186_v44, %v12470_v30 }
 0x400   : >> { %4015 = vmatpush.msrb.mxu1 %v4014_v5  ;;  %4074 = vmatpush.msrb.mxu2 %v10204_v18  ;;  %v4031_v8 = vsub.f32 %v10204_v18, %v12472_v41 }
 0x401   : >> { %v10218_v9 = vadd.f32 %v2916_v28, %v2875_v12  ;;  %3635 = vmatmul.f32.gmra.mxu2 %v10063_v51  ;;  %3964 = vmatpush.msrb.mxu0 %v10189_v42  ;;  %v3923_v51 = vmul.f32 %v3915_v37, %v3910_v7  ;;  %v4026_v46 = vand.u32 4294901760, %v4025_v19 }
 0x402   : >> { %v2922_v36 = vpop.f32.mrf.mxu3  ;;  %4021 = vmatpush.msrb.mxu1 %v4020_v55  ;;  %4115 = vmatpush.msrb.mxu3 %v10189_v42  ;;  %v4032_v12 = vand.u32 4294901760, %v4031_v8  ;;  %v10242_v55 = vsub.f32 %v3925_v39, %v10232_v21 }
 0x403   : >> { %v2783_v28 = vpop.f32.mrf.mxu0  ;;  %v10239_v7 = vand.u32 4294901760, %v3923_v51 }
 0x404   : >> { %v2836_v54 = vpop.f32.mrf.mxu1  ;;  %v2879_v5 = vpop.f32.mrf.mxu2  ;;  %4027 = vmatpush.msrb.mxu1 %v4026_v46 }
 0x405   : >> { %v2837_v30 = vadd.f32 %v2836_v54, %v2775_v0  ;;  %v10247_v0 = vand.u32 4294901760, %v3921_v11  ;;  %v10250_v59 = vsub.f32 %v3923_v51, %v10239_v7 }
 0x406   : >> { %3557 = vmatmul.f32.gmra.mxu0 %v10037_v43  ;;  %4033 = vmatpush.msrb.mxu1 %v4032_v12 }
 0x407   : >> { %v2880_v60 = vadd.f32 %v2879_v5, %v2837_v30  ;;  %3590 = vmatmul.f32.gmra.mxu1 %v9978_v17  ;;  %3700 = vmatmul.f32.gmra.mxu3 %v10037_v43  ;;  %v4290_v30 = vand.u32 4294901760, %v10242_v55  ;;  %v10254_v39 = vsub.f32 %v3921_v11, %v10247_v0  ;;  %v12474_v37 = vand.u32 4294901760, %v10250_v59 }
 0x408   : >> { %v12491_v61 = vand.u32 4294901760, %v10250_v59 }
 0x409   : >> { %v10244_v19 = vadd.f32 %v2922_v36, %v2880_v60  ;;  %3643 = vmatmul.f32.gmra.mxu2 %v10098_v13  ;;  %v10256_v36 = vand.u32 4294901760, %v3919_v32  ;;  %v4291_v51 = vsub.f32 %v10242_v55, %v4290_v30 }
 0x40a   : >> { %v2928_v8 = vpop.f32.mrf.mxu3 }
 0x40b   : >> { %v2791_v33 = vpop.f32.mrf.mxu0  ;;  %v10269_v11 = vsub.f32 %v3919_v32, %v10256_v36  ;;  %v4292_v41 = vand.u32 4294901760, %v4291_v51 }
 0x40c   : >> { %v2840_v46 = vpop.f32.mrf.mxu1  ;;  %v2884_v54 = vpop.f32.mrf.mxu2 }
 0x40d   : >> { %v2841_v5 = vadd.f32 %v2840_v46, %v2783_v28  ;;  %v4302_v28 = vand.u32 4294901760, %v10254_v39  ;;  %v4297_v46 = vsub.f32 %v10250_v59, %v12474_v37  ;;  %v12487_v37 = vand.u32 4294901760, %v10159_v27 }
 0x40e   : >> { %3561 = vmatmul.f32.gmra.mxu0 %v10068_v26 }
 0x40f   : >> { %v2885_v13 = vadd.f32 %v2884_v54, %v2841_v5  ;;  %3594 = vmatmul.f32.gmra.mxu1 %v10037_v43  ;;  %3704 = vmatmul.f32.gmra.mxu3 %v10068_v26 }
 0x411   : >> { %v10265_v12 = vadd.f32 %v2928_v8, %v2885_v13  ;;  %3651 = vmatmul.f32.gmra.mxu2 %v10135_v22  ;;  %v4303_v8 = vsub.f32 %v10254_v39, %v4302_v28  ;;  %v4308_v22 = vand.u32 4294901760, %v10269_v11  ;;  %v4298_v13 = vand.u32 4294901760, %v4297_v46  ;;  %v7983_v46 = vld [vmem:[%s8787_s8 + $0xa0] sm:$0xff] }
 0x412   : >> { %v2934_v2 = vpop.f32.mrf.mxu3 }
 0x413   : >> { %v2967_v60 = vpop.f32.mrf.mxu0  ;;  %v4304_v51 = vand.u32 4294901760, %v4303_v8 }
 0x414   : >> { %v2844_v54 = vpop.f32.mrf.mxu1  ;;  %v2889_v5 = vpop.f32.mrf.mxu2  ;;  %v2968_v27 = vadd.f32 %v2967_v60, %v10218_v9  ;;  %v12490_v9 = vand.u32 4294901760, %v10204_v18 }
 0x415   : >> { %v2845_v10 = vadd.f32 %v2844_v54, %v2791_v33  ;;  %v12488_v54 = vand.u32 4294901760, %v10171_v48 }
 0x416   : >> { %3734 = vmatmul.f32.vlgmr.msra.gmra.mxu0 %v9955_v14  ;;  %v4309_v14 = vsub.f32 %v10269_v11, %v4308_v22 }
 0x417   : >> { %v2890_v32 = vadd.f32 %v2889_v5, %v2845_v10  ;;  %3598 = vmatmul.f32.gmra.mxu1 %v10068_v26  ;;  %3864 = vmatmul.f32.vlgmr.msra.gmra.mxu3 %v9943_v4 }
 0x418   : >> { %4156 = vmatpush.msra.mxu0 %v12487_v37  ;;  %4293 = vmatpush.msra.mxu3 %v4292_v41 }
 0x419   : >> { %v10284_v33 = vadd.f32 %v2934_v2, %v2890_v32  ;;  %3827 = vmatmul.f32.vlgmr.msra.gmra.mxu2 %v9943_v4  ;;  %v12489_v4 = vand.u32 4294901760, %v10186_v44  ;;  %v4310_v32 = vand.u32 4294901760, %v4309_v14  ;;  %v3934_v44 = vsel %vm926_vm12, %v7983_v46, 0  ;;  %v7984_v14 = vld [vmem:[%s8787_s8 + $0xa8] sm:$0xff] }
 0x41a   : >> { %v3110_v10 = vpop.f32.mrf.mxu3  ;;  %4236 = vmatpush.msra.mxu2 %v10232_v21  ;;  %4160 = vmatpush.msra.mxu0 %v12488_v54 }
 0x41b   : >> { %v2971_v37 = vpop.f32.mrf.mxu0  ;;  %4299 = vmatpush.msra.mxu3 %v4298_v13 }
 0x41c   : >> { %v3004_v41 = vpop.f32.mrf.mxu1  ;;  %v3045_v2 = vpop.f32.mrf.mxu2  ;;  %4238 = vmatpush.msra.mxu2 %v10239_v7  ;;  %4164 = vmatpush.msra.mxu0 %v12489_v4 }
 0x41d   : >> { %v3005_v5 = vadd.f32 %v3004_v41, %v2968_v27  ;;  %v10298_v8 = vadd.f32 %v3110_v10, %v3045_v2  ;;  %4305 = vmatpush.msra.mxu3 %v4304_v51 }
 0x41e   : >> { %3739 = vmatmul.f32.gmra.mxu0 %v10011_v31  ;;  %4240 = vmatpush.msra.mxu2 %v10247_v0 }
 0x41f   : >> { %v10303_v48 = vadd.f32 %v3005_v5, %v9932_v53  ;;  %3776 = vmatmul.f32.vlgmr.msra.gmra.mxu1 %v9976_v50  ;;  %3868 = vmatmul.f32.gmra.mxu3 %v9978_v17  ;;  %v10314_v53 = vand.u32 4294901760, %v3934_v44  ;;  %v2972_v50 = vadd.f32 %v2971_v37, %v10244_v19 }
 0x420   : >> { %4199 = vmatpush.msra.mxu1 %v10146_v56  ;;  %4168 = vmatpush.msra.mxu0 %v12490_v9 }
 0x421   : >> { %3831 = vmatmul.f32.gmra.mxu2 %v9978_v17  ;;  %4311 = vmatpush.msra.mxu3 %v4310_v32  ;;  %v10324_v17 = vsub.f32 %v3934_v44, %v10314_v53 }
 0x422   : >> { %v3114_v31 = vpop.f32.mrf.mxu3  ;;  %4201 = vmatpush.msra.mxu1 %v10161_v57  ;;  %4242 = vmatpush.msra.mxu2 %v10256_v36 }
 0x423   : >> { %v2975_v60 = vpop.f32.mrf.mxu0 }
 0x424   : >> { %v3008_v13 = vpop.f32.mrf.mxu1  ;;  %v3053_v51 = vpop.f32.mrf.mxu2  ;;  %4203 = vmatpush.msra.mxu1 %v10176_v35  ;;  %v3937_v35 = vsel %vm926_vm12, %v7984_v14, 0 }
 0x425   : >> { %v3009_v56 = vadd.f32 %v3008_v13, %v2972_v50  ;;  %v10318_v18 = vadd.f32 %v3114_v31, %v3053_v51  ;;  %v10337_v54 = vand.u32 4294901760, %v3937_v35 }
 0x426   : >> { %3744 = vmatmul.f32.gmra.mxu0 %v10052_v16  ;;  %4205 = vmatpush.msra.mxu1 %v10189_v42  ;;  %v10334_v16 = vand.u32 4294901760, %v10324_v17  ;;  %v2976_v42 = vadd.f32 %v2975_v60, %v10265_v12  ;;  %v7986_v60 = vld [vmem:[%s8787_s8 + $0xb8] sm:$0xff] }
 0x427   : >> { %v10327_v57 = vadd.f32 %v3009_v56, %v9951_v23  ;;  %3782 = vmatmul.f32.gmra.mxu1 %v10035_v1  ;;  %3872 = vmatmul.f32.gmra.mxu3 %v10037_v43  ;;  %v7985_v1 = vld [vmem:[%s8787_s8 + $0xb0] sm:$0xff]  ;;  %v10351_v12 = vsub.f32 %v3937_v35, %v10337_v54  ;;  %v3943_v51 = vsel %vm926_vm12, %v7986_v60, 0  ;;  %v10467_v60 = vpop.permute.xlu0 %4513 }
 0x428   : >> { %v3940_v4 = vsel %vm926_vm12, %v7985_v1, 0  ;;  %v10395_v35 = vand.u32 4294901760, %v3943_v51 }
 0x429   : >> { %3835 = vmatmul.f32.gmra.mxu2 %v10037_v43  ;;  %v3968_v43 = vsub.f32 %v10324_v17, %v10334_v16  ;;  %v10361_v44 = vand.u32 4294901760, %v3940_v4 }
 0x42a   : >> { %v3118_v19 = vpop.f32.mrf.mxu3 }
 0x42b   : >> { %v2979_v10 = vpop.f32.mrf.mxu0  ;;  %v10377_v13 = vsub.f32 %v3940_v4, %v10361_v44 }
 0x42c   : >> { %v3012_v27 = vpop.f32.mrf.mxu1  ;;  %v3061_v23 = vpop.f32.mrf.mxu2  ;;  %v2980_v5 = vadd.f32 %v2979_v10, %v10284_v33 }
 0x42d   : >> { %v3013_v37 = vadd.f32 %v3012_v27, %v2976_v42  ;;  %v10339_v41 = vadd.f32 %v3118_v19, %v3061_v23  ;;  %v10393_v14 = vand.u32 4294901760, %v10377_v13 }
 0x42e   : >> { %3749 = vmatmul.f32.gmra.mxu0 %v10086_v15  ;;  %v10355_v15 = vand.u32 4294901760, %v3968_v43 }
 0x42f   : >> { %v10346_v2 = vadd.f32 %v3013_v37, %v10005_v34  ;;  %3788 = vmatmul.f32.gmra.mxu1 %v10066_v3  ;;  %3876 = vmatmul.f32.gmra.mxu3 %v10068_v26  ;;  %v10359_v34 = vand.u32 4294901760, %v10351_v12  ;;  %v3984_v62 = vsub.f32 %v10377_v13, %v10393_v14  ;;  %v4535_v37 = vperm.slane %v10447_v29, 0 }
 0x431   : >> { %3839 = vmatmul.f32.gmra.mxu2 %v10068_v26  ;;  %v3976_v33 = vsub.f32 %v10351_v12, %v10359_v34  ;;  %v10426_v23 = vand.u32 4294901760, %v3984_v62 }
 0x432   : >> { %v3122_v46 = vpop.f32.mrf.mxu3 }
 0x433   : >> { %v3152_v32 = vpop.f32.mrf.mxu0  ;;  %v10390_v56 = vand.u32 4294901760, %v3976_v33 }
 0x434   : >> { %v3016_v3 = vpop.f32.mrf.mxu1  ;;  %v3069_v9 = vpop.f32.mrf.mxu2 }
 0x435   : >> { %v3017_v31 = vadd.f32 %v3016_v3, %v2980_v5  ;;  %v10363_v50 = vadd.f32 %v3122_v46, %v3069_v9 }
 0x436   : >> { %3970 = vmatmul.f32.vlgmr.msrb.gmra.mxu0 %v10355_v15 }
 0x437   : >> { %v10370_v26 = vadd.f32 %v3017_v31, %v10046_v52  ;;  %3794 = vmatmul.f32.gmra.mxu1 %v10101_v58  ;;  %4119 = vmatmul.f32.vlgmr.msrb.gmra.mxu3 %v10334_v16  ;;  %v3153_v52 = vadd.f32 %v3152_v32, %v10298_v8 }
 0x438   : >> { %4343 = vmatpush.msrb.mxu0 %v10242_v55  ;;  %4477 = vmatpush.msrb.mxu3 %v10232_v21 }
 0x439   : >> { %4077 = vmatmul.f32.vlgmr.msrb.gmra.mxu2 %v10324_v17 }
 0x43a   : >> { %4346 = vmatpush.msrb.mxu0 %v10250_v59  ;;  %4434 = vmatpush.msrb.mxu2 %v4290_v30  ;;  %v3282_v24 = vpop.f32.mrf.mxu3  ;;  %v10411_v59 = vsub.f32 %v3943_v51, %v10395_v35 }
 0x43b   : >> { %4479 = vmatpush.msrb.mxu3 %v10239_v7  ;;  %v3157_v58 = vpop.f32.mrf.mxu0 }
 0x43c   : >> { %4349 = vmatpush.msrb.mxu0 %v10254_v39  ;;  %4438 = vmatpush.msrb.mxu2 %v12491_v61  ;;  %v3194_v55 = vpop.f32.mrf.mxu1  ;;  %v3245_v30 = vpop.f32.mrf.mxu2 }
 0x43d   : >> { %4481 = vmatpush.msrb.mxu3 %v10247_v0  ;;  %v3195_v8 = vadd.f32 %v3194_v55, %v3153_v52 }
 0x43e   : >> { %4352 = vmatpush.msrb.mxu0 %v10269_v11  ;;  %4442 = vmatpush.msrb.mxu2 %v4302_v28  ;;  %v3158_v28 = vadd.f32 %v3157_v58, %v10318_v18  ;;  %v10442_v18 = vpop.permute.xlu1 %4515 }
 0x43f   : >> { %4483 = vmatpush.msrb.mxu3 %v10256_v36  ;;  %v3246_v19 = vadd.f32 %v3245_v30, %v3195_v8  ;;  %3978 = vmatmul.f32.gmra.mxu0 %v10390_v56 }
 0x440   : >> { %4035 = vmatmul.f32.vlgmr.msrb.gmra.mxu1 %v10314_v53  ;;  %4125 = vmatmul.f32.gmra.mxu3 %v10359_v34 }
 0x441   : >> { %v3283_v42 = vadd.f32 %v3282_v24, %v3246_v19  ;;  %4387 = vmatpush.msrb.mxu1 %v10232_v21  ;;  %4446 = vmatpush.msrb.mxu2 %v4308_v22  ;;  %v10429_v21 = vand.u32 4294901760, %v10411_v59 }
 0x442   : >> { %4082 = vmatmul.f32.gmra.mxu2 %v10351_v12  ;;  %v3286_v39 = vpop.f32.mrf.mxu3 }
 0x443   : >> { %v10423_v10 = vadd.f32 %v3283_v42, %v10096_v20  ;;  %4389 = vmatpush.msrb.mxu1 %v10239_v7  ;;  %v3162_v27 = vpop.f32.mrf.mxu0  ;;  %v3992_v7 = vsub.f32 %v10411_v59, %v10429_v21  ;;  %v4520_v42 = vpop.permute.xlu0 %4519 }
 0x444   : >> { %v3200_v11 = vpop.f32.mrf.mxu1  ;;  %v3249_v22 = vpop.f32.mrf.mxu2  ;;  %v3163_v43 = vadd.f32 %v3162_v27, %v10339_v41 }
 0x445   : >> { %4391 = vmatpush.msrb.mxu1 %v10247_v0  ;;  %v3201_v63 = vadd.f32 %v3200_v11, %v3158_v28  ;;  %v10449_v0 = vpop.permute.xlu2 %4523  ;;  %v10463_v5 = vand.u32 4294901760, %v3992_v7 }
 0x446   : >> { %v4528_v1 = vsel %vm548_vm6, %v10442_v18, %v10449_v0  ;;  %v4522_v41 = vpop.permute.xlu1 %4521 }
 0x447   : >> { %4393 = vmatpush.msrb.mxu1 %v10256_v36  ;;  %v3250_v20 = vadd.f32 %v3249_v22, %v3201_v63  ;;  %3986 = vmatmul.f32.gmra.mxu0 %v10426_v23  ;;  %v4545_v31 = vmul.f32 %v4535_v37, %v4528_v1  ;;  %v4527_v24 = vsel %vm548_vm6, %v10467_v60, %v4522_v41 }
 0x448   : >> { %4039 = vmatmul.f32.gmra.mxu1 %v10337_v54  ;;  %4131 = vmatmul.f32.gmra.mxu3 %v10393_v14  ;;  %v4543_v55 = vmul.f32 %v4535_v37, %v4527_v24 }
 0x449   : >> { %v3287_v47 = vadd.f32 %v3286_v39, %v3250_v20 }
 0x44a   : >> { %4087 = vmatmul.f32.gmra.mxu2 %v10377_v13  ;;  %v3290_v36 = vpop.f32.mrf.mxu3  ;;  %v10487_v39 = vand.u32 4294901760, %v4543_v55 }
 0x44b   : >> { %v10461_v4 = vadd.f32 %v3287_v47, %v10133_v40  ;;  %v3167_v46 = vpop.f32.mrf.mxu0  ;;  %v10472_v40 = vand.u32 4294901760, %v4545_v31 }
 0x44c   : >> { %v3206_v32 = vpop.f32.mrf.mxu1  ;;  %v3253_v3 = vpop.f32.mrf.mxu2  ;;  %v3168_v52 = vadd.f32 %v3167_v46, %v10363_v50  ;;  %v10504_v47 = vsub.f32 %v4543_v55, %v10487_v39  ;;  %v4531_v55 = vsel %vm548_vm6, %v4522_v41, %v10467_v60 }
 0x44d   : >> { %v3207_v9 = vadd.f32 %v3206_v32, %v3163_v43  ;;  %v10474_v51 = vpop.permute.xlu2 %4511  ;;  %v10485_v62 = vsub.f32 %v4545_v31, %v10472_v40  ;;  %v4536_v31 = vperm.slane %v10447_v29, 1 }
 0x44e   : >> { %v4526_v28 = vsel %vm548_vm6, %v10474_v51, %v4520_v42  ;;  %v10498_v63 = vpop.permute.xlu1 %4509  ;;  %v4530_v60 = vsel %vm548_vm6, %v4520_v42, %v10474_v51 }
 0x44f   : >> { %v3254_v33 = vadd.f32 %v3253_v3, %v3207_v9  ;;  %3994 = vmatmul.f32.gmra.mxu0 %v10463_v5  ;;  %v4633_v11 = vand.u32 4294901760, %v10485_v62 }
 0x450   : >> { %4043 = vmatmul.f32.gmra.mxu1 %v10361_v44  ;;  %4137 = vmatmul.f32.gmra.mxu3 %v10429_v21 }
 0x451   : >> { %v3291_v6 = vadd.f32 %v3290_v36, %v3254_v33 }
 0x452   : >> { %4092 = vmatmul.f32.gmra.mxu2 %v10411_v59  ;;  %v3294_v45 = vpop.f32.mrf.mxu3 }
 0x453   : >> { %v10482_v58 = vadd.f32 %v3291_v6, %v10156_v49  ;;  %v3350_v61 = vpop.f32.mrf.mxu0  ;;  %v4541_v49 = vmul.f32 %v4535_v37, %v4526_v28  ;;  %v4639_v6 = vand.u32 4294901760, %v10504_v47 }
 0x454   : >> { %v3212_v30 = vpop.f32.mrf.mxu1  ;;  %v3257_v8 = vpop.f32.mrf.mxu2 }
 0x455   : >> { %v3213_v19 = vadd.f32 %v3212_v30, %v3168_v52  ;;  %v10496_v22 = vand.u32 4294901760, %v4541_v49  ;;  %v4518_v20 = vpop.permute.xlu2 %4517 }
 0x456   : >> { %v4525_v36 = vsel %vm548_vm6, %v10498_v63, %v4518_v20  ;;  %v4529_v51 = vsel %vm548_vm6, %v4518_v20, %v10498_v63 }
 0x457   : >> { %v3258_v27 = vadd.f32 %v3257_v8, %v3213_v19  ;;  %4170 = vmatmul.f32.vlgmr.msra.gmra.mxu0 %v10314_v53  ;;  %v4539_v46 = vmul.f32 %v4535_v37, %v4525_v36  ;;  %v10514_v9 = vsub.f32 %v4541_v49, %v10496_v22  ;;  %v4532_v37 = vsel %vm548_vm6, %v10449_v0, %v10442_v18 }
 0x458   : >> { %4047 = vmatmul.f32.gmra.mxu1 %v10395_v35  ;;  %4313 = vmatmul.f32.vlgmr.msra.gmra.mxu3 %v10314_v53  ;;  %v4640_v18 = vsub.f32 %v10504_v47, %v4639_v6 }
 0x459   : >> { %v3295_v50 = vadd.f32 %v3294_v45, %v3258_v27  ;;  %4579 = vmatpush.msra.mxu0 %v10472_v40  ;;  %4730 = vmatpush.msra.mxu3 %v10472_v40  ;;  %v10519_v33 = vand.u32 4294901760, %v4539_v46  ;;  %v4645_v0 = vand.u32 4294901760, %v10514_v9 }
 0x45a   : >> { %4248 = vmatmul.f32.vlgmr.msra.gmra.mxu2 %v10355_v15  ;;  %v3499_v7 = vpop.f32.mrf.mxu3  ;;  %v4641_v19 = vand.u32 4294901760, %v4640_v18 }
 0x45b   : >> { %v10510_v1 = vadd.f32 %v3295_v50, %v10181_v38  ;;  %v3358_v43 = vpop.f32.mrf.mxu0  ;;  %4686 = vmatpush.msra.mxu2 %v10485_v62  ;;  %4581 = vmatpush.msra.mxu0 %v10487_v39  ;;  %v4634_v38 = vsub.f32 %v10485_v62, %v4633_v11  ;;  %v10534_v45 = vsub.f32 %v4539_v46, %v10519_v33 }
 0x45c   : >> { %v3415_v32 = vpop.f32.mrf.mxu1  ;;  %v3457_v3 = vpop.f32.mrf.mxu2  ;;  %4732 = vmatpush.msra.mxu3 %v10487_v39  ;;  %v4646_v28 = vsub.f32 %v10514_v9, %v4645_v0  ;;  %v4544_v50 = vmul.f32 %v4536_v31, %v4531_v55 }
 0x45d   : >> { %v3416_v15 = vadd.f32 %v3415_v32, %v3350_v61  ;;  %4689 = vmatpush.msra.mxu2 %v10504_v47  ;;  %4583 = vmatpush.msra.mxu0 %v10496_v22  ;;  %v4635_v24 = vand.u32 4294901760, %v4634_v38  ;;  %v4546_v61 = vmul.f32 %v4536_v31, %v4532_v37  ;;  %v4651_v30 = vand.u32 4294901760, %v10534_v45 }
 0x45e   : >> { %4734 = vmatpush.msra.mxu3 %v10496_v22  ;;  %v10570_v42 = vand.u32 4294901760, %v4544_v50 }
 0x45f   : >> { %v3458_v29 = vadd.f32 %v3457_v3, %v3416_v15  ;;  %4174 = vmatmul.f32.gmra.mxu0 %v10337_v54  ;;  %4692 = vmatpush.msra.mxu2 %v10514_v9  ;;  %v4652_v41 = vsub.f32 %v10534_v45, %v4651_v30  ;;  %v10562_v46 = vand.u32 4294901760, %v4546_v61  ;;  %v4542_v3 = vmul.f32 %v4536_v31, %v4530_v60 }
 0x460   : >> { %4207 = vmatmul.f32.vlgmr.msra.gmra.mxu1 %v10314_v53  ;;  %4317 = vmatmul.f32.gmra.mxu3 %v10337_v54  ;;  %v10581_v55 = vsub.f32 %v4544_v50, %v10570_v42 }
 0x461   : >> { %v10543_v52 = vadd.f32 %v3499_v7, %v3458_v29  ;;  %4636 = vmatpush.msra.mxu1 %v4635_v24  ;;  %4695 = vmatpush.msra.mxu2 %v10534_v45  ;;  %v4647_v7 = vand.u32 4294901760, %v4646_v28  ;;  %v4653_v32 = vand.u32 4294901760, %v4652_v41  ;;  %v10578_v29 = vand.u32 4294901760, %v4542_v3  ;;  %v7990_v45 = vld [vmem:[%s8787_s8 + $0xc8] sm:$0xff] }
 0x462   : >> { %4256 = vmatmul.f32.gmra.mxu2 %v10390_v56  ;;  %v3505_v8 = vpop.f32.mrf.mxu3  ;;  %4585 = vmatpush.msra.mxu0 %v10519_v33  ;;  %v4540_v24 = vmul.f32 %v4536_v31, %v4529_v51 }
 0x463   : >> { %v3366_v27 = vpop.f32.mrf.mxu0  ;;  %4736 = vmatpush.msra.mxu3 %v10519_v33  ;;  %4642 = vmatpush.msra.mxu1 %v4641_v19  ;;  %v10585_v28 = vsub.f32 %v4542_v3, %v10578_v29 }
 0x464   : >> { %v3419_v56 = vpop.f32.mrf.mxu1  ;;  %v3462_v49 = vpop.f32.mrf.mxu2 }
 0x465   : >> { %v3420_v36 = vadd.f32 %v3419_v56, %v3358_v43  ;;  %4648 = vmatpush.msra.mxu1 %v4647_v7  ;;  %v10575_v43 = vsub.f32 %v4546_v61, %v10562_v46  ;;  %v10587_v61 = vand.u32 4294901760, %v4540_v24 }
 0x467   : >> { %v3463_v15 = vadd.f32 %v3462_v49, %v3420_v36  ;;  %4178 = vmatmul.f32.gmra.mxu0 %v10361_v44  ;;  %4654 = vmatpush.msra.mxu1 %v4653_v32  ;;  %v4911_v19 = vand.u32 4294901760, %v10575_v43  ;;  %v10600_v56 = vsub.f32 %v4540_v24, %v10587_v61  ;;  %v4923_v49 = vand.u32 4294901760, %v10585_v28 }
 0x468   : >> { %4211 = vmatmul.f32.gmra.mxu1 %v10337_v54  ;;  %4321 = vmatmul.f32.gmra.mxu3 %v10361_v44 }
 0x469   : >> { %v10572_v38 = vadd.f32 %v3505_v8, %v3463_v15  ;;  %v4924_v51 = vsub.f32 %v10585_v28, %v4923_v49 }
 0x46a   : >> { %4264 = vmatmul.f32.gmra.mxu2 %v10426_v23  ;;  %v3511_v37 = vpop.f32.mrf.mxu3  ;;  %v4917_v23 = vand.u32 4294901760, %v10581_v55 }
 0x46b   : >> { %v3374_v18 = vpop.f32.mrf.mxu0 }
 0x46c   : >> { %v3423_v63 = vpop.f32.mrf.mxu1  ;;  %v3467_v20 = vpop.f32.mrf.mxu2  ;;  %v4918_v32 = vsub.f32 %v10581_v55, %v4917_v23 }
 0x46d   : >> { %v3424_v8 = vadd.f32 %v3423_v63, %v3366_v27  ;;  %v4912_v27 = vsub.f32 %v10575_v43, %v4911_v19 }
 0x46e   : >> { %v4919_v24 = vand.u32 4294901760, %v4918_v32 }
 0x46f   : >> { %v3468_v60 = vadd.f32 %v3467_v20, %v3424_v8  ;;  %4182 = vmatmul.f32.gmra.mxu0 %v10395_v35  ;;  %v4913_v15 = vand.u32 4294901760, %v4912_v27  ;;  %v4925_v20 = vand.u32 4294901760, %v4924_v51 }
 0x470   : >> { %4215 = vmatmul.f32.gmra.mxu1 %v10361_v44  ;;  %4325 = vmatmul.f32.gmra.mxu3 %v10395_v35 }
 0x471   : >> { %v10593_v31 = vadd.f32 %v3511_v37, %v3468_v60 }
 0x472   : >> { %4272 = vmatmul.f32.gmra.mxu2 %v10463_v5  ;;  %v3517_v41 = vpop.f32.mrf.mxu3  ;;  %v4929_v5 = vand.u32 4294901760, %v10600_v56 }
 0x473   : >> { %v3550_v50 = vpop.f32.mrf.mxu0 }
 0x474   : >> { %v3427_v7 = vpop.f32.mrf.mxu1  ;;  %v3472_v36 = vpop.f32.mrf.mxu2  ;;  %v3551_v8 = vadd.f32 %v3550_v50, %v10543_v52 }
 0x475   : >> { %v3428_v3 = vadd.f32 %v3427_v7, %v3374_v18 }
 0x477   : >> { %v3473_v37 = vadd.f32 %v3472_v36, %v3428_v3  ;;  %4355 = vmatmul.f32.vlgmr.msrb.gmra.mxu0 %v10324_v17  ;;  %v4930_v17 = vsub.f32 %v10600_v56, %v4929_v5 }
 0x478   : >> { %4219 = vmatmul.f32.gmra.mxu1 %v10395_v35  ;;  %4485 = vmatmul.f32.vlgmr.msrb.gmra.mxu3 %v10314_v53 }
 0x479   : >> { %v10613_v63 = vadd.f32 %v3517_v41, %v3473_v37  ;;  %4777 = vmatpush.msrb.mxu0 %v4633_v11  ;;  %4914 = vmatpush.msrb.mxu3 %v4913_v15  ;;  %v4931_v52 = vand.u32 4294901760, %v4930_v17 }
 0x47a   : >> { %4448 = vmatmul.f32.vlgmr.msrb.gmra.mxu2 %v10314_v53  ;;  %v3693_v18 = vpop.f32.mrf.mxu3  ;;  %v7989_v53 = vld [vmem:[%s8787_s8 + $0xc0] sm:$0xff] }
 0x47b   : >> { %v3554_v60 = vpop.f32.mrf.mxu0  ;;  %4857 = vmatpush.msrb.mxu2 %v10562_v46  ;;  %4781 = vmatpush.msrb.mxu0 %v4639_v6  ;;  %v4555_v47 = vsel %vm926_vm12, %v7989_v53, 0 }
 0x47c   : >> { %v3587_v62 = vpop.f32.mrf.mxu1  ;;  %v3628_v11 = vpop.f32.mrf.mxu2  ;;  %4920 = vmatpush.msrb.mxu3 %v4919_v24 }
 0x47d   : >> { %v3588_v27 = vadd.f32 %v3587_v62, %v3551_v8  ;;  %v10625_v41 = vadd.f32 %v3693_v18, %v3628_v11  ;;  %4859 = vmatpush.msrb.mxu2 %v10570_v42  ;;  %4785 = vmatpush.msrb.mxu0 %v4645_v0  ;;  %v7992_v11 = vld [vmem:[%s8787_s8 + $0xd8] sm:$0xff] }
 0x47e   : >> { %4926 = vmatpush.msrb.mxu3 %v4925_v20  ;;  %v4564_v53 = vsel %vm926_vm12, %v7992_v11, 0 }
 0x47f   : >> { %v10632_v50 = vadd.f32 %v3588_v27, %v10303_v48  ;;  %4360 = vmatmul.f32.gmra.mxu0 %v10351_v12  ;;  %4861 = vmatpush.msrb.mxu2 %v10578_v29  ;;  %v3555_v12 = vadd.f32 %v3554_v60, %v10572_v38 }
 0x480   : >> { %4397 = vmatmul.f32.vlgmr.msrb.gmra.mxu1 %v10334_v16  ;;  %4489 = vmatmul.f32.gmra.mxu3 %v10337_v54  ;;  %v10646_v16 = vand.u32 4294901760, %v4555_v47 }
 0x481   : >> { %4820 = vmatpush.msrb.mxu1 %v10472_v40  ;;  %4789 = vmatpush.msrb.mxu0 %v4651_v30  ;;  %v4558_v30 = vsel %vm926_vm12, %v7990_v45, 0 }
 0x482   : >> { %4452 = vmatmul.f32.gmra.mxu2 %v10337_v54  ;;  %v3697_v48 = vpop.f32.mrf.mxu3  ;;  %4932 = vmatpush.msrb.mxu3 %v4931_v52  ;;  %v10668_v32 = vand.u32 4294901760, %v4558_v30 }
 0x483   : >> { %v3558_v9 = vpop.f32.mrf.mxu0  ;;  %4822 = vmatpush.msrb.mxu1 %v10487_v39  ;;  %4863 = vmatpush.msrb.mxu2 %v10587_v61  ;;  %v10658_v39 = vsub.f32 %v4555_v47, %v10646_v16 }
 0x484   : >> { %v3591_v6 = vpop.f32.mrf.mxu1  ;;  %v3636_v0 = vpop.f32.mrf.mxu2 }
 0x485   : >> { %v3592_v7 = vadd.f32 %v3591_v6, %v3555_v12  ;;  %v10648_v40 = vadd.f32 %v3697_v48, %v3636_v0  ;;  %4824 = vmatpush.msrb.mxu1 %v10496_v22  ;;  %v10722_v6 = vand.u32 4294901760, %v4564_v53 }
 0x487   : >> { %v10653_v54 = vadd.f32 %v3592_v7, %v10327_v57  ;;  %4365 = vmatmul.f32.gmra.mxu0 %v10377_v13  ;;  %4826 = vmatpush.msrb.mxu1 %v10519_v33  ;;  %v3559_v57 = vadd.f32 %v3558_v9, %v10593_v31  ;;  %v10666_v13 = vand.u32 4294901760, %v10658_v39  ;;  %v10682_v31 = vsub.f32 %v4558_v30, %v10668_v32 }
 0x488   : >> { %4403 = vmatmul.f32.gmra.mxu1 %v10359_v34  ;;  %4493 = vmatmul.f32.gmra.mxu3 %v10361_v44  ;;  %v7991_v34 = vld [vmem:[%s8787_s8 + $0xd0] sm:$0xff]  ;;  %v10736_v0 = vsub.f32 %v4564_v53, %v10722_v6 }
 0x489   : >> { %v4561_v37 = vsel %vm926_vm12, %v7991_v34, 0  ;;  %v10690_v8 = vand.u32 4294901760, %v10682_v31 }
 0x48a   : >> { %4456 = vmatmul.f32.gmra.mxu2 %v10361_v44  ;;  %v3701_v22 = vpop.f32.mrf.mxu3  ;;  %v4589_v44 = vsub.f32 %v10658_v39, %v10666_v13 }
 0x48b   : >> { %v3562_v38 = vpop.f32.mrf.mxu0 }
 0x48c   : >> { %v3595_v36 = vpop.f32.mrf.mxu1  ;;  %v3644_v33 = vpop.f32.mrf.mxu2 }
 0x48d   : >> { %v3596_v3 = vadd.f32 %v3595_v36, %v3559_v57  ;;  %v10670_v15 = vadd.f32 %v3701_v22, %v3644_v33  ;;  %v10761_v57 = vpop.permute.xlu1 %5144 }
 0x48f   : >> { %v10674_v51 = vadd.f32 %v3596_v3, %v10346_v2  ;;  %4370 = vmatmul.f32.gmra.mxu0 %v10411_v59  ;;  %v3563_v2 = vadd.f32 %v3562_v38, %v10613_v63  ;;  %v10687_v59 = vand.u32 4294901760, %v4589_v44  ;;  %v5137_v3 = vpop.permute.xlu0 %5136 }
 0x490   : >> { %4409 = vmatmul.f32.gmra.mxu1 %v10393_v14  ;;  %4497 = vmatmul.f32.gmra.mxu3 %v10395_v35  ;;  %v10692_v14 = vand.u32 4294901760, %v4561_v37 }
 0x492   : >> { %4460 = vmatmul.f32.gmra.mxu2 %v10395_v35  ;;  %v3705_v24 = vpop.f32.mrf.mxu3  ;;  %v4597_v35 = vsub.f32 %v10682_v31, %v10690_v8  ;;  %v10706_v63 = vsub.f32 %v4561_v37, %v10692_v14 }
 0x493   : >> { %v3735_v18 = vpop.f32.mrf.mxu0 }
 0x494   : >> { %v3599_v20 = vpop.f32.mrf.mxu1  ;;  %v3652_v17 = vpop.f32.mrf.mxu2  ;;  %v3736_v52 = vadd.f32 %v3735_v18, %v10625_v41  ;;  %v10717_v12 = vand.u32 4294901760, %v4597_v35  ;;  %v10720_v9 = vand.u32 4294901760, %v10706_v63 }
 0x495   : >> { %v3600_v60 = vadd.f32 %v3599_v20, %v3563_v2  ;;  %v10694_v62 = vadd.f32 %v3705_v24, %v3652_v17  ;;  %v5149_v24 = vsel %vm598_vm5, %v5137_v3, %v10761_v57  ;;  %v10776_v20 = vpop.permute.xlu2 %5134  ;;  %v10783_v11 = vpop.permute.xlu1 %5132 }
 0x497   : >> { %v10698_v27 = vadd.f32 %v3600_v60, %v10370_v26  ;;  %4591 = vmatmul.f32.vlgmr.msra.gmra.mxu0 %v10687_v59 }
 0x498   : >> { %4415 = vmatmul.f32.gmra.mxu1 %v10429_v21  ;;  %4740 = vmatmul.f32.vlgmr.msra.gmra.mxu3 %v10666_v13 }
 0x499   : >> { %4964 = vmatpush.msra.mxu0 %v10575_v43  ;;  %5098 = vmatpush.msra.mxu3 %v10562_v46 }
 0x49a   : >> { %4698 = vmatmul.f32.vlgmr.msra.gmra.mxu2 %v10658_v39  ;;  %v3865_v26 = vpop.f32.mrf.mxu3 }
 0x49b   : >> { %4967 = vmatpush.msra.mxu0 %v10581_v55  ;;  %5055 = vmatpush.msra.mxu2 %v4911_v19  ;;  %v3740_v21 = vpop.f32.mrf.mxu0  ;;  %v4605_v19 = vsub.f32 %v10706_v63, %v10720_v9 }
 0x49c   : >> { %5100 = vmatpush.msra.mxu3 %v10570_v42  ;;  %v3777_v47 = vpop.f32.mrf.mxu1  ;;  %v3828_v48 = vpop.f32.mrf.mxu2 }
 0x49d   : >> { %4970 = vmatpush.msra.mxu0 %v10585_v28  ;;  %5059 = vmatpush.msra.mxu2 %v4917_v23  ;;  %v3778_v41 = vadd.f32 %v3777_v47, %v3736_v52  ;;  %v3741_v23 = vadd.f32 %v3740_v21, %v10648_v40  ;;  %v10749_v22 = vand.u32 4294901760, %v4605_v19  ;;  %v5143_v52 = vpop.permute.xlu0 %5142 }
 0x49e   : >> { %5102 = vmatpush.msra.mxu3 %v10578_v29 }
 0x49f   : >> { %4973 = vmatpush.msra.mxu0 %v10600_v56  ;;  %5063 = vmatpush.msra.mxu2 %v4923_v49  ;;  %v3829_v43 = vadd.f32 %v3828_v48, %v3778_v41  ;;  %v5148_v48 = vsel %vm598_vm5, %v10776_v20, %v5143_v52 }
 0x4a0   : >> { %5104 = vmatpush.msra.mxu3 %v10587_v61  ;;  %4599 = vmatmul.f32.gmra.mxu0 %v10717_v12 }
 0x4a1   : >> { %v3866_v55 = vadd.f32 %v3865_v26, %v3829_v43  ;;  %4656 = vmatmul.f32.vlgmr.msra.gmra.mxu1 %v10646_v16  ;;  %4746 = vmatmul.f32.gmra.mxu3 %v10690_v8 }
 0x4a2   : >> { %5008 = vmatpush.msra.mxu1 %v10562_v46  ;;  %5067 = vmatpush.msra.mxu2 %v4929_v5  ;;  %v3869_v28 = vpop.f32.mrf.mxu3  ;;  %v10752_v46 = vand.u32 4294901760, %v10736_v0 }
 0x4a3   : >> { %v10745_v49 = vadd.f32 %v3866_v55, %v10423_v10  ;;  %4703 = vmatmul.f32.gmra.mxu2 %v10682_v31  ;;  %v3745_v7 = vpop.f32.mrf.mxu0  ;;  %v5141_v55 = vpop.permute.xlu2 %5140 }
 0x4a4   : >> { %5010 = vmatpush.msra.mxu1 %v10570_v42  ;;  %v3783_v45 = vpop.f32.mrf.mxu1  ;;  %v3832_v30 = vpop.f32.mrf.mxu2  ;;  %v4613_v10 = vsub.f32 %v10736_v0, %v10752_v46  ;;  %v3746_v38 = vadd.f32 %v3745_v7, %v10670_v15 }
 0x4a5   : >> { %v3784_v56 = vadd.f32 %v3783_v45, %v3741_v23 }
 0x4a6   : >> { %5012 = vmatpush.msra.mxu1 %v10578_v29  ;;  %v7993_v29 = vld [vmem:[%s12439_s1 + $0x7] ss:$8 sm:$0x3]  ;;  %v10771_v37 = vand.u32 4294901760, %v4613_v10  ;;  %v5139_v10 = vpop.permute.xlu1 %5138 }
 0x4a7   : >> { %v3833_v5 = vadd.f32 %v3832_v30, %v3784_v56  ;;  %v5156_v33 = vperm.slane %v7993_v29, 0 }
 0x4a8   : >> { %5014 = vmatpush.msra.mxu1 %v10587_v61  ;;  %4607 = vmatmul.f32.gmra.mxu0 %v10749_v22 }
 0x4a9   : >> { %v3870_v40 = vadd.f32 %v3869_v28, %v3833_v5  ;;  %4660 = vmatmul.f32.gmra.mxu1 %v10668_v32  ;;  %4752 = vmatmul.f32.gmra.mxu3 %v10720_v9  ;;  %v5166_v18 = vmul.f32 %v5156_v33, %v5149_v24  ;;  %v5164_v43 = vmul.f32 %v5156_v33, %v5148_v48 }
 0x4aa   : >> { %v3873_v42 = vpop.f32.mrf.mxu3 }
 0x4ab   : >> { %v10768_v61 = vadd.f32 %v3870_v40, %v10461_v4  ;;  %4708 = vmatmul.f32.gmra.mxu2 %v10706_v63  ;;  %v3750_v36 = vpop.f32.mrf.mxu0  ;;  %v10781_v60 = vand.u32 4294901760, %v5166_v18  ;;  %v10796_v28 = vand.u32 4294901760, %v5164_v43 }
 0x4ac   : >> { %v3789_v34 = vpop.f32.mrf.mxu1  ;;  %v3836_v44 = vpop.f32.mrf.mxu2  ;;  %v3751_v35 = vadd.f32 %v3750_v36, %v10694_v62 }
 0x4ad   : >> { %v3790_v2 = vadd.f32 %v3789_v34, %v3746_v38  ;;  %v10794_v19 = vsub.f32 %v5166_v18, %v10781_v60  ;;  %v10806_v56 = vsub.f32 %v5164_v43, %v10796_v28 }
 0x4af   : >> { %v3837_v15 = vadd.f32 %v3836_v44, %v3790_v2  ;;  %v5254_v30 = vand.u32 4294901760, %v10794_v19  ;;  %v5157_v2 = vperm.slane %v7993_v29, 1 }
 0x4b0   : >> { %4615 = vmatmul.f32.gmra.mxu0 %v10771_v37 }
 0x4b1   : >> { %v3874_v4 = vadd.f32 %v3873_v42, %v3837_v15  ;;  %4664 = vmatmul.f32.gmra.mxu1 %v10692_v14  ;;  %4758 = vmatmul.f32.gmra.mxu3 %v10752_v46  ;;  %v5131_v42 = vpop.permute.xlu0 %5130  ;;  %v5255_v15 = vsub.f32 %v10794_v19, %v5254_v30 }
 0x4b2   : >> { %v3877_v17 = vpop.f32.mrf.mxu3  ;;  %v5146_v44 = vsel %vm598_vm5, %v5131_v42, %v5139_v10 }
 0x4b3   : >> { %v10787_v53 = vadd.f32 %v3874_v4, %v10482_v58  ;;  %4713 = vmatmul.f32.gmra.mxu2 %v10736_v0  ;;  %v3971_v26 = vpop.f32.mrf.mxu0  ;;  %v5147_v58 = vsel %vm598_vm5, %v10783_v11, %v5141_v55  ;;  %v5160_v18 = vmul.f32 %v5156_v33, %v5146_v44  ;;  %v5260_v4 = vand.u32 4294901760, %v10806_v56 }
 0x4b4   : >> { %v3795_v21 = vpop.f32.mrf.mxu1  ;;  %v3840_v47 = vpop.f32.mrf.mxu2  ;;  %v5162_v23 = vmul.f32 %v5156_v33, %v5147_v58  ;;  %v5256_v33 = vand.u32 4294901760, %v5255_v15 }
 0x4b5   : >> { %v3796_v41 = vadd.f32 %v3795_v21, %v3751_v35 }
 0x4b6   : >> { %v10808_v5 = vand.u32 4294901760, %v5162_v23 }
 0x4b7   : >> { %v3841_v62 = vadd.f32 %v3840_v47, %v3796_v41  ;;  %v5152_v47 = vsel %vm598_vm5, %v5143_v52, %v10776_v20  ;;  %v5151_v20 = vsel %vm598_vm5, %v5141_v55, %v10783_v11  ;;  %v5150_v11 = vsel %vm598_vm5, %v5139_v10, %v5131_v42 }
 0x4b8   : >> { %4791 = vmatmul.f32.vlgmr.msrb.gmra.mxu0 %v10646_v16  ;;  %v10817_v34 = vsub.f32 %v5162_v23, %v10808_v5 }
 0x4b9   : >> { %v3878_v7 = vadd.f32 %v3877_v17, %v3841_v62  ;;  %4668 = vmatmul.f32.gmra.mxu1 %v10722_v6  ;;  %4934 = vmatmul.f32.vlgmr.msrb.gmra.mxu3 %v10646_v16  ;;  %v10833_v17 = vand.u32 4294901760, %v5160_v18 }
 0x4ba   : >> { %v4120_v45 = vpop.f32.mrf.mxu3  ;;  %5200 = vmatpush.msrb.mxu0 %v10781_v60  ;;  %5351 = vmatpush.msrb.mxu3 %v10781_v60 }
 0x4bb   : >> { %v10813_v40 = vadd.f32 %v3878_v7, %v10510_v1  ;;  %4869 = vmatmul.f32.vlgmr.msrb.gmra.mxu2 %v10687_v59  ;;  %v5153_v59 = vsel %vm598_vm5, %v10761_v57, %v5137_v3  ;;  %v5261_v57 = vsub.f32 %v10806_v56, %v5260_v4  ;;  %v5266_v3 = vand.u32 4294901760, %v10817_v34 }
 0x4bc   : >> { %v3979_v38 = vpop.f32.mrf.mxu0  ;;  %v4078_v36 = vpop.f32.mrf.mxu2  ;;  %5307 = vmatpush.msrb.mxu2 %v10794_v19  ;;  %5202 = vmatpush.msrb.mxu0 %v10796_v28  ;;  %v5167_v35 = vmul.f32 %v5157_v2, %v5153_v59 }
 0x4bd   : >> { %v4036_v24 = vpop.f32.mrf.mxu1  ;;  %5353 = vmatpush.msrb.mxu3 %v10796_v28  ;;  %v5262_v48 = vand.u32 4294901760, %v5261_v57  ;;  %v5267_v41 = vsub.f32 %v10817_v34, %v5266_v3 }
 0x4be   : >> { %v4037_v1 = vadd.f32 %v4036_v24, %v3971_v26  ;;  %5310 = vmatpush.msrb.mxu2 %v10806_v56  ;;  %5204 = vmatpush.msrb.mxu0 %v10808_v5  ;;  %v10845_v26 = vsub.f32 %v5160_v18, %v10833_v17  ;;  %v10866_v44 = vand.u32 4294901760, %v5167_v35  ;;  %v5163_v24 = vmul.f32 %v5157_v2, %v5151_v20 }
 0x4bf   : >> { %5355 = vmatpush.msrb.mxu3 %v10808_v5  ;;  %v5268_v52 = vand.u32 4294901760, %v5267_v41 }
 0x4c0   : >> { %v4079_v29 = vadd.f32 %v4078_v36, %v4037_v1  ;;  %4795 = vmatmul.f32.gmra.mxu0 %v10668_v32  ;;  %5313 = vmatpush.msrb.mxu2 %v10817_v34  ;;  %v5272_v62 = vand.u32 4294901760, %v10845_v26 }
 0x4c1   : >> { %4828 = vmatmul.f32.vlgmr.msrb.gmra.mxu1 %v10646_v16  ;;  %4938 = vmatmul.f32.gmra.mxu3 %v10668_v32 }
 0x4c2   : >> { %v10847_v21 = vadd.f32 %v4120_v45, %v4079_v29  ;;  %5257 = vmatpush.msrb.mxu1 %v5256_v33  ;;  %5206 = vmatpush.msrb.mxu0 %v10833_v17  ;;  %v5165_v45 = vmul.f32 %v5157_v2, %v5152_v47  ;;  %v10881_v29 = vand.u32 4294901760, %v5163_v24  ;;  %v5161_v33 = vmul.f32 %v5157_v2, %v5150_v11 }
 0x4c3   : >> { %4877 = vmatmul.f32.gmra.mxu2 %v10717_v12  ;;  %v4126_v43 = vpop.f32.mrf.mxu3  ;;  %5357 = vmatpush.msrb.mxu3 %v10833_v17  ;;  %v5273_v12 = vsub.f32 %v10845_v26, %v5272_v62 }
 0x4c4   : >> { %v3987_v58 = vpop.f32.mrf.mxu0  ;;  %5263 = vmatpush.msrb.mxu1 %v5262_v48  ;;  %5316 = vmatpush.msrb.mxu2 %v10845_v26  ;;  %v10873_v55 = vand.u32 4294901760, %v5165_v45  ;;  %v7996_v26 = vld [vmem:[%s8787_s8 + $0xe8] sm:$0xff] }
 0x4c5   : >> { %v4040_v23 = vpop.f32.mrf.mxu1  ;;  %v4083_v7 = vpop.f32.mrf.mxu2  ;;  %v5274_v18 = vand.u32 4294901760, %v5273_v12 }
 0x4c6   : >> { %v4041_v36 = vadd.f32 %v4040_v23, %v3979_v38  ;;  %5269 = vmatpush.msrb.mxu1 %v5268_v52  ;;  %v10878_v38 = vsub.f32 %v5167_v35, %v10866_v44  ;;  %v10884_v47 = vsub.f32 %v5165_v45, %v10873_v55  ;;  %v10890_v35 = vand.u32 4294901760, %v5161_v33 }
 0x4c8   : >> { %v4084_v1 = vadd.f32 %v4083_v7, %v4041_v36  ;;  %4799 = vmatmul.f32.gmra.mxu0 %v10692_v14  ;;  %5275 = vmatpush.msrb.mxu1 %v5274_v18  ;;  %v5532_v48 = vand.u32 4294901760, %v10878_v38  ;;  %v10903_v23 = vsub.f32 %v5161_v33, %v10890_v35 }
 0x4c9   : >> { %4832 = vmatmul.f32.gmra.mxu1 %v10668_v32  ;;  %4942 = vmatmul.f32.gmra.mxu3 %v10692_v14 }
 0x4ca   : >> { %v10875_v59 = vadd.f32 %v4126_v43, %v4084_v1  ;;  %v10888_v43 = vsub.f32 %v5163_v24, %v10881_v29 }
 0x4cb   : >> { %4885 = vmatmul.f32.gmra.mxu2 %v10749_v22  ;;  %v4132_v15 = vpop.f32.mrf.mxu3  ;;  %v5538_v22 = vand.u32 4294901760, %v10884_v47 }
 0x4cc   : >> { %v3995_v57 = vpop.f32.mrf.mxu0  ;;  %v5544_v7 = vand.u32 4294901760, %v10888_v43 }
 0x4cd   : >> { %v4044_v10 = vpop.f32.mrf.mxu1  ;;  %v4088_v42 = vpop.f32.mrf.mxu2  ;;  %v5539_v24 = vsub.f32 %v10884_v47, %v5538_v22 }
 0x4ce   : >> { %v4045_v41 = vadd.f32 %v4044_v10, %v3987_v58  ;;  %v5533_v58 = vsub.f32 %v10878_v38, %v5532_v48  ;;  %v5545_v11 = vsub.f32 %v10888_v43, %v5544_v7 }
 0x4cf   : >> { %v5540_v33 = vand.u32 4294901760, %v5539_v24 }
 0x4d0   : >> { %v4089_v20 = vadd.f32 %v4088_v42, %v4045_v41  ;;  %4803 = vmatmul.f32.gmra.mxu0 %v10722_v6  ;;  %v5534_v1 = vand.u32 4294901760, %v5533_v58  ;;  %v5546_v42 = vand.u32 4294901760, %v5545_v11 }
 0x4d1   : >> { %4836 = vmatmul.f32.gmra.mxu1 %v10692_v14  ;;  %4946 = vmatmul.f32.gmra.mxu3 %v10722_v6 }
 0x4d2   : >> { %v10896_v2 = vadd.f32 %v4132_v15, %v4089_v20 }
 0x4d3   : >> { %4893 = vmatmul.f32.gmra.mxu2 %v10771_v37  ;;  %v4138_v52 = vpop.f32.mrf.mxu3  ;;  %v5550_v37 = vand.u32 4294901760, %v10903_v23 }
 0x4d4   : >> { %v4171_v45 = vpop.f32.mrf.mxu0 }
 0x4d5   : >> { %v4048_v12 = vpop.f32.mrf.mxu1  ;;  %v4093_v36 = vpop.f32.mrf.mxu2  ;;  %v4172_v41 = vadd.f32 %v4171_v45, %v10847_v21 }
 0x4d6   : >> { %v4049_v18 = vadd.f32 %v4048_v12, %v3995_v57 }
 0x4d8   : >> { %v4094_v15 = vadd.f32 %v4093_v36, %v4049_v18  ;;  %4976 = vmatmul.f32.vlgmr.msra.gmra.mxu0 %v10658_v39  ;;  %v5551_v39 = vsub.f32 %v10903_v23, %v5550_v37 }
 0x4d9   : >> { %4840 = vmatmul.f32.gmra.mxu1 %v10722_v6  ;;  %5106 = vmatmul.f32.vlgmr.msra.gmra.mxu3 %v10646_v16 }
 0x4da   : >> { %v10916_v10 = vadd.f32 %v4138_v52, %v4094_v15  ;;  %5398 = vmatpush.msra.mxu0 %v5254_v30  ;;  %5535 = vmatpush.msra.mxu3 %v5534_v1  ;;  %v5552_v21 = vand.u32 4294901760, %v5551_v39 }
 0x4db   : >> { %5069 = vmatmul.f32.vlgmr.msra.gmra.mxu2 %v10646_v16  ;;  %v4314_v57 = vpop.f32.mrf.mxu3  ;;  %v7995_v16 = vld [vmem:[%s8787_s8 + $0xe0] sm:$0xff] }
 0x4dc   : >> { %v4175_v20 = vpop.f32.mrf.mxu0  ;;  %5478 = vmatpush.msra.mxu2 %v10866_v44  ;;  %5402 = vmatpush.msra.mxu0 %v5260_v4  ;;  %v5176_v56 = vsel %vm926_vm12, %v7995_v16, 0 }
 0x4dd   : >> { %v4208_v19 = vpop.f32.mrf.mxu1  ;;  %v4249_v30 = vpop.f32.mrf.mxu2  ;;  %5541 = vmatpush.msra.mxu3 %v5540_v33 }
 0x4de   : >> { %v4209_v58 = vadd.f32 %v4208_v19, %v4172_v41  ;;  %v10928_v52 = vadd.f32 %v4314_v57, %v4249_v30  ;;  %5480 = vmatpush.msra.mxu2 %v10873_v55  ;;  %5406 = vmatpush.msra.mxu0 %v5266_v3  ;;  %v7998_v30 = vld [vmem:[%s8787_s8 + $0xf8] sm:$0xff] }
 0x4df   : >> { %5547 = vmatpush.msra.mxu3 %v5546_v42  ;;  %v5185_v16 = vsel %vm926_vm12, %v7998_v30, 0 }
 0x4e0   : >> { %v10935_v45 = vadd.f32 %v4209_v58, %v10632_v50  ;;  %4981 = vmatmul.f32.gmra.mxu0 %v10682_v31  ;;  %5482 = vmatpush.msra.mxu2 %v10881_v29  ;;  %v4176_v31 = vadd.f32 %v4175_v20, %v10875_v59 }
 0x4e1   : >> { %5018 = vmatmul.f32.vlgmr.msra.gmra.mxu1 %v10666_v13  ;;  %5110 = vmatmul.f32.gmra.mxu3 %v10668_v32  ;;  %v10949_v13 = vand.u32 4294901760, %v5176_v56 }
 0x4e2   : >> { %5441 = vmatpush.msra.mxu1 %v10781_v60  ;;  %5410 = vmatpush.msra.mxu0 %v5272_v62  ;;  %v5179_v62 = vsel %vm926_vm12, %v7996_v26, 0 }
 0x4e3   : >> { %5073 = vmatmul.f32.gmra.mxu2 %v10668_v32  ;;  %v4318_v50 = vpop.f32.mrf.mxu3  ;;  %5553 = vmatpush.msra.mxu3 %v5552_v21  ;;  %v10971_v24 = vand.u32 4294901760, %v5179_v62 }
 0x4e4   : >> { %v4179_v34 = vpop.f32.mrf.mxu0  ;;  %5443 = vmatpush.msra.mxu1 %v10796_v28  ;;  %5484 = vmatpush.msra.mxu2 %v10890_v35  ;;  %v10961_v28 = vsub.f32 %v5176_v56, %v10949_v13 }
 0x4e5   : >> { %v4212_v4 = vpop.f32.mrf.mxu1  ;;  %v4257_v3 = vpop.f32.mrf.mxu2 }
 0x4e6   : >> { %v4213_v12 = vadd.f32 %v4212_v4, %v4176_v31  ;;  %v10951_v60 = vadd.f32 %v4318_v50, %v4257_v3  ;;  %5445 = vmatpush.msra.mxu1 %v10808_v5  ;;  %v11025_v4 = vand.u32 4294901760, %v5185_v16 }
 0x4e8   : >> { %v10956_v32 = vadd.f32 %v4213_v12, %v10653_v54  ;;  %4986 = vmatmul.f32.gmra.mxu0 %v10706_v63  ;;  %5447 = vmatpush.msra.mxu1 %v10833_v17  ;;  %v4180_v54 = vadd.f32 %v4179_v34, %v10896_v2  ;;  %v10969_v63 = vand.u32 4294901760, %v10961_v28  ;;  %v10985_v2 = vsub.f32 %v5179_v62, %v10971_v24 }
 0x4e9   : >> { %5024 = vmatmul.f32.gmra.mxu1 %v10690_v8  ;;  %5114 = vmatmul.f32.gmra.mxu3 %v10692_v14  ;;  %v7997_v8 = vld [vmem:[%s8787_s8 + $0xf0] sm:$0xff]  ;;  %v11039_v3 = vsub.f32 %v5185_v16, %v11025_v4 }
 0x4ea   : >> { %v5182_v15 = vsel %vm926_vm12, %v7997_v8, 0  ;;  %v10993_v41 = vand.u32 4294901760, %v10985_v2 }
 0x4eb   : >> { %5077 = vmatmul.f32.gmra.mxu2 %v10692_v14  ;;  %v4322_v5 = vpop.f32.mrf.mxu3  ;;  %v5210_v14 = vsub.f32 %v10961_v28, %v10969_v63 }
 0x4ec   : >> { %v4183_v59 = vpop.f32.mrf.mxu0 }
 0x4ed   : >> { %v4216_v36 = vpop.f32.mrf.mxu1  ;;  %v4265_v17 = vpop.f32.mrf.mxu2 }
 0x4ee   : >> { %v4217_v18 = vadd.f32 %v4216_v36, %v4180_v54  ;;  %v10973_v1 = vadd.f32 %v4322_v5, %v4265_v17  ;;  %v11064_v54 = vpop.permute.xlu2 %5757 }
 0x4f0   : >> { %v10977_v11 = vadd.f32 %v4217_v18, %v10674_v51  ;;  %4991 = vmatmul.f32.gmra.mxu0 %v10736_v0  ;;  %v4184_v51 = vadd.f32 %v4183_v59, %v10916_v10  ;;  %v10990_v0 = vand.u32 4294901760, %v5210_v14  ;;  %v5766_v18 = vpop.permute.xlu0 %5765 }
 0x4f1   : >> { %5030 = vmatmul.f32.gmra.mxu1 %v10720_v9  ;;  %5118 = vmatmul.f32.gmra.mxu3 %v10722_v6  ;;  %v10995_v9 = vand.u32 4294901760, %v5182_v15 }
 0x4f3   : >> { %5081 = vmatmul.f32.gmra.mxu2 %v10722_v6  ;;  %v4326_v33 = vpop.f32.mrf.mxu3  ;;  %v5218_v6 = vsub.f32 %v10985_v2, %v10993_v41  ;;  %v11009_v10 = vsub.f32 %v5182_v15, %v10995_v9 }
 0x4f4   : >> { %v4356_v57 = vpop.f32.mrf.mxu0 }
 0x4f5   : >> { %v4220_v42 = vpop.f32.mrf.mxu1  ;;  %v4273_v39 = vpop.f32.mrf.mxu2  ;;  %v4357_v21 = vadd.f32 %v4356_v57, %v10928_v52  ;;  %v11020_v31 = vand.u32 4294901760, %v5218_v6  ;;  %v11023_v34 = vand.u32 4294901760, %v11009_v10 }
 0x4f6   : >> { %v4221_v20 = vadd.f32 %v4220_v42, %v4184_v51  ;;  %v10997_v19 = vadd.f32 %v4326_v33, %v4273_v39  ;;  %v5770_v33 = vsel %vm648_vm7, %v11064_v54, %v5766_v18  ;;  %v11079_v42 = vpop.permute.xlu1 %5755  ;;  %v5764_v30 = vpop.permute.xlu2 %5763 }
 0x4f8   : >> { %v11001_v58 = vadd.f32 %v4221_v20, %v10698_v27  ;;  %5212 = vmatmul.f32.vlgmr.msrb.gmra.mxu0 %v10990_v0 }
 0x4f9   : >> { %5036 = vmatmul.f32.gmra.mxu1 %v10752_v46  ;;  %5361 = vmatmul.f32.vlgmr.msrb.gmra.mxu3 %v10969_v63 }
 0x4fa   : >> { %5585 = vmatpush.msrb.mxu0 %v10878_v38  ;;  %5719 = vmatpush.msrb.mxu3 %v10866_v44 }
 0x4fb   : >> { %5319 = vmatmul.f32.vlgmr.msrb.gmra.mxu2 %v10961_v28  ;;  %v4486_v27 = vpop.f32.mrf.mxu3 }
 0x4fc   : >> { %5588 = vmatpush.msrb.mxu0 %v10884_v47  ;;  %5676 = vmatpush.msrb.mxu2 %v5532_v48  ;;  %v4361_v46 = vpop.f32.mrf.mxu0  ;;  %v5226_v48 = vsub.f32 %v11009_v10, %v11023_v34 }
 0x4fd   : >> { %5721 = vmatpush.msrb.mxu3 %v10873_v55  ;;  %v4398_v56 = vpop.f32.mrf.mxu1  ;;  %v4449_v50 = vpop.f32.mrf.mxu2 }
 0x4fe   : >> { %5591 = vmatpush.msrb.mxu0 %v10888_v43  ;;  %5680 = vmatpush.msrb.mxu2 %v5538_v22  ;;  %v4399_v52 = vadd.f32 %v4398_v56, %v4357_v21  ;;  %v4362_v22 = vadd.f32 %v4361_v46, %v10951_v60  ;;  %v11052_v5 = vand.u32 4294901760, %v5226_v48  ;;  %v5769_v21 = vsel %vm648_vm7, %v11079_v42, %v5764_v30  ;;  %v11094_v46 = vpop.permute.xlu0 %5753 }
 0x4ff   : >> { %5723 = vmatpush.msrb.mxu3 %v10881_v29 }
 0x500   : >> { %5594 = vmatpush.msrb.mxu0 %v10903_v23  ;;  %5684 = vmatpush.msrb.mxu2 %v5544_v7  ;;  %v4450_v38 = vadd.f32 %v4449_v50, %v4399_v52 }
 0x501   : >> { %5725 = vmatpush.msrb.mxu3 %v10890_v35  ;;  %5220 = vmatmul.f32.gmra.mxu0 %v11020_v31 }
 0x502   : >> { %v4487_v47 = vadd.f32 %v4486_v27, %v4450_v38  ;;  %5277 = vmatmul.f32.vlgmr.msrb.gmra.mxu1 %v10949_v13  ;;  %5367 = vmatmul.f32.gmra.mxu3 %v10993_v41 }
 0x503   : >> { %5629 = vmatpush.msrb.mxu1 %v10866_v44  ;;  %5688 = vmatpush.msrb.mxu2 %v5550_v37  ;;  %v4490_v43 = vpop.f32.mrf.mxu3  ;;  %v11055_v44 = vand.u32 4294901760, %v11039_v3 }
 0x504   : >> { %v11048_v7 = vadd.f32 %v4487_v47, %v10745_v49  ;;  %5324 = vmatmul.f32.gmra.mxu2 %v10985_v2  ;;  %v4366_v12 = vpop.f32.mrf.mxu0 }
 0x505   : >> { %5631 = vmatpush.msrb.mxu1 %v10873_v55  ;;  %v4404_v26 = vpop.f32.mrf.mxu1  ;;  %v4453_v62 = vpop.f32.mrf.mxu2  ;;  %v5234_v49 = vsub.f32 %v11039_v3, %v11055_v44  ;;  %v4367_v59 = vadd.f32 %v4366_v12, %v10973_v1 }
 0x506   : >> { %v4405_v23 = vadd.f32 %v4404_v26, %v4362_v22 }
 0x507   : >> { %5633 = vmatpush.msrb.mxu1 %v10881_v29  ;;  %v7999_v29 = vld [vmem:[%s12439_s1 + $0x10] ss:$8 sm:$0x3]  ;;  %v11074_v15 = vand.u32 4294901760, %v5234_v49  ;;  %v5752_v49 = vpop.permute.xlu2 %5751 }
 0x508   : >> { %v4454_v37 = vadd.f32 %v4453_v62, %v4405_v23  ;;  %v5777_v17 = vperm.slane %v7999_v29, 0 }
 0x509   : >> { %5635 = vmatpush.msrb.mxu1 %v10890_v35  ;;  %5228 = vmatmul.f32.gmra.mxu0 %v11052_v5 }
 0x50a   : >> { %v4491_v60 = vadd.f32 %v4490_v43, %v4454_v37  ;;  %5281 = vmatmul.f32.gmra.mxu1 %v10971_v24  ;;  %5373 = vmatmul.f32.gmra.mxu3 %v11023_v34  ;;  %v5787_v57 = vmul.f32 %v5777_v17, %v5770_v33  ;;  %v5785_v52 = vmul.f32 %v5777_v17, %v5769_v21 }
 0x50b   : >> { %v4494_v55 = vpop.f32.mrf.mxu3 }
 0x50c   : >> { %v11071_v35 = vadd.f32 %v4491_v60, %v10768_v61  ;;  %5329 = vmatmul.f32.gmra.mxu2 %v11009_v10  ;;  %v4371_v36 = vpop.f32.mrf.mxu0  ;;  %v11084_v20 = vand.u32 4294901760, %v5787_v57 }
 0x50d   : >> { %v4410_v8 = vpop.f32.mrf.mxu1  ;;  %v4457_v14 = vpop.f32.mrf.mxu2  ;;  %v4372_v6 = vadd.f32 %v4371_v36, %v10997_v19  ;;  %v11099_v19 = vand.u32 4294901760, %v5785_v52 }
 0x50e   : >> { %v4411_v51 = vadd.f32 %v4410_v8, %v4367_v59  ;;  %v11097_v48 = vsub.f32 %v5787_v57, %v11084_v20 }
 0x50f   : >> { %v11109_v23 = vsub.f32 %v5785_v52, %v11099_v19 }
 0x510   : >> { %v4458_v1 = vadd.f32 %v4457_v14, %v4411_v51  ;;  %v5875_v62 = vand.u32 4294901760, %v11097_v48  ;;  %v5778_v51 = vperm.slane %v7999_v29, 1 }
 0x511   : >> { %5236 = vmatmul.f32.gmra.mxu0 %v11074_v15 }
 0x512   : >> { %v4495_v61 = vadd.f32 %v4494_v55, %v4458_v1  ;;  %5285 = vmatmul.f32.gmra.mxu1 %v10995_v9  ;;  %5379 = vmatmul.f32.gmra.mxu3 %v11055_v44  ;;  %v5760_v55 = vpop.permute.xlu0 %5759  ;;  %v5876_v1 = vsub.f32 %v11097_v48, %v5875_v62 }
 0x513   : >> { %v4498_v39 = vpop.f32.mrf.mxu3  ;;  %v5767_v14 = vsel %vm648_vm7, %v5752_v49, %v5760_v55 }
 0x514   : >> { %v11088_v16 = vadd.f32 %v4495_v61, %v10787_v53  ;;  %5334 = vmatmul.f32.gmra.mxu2 %v11039_v3  ;;  %v4592_v27 = vpop.f32.mrf.mxu0  ;;  %v5762_v53 = vpop.permute.xlu1 %5761  ;;  %v5781_v57 = vmul.f32 %v5777_v17, %v5767_v14  ;;  %v5881_v61 = vand.u32 4294901760, %v11109_v23 }
 0x515   : >> { %v4416_v56 = vpop.f32.mrf.mxu1  ;;  %v4461_v50 = vpop.f32.mrf.mxu2  ;;  %v5768_v43 = vsel %vm648_vm7, %v11094_v46, %v5762_v53 }
 0x516   : >> { %v4417_v38 = vadd.f32 %v4416_v56, %v4372_v6  ;;  %v5783_v22 = vmul.f32 %v5777_v17, %v5768_v43  ;;  %v5877_v17 = vand.u32 4294901760, %v5876_v1  ;;  %v5773_v56 = vsel %vm648_vm7, %v5764_v30, %v11079_v42 }
 0x517   : >> { %v5772_v42 = vsel %vm648_vm7, %v5762_v53, %v11094_v46  ;;  %v5771_v46 = vsel %vm648_vm7, %v5760_v55, %v5752_v49 }
 0x518   : >> { %v4462_v47 = vadd.f32 %v4461_v50, %v4417_v38  ;;  %v11111_v37 = vand.u32 4294901760, %v5783_v22 }
 0x519   : >> { %5412 = vmatmul.f32.vlgmr.msra.gmra.mxu0 %v10949_v13 }
 0x51a   : >> { %v4499_v12 = vadd.f32 %v4498_v39, %v4462_v47  ;;  %5289 = vmatmul.f32.gmra.mxu1 %v11025_v4  ;;  %5555 = vmatmul.f32.vlgmr.msra.gmra.mxu3 %v10949_v13  ;;  %v11120_v8 = vsub.f32 %v5783_v22, %v11111_v37  ;;  %v11135_v39 = vand.u32 4294901760, %v5781_v57 }
 0x51b   : >> { %v4741_v26 = vpop.f32.mrf.mxu3  ;;  %5821 = vmatpush.msra.mxu0 %v11084_v20  ;;  %5972 = vmatpush.msra.mxu3 %v11084_v20 }
 0x51c   : >> { %v11116_v60 = vadd.f32 %v4499_v12, %v10813_v40  ;;  %5490 = vmatmul.f32.vlgmr.msra.gmra.mxu2 %v10990_v0  ;;  %v5774_v0 = vsel %vm648_vm7, %v5766_v18, %v11064_v54  ;;  %v5882_v54 = vsub.f32 %v11109_v23, %v5881_v61  ;;  %v5887_v18 = vand.u32 4294901760, %v11120_v8 }
 0x51d   : >> { %v4600_v59 = vpop.f32.mrf.mxu0  ;;  %v4699_v36 = vpop.f32.mrf.mxu2  ;;  %5928 = vmatpush.msra.mxu2 %v11097_v48  ;;  %5823 = vmatpush.msra.mxu0 %v11099_v19  ;;  %v5788_v6 = vmul.f32 %v5778_v51, %v5774_v0 }
 0x51e   : >> { %v4657_v33 = vpop.f32.mrf.mxu1  ;;  %5974 = vmatpush.msra.mxu3 %v11099_v19  ;;  %v5883_v50 = vand.u32 4294901760, %v5882_v54  ;;  %v5888_v52 = vsub.f32 %v11120_v8, %v5887_v18 }
 0x51f   : >> { %v4658_v40 = vadd.f32 %v4657_v33, %v4592_v27  ;;  %5931 = vmatpush.msra.mxu2 %v11109_v23  ;;  %5825 = vmatpush.msra.mxu0 %v11111_v37  ;;  %v11148_v27 = vsub.f32 %v5781_v57, %v11135_v39  ;;  %v11169_v14 = vand.u32 4294901760, %v5788_v6  ;;  %v5784_v33 = vmul.f32 %v5778_v51, %v5772_v42 }
 0x520   : >> { %5976 = vmatpush.msra.mxu3 %v11111_v37  ;;  %v5889_v30 = vand.u32 4294901760, %v5888_v52 }
 0x521   : >> { %v4700_v29 = vadd.f32 %v4699_v36, %v4658_v40  ;;  %5416 = vmatmul.f32.gmra.mxu0 %v10971_v24  ;;  %5934 = vmatpush.msra.mxu2 %v11120_v8  ;;  %v5893_v47 = vand.u32 4294901760, %v11148_v27 }
 0x522   : >> { %5449 = vmatmul.f32.vlgmr.msra.gmra.mxu1 %v10949_v13  ;;  %5559 = vmatmul.f32.gmra.mxu3 %v10971_v24 }
 0x523   : >> { %v11150_v21 = vadd.f32 %v4741_v26, %v4700_v29  ;;  %5878 = vmatpush.msra.mxu1 %v5877_v17  ;;  %5827 = vmatpush.msra.mxu0 %v11135_v39  ;;  %v5786_v26 = vmul.f32 %v5778_v51, %v5773_v56  ;;  %v11184_v29 = vand.u32 4294901760, %v5784_v33  ;;  %v5782_v17 = vmul.f32 %v5778_v51, %v5771_v46 }
 0x524   : >> { %5498 = vmatmul.f32.gmra.mxu2 %v11020_v31  ;;  %v4747_v38 = vpop.f32.mrf.mxu3  ;;  %5978 = vmatpush.msra.mxu3 %v11135_v39  ;;  %v5894_v31 = vsub.f32 %v11148_v27, %v5893_v47 }
 0x525   : >> { %v4608_v43 = vpop.f32.mrf.mxu0  ;;  %5884 = vmatpush.msra.mxu1 %v5883_v50  ;;  %5937 = vmatpush.msra.mxu2 %v11148_v27  ;;  %v11176_v53 = vand.u32 4294901760, %v5786_v26  ;;  %v8002_v27 = vld [vmem:[%s8787_s8 + $0x108] sm:$0xff] }
 0x526   : >> { %v4661_v22 = vpop.f32.mrf.mxu1  ;;  %v4704_v12 = vpop.f32.mrf.mxu2  ;;  %v5895_v57 = vand.u32 4294901760, %v5894_v31 }
 0x527   : >> { %v4662_v36 = vadd.f32 %v4661_v22, %v4600_v59  ;;  %5890 = vmatpush.msra.mxu1 %v5889_v30  ;;  %v11181_v59 = vsub.f32 %v5788_v6, %v11169_v14  ;;  %v11187_v56 = vsub.f32 %v5786_v26, %v11176_v53  ;;  %v11193_v6 = vand.u32 4294901760, %v5782_v17 }
 0x529   : >> { %v4705_v40 = vadd.f32 %v4704_v12, %v4662_v36  ;;  %5420 = vmatmul.f32.gmra.mxu0 %v10995_v9  ;;  %5896 = vmatpush.msra.mxu1 %v5895_v57  ;;  %v6153_v50 = vand.u32 4294901760, %v11181_v59  ;;  %v11206_v22 = vsub.f32 %v5782_v17, %v11193_v6 }
 0x52a   : >> { %5453 = vmatmul.f32.gmra.mxu1 %v10971_v24  ;;  %5563 = vmatmul.f32.gmra.mxu3 %v10995_v9 }
 0x52b   : >> { %v11178_v0 = vadd.f32 %v4747_v38, %v4705_v40  ;;  %v11191_v38 = vsub.f32 %v5784_v33, %v11184_v29 }
 0x52c   : >> { %5506 = vmatmul.f32.gmra.mxu2 %v11052_v5  ;;  %v4753_v1 = vpop.f32.mrf.mxu3  ;;  %v6159_v5 = vand.u32 4294901760, %v11187_v56 }
 0x52d   : >> { %v4616_v54 = vpop.f32.mrf.mxu0  ;;  %v6165_v12 = vand.u32 4294901760, %v11191_v38 }
 0x52e   : >> { %v4665_v49 = vpop.f32.mrf.mxu1  ;;  %v4709_v55 = vpop.f32.mrf.mxu2  ;;  %v6160_v33 = vsub.f32 %v11187_v56, %v6159_v5 }
 0x52f   : >> { %v4666_v52 = vadd.f32 %v4665_v49, %v4608_v43  ;;  %v6154_v43 = vsub.f32 %v11181_v59, %v6153_v50  ;;  %v6166_v46 = vsub.f32 %v11191_v38, %v6165_v12 }
 0x530   : >> { %v6161_v17 = vand.u32 4294901760, %v6160_v33 }
 0x531   : >> { %v4710_v42 = vadd.f32 %v4709_v55, %v4666_v52  ;;  %5424 = vmatmul.f32.gmra.mxu0 %v11025_v4  ;;  %v6155_v40 = vand.u32 4294901760, %v6154_v43  ;;  %v6167_v55 = vand.u32 4294901760, %v6166_v46 }
 0x532   : >> { %5457 = vmatmul.f32.gmra.mxu1 %v10995_v9  ;;  %5567 = vmatmul.f32.gmra.mxu3 %v11025_v4 }
 0x533   : >> { %v11199_v51 = vadd.f32 %v4753_v1, %v4710_v42 }
 0x534   : >> { %5514 = vmatmul.f32.gmra.mxu2 %v11074_v15  ;;  %v4759_v30 = vpop.f32.mrf.mxu3  ;;  %v6171_v15 = vand.u32 4294901760, %v11206_v22 }
 0x535   : >> { %v4792_v26 = vpop.f32.mrf.mxu0 }
 0x536   : >> { %v4669_v31 = vpop.f32.mrf.mxu1  ;;  %v4714_v36 = vpop.f32.mrf.mxu2  ;;  %v4793_v52 = vadd.f32 %v4792_v26, %v11150_v21 }
 0x537   : >> { %v4670_v57 = vadd.f32 %v4669_v31, %v4616_v54 }
 0x539   : >> { %v4715_v1 = vadd.f32 %v4714_v36, %v4670_v57  ;;  %5597 = vmatmul.f32.vlgmr.msrb.gmra.mxu0 %v10961_v28  ;;  %v6172_v28 = vsub.f32 %v11206_v22, %v6171_v15 }
 0x53a   : >> { %5461 = vmatmul.f32.gmra.mxu1 %v11025_v4  ;;  %5727 = vmatmul.f32.vlgmr.msrb.gmra.mxu3 %v10949_v13 }
 0x53b   : >> { %v11219_v49 = vadd.f32 %v4759_v30, %v4715_v1  ;;  %6019 = vmatpush.msrb.mxu0 %v5875_v62  ;;  %6156 = vmatpush.msrb.mxu3 %v6155_v40  ;;  %v6173_v21 = vand.u32 4294901760, %v6172_v28 }
 0x53c   : >> { %5690 = vmatmul.f32.vlgmr.msrb.gmra.mxu2 %v10949_v13  ;;  %v4935_v54 = vpop.f32.mrf.mxu3  ;;  %v8001_v13 = vld [vmem:[%s8787_s8 + $0x100] sm:$0xff] }
 0x53d   : >> { %v4796_v42 = vpop.f32.mrf.mxu0  ;;  %6099 = vmatpush.msrb.mxu2 %v11169_v14  ;;  %6023 = vmatpush.msrb.mxu0 %v5881_v61  ;;  %v5797_v23 = vsel %vm926_vm12, %v8001_v13, 0 }
 0x53e   : >> { %v4829_v48 = vpop.f32.mrf.mxu1  ;;  %v4870_v62 = vpop.f32.mrf.mxu2  ;;  %6162 = vmatpush.msrb.mxu3 %v6161_v17 }
 0x53f   : >> { %v4830_v43 = vadd.f32 %v4829_v48, %v4793_v52  ;;  %v11231_v30 = vadd.f32 %v4935_v54, %v4870_v62  ;;  %6101 = vmatpush.msrb.mxu2 %v11176_v53  ;;  %6027 = vmatpush.msrb.mxu0 %v5887_v18  ;;  %v8004_v62 = vld [vmem:[%s8787_s8 + $0x118] sm:$0xff] }
 0x540   : >> { %6168 = vmatpush.msrb.mxu3 %v6167_v55  ;;  %v5806_v13 = vsel %vm926_vm12, %v8004_v62, 0 }
 0x541   : >> { %v11238_v26 = vadd.f32 %v4830_v43, %v10935_v45  ;;  %5602 = vmatmul.f32.gmra.mxu0 %v10985_v2  ;;  %6103 = vmatpush.msrb.mxu2 %v11184_v29  ;;  %v4797_v2 = vadd.f32 %v4796_v42, %v11178_v0 }
 0x542   : >> { %5639 = vmatmul.f32.vlgmr.msrb.gmra.mxu1 %v10969_v63  ;;  %5731 = vmatmul.f32.gmra.mxu3 %v10971_v24  ;;  %v11252_v63 = vand.u32 4294901760, %v5797_v23 }
 0x543   : >> { %6062 = vmatpush.msrb.mxu1 %v11084_v20  ;;  %6031 = vmatpush.msrb.mxu0 %v5893_v47  ;;  %v5800_v47 = vsel %vm926_vm12, %v8002_v27, 0 }
 0x544   : >> { %5694 = vmatmul.f32.gmra.mxu2 %v10971_v24  ;;  %v4939_v45 = vpop.f32.mrf.mxu3  ;;  %6174 = vmatpush.msrb.mxu3 %v6173_v21  ;;  %v11274_v33 = vand.u32 4294901760, %v5800_v47 }
 0x545   : >> { %v4800_v8 = vpop.f32.mrf.mxu0  ;;  %6064 = vmatpush.msrb.mxu1 %v11099_v19  ;;  %6105 = vmatpush.msrb.mxu2 %v11193_v6  ;;  %v11264_v19 = vsub.f32 %v5797_v23, %v11252_v63 }
 0x546   : >> { %v4833_v61 = vpop.f32.mrf.mxu1  ;;  %v4878_v18 = vpop.f32.mrf.mxu2 }
 0x547   : >> { %v4834_v31 = vadd.f32 %v4833_v61, %v4797_v2  ;;  %v11254_v20 = vadd.f32 %v4939_v45, %v4878_v18  ;;  %6066 = vmatpush.msrb.mxu1 %v11111_v37  ;;  %v11328_v61 = vand.u32 4294901760, %v5806_v13 }
 0x549   : >> { %v11259_v24 = vadd.f32 %v4834_v31, %v10956_v32  ;;  %5607 = vmatmul.f32.gmra.mxu0 %v11009_v10  ;;  %6068 = vmatpush.msrb.mxu1 %v11135_v39  ;;  %v4801_v32 = vadd.f32 %v4800_v8, %v11199_v51  ;;  %v11272_v10 = vand.u32 4294901760, %v11264_v19  ;;  %v11288_v51 = vsub.f32 %v5800_v47, %v11274_v33 }
 0x54a   : >> { %5645 = vmatmul.f32.gmra.mxu1 %v10993_v41  ;;  %5735 = vmatmul.f32.gmra.mxu3 %v10995_v9  ;;  %v8003_v41 = vld [vmem:[%s8787_s8 + $0x110] sm:$0xff]  ;;  %v11342_v18 = vsub.f32 %v5806_v13, %v11328_v61  ;;  %s8005_s8 = sshll.u32 %s8273_s25, 5  ;;  %s827_s25 = sadd.s32 1, %s8273_s25  }
 0x54b   : >> { %v5803_v1 = vsel %vm926_vm12, %v8003_v41, 0  ;;  %v11296_v52 = vand.u32 4294901760, %v11288_v51  ;;  %s11654_s7 = scalar_lea.vmem %s12442_s4, %s8005_s8  ;;  %p824_p4 = scmp.ge.s32.totalorder %s827_s25, 6  }
 0x54c   : >> { %5698 = vmatmul.f32.gmra.mxu2 %v10995_v9  ;;  %v4943_v37 = vpop.f32.mrf.mxu3  ;;  %v5831_v9 = vsub.f32 %v11264_v19, %v11272_v10 }
 0x54d   : >> { %v4804_v0 = vpop.f32.mrf.mxu0 }
 0x54e   : >> { %v4837_v36 = vpop.f32.mrf.mxu1  ;;  %v4886_v39 = vpop.f32.mrf.mxu2 }
 0x54f   : >> { %v4838_v57 = vadd.f32 %v4837_v36, %v4801_v32  ;;  %v11276_v40 = vadd.f32 %v4943_v37, %v4886_v39 }
 0x551   : >> { %v11280_v46 = vadd.f32 %v4838_v57, %v10977_v11  ;;  %5612 = vmatmul.f32.gmra.mxu0 %v11039_v3  ;;  %v4805_v11 = vadd.f32 %v4804_v0, %v11219_v49  ;;  %v11293_v3 = vand.u32 4294901760, %v5831_v9 }
 0x552   : >> { %5651 = vmatmul.f32.gmra.mxu1 %v11023_v34  ;;  %5739 = vmatmul.f32.gmra.mxu3 %v11025_v4  ;;  %v11298_v34 = vand.u32 4294901760, %v5803_v1 }
 0x553   : >> { %12492 = vst [vmem:[#allocation6_spill] sm:$0xff] %v11280_v46 }
 0x554   : >> { %5702 = vmatmul.f32.gmra.mxu2 %v11025_v4  ;;  %v4947_v17 = vpop.f32.mrf.mxu3  ;;  %v5839_v4 = vsub.f32 %v11288_v51, %v11296_v52  ;;  %v11312_v49 = vsub.f32 %v5803_v1, %v11298_v34 }
 0x555   : >> { %v4977_v54 = vpop.f32.mrf.mxu0 }
 0x556   : >> { %v4841_v55 = vpop.f32.mrf.mxu1  ;;  %v4894_v28 = vpop.f32.mrf.mxu2  ;;  %v4978_v21 = vadd.f32 %v4977_v54, %v11231_v30  ;;  %v11323_v2 = vand.u32 4294901760, %v5839_v4  ;;  %v11326_v8 = vand.u32 4294901760, %v11312_v49 }
 0x557   : >> { %v4842_v42 = vadd.f32 %v4841_v55, %v4805_v11  ;;  %v11300_v48 = vadd.f32 %v4947_v17, %v4894_v28 }
 0x559   : >> { %v11304_v43 = vadd.f32 %v4842_v42, %v11001_v58  ;;  %5833 = vmatmul.f32.vlgmr.msra.gmra.mxu0 %v11293_v3 }
 0x55a   : >> { %5657 = vmatmul.f32.gmra.mxu1 %v11055_v44  ;;  %5982 = vmatmul.f32.vlgmr.msra.gmra.mxu3 %v11272_v10 }
 0x55b   : >> { %12493 = vst [vmem:[#allocation7_spill] sm:$0xff] %v11304_v43  ;;  %6206 = vmatpush.msra.mxu0 %v11181_v59  ;;  %6340 = vmatpush.msra.mxu3 %v11169_v14 }
 0x55c   : >> { %5940 = vmatmul.f32.vlgmr.msra.gmra.mxu2 %v11264_v19  ;;  %v5107_v58 = vpop.f32.mrf.mxu3 }
 0x55d   : >> { %6209 = vmatpush.msra.mxu0 %v11187_v56  ;;  %6297 = vmatpush.msra.mxu2 %v6153_v50  ;;  %v4982_v44 = vpop.f32.mrf.mxu0  ;;  %v5847_v50 = vsub.f32 %v11312_v49, %v11326_v8 }
 0x55e   : >> { %6342 = vmatpush.msra.mxu3 %v11176_v53  ;;  %v5019_v23 = vpop.f32.mrf.mxu1  ;;  %v5070_v45 = vpop.f32.mrf.mxu2 }
 0x55f   : >> { %6212 = vmatpush.msra.mxu0 %v11191_v38  ;;  %6301 = vmatpush.msra.mxu2 %v6159_v5  ;;  %v5020_v30 = vadd.f32 %v5019_v23, %v4978_v21  ;;  %v4983_v5 = vadd.f32 %v4982_v44, %v11254_v20  ;;  %v5848_v37 = vand.u32 4294901760, %v5847_v50 }
 0x560   : >> { %6344 = vmatpush.msra.mxu3 %v11184_v29 }
 0x561   : >> { %6215 = vmatpush.msra.mxu0 %v11206_v22  ;;  %6305 = vmatpush.msra.mxu2 %v6165_v12  ;;  %v5071_v59 = vadd.f32 %v5070_v45, %v5020_v30  ;;  %v11356_v22 = vand.u32 4294901760, %v11342_v18 }
 0x562   : >> { %6346 = vmatpush.msra.mxu3 %v11193_v6  ;;  %5841 = vmatmul.f32.gmra.mxu0 %v11323_v2 }
 0x563   : >> { %v5108_v56 = vadd.f32 %v5107_v58, %v5071_v59  ;;  %5898 = vmatmul.f32.vlgmr.msra.gmra.mxu1 %v11252_v63  ;;  %6309 = vmatpush.msra.mxu2 %v6171_v15 }
 0x564   : >> { %6250 = vmatpush.msra.mxu1 %v11169_v14  ;;  %5945 = vmatmul.f32.gmra.mxu2 %v11288_v51  ;;  %v5111_v38 = vpop.f32.mrf.mxu3 }
 0x565   : >> { %v11351_v12 = vadd.f32 %v5108_v56, %v11048_v7  ;;  %5988 = vmatmul.f32.gmra.mxu3 %v11296_v52  ;;  %v4987_v31 = vpop.f32.mrf.mxu0  ;;  %v5855_v7 = vsub.f32 %v11342_v18, %v11356_v22 }
 0x566   : >> { %6252 = vmatpush.msra.mxu1 %v11176_v53  ;;  %v5025_v27 = vpop.f32.mrf.mxu1  ;;  %v5074_v47 = vpop.f32.mrf.mxu2  ;;  %v4988_v32 = vadd.f32 %v4987_v31, %v11276_v40 }
 0x567   : >> { %12494 = vst [vmem:[#allocation8_spill] sm:$0xff] %v11351_v12  ;;  %v5026_v14 = vadd.f32 %v5025_v27, %v4983_v5  ;;  %v5856_v39 = vand.u32 4294901760, %v5855_v7 }
 0x568   : >> { %6254 = vmatpush.msra.mxu1 %v11184_v29 }
 0x569   : >> { %v5075_v15 = vadd.f32 %v5074_v47, %v5026_v14 }
 0x56a   : >> { %6256 = vmatpush.msra.mxu1 %v11193_v6  ;;  %5849 = vmatmul.f32.gmra.mxu0 %v5848_v37 }
 0x56b   : >> { %v5112_v20 = vadd.f32 %v5111_v38, %v5075_v15  ;;  %5902 = vmatmul.f32.gmra.mxu1 %v11274_v33 }
 0x56c   : >> { %5950 = vmatmul.f32.gmra.mxu2 %v11312_v49  ;;  %v5115_v53 = vpop.f32.mrf.mxu3 }
 0x56d   : >> { %v11366_v0 = vadd.f32 %v5112_v20, %v11071_v35  ;;  %5994 = vmatmul.f32.gmra.mxu3 %v11326_v8  ;;  %v4992_v29 = vpop.f32.mrf.mxu0 }
 0x56e   : >> { %v5031_v36 = vpop.f32.mrf.mxu1  ;;  %v5078_v6 = vpop.f32.mrf.mxu2  ;;  %v4993_v40 = vadd.f32 %v4992_v29, %v11300_v48 }
 0x56f   : >> { %v5032_v57 = vadd.f32 %v5031_v36, %v4988_v32 }
 0x571   : >> { %v5079_v41 = vadd.f32 %v5078_v6, %v5032_v57 }
 0x572   : >> { %5857 = vmatmul.f32.gmra.mxu0 %v5856_v39 }
 0x573   : >> { %v5116_v9 = vadd.f32 %v5115_v53, %v5079_v41  ;;  %5906 = vmatmul.f32.gmra.mxu1 %v11298_v34 }
 0x574   : >> { %5955 = vmatmul.f32.gmra.mxu2 %v11342_v18  ;;  %v5119_v1 = vpop.f32.mrf.mxu3 }
 0x575   : >> { %v11373_v35 = vadd.f32 %v5116_v9, %v11088_v16  ;;  %6000 = vmatmul.f32.gmra.mxu3 %v11356_v22  ;;  %v11376_v17 = vpop.f32.mrf.mxu0 }
 0x576   : >> { %v5037_v11 = vpop.f32.mrf.mxu1  ;;  %v5082_v54 = vpop.f32.mrf.mxu2 }
 0x577   : >> { %12495 = vst [vmem:[#allocation9_spill] sm:$0xff] %v11373_v35  ;;  %v5038_v55 = vadd.f32 %v5037_v11, %v4993_v40 }
 0x579   : >> { %v5083_v28 = vadd.f32 %v5082_v54, %v5038_v55 }
 0x57a   : >> { %6033 = vmatmul.f32.vlgmr.msrb.gmra.mxu0 %v11252_v63 }
 0x57b   : >> { %v5120_v42 = vadd.f32 %v5119_v1, %v5083_v28  ;;  %5910 = vmatmul.f32.gmra.mxu1 %v11328_v61 }
 0x57c   : >> { %6111 = vmatmul.f32.vlgmr.msrb.gmra.mxu2 %v11293_v3  ;;  %v11381_v62 = vpop.f32.mrf.mxu3 }
 0x57d   : >> { %v11384_v16 = vadd.f32 %v5120_v42, %v11116_v60  ;;  %6176 = vmatmul.f32.vlgmr.msrb.gmra.mxu3 %v11252_v63 }
 0x57e   : >> { %v11387_v48 = vpop.f32.mrf.mxu0  ;;  %v11389_v4 = vpop.f32.mrf.mxu2 }
 0x57f   : >> { %12496 = vst [vmem:[#allocation10_spill] sm:$0xff] %v11384_v16  ;;  %v11391_v13 = vpop.f32.mrf.mxu1 }
 0x582   : >> { %6037 = vmatmul.f32.gmra.mxu0 %v11274_v33 }
 0x583   : >> { %6070 = vmatmul.f32.vlgmr.msrb.gmra.mxu1 %v11252_v63 }
 0x584   : >> { %6119 = vmatmul.f32.gmra.mxu2 %v11323_v2 }
 0x585   : >> { %6180 = vmatmul.f32.gmra.mxu3 %v11274_v33  ;;  %v11397_v3 = vpop.f32.mrf.mxu3 }
 0x586   : >> { %v11399_v60 = vpop.f32.mrf.mxu0 }
 0x587   : >> { %v11401_v58 = vpop.f32.mrf.mxu1  ;;  %v11403_v21 = vpop.f32.mrf.mxu2 }
 0x58a   : >> { %6041 = vmatmul.f32.gmra.mxu0 %v11298_v34 }
 0x58b   : >> { %6074 = vmatmul.f32.gmra.mxu1 %v11274_v33 }
 0x58c   : >> { %6127 = vmatmul.f32.gmra.mxu2 %v5848_v37 }
 0x58d   : >> { %6184 = vmatmul.f32.gmra.mxu3 %v11298_v34  ;;  %v11408_v44 = vpop.f32.mrf.mxu3 }
 0x58e   : >> { %v11410_v23 = vpop.f32.mrf.mxu0 }
 0x58f   : >> { %v11412_v45 = vpop.f32.mrf.mxu1  ;;  %v11414_v2 = vpop.f32.mrf.mxu2 }
 0x592   : >> { %6045 = vmatmul.f32.gmra.mxu0 %v11328_v61 }
 0x593   : >> { %6078 = vmatmul.f32.gmra.mxu1 %v11298_v34 }
 0x594   : >> { %6135 = vmatmul.f32.gmra.mxu2 %v5856_v39 }
 0x595   : >> { %6188 = vmatmul.f32.gmra.mxu3 %v11328_v61  ;;  %v11419_v30 = vpop.f32.mrf.mxu3 }
 0x596   : >> { %12497 = vst [vmem:[#allocation11_spill] sm:$0xff] %v11419_v30  ;;  %v11421_v59 = vpop.f32.mrf.mxu0 }
 0x597   : >> { %v11423_v50 = vpop.f32.mrf.mxu1  ;;  %v11425_v56 = vpop.f32.mrf.mxu2 }
 0x59a   : >> { %6218 = vmatmul.f32.vlgmr.msra.gmra.mxu0 %v11264_v19 }
 0x59b   : >> { %6082 = vmatmul.f32.gmra.mxu1 %v11328_v61 }
 0x59c   : >> { %6311 = vmatmul.f32.vlgmr.msra.gmra.mxu2 %v11252_v63 }
 0x59d   : >> { %6348 = vmatmul.f32.vlgmr.msra.gmra.mxu3 %v11252_v63  ;;  %v11431_v38 = vpop.f32.mrf.mxu3 }
 0x59e   : >> { %v11433_v5 = vpop.f32.mrf.mxu0 }
 0x59f   : >> { %v11435_v31 = vpop.f32.mrf.mxu1  ;;  %v11437_v27 = vpop.f32.mrf.mxu2 }
 0x5a2   : >> { %6223 = vmatmul.f32.gmra.mxu0 %v11288_v51 }
 0x5a3   : >> { %6260 = vmatmul.f32.vlgmr.msra.gmra.mxu1 %v11272_v10 }
 0x5a4   : >> { %6315 = vmatmul.f32.gmra.mxu2 %v11274_v33 }
 0x5a5   : >> { %6352 = vmatmul.f32.gmra.mxu3 %v11274_v33  ;;  %v11443_v19 = vpop.f32.mrf.mxu3 }
 0x5a6   : >> { %v11445_v47 = vpop.f32.mrf.mxu0 }
 0x5a7   : >> { %v11447_v63 = vpop.f32.mrf.mxu1  ;;  %v11449_v37 = vpop.f32.mrf.mxu2 }
 0x5aa   : >> { %6228 = vmatmul.f32.gmra.mxu0 %v11312_v49 }
 0x5ab   : >> { %6266 = vmatmul.f32.gmra.mxu1 %v11296_v52 }
 0x5ac   : >> { %6319 = vmatmul.f32.gmra.mxu2 %v11298_v34 }
 0x5ad   : >> { %6356 = vmatmul.f32.gmra.mxu3 %v11298_v34  ;;  %v11455_v10 = vpop.f32.mrf.mxu3 }
 0x5ae   : >> { %v11457_v51 = vpop.f32.mrf.mxu0 }
 0x5af   : >> { %12498 = vst [vmem:[#allocation12_spill] sm:$0xff] %v11457_v51  ;;  %v11459_v33 = vpop.f32.mrf.mxu1  ;;  %v11461_v14 = vpop.f32.mrf.mxu2 }
 0x5b2   : >> { %6233 = vmatmul.f32.gmra.mxu0 %v11342_v18 }
 0x5b3   : >> { %6272 = vmatmul.f32.gmra.mxu1 %v11326_v8 }
 0x5b4   : >> { %6323 = vmatmul.f32.gmra.mxu2 %v11328_v61 }
 0x5b5   : >> { %6360 = vmatmul.f32.gmra.mxu3 %v11328_v61  ;;  %v11467_v52 = vpop.f32.mrf.mxu3 }
 0x5b6   : >> { %v11469_v49 = vpop.f32.mrf.mxu0 }
 0x5b7   : >> { %v11471_v34 = vpop.f32.mrf.mxu1  ;;  %v11473_v15 = vpop.f32.mrf.mxu2 }
 0x5b8   : >> { %12499 = vst [vmem:[#allocation13_spill] sm:$0xff] %v11471_v34 }
 0x5bb   : >> { %6278 = vmatmul.f32.gmra.mxu1 %v11356_v22 }
 0x5bd   : >> { %v11476_v7 = vpop.f32.mrf.mxu3 }
 0x5be   : >> { %12500 = vst [vmem:[#allocation14_spill] sm:$0xff] %v11476_v7  ;;  %v5603_v20 = vpop.f32.mrf.mxu0 }
 0x5bf   : >> { %v11478_v18 = vpop.f32.mrf.mxu1  ;;  %v11480_v8 = vpop.f32.mrf.mxu2 }
 0x5c0   : >> { %12501 = vst [vmem:[#allocation15_spill] sm:$0xff] %v11478_v18 }
 0x5c1   : >> { %12502 = vst [vmem:[#allocation16_spill] sm:$0xff] %v11480_v8 }
 0x5c5   : >> { %v11482_v53 = vpop.f32.mrf.mxu3 }
 0x5c6   : >> { %v11484_v61 = vpop.f32.mrf.mxu0 }
 0x5c7   : >> { %v5646_v32 = vpop.f32.mrf.mxu1  ;;  %v11486_v29 = vpop.f32.mrf.mxu2 }
 0x5cd   : >> { %v11488_v36 = vpop.f32.mrf.mxu3 }
 0x5ce   : >> { %12503 = vst [vmem:[#allocation17_spill] sm:$0xff] %v11488_v36  ;;  %v11490_v6 = vpop.f32.mrf.mxu0 }
 0x5cf   : >> { %12504 = vst [vmem:[#allocation18_spill] sm:$0xff] %v11490_v6  ;;  %v11492_v39 = vpop.f32.mrf.mxu1  ;;  %v11494_v22 = vpop.f32.mrf.mxu2 }
 0x5d5   : >> { %v11496_v57 = vpop.f32.mrf.mxu3 }
 0x5d6   : >> { %12505 = vst [vmem:[#allocation19_spill] sm:$0xff] %v11496_v57  ;;  %v5834_v41 = vpop.f32.mrf.mxu0 }
 0x5d7   : >> { %v11498_v9 = vpop.f32.mrf.mxu1  ;;  %v11500_v1 = vpop.f32.mrf.mxu2 }
 0x5d8   : >> { %12506 = vst [vmem:[#allocation20_spill] sm:$0xff] %v11498_v9 }
 0x5d9   : >> { %12507 = vst [vmem:[#allocation21_spill] sm:$0xff] %v11500_v1  ;;  %v5279_v1 = vadd.f32 %v11391_v13, %v11376_v17 }
 0x5db   : >> { %v5321_v8 = vadd.f32 %v11389_v4, %v5279_v1 }
 0x5dd   : >> { %v5983_v40 = vpop.f32.mrf.mxu3 }
 0x5df   : >> { %v5842_v11 = vpop.f32.mrf.mxu0  ;;  %v5941_v54 = vpop.f32.mrf.mxu2 }
 0x5e0   : >> { %v5899_v55 = vpop.f32.mrf.mxu1 }
 0x5e1   : >> { %v5900_v28 = vadd.f32 %v5899_v55, %v5834_v41 }
 0x5e3   : >> { %v5942_v42 = vadd.f32 %v5941_v54, %v5900_v28  ;;  %v5363_v54 = vadd.f32 %v11381_v62, %v5321_v8 }
 0x5e5   : >> { %v5984_v25 = vadd.f32 %v5983_v40, %v5942_v42  ;;  %v5414_v55 = vadd.f32 %v11421_v59, %v5363_v54 }
 0x5e7   : >> { %v5850_v16 = vpop.f32.mrf.mxu0  ;;  %v5946_v12 = vpop.f32.mrf.mxu2  ;;  %v5451_v28 = vadd.f32 %v11435_v31, %v5414_v55 }
 0x5e8   : >> { %v5903_v43 = vpop.f32.mrf.mxu1  ;;  %v5989_v7 = vpop.f32.mrf.mxu3 }
 0x5e9   : >> { %v5743_v4 = vadd.f32 %v5451_v28, %v11238_v26  ;;  %v5283_v28 = vadd.f32 %v11401_v58, %v11387_v48 }
 0x5ef   : >> { %v11502_v34 = vpop.f32.mrf.mxu0  ;;  %v5951_v35 = vpop.f32.mrf.mxu2 }
 0x5f0   : >> { %v5907_v57 = vpop.f32.mrf.mxu1  ;;  %v11504_v51 = vpop.f32.mrf.mxu3 }
 0x5f7   : >> { %v6034_v46 = vpop.f32.mrf.mxu0  ;;  %v11509_v30 = vpop.f32.mrf.mxu2 }
 0x5f8   : >> { %12508 = vst [vmem:[#allocation22_spill] sm:$0xff] %v11509_v30  ;;  %v11511_v41 = vpop.f32.mrf.mxu1  ;;  %v11513_v40 = vpop.f32.mrf.mxu3  ;;  %v6035_v42 = vadd.f32 %v6034_v46, %v5984_v25 }
 0x5f9   : >> { %12509 = vst [vmem:[#allocation23_spill] sm:$0xff] %v11513_v40 }
 0x5ff   : >> { %v6038_v36 = vpop.f32.mrf.mxu0  ;;  %v11518_v9 = vpop.f32.mrf.mxu2 }
 0x600   : >> { %v6071_v17 = vpop.f32.mrf.mxu1  ;;  %v6177_v13 = vpop.f32.mrf.mxu3 }
 0x601   : >> { %v6072_v1 = vadd.f32 %v6071_v17, %v6035_v42  ;;  %v5561_v42 = vadd.f32 %v11443_v19, %v11449_v37  ;;  %v5908_v37 = vadd.f32 %v5907_v57, %v5850_v16 }
 0x603   : >> { %v11521_v30 = vadd.f32 %v6072_v1, %v5743_v4  ;;  %v5604_v17 = vadd.f32 %v5603_v20, %v5561_v42  ;;  %v5326_v4 = vadd.f32 %v11403_v21, %v5283_v28  ;;  %v5904_v1 = vadd.f32 %v5903_v43, %v5842_v11 }
 0x604   : >> { %v5565_v21 = vadd.f32 %v11455_v10, %v11461_v14  ;;  %v5557_v10 = vadd.f32 %v11431_v38, %v11437_v27 }
 0x605   : >> { %12510 = vst [vmem:[#allocation24_spill] sm:$0xff] %v11521_v30  ;;  %v5947_v48 = vadd.f32 %v5946_v12, %v5904_v1 }
 0x607   : >> { %v11523_v6 = vpop.f32.mrf.mxu0  ;;  %v6120_v40 = vpop.f32.mrf.mxu2 }
 0x608   : >> { %12511 = vst [vmem:[#allocation25_spill] sm:$0xff] %v11523_v6  ;;  %v6075_v18 = vpop.f32.mrf.mxu1  ;;  %v6181_v62 = vpop.f32.mrf.mxu3 }
 0x609   : >> { %v6182_v20 = vadd.f32 %v6181_v62, %v6120_v40  ;;  %v5569_v40 = vadd.f32 %v11467_v52, %v11473_v15 }
 0x60f   : >> { %v11525_v8 = vpop.f32.mrf.mxu0  ;;  %v6128_v59 = vpop.f32.mrf.mxu2  ;;  %v12519_v52 = vld [vmem:[#allocation25_spill] sm:$0xff] }
 0x610   : >> { %12512 = vst [vmem:[#allocation26_spill] sm:$0xff] %v11525_v8  ;;  %v11527_v31 = vpop.f32.mrf.mxu1  ;;  %v6185_v25 = vpop.f32.mrf.mxu3 }
 0x611   : >> { %12513 = vst [vmem:[#allocation27_spill] sm:$0xff] %v11527_v31  ;;  %v5647_v31 = vadd.f32 %v5646_v32, %v5604_v17  ;;  %v5609_v32 = vadd.f32 %v11484_v61, %v5565_v21  ;;  %v12523_v17 = vld [vmem:[#allocation17_spill] sm:$0xff]  ;;  %v12526_v21 = vld [vmem:[#allocation16_spill] sm:$0xff] }
 0x613   : >> { %v5696_v19 = vadd.f32 %v11486_v29, %v5647_v31  ;;  %v5952_v29 = vadd.f32 %v5951_v35, %v5908_v37  ;;  %v5653_v14 = vadd.f32 %v11492_v39, %v5609_v32  ;;  %v6186_v39 = vadd.f32 %v6185_v25, %v6128_v59  ;;  %v12518_v31 = vld [vmem:[#allocation18_spill] sm:$0xff] }
 0x614   : >> { %v12525_v37 = vld [vmem:[#allocation6_spill] sm:$0xff] }
 0x615   : >> { %v5733_v16 = vadd.f32 %v11482_v53, %v5696_v19  ;;  %v5996_v27 = vadd.f32 %v11504_v51, %v5952_v29  ;;  %v12530_v29 = vld [vmem:[#allocation9_spill] sm:$0xff] }
 0x617   : >> { %v6219_v46 = vpop.f32.mrf.mxu0  ;;  %v11529_v54 = vpop.f32.mrf.mxu2  ;;  %v5746_v38 = vadd.f32 %v5733_v16, %v11366_v0  ;;  %v6043_v15 = vadd.f32 %v12519_v52, %v5996_v27 }
 0x618   : >> { %12514 = vst [vmem:[#allocation28_spill] sm:$0xff] %v11529_v54  ;;  %v11531_v55 = vpop.f32.mrf.mxu1  ;;  %v11533_v26 = vpop.f32.mrf.mxu3  ;;  %v5287_v54 = vadd.f32 %v11412_v45, %v11399_v60  ;;  %v5291_v60 = vadd.f32 %v11423_v50, %v11410_v23  ;;  %v12522_v59 = vld [vmem:[#allocation27_spill] sm:$0xff] }
 0x619   : >> { %12515 = vst [vmem:[#allocation29_spill] sm:$0xff] %v11531_v55  ;;  %v6080_v25 = vadd.f32 %v12522_v59, %v6043_v15  ;;  %v12539_v15 = vld [vmem:[#allocation8_spill] sm:$0xff] }
 0x61a   : >> { %12516 = vst [vmem:[#allocation30_spill] sm:$0xff] %v11533_v26  ;;  %v5369_v26 = vadd.f32 %v11397_v3, %v5326_v4  ;;  %v5331_v58 = vadd.f32 %v11414_v2, %v5287_v54  ;;  %v5990_v3 = vadd.f32 %v5989_v7, %v5947_v48  ;;  %v5614_v54 = vadd.f32 %v12518_v31, %v5569_v40 }
 0x61c   : >> { %v5418_v43 = vadd.f32 %v11433_v5, %v5369_v26  ;;  %v5375_v2 = vadd.f32 %v11408_v44, %v5331_v58  ;;  %v6039_v23 = vadd.f32 %v6038_v36, %v5990_v3  ;;  %v5599_v44 = vadd.f32 %v11469_v49, %v5557_v10  ;;  %v12528_v3 = vld [vmem:[#allocation21_spill] sm:$0xff] }
 0x61d   : >> { %v5912_v36 = vadd.f32 %v11511_v41, %v11502_v34 }
 0x61e   : >> { %v5455_v45 = vadd.f32 %v11447_v63, %v5418_v43  ;;  %v5336_v63 = vadd.f32 %v11425_v56, %v5291_v60  ;;  %v5422_v7 = vadd.f32 %v11445_v47, %v5375_v2  ;;  %v6076_v53 = vadd.f32 %v6075_v18, %v6039_v23  ;;  %v12517_v18 = vld [vmem:[#allocation15_spill] sm:$0xff] }
 0x61f   : >> { %v6224_v30 = vpop.f32.mrf.mxu0  ;;  %v11540_v8 = vpop.f32.mrf.mxu2  ;;  %v5700_v56 = vadd.f32 %v11494_v22, %v5653_v14  ;;  %v6178_v47 = vadd.f32 %v6177_v13, %v11518_v9  ;;  %v5641_v62 = vadd.f32 %v12517_v18, %v5599_v44  ;;  %v12520_v22 = vld [vmem:[#allocation20_spill] sm:$0xff]  ;;  %v12521_v9 = vld [vmem:[#allocation22_spill] sm:$0xff] }
 0x620   : >> { %v6261_v55 = vpop.f32.mrf.mxu1  ;;  %v11544_v6 = vpop.f32.mrf.mxu3  ;;  %v6225_v12 = vadd.f32 %v6224_v30, %v6182_v20  ;;  %v5745_v61 = vadd.f32 %v5455_v45, %v11259_v24  ;;  %v5459_v49 = vadd.f32 %v11459_v33, %v5422_v7  ;;  %v5659_v41 = vadd.f32 %v12520_v22, %v5614_v54  ;;  %v12527_v45 = vld [vmem:[#allocation12_spill] sm:$0xff]  ;;  %v12535_v44 = vld [vmem:[#allocation14_spill] sm:$0xff]  ;;  %v12538_v54 = vld [vmem:[#allocation7_spill] sm:$0xff] }
 0x621   : >> { %v6220_v51 = vadd.f32 %v6219_v46, %v6178_v47  ;;  %v5957_v13 = vadd.f32 %v12521_v9, %v5912_v36  ;;  %v5737_v4 = vadd.f32 %v12523_v17, %v5700_v56  ;;  %v12524_v46 = vld [vmem:[#allocation11_spill] sm:$0xff]  ;;  %v5692_v20 = vadd.f32 %v12526_v21, %v5641_v62  ;;  %v12532_v10 = vld [vmem:[#allocation30_spill] sm:$0xff]  ;;  %v12537_v36 = vld [vmem:[#allocation29_spill] sm:$0xff] }
 0x622   : >> { %v11577_v0 = vadd.f32 %v6076_v53, %v5745_v61  ;;  %v5381_v19 = vadd.f32 %v12524_v46, %v5336_v63  ;;  %v5747_v43 = vadd.f32 %v5459_v49, %v12525_v37  ;;  %v12533_v63 = vld [vmem:[#allocation26_spill] sm:$0xff] }
 0x623   : >> { %v6262_v1 = vadd.f32 %v6261_v55, %v6220_v51  ;;  %v5729_v53 = vadd.f32 %v12535_v44, %v5692_v20  ;;  %v12540_v22 = vld [vmem:[#allocation10_spill] sm:$0xff] }
 0x624   : >> { %v5426_v32 = vadd.f32 %v12527_v45, %v5381_v19  ;;  %v11593_v16 = vadd.f32 %v6080_v25, %v5747_v43  ;;  %v12541_v25 = vld [vmem:[#allocation24_spill] sm:$0xff]  ;;  %v6386_v46 = vmul.f32 %v11577_v0, %v11577_v0 }
 0x625   : >> { %v6313_v23 = vadd.f32 %v11540_v8, %v6262_v1  ;;  %v5744_v51 = vadd.f32 %v5729_v53, %v12539_v15  ;;  %v6384_v19 = vmul.f32 %v12541_v25, %v12541_v25 }
 0x627   : >> { %v6316_v11 = vpop.f32.mrf.mxu2  ;;  %v6229_v30 = vpop.f32.mrf.mxu0  ;;  %v6350_v8 = vadd.f32 %v11544_v6, %v6313_v23 }
 0x628   : >> { %v6267_v5 = vpop.f32.mrf.mxu1  ;;  %v6353_v57 = vpop.f32.mrf.mxu3  ;;  %v6230_v26 = vadd.f32 %v6229_v30, %v6186_v39  ;;  %v12534_v30 = vld [vmem:[#allocation13_spill] sm:$0xff] }
 0x629   : >> { %v6268_v50 = vadd.f32 %v6267_v5, %v6225_v12  ;;  %v5704_v12 = vadd.f32 %v12528_v3, %v5659_v41  ;;  %v5748_v5 = vadd.f32 %v5737_v4, %v12530_v29  ;;  %v5463_v61 = vadd.f32 %v12534_v30, %v5426_v32 }
 0x62a   : >> { %v11618_v6 = vadd.f32 %v6350_v8, %v5744_v51 }
 0x62b   : >> { %v6317_v35 = vadd.f32 %v6316_v11, %v6268_v50  ;;  %v12529_v11 = vld [vmem:[#allocation23_spill] sm:$0xff]  ;;  %v5749_v52 = vadd.f32 %v5463_v61, %v12538_v54 }
 0x62c   : >> { %v6002_v2 = vadd.f32 %v12529_v11, %v5957_v13 }
 0x62d   : >> { %v6354_v24 = vadd.f32 %v6353_v57, %v6317_v35  ;;  %v12531_v57 = vld [vmem:[#allocation28_spill] sm:$0xff] }
 0x62e   : >> { %v6190_v14 = vadd.f32 %v12532_v10, %v12531_v57  ;;  %v6047_v7 = vadd.f32 %v12533_v63, %v6002_v2 }
 0x62f   : >> { %v11579_v28 = vadd.f32 %v6354_v24, %v5746_v38  ;;  %v6320_v34 = vpop.f32.mrf.mxu2  ;;  %v6234_v55 = vpop.f32.mrf.mxu0  ;;  %v12536_v38 = vld [vmem:[#allocation19_spill] sm:$0xff]  ;;  %v6388_v24 = vmul.f32 %v11593_v16, %v11593_v16 }
 0x630   : >> { %v6273_v33 = vpop.f32.mrf.mxu1  ;;  %v6357_v42 = vpop.f32.mrf.mxu3  ;;  %v6235_v35 = vadd.f32 %v6234_v55, %v6190_v14  ;;  %v5741_v27 = vadd.f32 %v12536_v38, %v5704_v12  ;;  %v6084_v56 = vadd.f32 %v12537_v36, %v6047_v7 }
 0x631   : >> { %v6274_v48 = vadd.f32 %v6273_v33, %v6230_v26  ;;  %v6375_v58 = vadd.f32 %v11579_v28, %v11577_v0  ;;  %v6372_v33 = vadd.f32 %v11618_v6, %v12541_v25 }
 0x632   : >> { %v5750_v41 = vadd.f32 %v5741_v27, %v12540_v22  ;;  %v11616_v9 = vadd.f32 %v6084_v56, %v5749_v52 }
 0x633   : >> { %v6321_v60 = vadd.f32 %v6320_v34, %v6274_v48  ;;  %6376 = vadd.xlane.f32.xlu2 %v6375_v58  ;;  %v6387_v48 = vmul.f32 %v11579_v28, %v11579_v28  ;;  %v6385_v58 = vmul.f32 %v11618_v6, %v11618_v6 }
 0x635   : >> { %v6358_v50 = vadd.f32 %v6357_v42, %v6321_v60  ;;  %v6390_v42 = vmul.f32 %v11616_v9, %v11616_v9  ;;  %v6395_v37 = vadd.f32 %v6387_v48, %v6386_v46  ;;  %v6392_v43 = vadd.f32 %v6385_v58, %v6384_v19 }
 0x637   : >> { %v11602_v40 = vadd.f32 %v6358_v50, %v5748_v5  ;;  %v6324_v39 = vpop.f32.mrf.mxu2 }
 0x638   : >> { %v6279_v47 = vpop.f32.mrf.mxu1  ;;  %v6361_v31 = vpop.f32.mrf.mxu3 }
 0x639   : >> { %v6280_v49 = vadd.f32 %v6279_v47, %v6235_v35  ;;  %v6378_v18 = vadd.f32 %v11602_v40, %v11593_v16  ;;  %v6389_v62 = vmul.f32 %v11602_v40, %v11602_v40 }
 0x63b   : >> { %v6325_v26 = vadd.f32 %v6324_v39, %v6280_v49  ;;  %6379 = vadd.xlane.f32.xlu2 %v6378_v18  ;;  %v6398_v34 = vadd.f32 %v6389_v62, %v6388_v24  ;;  %v6486_v49 = vld [vmem:[%s11654_s7] sm:$0xff] }
 0x63c   : >> { %v6491_v15 = vsel %vm926_vm12, %v6486_v49, 0 }
 0x63d   : >> { %v6362_v13 = vadd.f32 %v6361_v31, %v6325_v26  ;;  %6399 = vadd.xlane.f32.xlu1 %v6398_v34  ;;  %v11658_v22 = vand.u32 4294901760, %v6491_v15 }
 0x63f   : >> { %v11620_v59 = vadd.f32 %v6362_v13, %v5750_v41 }
 0x641   : >> { %v6391_v17 = vmul.f32 %v11620_v59, %v11620_v59  ;;  %v6381_v1 = vadd.f32 %v11620_v59, %v11616_v9 }
 0x643   : >> { %6373 = vadd.xlane.f32.xlu2 %v6372_v33  ;;  %v6401_v4 = vadd.f32 %v6391_v17, %v6390_v42 }
 0x645   : >> { %6402 = vadd.xlane.f32.xlu0 %v6401_v4  ;;  %6382 = vadd.xlane.f32.xlu1 %v6381_v1  ;;  %v11663_v4 = vsub.f32 %v6491_v15, %v11658_v22 }
 0x64d   : >> { %6396 = vadd.xlane.f32.xlu0 %v6395_v37  ;;  %6393 = vadd.xlane.f32.xlu1 %v6392_v43 }
 0x6a6   : >> { %v6377_v21 = vpop.xlane.xlu2 %6376 }
 0x6a7   : >> { %v11642_v23 = vmul.f32 0.00390625, %v6377_v21 }
 0x6a9   : >> { %v6413_v35 = vmul.f32 %v11642_v23, %v11642_v23  ;;  %v6426_v19 = vsub.f32 %v11577_v0, %v11642_v23 }
 0x6ae   : >> { %v6380_v20 = vpop.xlane.xlu2 %6379 }
 0x6af   : >> { %v6406_v60 = vmul.f32 0.00390625, %v6380_v20 }
 0x6b0   : >> { %v6400_v45 = vpop.xlane.xlu1 %6399 }
 0x6b1   : >> { %v6410_v32 = vmul.f32 0.00390625, %v6400_v45  ;;  %v6414_v3 = vmul.f32 %v6406_v60, %v6406_v60  ;;  %v6428_v41 = vsub.f32 %v11593_v16, %v6406_v60  ;;  %v6429_v33 = vsub.f32 %v11602_v40, %v6406_v60 }
 0x6b2   : >> { %v6427_v40 = vsub.f32 %v11579_v28, %v11642_v23  ;;  %v11674_v45 = vand.u32 4294901760, %v11663_v4 }
 0x6b3   : >> { %v6418_v12 = vsub.f32 %v6410_v32, %v6414_v3  ;;  %v6487_v32 = vld [vmem:[%s11654_s7 + $0x8] sm:$0xff] }
 0x6b5   : >> { %v6422_v11 = vmax.f32 %v6418_v12, 0.0 }
 0x6b6   : >> { %v6374_v5 = vpop.xlane.xlu2 %6373 }
 0x6b7   : >> { %v6434_v2 = vadd.f32 1e-05, %v6422_v11  ;;  %v11644_v50 = vmul.f32 0.00390625, %v6374_v5 }
 0x6b8   : >> { %v6403_v55 = vpop.xlane.xlu0 %6402  ;;  %v6383_v29 = vpop.xlane.xlu1 %6382 }
 0x6b9   : >> { %8154 = vrsqrt.f32 %v6434_v2  ;;  %v11638_v57 = vmul.f32 0.00390625, %v6383_v29  ;;  %v6411_v10 = vmul.f32 0.00390625, %v6403_v55  ;;  %v6412_v27 = vmul.f32 %v11644_v50, %v11644_v50 }
 0x6ba   : >> { %vm6462_vm14 = vweird.f32 %v6434_v2  ;;  %v6424_v20 = vsub.f32 %v12541_v25, %v11644_v50  ;;  %v6425_v11 = vsub.f32 %v11618_v6, %v11644_v50 }
 0x6bb   : >> { %v6415_v14 = vmul.f32 %v11638_v57, %v11638_v57  ;;  %v6431_v28 = vsub.f32 %v11620_v59, %v11638_v57  ;;  %v6525_v59 = vsub.f32 %v11663_v4, %v11674_v45 }
 0x6bd   : >> { %v6419_v63 = vsub.f32 %v6411_v10, %v6415_v14  ;;  %v6494_v10 = vsel %vm926_vm12, %v6487_v32, 0 }
 0x6bf   : >> { %v8155_v7 = vpop.eup %8154  ;;  %v6423_v61 = vmax.f32 %v6419_v63, 0.0 }
 0x6c0   : >> { %v6457_v30 = vmul.f32 %v8155_v7, %v6434_v2  ;;  %v6397_v44 = vpop.xlane.xlu0 %6396  ;;  %v6394_v53 = vpop.xlane.xlu1 %6393  ;;  %vm6463_vm13 = vweird.f32 %v8155_v7  ;;  %v6430_v2 = vsub.f32 %v11616_v9, %v11638_v57 }
 0x6c1   : >> { %v6409_v38 = vmul.f32 0.00390625, %v6397_v44  ;;  %v6408_v36 = vmul.f32 0.00390625, %v6394_v53  ;;  %v6435_v47 = vadd.f32 1e-05, %v6423_v61  ;;  %vm6464_vm15 = vmor %vm6462_vm14, %vm6463_vm13  ;;  %v11700_v44 = vand.u32 4294901760, %v6494_v10 }
 0x6c2   : >> { %v6458_v56 = vmul.f32 %v8155_v7, %v6457_v30 }
 0x6c3   : >> { %v6417_v39 = vsub.f32 %v6409_v38, %v6413_v35  ;;  %v6416_v24 = vsub.f32 %v6408_v36, %v6412_v27  ;;  %8156 = vrsqrt.f32 %v6435_v47  ;;  %vm6472_vm9 = vweird.f32 %v6435_v47 }
 0x6c4   : >> { %v6459_v8 = vmul.f32 0.5, %v6458_v56 }
 0x6c5   : >> { %v6421_v18 = vmax.f32 %v6417_v39, 0.0  ;;  %v6420_v62 = vmax.f32 %v6416_v24, 0.0 }
 0x6c6   : >> { %v6460_v31 = vsub.f32 1.5, %v6459_v8 }
 0x6c7   : >> { %v6433_v54 = vadd.f32 1e-05, %v6421_v18  ;;  %v6432_v52 = vadd.f32 1e-05, %v6420_v62 }
 0x6c8   : >> { %v6461_v51 = vmul.f32 %v8155_v7, %v6460_v31 }
 0x6c9   : >> { %8158 = vrsqrt.f32 %v6433_v54  ;;  %v8157_v26 = vpop.eup %8156  ;;  %vm6452_vm14 = vweird.f32 %v6433_v54 }
 0x6ca   : >> { %8160 = vrsqrt.f32 %v6432_v52  ;;  %v6465_v34 = vsel %vm6464_vm15, %v8155_v7, %v6461_v51  ;;  %v6467_v13 = vmul.f32 %v8157_v26, %v6435_v47  ;;  %vm6473_vm8 = vweird.f32 %v8157_v26 }
 0x6cb   : >> { %v6480_v17 = vmul.f32 %v6465_v34, %v6428_v41  ;;  %v6481_v58 = vmul.f32 %v6465_v34, %v6429_v33  ;;  %vm6474_vm10 = vmor %vm6472_vm9, %vm6473_vm8  ;;  %vm6442_vm8 = vweird.f32 %v6432_v52  ;;  %v6488_v34 = vld [vmem:[%s11654_s7 + $0x10] sm:$0xff] }
 0x6cc   : >> { %v6468_v42 = vmul.f32 %v8157_v26, %v6467_v13 }
 0x6cd   : >> { %v11667_v21 = vand.u32 4294901760, %v6480_v17  ;;  %v11677_v12 = vand.u32 4294901760, %v6481_v58 }
 0x6ce   : >> { %v6469_v48 = vmul.f32 0.5, %v6468_v42 }
 0x6cf   : >> { %v8159_v1 = vpop.eup %8158  ;;  %v11687_v5 = vsub.f32 %v6480_v17, %v11667_v21  ;;  %v11691_v9 = vsub.f32 %v6481_v58, %v11677_v12 }
 0x6d0   : >> { %v8161_v46 = vpop.eup %8160  ;;  %v6447_v37 = vmul.f32 %v8159_v1, %v6433_v54  ;;  %v6470_v43 = vsub.f32 1.5, %v6469_v48  ;;  %vm6453_vm11 = vweird.f32 %v8159_v1  ;;  %v11718_v54 = vsub.f32 %v6494_v10, %v11700_v44 }
 0x6d1   : >> { %v6437_v16 = vmul.f32 %v8161_v46, %v6432_v52  ;;  %vm6443_vm13 = vweird.f32 %v8161_v46  ;;  %vm6454_vm15 = vmor %vm6452_vm14, %vm6453_vm11  ;;  %v6575_v61 = vand.u32 4294901760, %v11687_v5  ;;  %v6853_v56 = vand.u32 4294901760, %v11691_v9 }
 0x6d2   : >> { %v6448_v60 = vmul.f32 %v8159_v1, %v6447_v37  ;;  %v6471_v3 = vmul.f32 %v8157_v26, %v6470_v43  ;;  %vm6444_vm9 = vmor %vm6442_vm8, %vm6443_vm13  ;;  %v11746_v43 = vand.u32 4294901760, %v6525_v59 }
 0x6d3   : >> { %v6438_v0 = vmul.f32 %v8161_v46, %v6437_v16  ;;  %v6576_v62 = vsub.f32 %v11687_v5, %v6575_v61  ;;  %v6854_v13 = vsub.f32 %v11691_v9, %v6853_v56 }
 0x6d4   : >> { %v6449_v25 = vmul.f32 0.5, %v6448_v60  ;;  %v6475_v55 = vsel %vm6474_vm10, %v8157_v26, %v6471_v3  ;;  %v11751_v3 = vand.u32 4294901760, %v11718_v54 }
 0x6d5   : >> { %v6439_v29 = vmul.f32 0.5, %v6438_v0  ;;  %v6482_v14 = vmul.f32 %v6475_v55, %v6430_v2  ;;  %v6483_v23 = vmul.f32 %v6475_v55, %v6431_v28  ;;  %v6577_v37 = vand.u32 4294901760, %v6576_v62  ;;  %v6489_v55 = vld [vmem:[%s11654_s7 + $0x18] sm:$0xff] }
 0x6d6   : >> { %v6450_v63 = vsub.f32 1.5, %v6449_v25  ;;  %v6855_v32 = vand.u32 4294901760, %v6854_v13 }
 0x6d7   : >> { %v6440_v6 = vsub.f32 1.5, %v6439_v29  ;;  %v11695_v57 = vand.u32 4294901760, %v6483_v23  ;;  %v11697_v7 = vand.u32 4294901760, %v6482_v14  ;;  %v6533_v29 = vsub.f32 %v11718_v54, %v11751_v3 }
 0x6d8   : >> { %v6451_v50 = vmul.f32 %v8159_v1, %v6450_v63 }
 0x6d9   : >> { %v6441_v30 = vmul.f32 %v8161_v46, %v6440_v6  ;;  %v11703_v53 = vsub.f32 %v6483_v23, %v11695_v57  ;;  %6515 = vmatpush.msrb.mxu0 %v11697_v7  ;;  %6666 = vmatpush.msrb.mxu3 %v11697_v7  ;;  %v6568_v35 = vsub.f32 %v6482_v14, %v11697_v7  ;;  %v6500_v23 = vsel %vm926_vm12, %v6489_v55, 0 }
 0x6da   : >> { %v6455_v38 = vsel %vm6454_vm15, %v8159_v1, %v6451_v50  ;;  %v6534_v63 = vand.u32 4294901760, %v6533_v29  ;;  %v11774_v59 = vand.u32 4294901760, %v6500_v23 }
 0x6db   : >> { %v6478_v27 = vmul.f32 %v6455_v38, %v6426_v19  ;;  %v6445_v36 = vsel %vm6444_vm9, %v8161_v46, %v6441_v30  ;;  %v6479_v47 = vmul.f32 %v6455_v38, %v6427_v40  ;;  %6517 = vmatpush.msrb.mxu0 %v11667_v21  ;;  %6622 = vmatpush.msrb.mxu2 %v6568_v35  ;;  %v6569_v24 = vand.u32 4294901760, %v6568_v35 }
 0x6dc   : >> { %v6476_v39 = vmul.f32 %v6445_v36, %v6424_v20  ;;  %v6847_v8 = vand.u32 4294901760, %v11703_v53  ;;  %v6477_v49 = vmul.f32 %v6445_v36, %v6425_v11  ;;  %6668 = vmatpush.msrb.mxu3 %v11667_v21  ;;  %v6497_v19 = vsel %vm926_vm12, %v6488_v34, 0 }
 0x6dd   : >> { %v11712_v18 = vand.u32 4294901760, %v6478_v27  ;;  %v11715_v31 = vand.u32 4294901760, %v6479_v47  ;;  %6625 = vmatpush.msrb.mxu2 %v11687_v5  ;;  %v6570_v15 = vsub.f32 %v6568_v35, %v6569_v24  ;;  %v11753_v0 = vand.u32 4294901760, %v6497_v19 }
 0x6de   : >> { %v11721_v52 = vand.u32 4294901760, %v6476_v39  ;;  %v6848_v51 = vsub.f32 %v11703_v53, %v6847_v8  ;;  %v11726_v26 = vand.u32 4294901760, %v6477_v49  ;;  %v6547_v30 = vsub.f32 %v6500_v23, %v11774_v59 }
 0x6df   : >> { %6519 = vmatpush.msrb.mxu0 %v11712_v18  ;;  %6670 = vmatpush.msrb.mxu3 %v11712_v18  ;;  %v6580_v41 = vsub.f32 %v6478_v27, %v11712_v18  ;;  %v11736_v33 = vsub.f32 %v6479_v47, %v11715_v31  ;;  %v6571_v42 = vand.u32 4294901760, %v6570_v15  ;;  %v11764_v5 = vsub.f32 %v6497_v19, %v11753_v0 }
 0x6e0   : >> { %v6849_v17 = vand.u32 4294901760, %v6848_v51  ;;  %v6586_v1 = vsub.f32 %v6476_v39, %v11721_v52  ;;  %v11740_v48 = vsub.f32 %v6477_v49, %v11726_v26 }
 0x6e1   : >> { %6521 = vmatpush.msrb.mxu0 %v11721_v52  ;;  %6628 = vmatpush.msrb.mxu2 %v6580_v41  ;;  %v6581_v58 = vand.u32 4294901760, %v6580_v41  ;;  %v6859_v46 = vand.u32 4294901760, %v11736_v33  ;;  %v11772_v6 = vand.u32 4294901760, %v11764_v5 }
 0x6e2   : >> { %6572 = vmatpush.msrb.mxu1 %v6571_v42  ;;  %6672 = vmatpush.msrb.mxu3 %v11721_v52  ;;  %v6587_v16 = vand.u32 4294901760, %v6586_v1  ;;  %v6865_v40 = vand.u32 4294901760, %v11740_v48 }
 0x6e3   : >> { %6713 = vmatpush.msra.mxu0 %v6569_v24  ;;  %v6582_v20 = vsub.f32 %v6580_v41, %v6581_v58  ;;  %v6860_v60 = vsub.f32 %v11736_v33, %v6859_v46  ;;  %6631 = vmatpush.msrb.mxu2 %v6586_v1  ;;  %v6541_v50 = vsub.f32 %v11764_v5, %v11772_v6 }
 0x6e4   : >> { %6850 = vmatpush.msra.mxu3 %v6849_v17  ;;  %6578 = vmatpush.msrb.mxu1 %v6577_v37  ;;  %v6588_v28 = vsub.f32 %v6586_v1, %v6587_v16  ;;  %v6866_v25 = vsub.f32 %v11740_v48, %v6865_v40 }
 0x6e5   : >> { %6717 = vmatpush.msra.mxu0 %v6575_v61  ;;  %6793 = vmatpush.msra.mxu2 %v11695_v57  ;;  %v6583_v11 = vand.u32 4294901760, %v6582_v20  ;;  %v6861_v2 = vand.u32 4294901760, %v6860_v60 }
 0x6e6   : >> { %6856 = vmatpush.msra.mxu3 %v6855_v32  ;;  %6527 = vmatmul.f32.vlgmr.msrb.gmra.mxu0 %v11746_v43  ;;  %v6589_v10 = vand.u32 4294901760, %v6588_v28  ;;  %v6867_v14 = vand.u32 4294901760, %v6866_v25 }
 0x6e7   : >> { %6634 = vmatmul.f32.vlgmr.msrb.gmra.mxu2 %v11663_v4  ;;  %6721 = vmatpush.msra.mxu0 %v6581_v58 }
 0x6e8   : >> { %6795 = vmatpush.msra.mxu2 %v11677_v12  ;;  %6584 = vmatpush.msrb.mxu1 %v6583_v11 }
 0x6e9   : >> { %6862 = vmatpush.msra.mxu3 %v6861_v2  ;;  %6725 = vmatpush.msra.mxu0 %v6587_v16 }
 0x6ea   : >> { %6676 = vmatmul.f32.vlgmr.msrb.gmra.mxu3 %v11674_v45  ;;  %6797 = vmatpush.msra.mxu2 %v11715_v31 }
 0x6eb   : >> { %6590 = vmatpush.msrb.mxu1 %v6589_v10  ;;  %6868 = vmatpush.msra.mxu3 %v6867_v14 }
 0x6ec   : >> { %6900 = vmatpush.msrb.mxu0 %v11703_v53  ;;  %6592 = vmatmul.f32.vlgmr.msrb.gmra.mxu1 %v11658_v22 }
 0x6ed   : >> { %6756 = vmatpush.msra.mxu1 %v11697_v7  ;;  %6799 = vmatpush.msra.mxu2 %v11726_v26  ;;  %v6548_v7 = vand.u32 4294901760, %v6547_v30 }
 0x6ee   : >> { %7034 = vmatpush.msrb.mxu3 %v11695_v57  ;;  %6903 = vmatpush.msrb.mxu0 %v11691_v9 }
 0x6ef   : >> { %6991 = vmatpush.msrb.mxu2 %v6847_v8  ;;  %6758 = vmatpush.msra.mxu1 %v11667_v21  ;;  %v6542_v21 = vand.u32 4294901760, %v6541_v50  ;;  %v6549_v9 = vsub.f32 %v6547_v30, %v6548_v7 }
 0x6f0   : >> { %7036 = vmatpush.msrb.mxu3 %v11677_v12  ;;  %6535 = vmatmul.f32.gmra.mxu0 %v6534_v63 }
 0x6f1   : >> { %6906 = vmatpush.msrb.mxu0 %v11736_v33  ;;  %6995 = vmatpush.msrb.mxu2 %v6853_v56  ;;  %v6550_v61 = vand.u32 4294901760, %v6549_v9 }
 0x6f2   : >> { %6639 = vmatmul.f32.gmra.mxu2 %v11718_v54  ;;  %6760 = vmatpush.msra.mxu1 %v11712_v18 }
 0x6f3   : >> { %7038 = vmatpush.msrb.mxu3 %v11715_v31  ;;  %6909 = vmatpush.msrb.mxu0 %v11740_v48 }
 0x6f4   : >> { %6999 = vmatpush.msrb.mxu2 %v6859_v46  ;;  %6682 = vmatmul.f32.gmra.mxu3 %v11751_v3 }
 0x6f5   : >> { %6762 = vmatpush.msra.mxu1 %v11721_v52  ;;  %7040 = vmatpush.msrb.mxu3 %v11726_v26 }
 0x6f6   : >> { %7003 = vmatpush.msrb.mxu2 %v6865_v40  ;;  %6596 = vmatmul.f32.gmra.mxu1 %v11700_v44 }
 0x6f7   : >> { %6944 = vmatpush.msrb.mxu1 %v11695_v57 }
 0x6f8   : >> { %6543 = vmatmul.f32.gmra.mxu0 %v6542_v21 }
 0x6f9   : >> { %6946 = vmatpush.msrb.mxu1 %v11677_v12 }
 0x6fa   : >> { %6644 = vmatmul.f32.gmra.mxu2 %v11764_v5 }
 0x6fb   : >> { %6948 = vmatpush.msrb.mxu1 %v11715_v31 }
 0x6fc   : >> { %6688 = vmatmul.f32.gmra.mxu3 %v11772_v6 }
 0x6fd   : >> { %6950 = vmatpush.msrb.mxu1 %v11726_v26 }
 0x6fe   : >> { %6600 = vmatmul.f32.gmra.mxu1 %v11753_v0 }
 0x700   : >> { %6551 = vmatmul.f32.gmra.mxu0 %v6550_v61 }
 0x702   : >> { %6649 = vmatmul.f32.gmra.mxu2 %v6547_v30 }
 0x704   : >> { %6694 = vmatmul.f32.gmra.mxu3 %v6548_v7 }
 0x706   : >> { %6604 = vmatmul.f32.gmra.mxu1 %v11774_v59 }
 0x708   : >> { %6727 = vmatmul.f32.vlgmr.msra.gmra.mxu0 %v11658_v22 }
 0x70a   : >> { %6805 = vmatmul.f32.vlgmr.msra.gmra.mxu2 %v11746_v43 }
 0x70c   : >> { %6870 = vmatmul.f32.vlgmr.msra.gmra.mxu3 %v11658_v22 }
 0x70e   : >> { %6764 = vmatmul.f32.vlgmr.msra.gmra.mxu1 %v11658_v22 }
 0x710   : >> { %6731 = vmatmul.f32.gmra.mxu0 %v11700_v44 }
 0x712   : >> { %6813 = vmatmul.f32.gmra.mxu2 %v6534_v63 }
 0x714   : >> { %6874 = vmatmul.f32.gmra.mxu3 %v11700_v44 }
 0x716   : >> { %6768 = vmatmul.f32.gmra.mxu1 %v11700_v44 }
 0x718   : >> { %6735 = vmatmul.f32.gmra.mxu0 %v11753_v0 }
 0x71a   : >> { %6821 = vmatmul.f32.gmra.mxu2 %v6542_v21 }
 0x71c   : >> { %6878 = vmatmul.f32.gmra.mxu3 %v11753_v0 }
 0x71e   : >> { %6772 = vmatmul.f32.gmra.mxu1 %v11753_v0 }
 0x720   : >> { %6739 = vmatmul.f32.gmra.mxu0 %v11774_v59 }
 0x722   : >> { %6829 = vmatmul.f32.gmra.mxu2 %v6550_v61 }
 0x724   : >> { %6882 = vmatmul.f32.gmra.mxu3 %v11774_v59 }
 0x726   : >> { %6776 = vmatmul.f32.gmra.mxu1 %v11774_v59 }
 0x728   : >> { %6912 = vmatmul.f32.vlgmr.msrb.gmra.mxu0 %v11663_v4 }
 0x72a   : >> { %7005 = vmatmul.f32.vlgmr.msrb.gmra.mxu2 %v11658_v22 }
 0x72c   : >> { %7042 = vmatmul.f32.vlgmr.msrb.gmra.mxu3 %v11658_v22 }
 0x72e   : >> { %6954 = vmatmul.f32.vlgmr.msrb.gmra.mxu1 %v11674_v45 }
 0x730   : >> { %6917 = vmatmul.f32.gmra.mxu0 %v11718_v54 }
 0x732   : >> { %7009 = vmatmul.f32.gmra.mxu2 %v11700_v44 }
 0x734   : >> { %7046 = vmatmul.f32.gmra.mxu3 %v11700_v44 }
 0x736   : >> { %6960 = vmatmul.f32.gmra.mxu1 %v11751_v3 }
 0x738   : >> { %6922 = vmatmul.f32.gmra.mxu0 %v11764_v5 }
 0x73a   : >> { %7013 = vmatmul.f32.gmra.mxu2 %v11753_v0 }
 0x73c   : >> { %7050 = vmatmul.f32.gmra.mxu3 %v11753_v0 }
 0x73e   : >> { %6966 = vmatmul.f32.gmra.mxu1 %v11772_v6 }
 0x740   : >> { %6927 = vmatmul.f32.gmra.mxu0 %v6547_v30 }
 0x742   : >> { %7017 = vmatmul.f32.gmra.mxu2 %v11774_v59 }
 0x744   : >> { %7054 = vmatmul.f32.gmra.mxu3 %v11774_v59 }
 0x746   : >> { %6972 = vmatmul.f32.gmra.mxu1 %v6548_v7 }
 0x763   : >> { %v6528_v22 = vpop.f32.mrf.mxu0 }
 0x769   : >> { %v6593_v4 = vpop.f32.mrf.mxu1 }
 0x76a   : >> { %v6635_v45 = vpop.f32.mrf.mxu2  ;;  %v6594_v42 = vadd.f32 %v6593_v4, %v6528_v22 }
 0x76c   : >> { %v6636_v58 = vadd.f32 %v6635_v45, %v6594_v42 }
 0x76d   : >> { %v6536_v12 = vpop.f32.mrf.mxu0  ;;  %v6677_v57 = vpop.f32.mrf.mxu3 }
 0x76e   : >> { %v6678_v37 = vadd.f32 %v6677_v57, %v6636_v58 }
 0x773   : >> { %v6597_v44 = vpop.f32.mrf.mxu1 }
 0x774   : >> { %v6598_v3 = vadd.f32 %v6597_v44, %v6536_v12 }
 0x775   : >> { %v6640_v53 = vpop.f32.mrf.mxu2  ;;  %v6544_v35 = vpop.f32.mrf.mxu0 }
 0x776   : >> { %v6641_v55 = vadd.f32 %v6640_v53, %v6598_v3 }
 0x777   : >> { %v6683_v38 = vpop.f32.mrf.mxu3 }
 0x778   : >> { %v6684_v21 = vadd.f32 %v6683_v38, %v6641_v55 }
 0x77b   : >> { %v6601_v27 = vpop.f32.mrf.mxu1 }
 0x77c   : >> { %v6602_v63 = vadd.f32 %v6601_v27, %v6544_v35 }
 0x77d   : >> { %v6645_v36 = vpop.f32.mrf.mxu2  ;;  %v6552_v56 = vpop.f32.mrf.mxu0 }
 0x77e   : >> { %v6646_v61 = vadd.f32 %v6645_v36, %v6602_v63 }
 0x77f   : >> { %v6689_v47 = vpop.f32.mrf.mxu3 }
 0x780   : >> { %v6690_v35 = vadd.f32 %v6689_v47, %v6646_v61 }
 0x783   : >> { %v6605_v39 = vpop.f32.mrf.mxu1 }
 0x784   : >> { %v6606_v12 = vadd.f32 %v6605_v39, %v6552_v56 }
 0x785   : >> { %v11833_v24 = vpop.f32.mrf.mxu2  ;;  %v6728_v8 = vpop.f32.mrf.mxu0 }
 0x786   : >> { %v6729_v40 = vadd.f32 %v6728_v8, %v6678_v37  ;;  %v6651_v38 = vadd.f32 %v11833_v24, %v6606_v12 }
 0x787   : >> { %v11835_v49 = vpop.f32.mrf.mxu3 }
 0x78b   : >> { %v6765_v18 = vpop.f32.mrf.mxu1 }
 0x78c   : >> { %v11841_v0 = vadd.f32 %v6765_v18, %v6729_v40 }
 0x78d   : >> { %v6806_v62 = vpop.f32.mrf.mxu2  ;;  %v6732_v31 = vpop.f32.mrf.mxu0 }
 0x78e   : >> { %v7070_v10 = vmul.f32 %v11841_v0, %v11841_v0  ;;  %v6733_v22 = vadd.f32 %v6732_v31, %v6684_v21 }
 0x78f   : >> { %v6871_v54 = vpop.f32.mrf.mxu3 }
 0x790   : >> { %v6872_v19 = vadd.f32 %v6871_v54, %v6806_v62 }
 0x793   : >> { %v6769_v52 = vpop.f32.mrf.mxu1 }
 0x794   : >> { %v11853_v57 = vadd.f32 %v6769_v52, %v6733_v22  ;;  %v6696_v52 = vadd.f32 %v11835_v49, %v6651_v38 }
 0x795   : >> { %v6814_v15 = vpop.f32.mrf.mxu2  ;;  %v6736_v51 = vpop.f32.mrf.mxu0 }
 0x796   : >> { %v6737_v62 = vadd.f32 %v6736_v51, %v6690_v35  ;;  %v7072_v49 = vmul.f32 %v11853_v57, %v11853_v57 }
 0x797   : >> { %v6875_v26 = vpop.f32.mrf.mxu3 }
 0x798   : >> { %v6876_v28 = vadd.f32 %v6875_v26, %v6814_v15 }
 0x79b   : >> { %v6773_v34 = vpop.f32.mrf.mxu1 }
 0x79c   : >> { %v11858_v15 = vadd.f32 %v6773_v34, %v6737_v62 }
 0x79d   : >> { %v6822_v41 = vpop.f32.mrf.mxu2  ;;  %v11837_v13 = vpop.f32.mrf.mxu0 }
 0x79f   : >> { %v6879_v33 = vpop.f32.mrf.mxu3 }
 0x7a0   : >> { %v6880_v4 = vadd.f32 %v6879_v33, %v6822_v41  ;;  %v6741_v33 = vadd.f32 %v11837_v13, %v6696_v52 }
 0x7a3   : >> { %v11839_v17 = vpop.f32.mrf.mxu1 }
 0x7a4   : >> { %v11867_v42 = vadd.f32 %v11839_v17, %v6741_v33 }
 0x7a5   : >> { %v6830_v1 = vpop.f32.mrf.mxu2  ;;  %v6913_v48 = vpop.f32.mrf.mxu0 }
 0x7a6   : >> { %v6914_v43 = vadd.f32 %v6913_v48, %v6872_v19  ;;  %v7076_v19 = vmul.f32 %v11867_v42, %v11867_v42 }
 0x7a7   : >> { %v6883_v46 = vpop.f32.mrf.mxu3 }
 0x7a8   : >> { %v6884_v56 = vadd.f32 %v6883_v46, %v6830_v1 }
 0x7ab   : >> { %v6955_v16 = vpop.f32.mrf.mxu1 }
 0x7ac   : >> { %v6956_v20 = vadd.f32 %v6955_v16, %v6914_v43  ;;  %v7074_v16 = vmul.f32 %v11858_v15, %v11858_v15 }
 0x7ad   : >> { %v7006_v60 = vpop.f32.mrf.mxu2  ;;  %v6918_v32 = vpop.f32.mrf.mxu0 }
 0x7ae   : >> { %v7007_v11 = vadd.f32 %v7006_v60, %v6956_v20  ;;  %v6919_v29 = vadd.f32 %v6918_v32, %v6876_v28 }
 0x7af   : >> { %v7043_v2 = vpop.f32.mrf.mxu3 }
 0x7b0   : >> { %v11843_v25 = vadd.f32 %v7043_v2, %v7007_v11 }
 0x7b2   : >> { %v7058_v5 = vadd.f32 %v11843_v25, %v11841_v0  ;;  %v7071_v14 = vmul.f32 %v11843_v25, %v11843_v25 }
 0x7b3   : >> { %v6961_v23 = vpop.f32.mrf.mxu1 }
 0x7b4   : >> { %v6962_v6 = vadd.f32 %v6961_v23, %v6919_v29  ;;  %7059 = vadd.xlane.f32.xlu2 %v7058_v5  ;;  %v7078_v50 = vadd.f32 %v7071_v14, %v7070_v10 }
 0x7b5   : >> { %v7010_v59 = vpop.f32.mrf.mxu2  ;;  %v6923_v30 = vpop.f32.mrf.mxu0 }
 0x7b6   : >> { %v7011_v7 = vadd.f32 %v7010_v59, %v6962_v6  ;;  %7079 = vadd.xlane.f32.xlu0 %v7078_v50  ;;  %v6924_v44 = vadd.f32 %v6923_v30, %v6880_v4 }
 0x7b7   : >> { %v7047_v9 = vpop.f32.mrf.mxu3 }
 0x7b8   : >> { %v11851_v45 = vadd.f32 %v7047_v9, %v7011_v7 }
 0x7ba   : >> { %v7061_v18 = vadd.f32 %v11851_v45, %v11853_v57  ;;  %v7073_v1 = vmul.f32 %v11851_v45, %v11851_v45 }
 0x7bb   : >> { %v6967_v53 = vpop.f32.mrf.mxu1 }
 0x7bc   : >> { %v6968_v27 = vadd.f32 %v6967_v53, %v6924_v44  ;;  %v7081_v46 = vadd.f32 %v7073_v1, %v7072_v49 }
 0x7bd   : >> { %v7014_v8 = vpop.f32.mrf.mxu2  ;;  %v6928_v31 = vpop.f32.mrf.mxu0 }
 0x7be   : >> { %v7015_v54 = vadd.f32 %v7014_v8, %v6968_v27  ;;  %7062 = vadd.xlane.f32.xlu0 %v7061_v18  ;;  %v6929_v47 = vadd.f32 %v6928_v31, %v6884_v56 }
 0x7bf   : >> { %v7051_v36 = vpop.f32.mrf.mxu3 }
 0x7c0   : >> { %v11860_v39 = vadd.f32 %v7051_v36, %v7015_v54 }
 0x7c2   : >> { %v7064_v26 = vadd.f32 %v11860_v39, %v11858_v15  ;;  %v7075_v43 = vmul.f32 %v11860_v39, %v11860_v39 }
 0x7c3   : >> { %v6973_v41 = vpop.f32.mrf.mxu1 }
 0x7c4   : >> { %v6974_v24 = vadd.f32 %v6973_v41, %v6929_v47  ;;  %7065 = vadd.xlane.f32.xlu1 %v7064_v26  ;;  %v7084_v40 = vadd.f32 %v7075_v43, %v7074_v16 }
 0x7c5   : >> { %v7018_v51 = vpop.f32.mrf.mxu2 }
 0x7c6   : >> { %v7019_v34 = vadd.f32 %v7018_v51, %v6974_v24 }
 0x7c7   : >> { %v7055_v48 = vpop.f32.mrf.mxu3 }
 0x7c8   : >> { %v11871_v58 = vadd.f32 %v7055_v48, %v7019_v34 }
 0x7ca   : >> { %v7067_v13 = vadd.f32 %v11871_v58, %v11867_v42  ;;  %v7077_v17 = vmul.f32 %v11871_v58, %v11871_v58 }
 0x7cc   : >> { %7082 = vadd.xlane.f32.xlu1 %v7081_v46  ;;  %7068 = vadd.xlane.f32.xlu2 %v7067_v13  ;;  %v7087_v37 = vadd.f32 %v7077_v17, %v7076_v19 }
 0x7ce   : >> { %7088 = vadd.xlane.f32.xlu0 %v7087_v37 }
 0x7d4   : >> { %7085 = vadd.xlane.f32.xlu2 %v7084_v40 }
 0x827   : >> { %v7060_v20 = vpop.xlane.xlu2 %7059 }
 0x828   : >> { %v7090_v60 = vmul.f32 0.00390625, %v7060_v20 }
 0x829   : >> { %v7080_v32 = vpop.xlane.xlu0 %7079 }
 0x82a   : >> { %v7094_v3 = vmul.f32 0.00390625, %v7080_v32  ;;  %v7098_v11 = vmul.f32 %v7090_v60, %v7090_v60  ;;  %v7110_v4 = vsub.f32 %v11841_v0, %v7090_v60  ;;  %v7111_v12 = vsub.f32 %v11843_v25, %v7090_v60 }
 0x82c   : >> { %v7102_v2 = vsub.f32 %v7094_v3, %v7098_v11 }
 0x82e   : >> { %v7106_v28 = vmax.f32 %v7102_v2, 0.0 }
 0x830   : >> { %v7118_v55 = vadd.f32 1e-05, %v7106_v28 }
 0x831   : >> { %v7063_v14 = vpop.xlane.xlu0 %7062 }
 0x832   : >> { %8162 = vrsqrt.f32 %v7118_v55  ;;  %v7091_v63 = vmul.f32 0.00390625, %v7063_v14  ;;  %vm7128_vm10 = vweird.f32 %v7118_v55 }
 0x834   : >> { %v7099_v7 = vmul.f32 %v7091_v63, %v7091_v63  ;;  %v7112_v40 = vsub.f32 %v11853_v57, %v7091_v63  ;;  %v7113_v20 = vsub.f32 %v11851_v45, %v7091_v63 }
 0x837   : >> { %v7066_v29 = vpop.xlane.xlu1 %7065 }
 0x838   : >> { %v8163_v5 = vpop.eup %8162  ;;  %v11895_v38 = vmul.f32 0.00390625, %v7066_v29 }
 0x839   : >> { %v7123_v10 = vmul.f32 %v8163_v5, %v7118_v55  ;;  %vm7129_vm12 = vweird.f32 %v8163_v5 }
 0x83a   : >> { %vm7130_vm11 = vmor %vm7128_vm10, %vm7129_vm12  ;;  %v7100_v52 = vmul.f32 %v11895_v38, %v11895_v38 }
 0x83b   : >> { %v7124_v23 = vmul.f32 %v8163_v5, %v7123_v10 }
 0x83d   : >> { %v7125_v6 = vmul.f32 0.5, %v7124_v23 }
 0x83f   : >> { %v7126_v59 = vsub.f32 1.5, %v7125_v6  ;;  %v7083_v50 = vpop.xlane.xlu1 %7082  ;;  %v7069_v30 = vpop.xlane.xlu2 %7068 }
 0x840   : >> { %v7095_v21 = vmul.f32 0.00390625, %v7083_v50  ;;  %v11885_v9 = vmul.f32 0.00390625, %v7069_v30  ;;  %v7114_v30 = vsub.f32 %v11858_v15, %v11895_v38  ;;  %v7182_v15 = vld [vmem:[#allocation2 + $0x8] sm:$0xff] (%p824_p4) }
 0x841   : >> { %v7127_v61 = vmul.f32 %v8163_v5, %v7126_v59  ;;  %v7089_v22 = vpop.xlane.xlu0 %7088 }
 0x842   : >> { %v7103_v44 = vsub.f32 %v7095_v21, %v7099_v7  ;;  %v7097_v53 = vmul.f32 0.00390625, %v7089_v22  ;;  %v7101_v27 = vmul.f32 %v11885_v9, %v11885_v9  ;;  %v7116_v55 = vsub.f32 %v11867_v42, %v11885_v9 }
 0x843   : >> { %v7131_v35 = vsel %vm7130_vm11, %v8163_v5, %v7127_v61  ;;  %v7117_v29 = vsub.f32 %v11871_v58, %v11885_v9  ;;  %v7115_v42 = vsub.f32 %v11860_v39, %v11895_v38  ;;  %v7179_v39 = vld [vmem:[#allocation2] sm:$0xff] (%p824_p4) }
 0x844   : >> { %v11891_v8 = vmul.f32 %v7131_v35, %v7110_v4  ;;  %v11893_v1 = vmul.f32 %v7131_v35, %v7111_v12  ;;  %v7107_v62 = vmax.f32 %v7103_v44, 0.0  ;;  %v7105_v54 = vsub.f32 %v7097_v53, %v7101_v27  ;;  %v7178_v4 = vld [vmem:[#allocation2 + $0x30] sm:$0xff] (%p824_p4) }
 0x845   : > { %v12551_v12 = vmov (%p824_p4), 0   ;;  %v7181_v27 = vld [vmem:[#allocation2 + $0x10] sm:$0xff] (%p824_p4) }
 0x846   : >> { %v12542_v18 = vmov %v11893_v1  ;;  %v7170_v36 = vmax.f32 %v11891_v8, 0.0   ;;  %v7119_v25 = vadd.f32 1e-05, %v7107_v62  ;;  %v7109_v31 = vmax.f32 %v7105_v54, 0.0  ;;  %8170 = vset.pattern.permute.xlu2 (%p824_p4), %v12551_v12  ;;  %8172 = vset.pattern.permute.xlu1 (%p824_p4), %v12551_v12  ;;  %v7185_v54 = vld [vmem:[#allocation2 + $0x38] sm:$0xff] (%p824_p4) }
 0x847   : >> { %v7171_v0 = vmax.f32 %v12542_v18, 0.0   ;;  %v7086_v56 = vpop.xlane.xlu2 %7085  ;;  %8171 = vset.pattern.permute.xlu0 (%p824_p4), %v12551_v12  ;;  %v7180_v18 = vld [vmem:[#allocation2 + $0x18] sm:$0xff] (%p824_p4) }
 0x848   : >> { %8164 = vrsqrt.f32 %v7119_v25  ;;  %v7096_v47 = vmul.f32 0.00390625, %v7086_v56  ;;  %v7121_v26 = vadd.f32 1e-05, %v7109_v31  ;;  %vm7138_vm14 = vweird.f32 %v7119_v25  ;;  %v11982_v56 = vld [vmem:[%s12443_s5 + $0x10] sm:$0xff] (%p824_p4) }
 0x849   : > { %v11940_v53 = vadd.f32 (%p824_p4), %v7179_v39, %v7171_v0  ;;  %v11944_v35 = vadd.f32 (%p824_p4), %v7178_v4, %v7170_v36 }
 0x84a   : >> { %v7104_v41 = vsub.f32 %v7096_v47, %v7100_v52  ;;  %8166 = vrsqrt.f32 %v7121_v26  ;;  %vm7158_vm9 = vweird.f32 %v7121_v26  ;;  %v11987_v52 = vld [vmem:[%s12443_s5 + $0x18] sm:$0xff] (%p824_p4) }
 0x84b   : > { %7202 = vrot.lane.b32.xlu2 (%p824_p4), %v11940_v53, %s8277_s14  ;;  %7194 = vrot.lane.b32.xlu0 (%p824_p4), %v11944_v35, %s8277_s14 }
 0x84c   : >> { %v7108_v33 = vmax.f32 %v7104_v41, 0.0  ;;  %v12553_v41 = vmov (%p824_p4), 2  }
 0x84e   : >> { %v8165_v24 = vpop.eup %8164  ;;  %v7120_v51 = vadd.f32 1e-05, %v7108_v33 }
 0x84f   : >> { %v7133_v34 = vmul.f32 %v8165_v24, %v7119_v25  ;;  %vm7139_vm13 = vweird.f32 %v8165_v24  ;;  %v11970_v25 = vld [vmem:[%s12443_s5] sm:$0xff] (%p824_p4) }
 0x850   : >> { %8168 = vrsqrt.f32 %v7120_v51  ;;  %v8167_v48 = vpop.eup %8166  ;;  %vm7140_vm15 = vmor %vm7138_vm14, %vm7139_vm13  ;;  %vm7148_vm11 = vweird.f32 %v7120_v51 }
 0x851   : >> { %v7134_v1 = vmul.f32 %v8165_v24, %v7133_v34  ;;  %v7153_v49 = vmul.f32 %v8167_v48, %v7121_v26  ;;  %vm7159_vm8 = vweird.f32 %v8167_v48  ;;  %v12552_v26 = vmov (%p824_p4), 1  }
 0x852   : >> { %vm7160_vm12 = vmor %vm7158_vm9, %vm7159_vm8 }
 0x853   : >> { %v7135_v46 = vmul.f32 0.5, %v7134_v1  ;;  %v7154_v13 = vmul.f32 %v8167_v48, %v7153_v49  ;;  %v12549_v1 = vmov %v7171_v0 }
 0x855   : >> { %v7136_v19 = vsub.f32 1.5, %v7135_v46  ;;  %v7155_v37 = vmul.f32 0.5, %v7154_v13  ;;  %v12555_v46 = vmov (%p824_p4), 4  }
 0x856   : >> { %v8169_v17 = vpop.eup %8168 }
 0x857   : >> { %v7137_v43 = vmul.f32 %v8165_v24, %v7136_v19  ;;  %v7143_v16 = vmul.f32 %v8169_v17, %v7120_v51  ;;  %v7156_v60 = vsub.f32 1.5, %v7155_v37  ;;  %vm7149_vm10 = vweird.f32 %v8169_v17 }
 0x858   : >> { %vm7150_vm13 = vmor %vm7148_vm11, %vm7149_vm10 }
 0x859   : >> { %v7141_v32 = vsel %vm7140_vm15, %v8165_v24, %v7137_v43  ;;  %v7144_v3 = vmul.f32 %v8169_v17, %v7143_v16  ;;  %v7157_v28 = vmul.f32 %v8167_v48, %v7156_v60 }
 0x85a   : >> { %v7164_v11 = vmul.f32 %v7141_v32, %v7112_v40  ;;  %v7165_v2 = vmul.f32 %v7141_v32, %v7113_v20 }
 0x85b   : >> { %v7145_v5 = vmul.f32 0.5, %v7144_v3  ;;  %v7161_v45 = vsel %vm7160_vm12, %v8167_v48, %v7157_v28  ;;  %v7218_v48 = vld [vmem:[%s12439_s1] ss:$8 sm:$0x3] (%p824_p4)  ;;  %v12557_v28 = vmov (%p824_p4), 5  }
 0x85c   : >> { %v7172_v57 = vmax.f32 %v7164_v11, 0.0   ;;  %v7173_v10 = vmax.f32 %v7165_v2, 0.0   ;;  %v7168_v14 = vmul.f32 %v7161_v45, %v7116_v55  ;;  %v7169_v23 = vmul.f32 %v7161_v45, %v7117_v29 }
 0x85d   : >> { %v7146_v63 = vsub.f32 1.5, %v7145_v5  ;;  %v12550_v45 = vmov %v7170_v36  ;;  %v7183_v36 = vld [vmem:[#allocation2 + $0x20] sm:$0xff] (%p824_p4)  ;;  %v7220_v1 = vperm.slane (%p824_p4), %v7218_v48, 0  ;;  %v7221_v49 = vperm.slane (%p824_p4), %v7218_v48, 1 }
 0x85e   : >> { %v7176_v6 = vmax.f32 %v7168_v14, 0.0   ;;  %v7177_v59 = vmax.f32 %v7169_v23, 0.0   ;;  %v12547_v47 = vmov %v7173_v10  ;;  %v11957_v8 = vadd.f32 (%p824_p4), %v7180_v18, %v7172_v57 }
 0x85f   : >> { %v7147_v50 = vmul.f32 %v8169_v17, %v7146_v63  ;;  %v12548_v63 = vmov %v7172_v57  ;;  %v11992_v47 = vld [vmem:[%s12443_s5 + $0x8] sm:$0xff] (%p824_p4) }
 0x860   : >> { %v12543_v24 = vmov %v7177_v59  ;;  %v12544_v62 = vmov %v7176_v6  ;;  %7196 = vrot.lane.b32.xlu0 (%p824_p4), %v11957_v8, %s8277_s14  ;;  %v11965_v0 = vadd.f32 (%p824_p4), %v7185_v54, %v7177_v59 }
 0x861   : >> { %v7151_v58 = vsel %vm7150_vm13, %v8169_v17, %v7147_v50  ;;  %v11955_v62 = vadd.f32 (%p824_p4), %v7181_v27, %v7173_v10  ;;  %v12554_v24 = vmov (%p824_p4), 3  }
 0x862   : >> { %v7166_v21 = vmul.f32 %v7151_v58, %v7114_v30  ;;  %v7167_v7 = vmul.f32 %v7151_v58, %v7115_v42  ;;  %826 = sbr.rel (!%p824_p4) target bundleno = 454 (0x1c6), region = 98 }
 0x863   : > { %7204 = vrot.lane.b32.xlu2 (%p824_p4), %v11955_v62, %s8277_s14 }
 0x864   : >> { %v7174_v9 = vmax.f32 %v7166_v21, 0.0   ;;  %v7175_v22 = vmax.f32 %v7167_v7, 0.0  }
 0x866   : >> { %v12545_v29 = vmov %v7175_v22  ;;  %v12546_v61 = vmov %v7174_v9  ;;  %v11936_v44 = vadd.f32 (%p824_p4), %v7182_v15, %v7174_v9  ;;  %v11972_v31 = vadd.f32 (%p824_p4), %v7183_v36, %v7175_v22 }
 0x867   : > { %v7184_v61 = vld [vmem:[#allocation2 + $0x28] sm:$0xff] }
 0x868   : > { %7198 = vrot.lane.b32.xlu1 %v11936_v44, %s8277_s14  ;;  %v11953_v38 = vadd.f32 %v7184_v61, %v7176_v6  ;;  %7206 = vrot.lane.b32.xlu0 %v11972_v31, %s8277_s14 }
 0x86b   : > { %7238 = vperm.xlu2 %8170, %v11970_v25  }
 0x870   : > { %7200 = vrot.lane.b32.xlu1 %v11953_v38, %s8277_s14  ;;  %7243 = vperm.xlu0 %8171, %v11992_v47  }
 0x873   : > { %7253 = vperm.xlu2 %8170, %v11987_v52  }
 0x878   : > { %7208 = vrot.lane.b32.xlu1 %v11965_v0, %s8277_s14  ;;  %7276 = vrot.lane.b32.xlu0 %v11936_v44, %s8278_s15 }
 0x879   : > { %8173 = vset.pattern.permute.xlu0 %v12552_v26 }
 0x87b   : > { %7274 = vrot.lane.b32.xlu2 %v11957_v8, %s8278_s15 }
 0x87c   : > { %8175 = vset.pattern.permute.xlu2 %v12552_v26 }
 0x880   : > { %7248 = vperm.xlu1 %8172, %v11982_v56   ;;  %7282 = vrot.lane.b32.xlu0 %v11955_v62, %s8278_s15 }
 0x883   : > { %7280 = vrot.lane.b32.xlu2 %v11940_v53, %s8278_s15 }
 0x888   : > { %7272 = vrot.lane.b32.xlu1 %v11944_v35, %s8278_s15  ;;  %7311 = vperm.xlu0 %8173, %v11970_v25  }
 0x889   : > { %8174 = vset.pattern.permute.xlu1 %v12552_v26 }
 0x88b   : > { %7286 = vrot.lane.b32.xlu2 %v11965_v0, %s8278_s15 }
 0x890   : > { %7278 = vrot.lane.b32.xlu1 %v11953_v38, %s8278_s15  ;;  %7344 = vrot.lane.b32.xlu0 %v11957_v8, %s8279_s16 }
 0x891   : > { %8178 = vset.pattern.permute.xlu0 %v12553_v41 }
 0x893   : > { %7319 = vperm.xlu2 %8175, %v11982_v56  }
 0x898   : > { %7284 = vrot.lane.b32.xlu1 %v11972_v31, %s8278_s15  ;;  %7350 = vrot.lane.b32.xlu0 %v11940_v53, %s8279_s16 }
 0x89b   : > { %7342 = vrot.lane.b32.xlu2 %v11944_v35, %s8279_s16 }
 0x89c   : > { %8177 = vset.pattern.permute.xlu2 %v12553_v41 }
 0x8a0   : > { %7315 = vperm.xlu1 %8174, %v11992_v47   ;;  %7356 = vrot.lane.b32.xlu0 %v11965_v0, %s8279_s16 }
 0x8a3   : > { %7348 = vrot.lane.b32.xlu2 %v11953_v38, %s8279_s16 }
 0x8a5   : > { %v7203_v33 = vpop.permute.xlu2 %7202 }
 0x8a8   : > { %7323 = vperm.xlu1 %8174, %v11987_v52   ;;  %7389 = vperm.xlu0 %8178, %v11982_v56  }
 0x8ab   : > { %7354 = vrot.lane.b32.xlu2 %v11972_v31, %s8279_s16 }
 0x8b0   : > { %7346 = vrot.lane.b32.xlu1 %v11936_v44, %s8279_s16  ;;  %7418 = vrot.lane.b32.xlu0 %v11953_v38, %s8281_s17 }
 0x8b1   : > { %8176 = vset.pattern.permute.xlu1 %v12553_v41  ;;  %8180 = vset.pattern.permute.xlu0 %v12554_v24  ;;  %v12558_v41 = vmov 6  }
 0x8b3   : > { %7385 = vperm.xlu2 %8177, %v11992_v47  }
 0x8b8   : > { %7352 = vrot.lane.b32.xlu1 %v11955_v62, %s8279_s16  ;;  %7424 = vrot.lane.b32.xlu0 %v11972_v31, %s8281_s17 }
 0x8bb   : > { %7412 = vrot.lane.b32.xlu2 %v11944_v35, %s8281_s17 }
 0x8bc   : > { %8179 = vset.pattern.permute.xlu2 %v12554_v24 }
 0x8bd   : > { %v7205_v51 = vpop.permute.xlu2 %7204  ;;  %v7195_v17 = vpop.permute.xlu0 %7194 }
 0x8be   : > { %v7210_v43 = vsel %vm259_vm0, %v7195_v17, %v7203_v33  ;;  %v7214_v16 = vsel %vm259_vm0, %v7203_v33, %v7195_v17 }
 0x8bf   : > { %v7224_v40 = vmul.f32 %v7220_v1, %v7214_v16  ;;  %v7225_v20 = vmul.f32 %v7221_v49, %v7210_v43 }
 0x8c0   : > { %7381 = vperm.xlu1 %8176, %v11970_v25   ;;  %7455 = vperm.xlu0 %8180, %v11992_v47  }
 0x8c3   : > { %7416 = vrot.lane.b32.xlu2 %v11936_v44, %s8281_s17 }
 0x8c5   : > { %v7239_v34 = vpop.permute.xlu2 %7238 }
 0x8c6   : > { %v12070_v60 = vmul.f32 %v7239_v34, %v7224_v40  ;;  %v12072_v32 = vmul.f32 %v7239_v34, %v7225_v20 }
 0x8c8   : > { %7393 = vperm.xlu1 %8176, %v11987_v52   ;;  %8184 = vset.pattern.permute.xlu0 %v12555_v46 }
 0x8c9   : > { %7491 = vperm.xlu0 %8184, %v11982_v56  }
 0x8cb   : > { %7422 = vrot.lane.b32.xlu2 %v11955_v62, %s8281_s17 }
 0x8cd   : > { %v7254_v19 = vpop.permute.xlu2 %7253 }
 0x8d0   : > { %7414 = vrot.lane.b32.xlu1 %v11957_v8, %s8281_s17 }
 0x8d1   : > { %8181 = vset.pattern.permute.xlu1 %v12554_v24  ;;  %7520 = vrot.lane.b32.xlu0 %v11953_v38, %s8285_s18 }
 0x8d2   : > { %v7197_v2 = vpop.permute.xlu0 %7196  ;;  %8186 = vset.pattern.permute.xlu0 %v12557_v28 }
 0x8d3   : > { %7451 = vperm.xlu2 %8179, %v11970_v25   ;;  %v7211_v55 = vsel %vm259_vm0, %v7197_v2, %v7205_v51  ;;  %v7215_v29 = vsel %vm259_vm0, %v7205_v51, %v7197_v2  ;;  %v8006_v51 = vld [vmem:[%s12439_s1 + $0x1] ss:$8 sm:$0x3] }
 0x8d4   : > { %v7226_v21 = vmul.f32 %v7220_v1, %v7215_v29  ;;  %v7227_v7 = vmul.f32 %v7221_v49, %v7211_v55 }
 0x8d5   : > { %v7275_v11 = vpop.permute.xlu2 %7274 }
 0x8d8   : > { %7420 = vrot.lane.b32.xlu1 %v11940_v53, %s8281_s17 }
 0x8d9   : > { %7526 = vrot.lane.b32.xlu0 %v11972_v31, %s8285_s18 }
 0x8da   : > { %v7199_v13 = vpop.permute.xlu1 %7198  ;;  %v7207_v14 = vpop.permute.xlu0 %7206 }
 0x8db   : > { %7463 = vperm.xlu2 %8179, %v11987_v52   ;;  %v7212_v6 = vsel %vm259_vm0, %v7199_v13, %v7207_v14  ;;  %v7216_v59 = vsel %vm259_vm0, %v7207_v14, %v7199_v13  ;;  %v7298_v13 = vperm.slane %v8006_v51, 0 }
 0x8dc   : > { %v7228_v42 = vmul.f32 %v7220_v1, %v7216_v59  ;;  %v7229_v58 = vmul.f32 %v7221_v49, %v7212_v6 }
 0x8dd   : > { %v7281_v57 = vpop.permute.xlu2 %7280 }
 0x8e0   : > { %7426 = vrot.lane.b32.xlu1 %v11965_v0, %s8281_s17 }
 0x8e1   : > { %7557 = vperm.xlu0 %8186, %v11992_v47  }
 0x8e2   : > { %v7201_v3 = vpop.permute.xlu1 %7200  ;;  %v7244_v4 = vpop.permute.xlu0 %7243 }
 0x8e3   : > { %8183 = vset.pattern.permute.xlu2 %v12555_v46  ;;  %v7258_v12 = vmul.f32 %v7244_v4, %v7226_v21  ;;  %v7259_v61 = vmul.f32 %v7244_v4, %v7227_v7  ;;  %v12559_v7 = vmov 7  }
 0x8e4   : > { %7487 = vperm.xlu2 %8183, %v11992_v47  }
 0x8e5   : > { %v7287_v22 = vpop.permute.xlu2 %7286 }
 0x8e8   : > { %7459 = vperm.xlu1 %8181, %v11982_v56  }
 0x8e9   : > { %7588 = vrot.lane.b32.xlu0 %v11936_v44, %s8288_s20 }
 0x8ea   : > { %v7209_v5 = vpop.permute.xlu1 %7208  ;;  %v7277_v26 = vpop.permute.xlu0 %7276  ;;  %8188 = vset.pattern.permute.xlu0 %v12558_v41 }
 0x8eb   : > { %v7213_v10 = vsel %vm259_vm0, %v7201_v3, %v7209_v5  ;;  %v7217_v45 = vsel %vm259_vm0, %v7209_v5, %v7201_v3  ;;  %vm7817_vm0 = vcmask 1040384  }
 0x8ec   : > { %v7230_v23 = vmul.f32 %v7220_v1, %v7217_v45  ;;  %v7231_v63 = vmul.f32 %v7221_v49, %v7213_v10  ;;  %7514 = vrot.lane.b32.xlu2 %v11944_v35, %s8285_s18 }
 0x8ed   : > { %v7320_v18 = vpop.permute.xlu2 %7319  ;;  %8185 = vset.pattern.permute.xlu2 %v12557_v28 }
 0x8ee   : > { %v12096_v50 = vmul.f32 %v7254_v19, %v7230_v23  ;;  %v12098_v30 = vmul.f32 %v7254_v19, %v7231_v63  ;;  %v7299_v19 = vperm.slane %v8006_v51, 1 }
 0x8f0   : > { %8182 = vset.pattern.permute.xlu1 %v12555_v46 }
 0x8f1   : > { %7483 = vperm.xlu1 %8182, %v11970_v25   ;;  %7594 = vrot.lane.b32.xlu0 %v11955_v62, %s8288_s20 }
 0x8f2   : > { %v7249_v9 = vpop.permute.xlu1 %7248  ;;  %v7283_v1 = vpop.permute.xlu0 %7282 }
 0x8f3   : > { %v7260_v15 = vmul.f32 %v7249_v9, %v7228_v42  ;;  %v7261_v39 = vmul.f32 %v7249_v9, %v7229_v58  ;;  %v7289_v49 = vsel %vm316_vm1, %v7275_v11, %v7283_v1  ;;  %v7293_v46 = vsel %vm316_vm1, %v7283_v1, %v7275_v11 }
 0x8f4   : > { %7518 = vrot.lane.b32.xlu2 %v11936_v44, %s8285_s18  ;;  %v7304_v63 = vmul.f32 %v7298_v13, %v7293_v46  ;;  %v7305_v6 = vmul.f32 %v7299_v19, %v7289_v49 }
 0x8f5   : > { %v7343_v24 = vpop.permute.xlu2 %7342 }
 0x8f9   : > { %7495 = vperm.xlu1 %8182, %v11987_v52   ;;  %7623 = vperm.xlu0 %8188, %v11970_v25  }
 0x8fa   : > { %v7273_v27 = vpop.permute.xlu1 %7272  ;;  %v7312_v11 = vpop.permute.xlu0 %7311 }
 0x8fb   : > { %v7288_v54 = vsel %vm316_vm1, %v7273_v27, %v7281_v57  ;;  %v7292_v36 = vsel %vm316_vm1, %v7281_v57, %v7273_v27 }
 0x8fc   : > { %7524 = vrot.lane.b32.xlu2 %v11955_v62, %s8285_s18  ;;  %v7302_v17 = vmul.f32 %v7298_v13, %v7292_v36  ;;  %v7303_v43 = vmul.f32 %v7299_v19, %v7288_v54 }
 0x8fd   : > { %v7349_v40 = vpop.permute.xlu2 %7348 }
 0x8fe   : > { %v7326_v55 = vmul.f32 %v7312_v11, %v7302_v17  ;;  %v7327_v29 = vmul.f32 %v7312_v11, %v7303_v43 }
 0x900   : > { %v12144_v10 = vadd.f32 %v7326_v55, %v12070_v60  ;;  %v12147_v45 = vadd.f32 %v7327_v29, %v12072_v32 }
 0x901   : > { %7516 = vrot.lane.b32.xlu1 %v11957_v8, %s8285_s18  ;;  %7656 = vrot.lane.b32.xlu0 %v11957_v8, %s8286_s19 }
 0x902   : > { %v7279_v33 = vpop.permute.xlu1 %7278  ;;  %8187 = vset.pattern.permute.xlu1 %v12557_v28  ;;  %v7345_v21 = vpop.permute.xlu0 %7344  ;;  %8192 = vset.pattern.permute.xlu0 %v12559_v7 }
 0x903   : > { %v7291_v34 = vsel %vm316_vm1, %v7279_v33, %v7287_v22  ;;  %v7295_v48 = vsel %vm316_vm1, %v7287_v22, %v7279_v33 }
 0x904   : > { %7553 = vperm.xlu2 %8185, %v11970_v25   ;;  %v7308_v22 = vmul.f32 %v7298_v13, %v7295_v48 }
 0x905   : > { %v7355_v42 = vpop.permute.xlu2 %7354 }
 0x909   : > { %7522 = vrot.lane.b32.xlu1 %v11940_v53, %s8285_s18  ;;  %7662 = vrot.lane.b32.xlu0 %v11940_v53, %s8286_s19 }
 0x90a   : > { %v7285_v16 = vpop.permute.xlu1 %7284  ;;  %v7351_v54 = vpop.permute.xlu0 %7350 }
 0x90b   : > { %v7290_v20 = vsel %vm316_vm1, %v7277_v26, %v7285_v16  ;;  %v7294_v3 = vsel %vm316_vm1, %v7285_v16, %v7277_v26  ;;  %v7358_v36 = vsel %vm366_vm2, %v7343_v24, %v7351_v54 }
 0x90c   : > { %v7306_v2 = vmul.f32 %v7298_v13, %v7294_v3  ;;  %v7307_v28 = vmul.f32 %v7299_v19, %v7290_v20  ;;  %7565 = vperm.xlu2 %8185, %v11987_v52  }
 0x90d   : > { %v7386_v4 = vpop.permute.xlu2 %7385 }
 0x90e   : > { %v7330_v5 = vmul.f32 %v7320_v18, %v7306_v2  ;;  %v7331_v57 = vmul.f32 %v7320_v18, %v7307_v28 }
 0x910   : > { %v7338_v14 = vadd.f32 %v7330_v5, %v7260_v15  ;;  %v7339_v23 = vadd.f32 %v7331_v57, %v7261_v39  ;;  %v7309_v15 = vmul.f32 %v7299_v19, %v7291_v34 }
 0x911   : > { %7528 = vrot.lane.b32.xlu1 %v11965_v0, %s8285_s18  ;;  %7668 = vrot.lane.b32.xlu0 %v11965_v0, %s8286_s19 }
 0x912   : > { %v7316_v59 = vpop.permute.xlu1 %7315 }
 0x913   : > { %v7328_v58 = vmul.f32 %v7316_v59, %v7304_v63  ;;  %v7329_v60 = vmul.f32 %v7316_v59, %v7305_v6 }
 0x914   : > { %7586 = vrot.lane.b32.xlu2 %v11957_v8, %s8288_s20 }
 0x915   : > { %v7336_v32 = vadd.f32 %v7328_v58, %v7258_v12  ;;  %v7337_v9 = vadd.f32 %v7329_v60, %v7259_v61  ;;  %v7362_v12 = vsel %vm366_vm2, %v7351_v54, %v7343_v24  ;;  %v12169_v51 = vpop.permute.xlu2 %7412  ;;  %8190 = vset.pattern.permute.xlu2 %v12558_v41  ;;  %v12560_v54 = vmov 8  }
 0x919   : > { %7561 = vperm.xlu1 %8187, %v11982_v56   ;;  %7726 = vrot.lane.b32.xlu0 %v11957_v8, %s8291_s22 }
 0x91a   : > { %v7324_v39 = vpop.permute.xlu1 %7323 }
 0x91b   : > { %v7332_v27 = vmul.f32 %v7324_v39, %v7308_v22  ;;  %v7333_v18 = vmul.f32 %v7324_v39, %v7309_v15 }
 0x91c   : > { %7592 = vrot.lane.b32.xlu2 %v11940_v53, %s8288_s20 }
 0x91d   : > { %v7340_v61 = vadd.f32 %v7332_v27, %v12096_v50  ;;  %v7341_v26 = vadd.f32 %v7333_v18, %v12098_v30  ;;  %v7357_v30 = vpop.permute.xlu0 %7356  ;;  %v7417_v17 = vpop.permute.xlu2 %7416 }
 0x91e   : > { %v7361_v34 = vsel %vm366_vm2, %v7349_v40, %v7357_v30  ;;  %v7365_v48 = vsel %vm366_vm2, %v7357_v30, %v7349_v40 }
 0x921   : > { %7584 = vrot.lane.b32.xlu1 %v11944_v35, %s8288_s20  ;;  %7697 = vperm.xlu0 %8192, %v11992_v47  }
 0x922   : > { %v7347_v33 = vpop.permute.xlu1 %7346  ;;  %8189 = vset.pattern.permute.xlu1 %v12558_v41  ;;  %v8007_v41 = vld [vmem:[%s12439_s1 + $0x2] ss:$8 sm:$0x3] }
 0x923   : > { %v7360_v24 = vsel %vm366_vm2, %v7347_v33, %v7355_v42  ;;  %v7364_v50 = vsel %vm366_vm2, %v7355_v42, %v7347_v33  ;;  %v7368_v1 = vperm.slane %v8007_v41, 0  ;;  %v7369_v49 = vperm.slane %v8007_v41, 1  ;;  %v8008_v33 = vld [vmem:[%s12439_s1 + $0x3] ss:$8 sm:$0x3] }
 0x924   : > { %7598 = vrot.lane.b32.xlu2 %v11965_v0, %s8288_s20 }
 0x925   : > { %v7376_v46 = vmul.f32 %v7368_v1, %v7364_v50  ;;  %v7377_v13 = vmul.f32 %v7369_v49, %v7360_v24  ;;  %v7390_v40 = vpop.permute.xlu0 %7389  ;;  %v7372_v6 = vmul.f32 %v7368_v1, %v7362_v12  ;;  %v7373_v59 = vmul.f32 %v7369_v49, %v7358_v36  ;;  %v7423_v58 = vpop.permute.xlu2 %7422 }
 0x926   : > { %v7438_v24 = vperm.slane %v8008_v33, 0  ;;  %v7439_v50 = vperm.slane %v8008_v33, 1 }
 0x927   : > { %v7400_v11 = vmul.f32 %v7390_v40, %v7376_v46  ;;  %v7401_v2 = vmul.f32 %v7390_v40, %v7377_v13 }
 0x929   : > { %7590 = vrot.lane.b32.xlu1 %v11953_v38, %s8288_s20  ;;  %v12196_v29 = vadd.f32 %v7400_v11, %v7338_v14  ;;  %v12198_v5 = vadd.f32 %v7401_v2, %v7339_v23  ;;  %8194 = vset.pattern.permute.xlu0 %v12560_v54 }
 0x92a   : > { %v7353_v19 = vpop.permute.xlu1 %7352  ;;  %7767 = vperm.xlu0 %8194, %v11992_v47  }
 0x92b   : > { %v7359_v43 = vsel %vm366_vm2, %v7345_v21, %v7353_v19  ;;  %v7363_v16 = vsel %vm366_vm2, %v7353_v19, %v7345_v21 }
 0x92c   : > { %v7374_v20 = vmul.f32 %v7368_v1, %v7363_v16  ;;  %v7375_v3 = vmul.f32 %v7369_v49, %v7359_v43  ;;  %7631 = vperm.xlu2 %8190, %v11982_v56  }
 0x92d   : > { %v7419_v22 = vpop.permute.xlu0 %7418  ;;  %v7452_v39 = vpop.permute.xlu2 %7451 }
 0x92e   : > { %v7398_v28 = vmul.f32 %v7386_v4, %v7374_v20  ;;  %v7399_v55 = vmul.f32 %v7386_v4, %v7375_v3 }
 0x930   : > { %v7406_v57 = vadd.f32 %v7398_v28, %v7336_v32  ;;  %v7407_v63 = vadd.f32 %v7399_v55, %v7337_v9  ;;  %v7378_v32 = vmul.f32 %v7368_v1, %v7365_v48  ;;  %v7379_v9 = vmul.f32 %v7369_v49, %v7361_v34 }
 0x931   : > { %7596 = vrot.lane.b32.xlu1 %v11972_v31, %s8288_s20 }
 0x932   : > { %v7382_v42 = vpop.permute.xlu1 %7381  ;;  %7775 = vperm.xlu0 %8194, %v11987_v52  }
 0x933   : > { %v7396_v60 = vmul.f32 %v7382_v42, %v7372_v6  ;;  %v7397_v21 = vmul.f32 %v7382_v42, %v7373_v59 }
 0x934   : > { %7654 = vrot.lane.b32.xlu2 %v11944_v35, %s8286_s19 }
 0x935   : > { %v7404_v14 = vadd.f32 %v7396_v60, %v12144_v10  ;;  %v7405_v23 = vadd.f32 %v7397_v21, %v12147_v45  ;;  %v7425_v18 = vpop.permute.xlu0 %7424  ;;  %v7464_v34 = vpop.permute.xlu2 %7463  ;;  %8193 = vset.pattern.permute.xlu2 %v12560_v54 }
 0x936   : > { %v7430_v36 = vsel %vm416_vm3, %v7417_v17, %v7425_v18  ;;  %v7434_v10 = vsel %vm416_vm3, %v7425_v18, %v7417_v17 }
 0x939   : > { %7627 = vperm.xlu1 %8189, %v11992_v47  }
 0x93a   : > { %v7394_v15 = vpop.permute.xlu1 %7393 }
 0x93b   : > { %v7402_v4 = vmul.f32 %v7394_v15, %v7378_v32  ;;  %v7403_v27 = vmul.f32 %v7394_v15, %v7379_v9  ;;  %v7446_v15 = vmul.f32 %v7438_v24, %v7434_v10 }
 0x93c   : > { %7660 = vrot.lane.b32.xlu2 %v11953_v38, %s8286_s19 }
 0x93d   : > { %v7410_v45 = vadd.f32 %v7402_v4, %v7340_v61  ;;  %v7411_v12 = vadd.f32 %v7403_v27, %v7341_v26  ;;  %v7456_v26 = vpop.permute.xlu0 %7455 }
 0x93e   : > { %v7488_v16 = vpop.permute.xlu2 %7487 }
 0x93f   : > { %v7500_v3 = vmul.f32 %v7488_v16, %v11957_v8  ;;  %v7501_v11 = vmul.f32 %v7488_v16, %v11955_v62 }
 0x941   : > { %7635 = vperm.xlu1 %8189, %v11987_v52  }
 0x942   : > { %v7415_v30 = vpop.permute.xlu1 %7414 }
 0x943   : > { %v7429_v47 = vsel %vm416_vm3, %v7415_v30, %v7423_v58  ;;  %v7433_v61 = vsel %vm416_vm3, %v7423_v58, %v7415_v30 }
 0x944   : > { %v7444_v48 = vmul.f32 %v7438_v24, %v7433_v61  ;;  %v7445_v41 = vmul.f32 %v7439_v50, %v7429_v47  ;;  %7666 = vrot.lane.b32.xlu2 %v11972_v31, %s8286_s19 }
 0x945   : > { %v7492_v2 = vpop.permute.xlu0 %7491 }
 0x946   : > { %v7468_v1 = vmul.f32 %v7456_v26, %v7444_v48  ;;  %v7469_v49 = vmul.f32 %v7456_v26, %v7445_v41  ;;  %v12252_v42 = vpop.permute.xlu2 %7514  ;;  %v7502_v18 = vmul.f32 %v7492_v2, %v11936_v44  ;;  %v7503_v54 = vmul.f32 %v7492_v2, %v11972_v31 }
 0x948   : > { %v7476_v46 = vadd.f32 %v7468_v1, %v7406_v57  ;;  %v7477_v13 = vadd.f32 %v7469_v49, %v7407_v63 }
 0x949   : > { %7658 = vrot.lane.b32.xlu1 %v11936_v44, %s8286_s19 }
 0x94a   : > { %v7421_v19 = vpop.permute.xlu1 %7420  ;;  %8191 = vset.pattern.permute.xlu1 %v12559_v7  ;;  %v12240_v57 = vadd.f32 %v7500_v3, %v7476_v46  ;;  %v12242_v7 = vadd.f32 %v7501_v11, %v7477_v13 }
 0x94b   : > { %v7428_v17 = vsel %vm416_vm3, %v12169_v51, %v7421_v19  ;;  %v7432_v43 = vsel %vm416_vm3, %v7421_v19, %v12169_v51 }
 0x94c   : > { %v7442_v40 = vmul.f32 %v7438_v24, %v7432_v43  ;;  %v7443_v20 = vmul.f32 %v7439_v50, %v7428_v17  ;;  %7724 = vrot.lane.b32.xlu2 %v11944_v35, %s8291_s22 }
 0x94d   : > { %v12254_v21 = vpop.permute.xlu0 %7520 }
 0x94e   : > { %v7466_v28 = vmul.f32 %v7452_v39, %v7442_v40  ;;  %v7467_v55 = vmul.f32 %v7452_v39, %v7443_v20  ;;  %v7447_v39 = vmul.f32 %v7439_v50, %v7430_v36  ;;  %v7519_v33 = vpop.permute.xlu2 %7518 }
 0x950   : > { %v7474_v63 = vadd.f32 %v7466_v28, %v7404_v14  ;;  %v7475_v6 = vadd.f32 %v7467_v55, %v7405_v23 }
 0x951   : > { %7664 = vrot.lane.b32.xlu1 %v11955_v62, %s8286_s19 }
 0x952   : > { %v7427_v51 = vpop.permute.xlu1 %7426 }
 0x953   : > { %v7431_v8 = vsel %vm416_vm3, %v7419_v22, %v7427_v51  ;;  %v7435_v59 = vsel %vm416_vm3, %v7427_v51, %v7419_v22 }
 0x954   : > { %v7448_v58 = vmul.f32 %v7438_v24, %v7435_v59  ;;  %v7449_v60 = vmul.f32 %v7439_v50, %v7431_v8  ;;  %7734 = vrot.lane.b32.xlu2 %v11955_v62, %s8291_s22 }
 0x955   : > { %v7527_v30 = vpop.permute.xlu0 %7526 }
 0x956   : > { %v7472_v14 = vmul.f32 %v7464_v34, %v7448_v58  ;;  %v7473_v23 = vmul.f32 %v7464_v34, %v7449_v60  ;;  %v7532_v36 = vsel %vm498_vm4, %v7519_v33, %v7527_v30  ;;  %v7536_v10 = vsel %vm498_vm4, %v7527_v30, %v7519_v33 }
 0x958   : > { %v7480_v32 = vadd.f32 %v7472_v14, %v7410_v45  ;;  %v7481_v9 = vadd.f32 %v7473_v23, %v7411_v12 }
 0x959   : > { %7693 = vperm.xlu1 %8191, %v11970_v25  }
 0x95a   : > { %v7460_v4 = vpop.permute.xlu1 %7459 }
 0x95b   : > { %v7470_v27 = vmul.f32 %v7460_v4, %v7446_v15  ;;  %v7471_v22 = vmul.f32 %v7460_v4, %v7447_v39 }
 0x95c   : > { %7736 = vrot.lane.b32.xlu2 %v11972_v31, %s8291_s22 }
 0x95d   : > { %v7478_v34 = vadd.f32 %v7470_v27, %v12196_v29  ;;  %v7479_v45 = vadd.f32 %v7471_v22, %v12198_v5  ;;  %v7525_v29 = vpop.permute.xlu2 %7524  ;;  %v7558_v43 = vpop.permute.xlu0 %7557 }
 0x95f   : > { %v12267_v12 = vadd.f32 %v7502_v18, %v7478_v34  ;;  %v12269_v24 = vadd.f32 %v7503_v54, %v7479_v45 }
 0x961   : > { %7732 = vrot.lane.b32.xlu1 %v11940_v53, %s8291_s22 }
 0x963   : > { %v7484_v50 = vpop.permute.xlu1 %7483 }
 0x964   : > { %v7498_v5 = vmul.f32 %v7484_v50, %v11944_v35  ;;  %v7499_v47 = vmul.f32 %v7484_v50, %v11940_v53  ;;  %v8009_v53 = vld [vmem:[%s12439_s1 + $0x5] ss:$8 sm:$0x3]  ;;  %7763 = vperm.xlu2 %8193, %v11970_v25  }
 0x965   : > { %v7554_v41 = vpop.permute.xlu2 %7553  ;;  %v7540_v35 = vperm.slane %v8009_v53, 0  ;;  %v7541_v13 = vperm.slane %v8009_v53, 1  ;;  %v7589_v8 = vpop.permute.xlu0 %7588 }
 0x966   : > { %v7506_v61 = vadd.f32 %v7498_v5, %v7474_v63  ;;  %v7507_v26 = vadd.f32 %v7499_v47, %v7475_v6 }
 0x967   : > { %v7548_v39 = vmul.f32 %v7540_v35, %v7532_v36 }
 0x969   : > { %7728 = vrot.lane.b32.xlu1 %v11936_v44, %s8291_s22 }
 0x96b   : > { %v7496_v48 = vpop.permute.xlu1 %7495 }
 0x96c   : > { %v7504_v1 = vmul.f32 %v7496_v48, %v11953_v38  ;;  %v7505_v62 = vmul.f32 %v7496_v48, %v11965_v0  ;;  %7738 = vrot.lane.b32.xlu2 %v11965_v0, %s8291_s22 }
 0x96d   : > { %v7566_v31 = vpop.permute.xlu2 %7565  ;;  %v7595_v4 = vpop.permute.xlu0 %7594 }
 0x96e   : > { %v7512_v49 = vadd.f32 %v7504_v1, %v7480_v32  ;;  %v7513_v46 = vadd.f32 %v7505_v62, %v7481_v9 }
 0x971   : > { %7701 = vperm.xlu1 %8191, %v11982_v56  }
 0x973   : > { %v7517_v44 = vpop.permute.xlu1 %7516 }
 0x974   : > { %v7531_v19 = vsel %vm498_vm4, %v7517_v44, %v7525_v29  ;;  %v7535_v17 = vsel %vm498_vm4, %v7525_v29, %v7517_v44  ;;  %7771 = vperm.xlu2 %8193, %v11982_v56   ;;  %v7549_v56 = vmul.f32 %v7541_v13, %v7536_v10 }
 0x975   : > { %v7546_v16 = vmul.f32 %v7540_v35, %v7531_v19  ;;  %v7547_v40 = vmul.f32 %v7541_v13, %v7535_v17  ;;  %v7587_v28 = vpop.permute.xlu2 %7586  ;;  %v7624_v5 = vpop.permute.xlu0 %7623 }
 0x976   : > { %v7601_v17 = vsel %vm548_vm6, %v7587_v28, %v7595_v4 }
 0x977   : > { %v7570_v20 = vmul.f32 %v7558_v43, %v7546_v16  ;;  %v7571_v3 = vmul.f32 %v7558_v43, %v7547_v40  ;;  %v7605_v43 = vsel %vm548_vm6, %v7595_v4, %v7587_v28 }
 0x979   : > { %v12293_v11 = vadd.f32 %v7570_v20, %v12240_v57  ;;  %v12296_v2 = vadd.f32 %v7571_v3, %v12242_v7  ;;  %7730 = vrot.lane.b32.xlu1 %v11953_v38, %s8291_s22 }
 0x97b   : > { %v7523_v25 = vpop.permute.xlu1 %7522 }
 0x97c   : > { %v7530_v55 = vsel %vm498_vm4, %v12252_v42, %v7523_v25  ;;  %v7534_v57 = vsel %vm498_vm4, %v7523_v25, %v12252_v42 }
 0x97d   : > { %v7544_v63 = vmul.f32 %v7540_v35, %v7530_v55  ;;  %v7545_v6 = vmul.f32 %v7541_v13, %v7534_v57  ;;  %v7593_v58 = vpop.permute.xlu2 %7592 }
 0x97f   : > { %v7568_v7 = vmul.f32 %v7554_v41, %v7544_v63  ;;  %v7569_v51 = vmul.f32 %v7554_v41, %v7545_v6 }
 0x981   : > { %7705 = vperm.xlu1 %8191, %v11987_v52   ;;  %v7576_v38 = vadd.f32 %v7568_v7, %v7506_v61  ;;  %v7577_v0 = vadd.f32 %v7569_v51, %v7507_v26 }
 0x983   : > { %v7529_v59 = vpop.permute.xlu1 %7528 }
 0x984   : > { %v7533_v60 = vsel %vm498_vm4, %v12254_v21, %v7529_v59  ;;  %v7537_v42 = vsel %vm498_vm4, %v7529_v59, %v12254_v21  ;;  %v8010_v21 = vld [vmem:[%s12439_s1 + $0x6] ss:$8 sm:$0x3] }
 0x985   : > { %v7550_v14 = vmul.f32 %v7540_v35, %v7533_v60  ;;  %v7551_v23 = vmul.f32 %v7541_v13, %v7537_v42  ;;  %v7599_v22 = vpop.permute.xlu2 %7598  ;;  %v7610_v34 = vperm.slane %v8010_v21, 0  ;;  %v7611_v45 = vperm.slane %v8010_v21, 1 }
 0x987   : > { %v7574_v32 = vmul.f32 %v7566_v31, %v7550_v14  ;;  %v7575_v9 = vmul.f32 %v7566_v31, %v7551_v23  ;;  %v7616_v55 = vmul.f32 %v7610_v34, %v7601_v17  ;;  %v7617_v57 = vmul.f32 %v7611_v45, %v7605_v43 }
 0x989   : > { %v7582_v15 = vadd.f32 %v7574_v32, %v7512_v49  ;;  %v7583_v52 = vadd.f32 %v7575_v9, %v7513_v46  ;;  %v7657_v46 = vpop.permute.xlu0 %7656 }
 0x98b   : > { %v7562_v27 = vpop.permute.xlu1 %7561 }
 0x98c   : > { %v7572_v18 = vmul.f32 %v7562_v27, %v7548_v39  ;;  %v7573_v54 = vmul.f32 %v7562_v27, %v7549_v56 }
 0x98d   : > { %v7632_v29 = vpop.permute.xlu2 %7631 }
 0x98e   : > { %v7580_v33 = vadd.f32 %v7572_v18, %v12267_v12  ;;  %v7581_v30 = vadd.f32 %v7573_v54, %v12269_v24 }
 0x991   : > { %v7663_v20 = vpop.permute.xlu0 %7662 }
 0x993   : > { %v7585_v50 = vpop.permute.xlu1 %7584 }
 0x994   : > { %v7600_v36 = vsel %vm548_vm6, %v7585_v50, %v7593_v58  ;;  %v7604_v10 = vsel %vm548_vm6, %v7593_v58, %v7585_v50 }
 0x995   : > { %v7614_v47 = vmul.f32 %v7610_v34, %v7600_v36  ;;  %v7615_v61 = vmul.f32 %v7611_v45, %v7604_v10  ;;  %v7655_v1 = vpop.permute.xlu2 %7654 }
 0x996   : > { %v7670_v36 = vsel %vm598_vm5, %v7655_v1, %v7663_v20  ;;  %v7674_v10 = vsel %vm598_vm5, %v7663_v20, %v7655_v1 }
 0x997   : > { %v7638_v12 = vmul.f32 %v7624_v5, %v7614_v47  ;;  %v7639_v26 = vmul.f32 %v7624_v5, %v7615_v61 }
 0x999   : > { %v12325_v24 = vadd.f32 %v7638_v12, %v7576_v38  ;;  %v12327_v48 = vadd.f32 %v7639_v26, %v7577_v0  ;;  %v12351_v59 = vpop.permute.xlu0 %7668 }
 0x99b   : > { %v7591_v41 = vpop.permute.xlu1 %7590 }
 0x99c   : > { %v7603_v62 = vsel %vm548_vm6, %v7591_v41, %v7599_v22  ;;  %v7607_v49 = vsel %vm548_vm6, %v7599_v22, %v7591_v41  ;;  %v8012_v22 = vld [vmem:[%s12439_s1 + $0x10] ss:$8 sm:$0x3] }
 0x99d   : > { %v12333_v35 = vpop.permute.xlu2 %7660  ;;  %v7620_v0 = vmul.f32 %v7610_v34, %v7603_v62  ;;  %v7621_v28 = vmul.f32 %v7611_v45, %v7607_v49  ;;  %v12373_v21 = vperm.slane %v8012_v22, 1 }
 0x9a1   : > { %v7727_v56 = vpop.permute.xlu0 %7726 }
 0x9a3   : > { %v7597_v53 = vpop.permute.xlu1 %7596 }
 0x9a4   : > { %v7602_v13 = vsel %vm548_vm6, %v7589_v8, %v7597_v53  ;;  %v7606_v44 = vsel %vm548_vm6, %v7597_v53, %v7589_v8 }
 0x9a5   : > { %v7618_v31 = vmul.f32 %v7610_v34, %v7602_v13  ;;  %v7619_v19 = vmul.f32 %v7611_v45, %v7606_v44  ;;  %v12347_v6 = vpop.permute.xlu2 %7666 }
 0x9a7   : > { %v7642_v16 = vmul.f32 %v7632_v29, %v7618_v31  ;;  %v7643_v40 = vmul.f32 %v7632_v29, %v7619_v19 }
 0x9a9   : > { %v12343_v3 = vadd.f32 %v7642_v16, %v7580_v33  ;;  %v12345_v25 = vadd.f32 %v7643_v40, %v7581_v30  ;;  %v12371_v30 = vperm.slane %v8012_v22, 0 }
 0x9ab   : > { %v7628_v63 = vpop.permute.xlu1 %7627 }
 0x9ac   : > { %v7640_v7 = vmul.f32 %v7628_v63, %v7616_v55  ;;  %v7641_v51 = vmul.f32 %v7628_v63, %v7617_v57 }
 0x9ad   : > { %v7725_v60 = vpop.permute.xlu2 %7724 }
 0x9ae   : > { %v7648_v8 = vadd.f32 %v7640_v7, %v12293_v11  ;;  %v7649_v38 = vadd.f32 %v7641_v51, %v12296_v2  ;;  %v7698_v11 = vpop.permute.xlu0 %7697  ;;  %v8011_v2 = vld [vmem:[%s12439_s1 + $0x7] ss:$8 sm:$0x3] }
 0x9af   : > { %v12367_v18 = vperm.slane %v8011_v2, 0  ;;  %v12369_v54 = vperm.slane %v8011_v2, 1 }
 0x9b1   : > { %v7684_v12 = vmul.f32 %v12367_v18, %v7670_v36  ;;  %v7685_v26 = vmul.f32 %v12369_v54, %v7674_v10  ;;  %v7673_v10 = vsel %vm598_vm5, %v12333_v35, %v12351_v59 }
 0x9b3   : > { %v7636_v58 = vpop.permute.xlu1 %7635 }
 0x9b4   : > { %v7644_v42 = vmul.f32 %v7636_v58, %v7620_v0  ;;  %v7645_v14 = vmul.f32 %v7636_v58, %v7621_v28 }
 0x9b5   : > { %v7735_v39 = vpop.permute.xlu2 %7734 }
 0x9b6   : > { %v12353_v23 = vadd.f32 %v7644_v42, %v7582_v15  ;;  %v12355_v32 = vadd.f32 %v7645_v14, %v7583_v52  ;;  %v7741_v34 = vsel %vm648_vm7, %v7727_v56, %v7735_v39  ;;  %v7745_v45 = vsel %vm648_vm7, %v7735_v39, %v7727_v56  ;;  %v7768_v49 = vpop.permute.xlu0 %7767 }
 0x9b7   : > { %v7756_v47 = vmul.f32 %v12371_v30, %v7741_v34  ;;  %v7757_v61 = vmul.f32 %v12373_v21, %v7745_v45 }
 0x9b9   : > { %v7780_v44 = vmul.f32 %v7768_v49, %v7756_v47  ;;  %v7781_v31 = vmul.f32 %v7768_v49, %v7757_v61 }
 0x9bb   : > { %v7659_v9 = vpop.permute.xlu1 %7658 }
 0x9bd   : > { %v7737_v27 = vpop.permute.xlu2 %7736 }
 0x9c3   : > { %v7665_v4 = vpop.permute.xlu1 %7664 }
 0x9c4   : > { %v7671_v15 = vsel %vm598_vm5, %v7657_v46, %v7665_v4  ;;  %v7675_v52 = vsel %vm598_vm5, %v7665_v4, %v7657_v46 }
 0x9c5   : > { %v7686_v50 = vmul.f32 %v12367_v18, %v7671_v15  ;;  %v7687_v29 = vmul.f32 %v12369_v54, %v7675_v52  ;;  %v7764_v5 = vpop.permute.xlu2 %7763 }
 0x9c7   : > { %v7710_v41 = vmul.f32 %v7698_v11, %v7686_v50  ;;  %v7711_v62 = vmul.f32 %v7698_v11, %v7687_v29 }
 0x9c9   : > { %v7718_v17 = vadd.f32 %v7710_v41, %v7648_v8  ;;  %v7719_v43 = vadd.f32 %v7711_v62, %v7649_v38  ;;  %v7672_v8 = vsel %vm598_vm5, %v7659_v9, %v12347_v6  ;;  %v7776_v41 = vpop.permute.xlu0 %7775 }
 0x9ca   : > { %v7688_v39 = vmul.f32 %v12367_v18, %v7672_v8 }
 0x9cb   : > { %v7694_v33 = vpop.permute.xlu1 %7693  ;;  %v7788_v7 = vadd.f32 %v7780_v44, %v7718_v17  ;;  %v7789_v51 = vadd.f32 %v7781_v31, %v7719_v43 }
 0x9cc   : > { %v7708_v46 = vmul.f32 %v7694_v33, %v7684_v12  ;;  %v7709_v53 = vmul.f32 %v7694_v33, %v7685_v26  ;;  %v7690_v12 = vmul.f32 %v12367_v18, %v7673_v10 }
 0x9cd   : > { %v7739_v58 = vpop.permute.xlu2 %7738 }
 0x9ce   : > { %v7716_v20 = vadd.f32 %v7708_v46, %v12325_v24  ;;  %v7717_v55 = vadd.f32 %v7709_v53, %v12327_v48  ;;  %v7676_v24 = vsel %vm598_vm5, %v12347_v6, %v7659_v9 }
 0x9cf   : > { %v7689_v56 = vmul.f32 %v12369_v54, %v7676_v24 }
 0x9d3   : > { %v7733_v13 = vpop.permute.xlu1 %7732 }
 0x9d4   : > { %v7740_v1 = vsel %vm648_vm7, %v7725_v60, %v7733_v13  ;;  %v7744_v19 = vsel %vm648_vm7, %v7733_v13, %v7725_v60 }
 0x9d5   : > { %v7754_v16 = vmul.f32 %v12371_v30, %v7740_v1  ;;  %v7755_v40 = vmul.f32 %v12373_v21, %v7744_v19  ;;  %v7772_v2 = vpop.permute.xlu2 %7771 }
 0x9d7   : > { %v7778_v57 = vmul.f32 %v7764_v5, %v7754_v16  ;;  %v7779_v63 = vmul.f32 %v7764_v5, %v7755_v40  ;;  %v7677_v5 = vsel %vm598_vm5, %v12351_v59, %v12333_v35 }
 0x9d8   : > { %v7691_v26 = vmul.f32 %v12369_v54, %v7677_v5 }
 0x9d9   : > { %v7786_v0 = vadd.f32 %v7778_v57, %v7716_v20  ;;  %v7787_v28 = vadd.f32 %v7779_v63, %v7717_v55 }
 0x9db   : > { %v7794_v42 = vadd.f32 %v7788_v7, %v7786_v0  ;;  %v7803_v14 = vadd.f32 %v7789_v51, %v7787_v28  ;;  %v7729_v60 = vpop.permute.xlu1 %7728  ;;  %v12563_v7 = vld [vmem:[#allocation3_spill] sm:$0xff] }
 0x9dc   : > { %v7742_v48 = vsel %vm648_vm7, %v7729_v60, %v7737_v27  ;;  %v7746_v38 = vsel %vm648_vm7, %v7737_v27, %v7729_v60 }
 0x9dd   : > { %v7758_v4 = vmul.f32 %v12371_v30, %v7742_v48  ;;  %v7759_v11 = vmul.f32 %v12373_v21, %v7746_v38 }
 0x9df   : > { %v7782_v33 = vmul.f32 %v7772_v2, %v7758_v4  ;;  %v7783_v6 = vmul.f32 %v7772_v2, %v7759_v11 }
 0x9e3   : > { %v7702_v22 = vpop.permute.xlu1 %7701 }
 0x9e4   : > { %v7712_v15 = vmul.f32 %v7702_v22, %v7688_v39  ;;  %v7713_v52 = vmul.f32 %v7702_v22, %v7689_v56 }
 0x9e6   : > { %v7720_v9 = vadd.f32 %v7712_v15, %v12343_v3  ;;  %v7721_v34 = vadd.f32 %v7713_v52, %v12345_v25 }
 0x9e8   : > { %v7790_v45 = vadd.f32 %v7782_v33, %v7720_v9  ;;  %v7791_v27 = vadd.f32 %v7783_v6, %v7721_v34 }
 0x9ea   : > { %v7795_v50 = vadd.f32 %v7794_v42, %v7790_v45  ;;  %v7804_v29 = vadd.f32 %v7803_v14, %v7791_v27 }
 0x9eb   : > { %v7731_v36 = vpop.permute.xlu1 %7730 }
 0x9ec   : > { %v7743_v3 = vsel %vm648_vm7, %v7731_v36, %v7739_v58  ;;  %v7747_v25 = vsel %vm648_vm7, %v7739_v58, %v7731_v36 }
 0x9ed   : > { %v7760_v47 = vmul.f32 %v12371_v30, %v7743_v3  ;;  %v7761_v61 = vmul.f32 %v12373_v21, %v7747_v25 }
 0x9ef   : > { %v7784_v53 = vmul.f32 %v7776_v41, %v7760_v47  ;;  %v7785_v35 = vmul.f32 %v7776_v41, %v7761_v61 }
 0x9f3   : > { %v7706_v62 = vpop.permute.xlu1 %7705 }
 0x9f4   : > { %v7714_v49 = vmul.f32 %v7706_v62, %v7690_v12  ;;  %v7715_v46 = vmul.f32 %v7706_v62, %v7691_v26 }
 0x9f6   : > { %v7722_v59 = vadd.f32 %v7714_v49, %v12353_v23  ;;  %v7723_v13 = vadd.f32 %v7715_v46, %v12355_v32  ;;  %v12561_v23 = vld [vmem:[#allocation4_spill] sm:$0xff]  ;;  %v12562_v32 = vlaneseq }
 0x9f8   : > { %v7792_v37 = vadd.f32 %v7784_v53, %v7722_v59  ;;  %v7793_v44 = vadd.f32 %v7785_v35, %v7723_v13  ;;  %vm7822_vm1 = vcmp.lt.s32.totalorder %v12562_v32, 256 }
 0x9fa   : > { %v7796_v31 = vadd.f32 %v7795_v50, %v7792_v37  ;;  %v7805_v30 = vadd.f32 %v7804_v29, %v7793_v44 }
 0x9fc   : > { %v7797_v1 = vrot.slane %v7796_v31, 4  ;;  %v7806_v21 = vrot.slane %v7805_v30, 4 }
 0x9fe   : > { %v7798_v19 = vadd.f32 %v7797_v1, %v7796_v31  ;;  %v7807_v18 = vadd.f32 %v7806_v21, %v7805_v30 }
 0xa00   : > { %v7799_v54 = vrot.slane %v7798_v19, 2  ;;  %v7808_v17 = vrot.slane %v7807_v18, 2 }
 0xa02   : > { %v7800_v43 = vadd.f32 %v7799_v54, %v7798_v19  ;;  %v7809_v16 = vadd.f32 %v7808_v17, %v7807_v18 }
 0xa04   : > { %v7801_v40 = vrot.slane %v7800_v43, 1  ;;  %v7810_v20 = vrot.slane %v7809_v16, 1 }
 0xa06   : > { %v7802_v55 = vadd.f32 %v7801_v40, %v7800_v43  ;;  %v7811_v57 = vadd.f32 %v7810_v20, %v7809_v16 }
 0xa08   : > { %v7813_v63 = vadd.f32 %v7811_v57, %v12561_v23  ;;  %v7812_v51 = vadd.f32 %v7802_v55, %v12563_v7 }
 0xa0a   : > { %v7816_v0 = vrot.slane %v7813_v63, 7 }
 0xa0c   : > { %v7818_v28 = vsel %vm7817_vm0, %v7812_v51, %v7816_v0 }
 0xa0d   : > { %7824 = vst.msk [vmem:[%s8364_s9] sm:$0x3] %vm7822_vm1, %v7818_v28 }
 0xa0e PF: > { %s16_s21 = sadd.s32 1, %s8237_s21  }
 0xa0f   : > { %p13_p5 = scmp.ge.s32.totalorder %s16_s21, 4  }
 0xa11   :  { %15 = sbr.rel (!%p13_p5) target bundleno = 1 (0x1), region = 109 }

</bundles_post_ra>
